<compile_context>
chip_gen: v5e
topology: v5e:2x2
jax: 0.10.0
libtpu: 0.0.40
codegen_flags: <defaults>
</compile_context>

<pallas_src>
import jax
import jax.numpy as jnp
from jax.experimental import pallas as pl
from jax.experimental.pallas import tpu as pltpu

_LANE = 128
_VMEM_LIMIT = 48 * 1024 * 1024  # explicit scoped-VMEM budget, safe on v5e/v6e/v7x


def _round_up(x, m):
    return (x + m - 1) // m * m


def _pick_tile_m(m):
    # Big enough to hide the ~0.35us/step overhead and reach the HBM roofline,
    # small enough that double-buffered bf16/f32 tiles fit v7x's 64 MiB VMEM.
    for t in (1024, 512, 256, 128):
        if m >= 2 * t:
            return t
    return max(8, _round_up(m, 8))


# ---------------------------------------------------------------------------
# Kernel bodies
# ---------------------------------------------------------------------------
def _mm_bias_silu_kernel(x_ref, w_ref, b_ref, o_ref):
    # Conv (as matmul, BN scale pre-folded into w) + bias + SiLU.
    acc = jnp.dot(x_ref[...], w_ref[...], preferred_element_type=jnp.float32)
    y = acc + b_ref[...]
    o_ref[...] = (y * jax.nn.sigmoid(y)).astype(o_ref.dtype)


def _mm_bias_silu_res_kernel(x_ref, r_ref, w_ref, b_ref, o_ref):
    # Same as above with the Bottleneck residual add fused in.
    acc = jnp.dot(x_ref[...], w_ref[...], preferred_element_type=jnp.float32)
    y = acc + b_ref[...]
    o_ref[...] = (r_ref[...].astype(jnp.float32) + y * jax.nn.sigmoid(y)).astype(o_ref.dtype)


def _csp_tail_kernel(h_ref, x_ref, w3_ref, b1_ref, w2_ref, b2_ref,
                     w4a_ref, w4b_ref, b4_ref, o_ref):
    # Fused: y1 = cv3(h), y2 = cv2(x), z = SiLU(BN(cat(y1, y2))),
    #        out = SiLU(BN(cv4(z)))   (all BN scales folded into the weights).
    y1 = jnp.dot(h_ref[...], w3_ref[...], preferred_element_type=jnp.float32) + b1_ref[...]
    a1 = y1 * jax.nn.sigmoid(y1)
    y2 = jnp.dot(x_ref[...], w2_ref[...], preferred_element_type=jnp.float32) + b2_ref[...]
    a2 = y2 * jax.nn.sigmoid(y2)
    pre = (jnp.dot(a1.astype(w4a_ref.dtype), w4a_ref[...], preferred_element_type=jnp.float32)
           + jnp.dot(a2.astype(w4b_ref.dtype), w4b_ref[...], preferred_element_type=jnp.float32)
           + b4_ref[...])
    o_ref[...] = (pre * jax.nn.sigmoid(pre)).astype(o_ref.dtype)


# ---------------------------------------------------------------------------
# pallas_call wrapper: M-tiled grid, resident weights, lane-dense output
# ---------------------------------------------------------------------------
def _tiled_call(kernel, m_inputs, resident_inputs, out_n, out_dtype, cost):
    m = m_inputs[0].shape[0]
    tm = _pick_tile_m(m)
    in_specs = ([pl.BlockSpec((tm, a.shape[1]), lambda i: (i, 0)) for a in m_inputs]
                + [pl.BlockSpec(a.shape, lambda i: (0, 0)) for a in resident_inputs])
    return pl.pallas_call(
        kernel,
        out_shape=jax.ShapeDtypeStruct((m, out_n), out_dtype),
        grid_spec=pltpu.PrefetchScalarGridSpec(
            num_scalar_prefetch=0,
            grid=(pl.cdiv(m, tm),),
            in_specs=in_specs,
            out_specs=pl.BlockSpec((tm, out_n), lambda i: (i, 0)),
        ),
        compiler_params=pltpu.CompilerParams(
            dimension_semantics=("parallel",),
            vmem_limit_bytes=_VMEM_LIMIT,
        ),
        cost_estimate=cost,
    )(*m_inputs, *resident_inputs)


def _mm_bias_silu(x, w, b):
    m, k = x.shape
    n = w.shape[1]
    cost = pl.CostEstimate(flops=2 * m * k * n, transcendentals=m * n,
                           bytes_accessed=m * k * 2 + k * n * 2 + n * 4 + m * n * 2)
    return _tiled_call(_mm_bias_silu_kernel, [x], [w, b], n, jnp.bfloat16, cost)


def _mm_bias_silu_res(x, r, w, b):
    m, k = x.shape
    n = w.shape[1]
    cost = pl.CostEstimate(flops=2 * m * k * n + m * n, transcendentals=m * n,
                           bytes_accessed=(m * k + m * n) * 2 + k * n * 2 + n * 4 + m * n * 2)
    return _tiled_call(_mm_bias_silu_res_kernel, [x, r], [w, b], n, jnp.bfloat16, cost)


def _csp_tail(h, x, w3, b1, w2, b2, w4a, w4b, b4):
    m, k1 = h.shape
    k2 = x.shape[1]
    nm = w3.shape[1]
    n = w4a.shape[1]
    flops = 2 * m * (k1 * nm + k2 * nm + 2 * nm * n)
    cost = pl.CostEstimate(
        flops=flops, transcendentals=m * (2 * nm + n),
        bytes_accessed=m * (k1 + k2) * 2 + m * n * 4
                       + (k1 * nm + k2 * nm + 2 * nm * n) * 2 + (2 * nm + n) * 4)
    return _tiled_call(_csp_tail_kernel, [h, x],
                       [w3, b1, w2, b2, w4a, w4b, b4], n, jnp.float32, cost)


# ---------------------------------------------------------------------------
# Glue: im2col, BN folding, weight packing (channels padded to 128)
# ---------------------------------------------------------------------------
def _im2col_3x3(h_flat, b, hh, ww):
    c = h_flat.shape[1]
    x4 = h_flat.reshape(b, hh, ww, c)
    xp = jnp.pad(x4, ((0, 0), (1, 1), (1, 1), (0, 0)))
    cols = [xp[:, dy:dy + hh, dx:dx + ww, :] for dy in range(3) for dx in range(3)]
    return jnp.concatenate(cols, axis=-1).reshape(b * hh * ww, 9 * c)


def _fold_bn(bn, eps):
    s = bn['gamma'] / jnp.sqrt(bn['var'] + eps)
    return s, bn['beta'] - bn['mean'] * s


def _prep_1x1(w, scale, bias, cin_p, cout_p):
    cout, cin = w.shape[0], w.shape[1]
    wm = w[:, :, 0, 0].T * scale[None, :]                       # (cin, cout)
    wm = jnp.pad(wm, ((0, cin_p - cin), (0, cout_p - cout)))
    b = jnp.pad(bias, (0, cout_p - cout)).reshape(1, cout_p)
    return wm.astype(jnp.bfloat16), b.astype(jnp.float32)


def _prep_3x3(w, scale, bias, cin_p, cout_p):
    cout, cin = w.shape[0], w.shape[1]
    wt = jnp.transpose(w, (2, 3, 1, 0)) * scale[None, None, None, :]   # (ky,kx,ci,o)
    wt = jnp.pad(wt, ((0, 0), (0, 0), (0, cin_p - cin), (0, cout_p - cout)))
    wm = wt.reshape(9 * cin_p, cout_p)
    b = jnp.pad(bias, (0, cout_p - cout)).reshape(1, cout_p)
    return wm.astype(jnp.bfloat16), b.astype(jnp.float32)


# ---------------------------------------------------------------------------
# BottleneckCSP forward (Pallas)
# ---------------------------------------------------------------------------
def bottleneck_csp_forward(x, p, n=1, shortcut=True, g=1, eps=1e-5):
    if g != 1:
        # TODO(synk): grouped Bottleneck.cv2 (g > 1) has no clean dense-matmul mapping here.
        raise NotImplementedError("grouped conv (g > 1) not supported")
    b_, c1, hh, ww = x.shape
    c2 = p['cv4']['w'].shape[0]
    c_ = p['cv1']['w'].shape[0]
    m = b_ * hh * ww
    c1p, cp, c2p = (_round_up(c, _LANE) for c in (c1, c_, c2))

    # NCHW -> channels-last (M, c1p), bf16 (layout conversion happens once).
    x_flat = jnp.transpose(x, (0, 2, 3, 1)).reshape(m, c1)
    x_flat = jnp.pad(x_flat, ((0, 0), (0, c1p - c1))).astype(jnp.bfloat16)

    # cv1: 1x1 conv + BN + SiLU
    s, b = _fold_bn(p['cv1']['bn'], eps)
    w_cv1, b_cv1 = _prep_1x1(p['cv1']['w'], s, b, c1p, cp)
    h = _mm_bias_silu(x_flat, w_cv1, b_cv1)                      # (M, cp) bf16

    # m: n standard Bottlenecks (3x3 Conv, 3x3 Conv, optional residual)
    add = shortcut  # Bottleneck(c_, c_) -> c1 == c2, so the shortcut applies
    for i in range(n):
        blk = p['m'][i]
        s1, bb1 = _fold_bn(blk['cv1']['bn'], eps)
        w1, bias1 = _prep_3x3(blk['cv1']['w'], s1, bb1, cp, cp)
        s2, bb2 = _fold_bn(blk['cv2']['bn'], eps)
        w2, bias2 = _prep_3x3(blk['cv2']['w'], s2, bb2, cp, cp)
        t = _mm_bias_silu(_im2col_3x3(h, b_, hh, ww), w1, bias1)
        cols = _im2col_3x3(t, b_, hh, ww)
        if add:
            h = _mm_bias_silu_res(cols, h, w2, bias2)
        else:
            h = _mm_bias_silu(cols, w2, bias2)

    # tail: cv3(h), cv2(x), concat, BN, SiLU, cv4(+BN+SiLU) -- fully fused.
    s_bn, b_bn = _fold_bn(p['bn'], eps)
    w3, bt1 = _prep_1x1(p['cv3_w'], s_bn[:c_], b_bn[:c_], cp, cp)
    w2c, bt2 = _prep_1x1(p['cv2_w'], s_bn[c_:], b_bn[c_:], c1p, cp)
    s4, b4f = _fold_bn(p['cv4']['bn'], eps)
    w4 = p['cv4']['w'][:, :, 0, 0].T * s4[None, :]               # (2c_, c2)
    w4a = jnp.pad(w4[:c_], ((0, cp - c_), (0, c2p - c2))).astype(jnp.bfloat16)
    w4b = jnp.pad(w4[c_:], ((0, cp - c_), (0, c2p - c2))).astype(jnp.bfloat16)
    b4 = jnp.pad(b4f, (0, c2p - c2)).reshape(1, c2p).astype(jnp.float32)

    out_flat = _csp_tail(h, x_flat, w3, bt1, w2c, bt2, w4a, w4b, b4)   # (M, c2p) f32

    return out_flat[:, :c2].reshape(b_, hh, ww, c2).transpose(0, 3, 1, 2)


# ---------------------------------------------------------------------------
# Deterministic synthetic parameters + pure-JAX reference
# ---------------------------------------------------------------------------
def init_params(key, c1, c2, n=1, e=0.5):
    c_ = int(c2 * e)
    keys = iter(jax.random.split(key, 64))

    def conv_w(cout, cin, k):
        fan = cin * k * k
        return jax.random.normal(next(keys), (cout, cin, k, k), jnp.float32) / jnp.sqrt(fan)

    def bn(c):
        return dict(
            gamma=1.0 + 0.1 * jax.random.normal(next(keys), (c,), jnp.float32),
            beta=0.1 * jax.random.normal(next(keys), (c,), jnp.float32),
            mean=0.1 * jax.random.normal(next(keys), (c,), jnp.float32),
            var=jnp.abs(1.0 + 0.1 * jax.random.normal(next(keys), (c,), jnp.float32)),
        )

    return dict(
        cv1=dict(w=conv_w(c_, c1, 1), bn=bn(c_)),
        cv2_w=conv_w(c_, c1, 1),
        cv3_w=conv_w(c_, c_, 1),
        cv4=dict(w=conv_w(c2, 2 * c_, 1), bn=bn(c2)),
        bn=bn(2 * c_),
        m=[dict(cv1=dict(w=conv_w(c_, c_, 3), bn=bn(c_)),
                cv2=dict(w=conv_w(c_, c_, 3), bn=bn(c_))) for _ in range(n)],
    )


def ref_forward(x, p, n=1, shortcut=True, eps=1e-5):
    def conv(xx, w, pad):
        return jax.lax.conv_general_dilated(
            xx, w, (1, 1), [(pad, pad), (pad, pad)],
            dimension_numbers=('NCHW', 'OIHW', 'NCHW'))

    def bn(xx, bp):
        s = bp['gamma'] / jnp.sqrt(bp['var'] + eps)
        return xx * s[None, :, None, None] + (bp['beta'] - bp['mean'] * s)[None, :, None, None]

    def silu(xx):
        return xx * jax.nn.sigmoid(xx)

    def conv_block(xx, blk, k):
        return silu(bn(conv(xx, blk['w'], k // 2), blk['bn']))

    h = conv_block(x, p['cv1'], 1)
    for i in range(n):
        t = conv_block(h, p['m'][i]['cv1'], 3)
        u = conv_block(t, p['m'][i]['cv2'], 3)
        h = h + u if shortcut else u
    y1 = conv(h, p['cv3_w'], 0)
    y2 = conv(x, p['cv2_w'], 0)
    z = silu(bn(jnp.concatenate([y1, y2], axis=1), p['bn']))
    return conv_block(z, p['cv4'], 1)


if __name__ == "__main__":
    B, C1, H, W = 2, 4, 16, 16
    C2, N = 32, 1

    key = jax.random.PRNGKey(0)
    kx, kp = jax.random.split(key)
    x = jax.random.normal(kx, (B, C1, H, W), dtype=jnp.float32)
    params = init_params(kp, C1, C2, n=N)

    fwd = jax.jit(lambda xx, pp: bottleneck_csp_forward(xx, pp, n=N, shortcut=True))
    out = fwd(x, params)
    jax.block_until_ready(out)

    ref = ref_forward(x, params, n=N, shortcut=True)
    assert out.shape == (B, C2, H, W)
    # bf16 matmul operands + f32 accumulation over ~6 chained convs -> loosened tolerance.
    assert jnp.allclose(out, ref, atol=3e-2, rtol=3e-2), float(jnp.max(jnp.abs(out - ref)))

    print("KERNEL_OK")
</pallas_src>

<mosaic_0001>
module attributes {stable_mosaic.version = 11 : i64} {
  func.func @_mm_bias_silu_kernel(%arg0: i32, %arg1: memref<256x128xbf16, #tpu.memory_space<vmem>>, %arg2: memref<128x128xbf16, #tpu.memory_space<vmem>>, %arg3: memref<1x128xf32, #tpu.memory_space<vmem>>, %arg4: memref<256x128xbf16, #tpu.memory_space<vmem>>) attributes {dimension_semantics = [#tpu.dimension_semantics<parallel>], iteration_bounds = array<i64: 2>, scalar_prefetch = 0 : i64, scratch_operands = 0 : i64, tpu.core_type = #tpu.core_type<tc>, window_params = [{transform_indices = @transform_0, window_bounds = array<i64: 256, 128>}, {pipeline_mode = #tpu.pipeline_mode<synchronous>, transform_indices = @transform_1, window_bounds = array<i64: 128, 128>}, {pipeline_mode = #tpu.pipeline_mode<synchronous>, transform_indices = @transform_2, window_bounds = array<i64: 1, 128>}, {transform_indices = @transform_3, window_bounds = array<i64: 256, 128>}]} {
    %c0 = arith.constant 0 : index
    %c0_0 = arith.constant 0 : index
    %0 = vector.load %arg1[%c0, %c0_0] : memref<256x128xbf16, #tpu.memory_space<vmem>>, vector<256x128xbf16>
    %c0_1 = arith.constant 0 : index
    %c0_2 = arith.constant 0 : index
    %1 = vector.load %arg2[%c0_1, %c0_2] : memref<128x128xbf16, #tpu.memory_space<vmem>>, vector<128x128xbf16>
    %cst = arith.constant dense<0.000000e+00> : vector<256x128xf32>
    %2 = tpu.matmul %0, %1, %cst {dimension_numbers = #tpu.dot_dimension_numbers<[1], [0], [0], [1], [0, 0, 1, 1], [], []>} : vector<256x128xbf16>, vector<128x128xbf16>, vector<256x128xf32> -> vector<256x128xf32>
    %c0_3 = arith.constant 0 : index
    %c0_4 = arith.constant 0 : index
    %3 = vector.load %arg3[%c0_3, %c0_4] : memref<1x128xf32, #tpu.memory_space<vmem>>, vector<1x128xf32>
    %4 = vector.broadcast %3 : vector<1x128xf32> to vector<256x128xf32>
    %5 = arith.addf %2, %4 : vector<256x128xf32>
    %6 = arith.negf %5 : vector<256x128xf32>
    %7 = math.exp %6 : vector<256x128xf32>
    %cst_5 = arith.constant 1.000000e+00 : f32
    %8 = vector.broadcast %cst_5 : f32 to vector<256x128xf32>
    %9 = arith.addf %8, %7 : vector<256x128xf32>
    %10 = arith.divf %8, %9 : vector<256x128xf32>
    %11 = arith.mulf %5, %10 : vector<256x128xf32>
    %12 = arith.truncf %11 : vector<256x128xf32> to vector<256x128xbf16>
    %c0_6 = arith.constant 0 : index
    %c0_7 = arith.constant 0 : index
    %13 = vector.load %arg4[%c0_6, %c0_7] : memref<256x128xbf16, #tpu.memory_space<vmem>>, vector<256x128xbf16>
    tpu.vector_store %arg4[%c0_6, %c0_7], %12 {strides = array<i32>} : memref<256x128xbf16, #tpu.memory_space<vmem>>, vector<256x128xbf16>,
    return
  }
  func.func @transform_0(%arg0: i32) -> (i32, i32) {
    %c0_i32 = arith.constant 0 : i32
    %c0_i32_0 = arith.constant 0 : i32
    return %arg0, %c0_i32 : i32, i32
  }
  func.func @transform_1(%arg0: i32) -> (i32, i32) {
    %c0_i32 = arith.constant 0 : i32
    %c0_i32_0 = arith.constant 0 : i32
    %c0_i32_1 = arith.constant 0 : i32
    return %c0_i32, %c0_i32_0 : i32, i32
  }
  func.func @transform_2(%arg0: i32) -> (i32, i32) {
    %c0_i32 = arith.constant 0 : i32
    %c0_i32_0 = arith.constant 0 : i32
    %c0_i32_1 = arith.constant 0 : i32
    return %c0_i32, %c0_i32_0 : i32, i32
  }
  func.func @transform_3(%arg0: i32) -> (i32, i32) {
    %c0_i32 = arith.constant 0 : i32
    %c0_i32_0 = arith.constant 0 : i32
    return %arg0, %c0_i32 : i32, i32
  }
}

module attributes {stable_mosaic.version = 11 : i64} {
  func.func @_mm_bias_silu_kernel(%arg0: i32, %arg1: memref<256x1152xbf16, #tpu.memory_space<vmem>>, %arg2: memref<1152x128xbf16, #tpu.memory_space<vmem>>, %arg3: memref<1x128xf32, #tpu.memory_space<vmem>>, %arg4: memref<256x128xbf16, #tpu.memory_space<vmem>>) attributes {dimension_semantics = [#tpu.dimension_semantics<parallel>], iteration_bounds = array<i64: 2>, scalar_prefetch = 0 : i64, scratch_operands = 0 : i64, tpu.core_type = #tpu.core_type<tc>, window_params = [{transform_indices = @transform_0, window_bounds = array<i64: 256, 1152>}, {pipeline_mode = #tpu.pipeline_mode<synchronous>, transform_indices = @transform_1, window_bounds = array<i64: 1152, 128>}, {pipeline_mode = #tpu.pipeline_mode<synchronous>, transform_indices = @transform_2, window_bounds = array<i64: 1, 128>}, {transform_indices = @transform_3, window_bounds = array<i64: 256, 128>}]} {
    %c0 = arith.constant 0 : index
    %c0_0 = arith.constant 0 : index
    %0 = vector.load %arg1[%c0, %c0_0] : memref<256x1152xbf16, #tpu.memory_space<vmem>>, vector<256x1152xbf16>
    %c0_1 = arith.constant 0 : index
    %c0_2 = arith.constant 0 : index
    %1 = vector.load %arg2[%c0_1, %c0_2] : memref<1152x128xbf16, #tpu.memory_space<vmem>>, vector<1152x128xbf16>
    %cst = arith.constant dense<0.000000e+00> : vector<256x128xf32>
    %2 = tpu.matmul %0, %1, %cst {dimension_numbers = #tpu.dot_dimension_numbers<[1], [0], [0], [1], [0, 0, 1, 1], [], []>} : vector<256x1152xbf16>, vector<1152x128xbf16>, vector<256x128xf32> -> vector<256x128xf32>
    %c0_3 = arith.constant 0 : index
    %c0_4 = arith.constant 0 : index
    %3 = vector.load %arg3[%c0_3, %c0_4] : memref<1x128xf32, #tpu.memory_space<vmem>>, vector<1x128xf32>
    %4 = vector.broadcast %3 : vector<1x128xf32> to vector<256x128xf32>
    %5 = arith.addf %2, %4 : vector<256x128xf32>
    %6 = arith.negf %5 : vector<256x128xf32>
    %7 = math.exp %6 : vector<256x128xf32>
    %cst_5 = arith.constant 1.000000e+00 : f32
    %8 = vector.broadcast %cst_5 : f32 to vector<256x128xf32>
    %9 = arith.addf %8, %7 : vector<256x128xf32>
    %10 = arith.divf %8, %9 : vector<256x128xf32>
    %11 = arith.mulf %5, %10 : vector<256x128xf32>
    %12 = arith.truncf %11 : vector<256x128xf32> to vector<256x128xbf16>
    %c0_6 = arith.constant 0 : index
    %c0_7 = arith.constant 0 : index
    %13 = vector.load %arg4[%c0_6, %c0_7] : memref<256x128xbf16, #tpu.memory_space<vmem>>, vector<256x128xbf16>
    tpu.vector_store %arg4[%c0_6, %c0_7], %12 {strides = array<i32>} : memref<256x128xbf16, #tpu.memory_space<vmem>>, vector<256x128xbf16>,
    return
  }
  func.func @transform_0(%arg0: i32) -> (i32, i32) {
    %c0_i32 = arith.constant 0 : i32
    %c0_i32_0 = arith.constant 0 : i32
    return %arg0, %c0_i32 : i32, i32
  }
  func.func @transform_1(%arg0: i32) -> (i32, i32) {
    %c0_i32 = arith.constant 0 : i32
    %c0_i32_0 = arith.constant 0 : i32
    %c0_i32_1 = arith.constant 0 : i32
    return %c0_i32, %c0_i32_0 : i32, i32
  }
  func.func @transform_2(%arg0: i32) -> (i32, i32) {
    %c0_i32 = arith.constant 0 : i32
    %c0_i32_0 = arith.constant 0 : i32
    %c0_i32_1 = arith.constant 0 : i32
    return %c0_i32, %c0_i32_0 : i32, i32
  }
  func.func @transform_3(%arg0: i32) -> (i32, i32) {
    %c0_i32 = arith.constant 0 : i32
    %c0_i32_0 = arith.constant 0 : i32
    return %arg0, %c0_i32 : i32, i32
  }
}

module attributes {stable_mosaic.version = 11 : i64} {
  func.func @_mm_bias_silu_res_kernel(%arg0: i32, %arg1: memref<256x1152xbf16, #tpu.memory_space<vmem>>, %arg2: memref<256x128xbf16, #tpu.memory_space<vmem>>, %arg3: memref<1152x128xbf16, #tpu.memory_space<vmem>>, %arg4: memref<1x128xf32, #tpu.memory_space<vmem>>, %arg5: memref<256x128xbf16, #tpu.memory_space<vmem>>) attributes {dimension_semantics = [#tpu.dimension_semantics<parallel>], iteration_bounds = array<i64: 2>, scalar_prefetch = 0 : i64, scratch_operands = 0 : i64, tpu.core_type = #tpu.core_type<tc>, window_params = [{transform_indices = @transform_0, window_bounds = array<i64: 256, 1152>}, {transform_indices = @transform_1, window_bounds = array<i64: 256, 128>}, {pipeline_mode = #tpu.pipeline_mode<synchronous>, transform_indices = @transform_2, window_bounds = array<i64: 1152, 128>}, {pipeline_mode = #tpu.pipeline_mode<synchronous>, transform_indices = @transform_3, window_bounds = array<i64: 1, 128>}, {transform_indices = @transform_4, window_bounds = array<i64: 256, 128>}]} {
    %c0 = arith.constant 0 : index
    %c0_0 = arith.constant 0 : index
    %0 = vector.load %arg1[%c0, %c0_0] : memref<256x1152xbf16, #tpu.memory_space<vmem>>, vector<256x1152xbf16>
    %c0_1 = arith.constant 0 : index
    %c0_2 = arith.constant 0 : index
    %1 = vector.load %arg3[%c0_1, %c0_2] : memref<1152x128xbf16, #tpu.memory_space<vmem>>, vector<1152x128xbf16>
    %cst = arith.constant dense<0.000000e+00> : vector<256x128xf32>
    %2 = tpu.matmul %0, %1, %cst {dimension_numbers = #tpu.dot_dimension_numbers<[1], [0], [0], [1], [0, 0, 1, 1], [], []>} : vector<256x1152xbf16>, vector<1152x128xbf16>, vector<256x128xf32> -> vector<256x128xf32>
    %c0_3 = arith.constant 0 : index
    %c0_4 = arith.constant 0 : index
    %3 = vector.load %arg4[%c0_3, %c0_4] : memref<1x128xf32, #tpu.memory_space<vmem>>, vector<1x128xf32>
    %4 = vector.broadcast %3 : vector<1x128xf32> to vector<256x128xf32>
    %5 = arith.addf %2, %4 : vector<256x128xf32>
    %c0_5 = arith.constant 0 : index
    %c0_6 = arith.constant 0 : index
    %6 = vector.load %arg2[%c0_5, %c0_6] : memref<256x128xbf16, #tpu.memory_space<vmem>>, vector<256x128xbf16>
    %7 = arith.extf %6 : vector<256x128xbf16> to vector<256x128xf32>
    %8 = arith.negf %5 : vector<256x128xf32>
    %9 = math.exp %8 : vector<256x128xf32>
    %cst_7 = arith.constant 1.000000e+00 : f32
    %10 = vector.broadcast %cst_7 : f32 to vector<256x128xf32>
    %11 = arith.addf %10, %9 : vector<256x128xf32>
    %12 = arith.divf %10, %11 : vector<256x128xf32>
    %13 = arith.mulf %5, %12 : vector<256x128xf32>
    %14 = arith.addf %7, %13 : vector<256x128xf32>
    %15 = arith.truncf %14 : vector<256x128xf32> to vector<256x128xbf16>
    %c0_8 = arith.constant 0 : index
    %c0_9 = arith.constant 0 : index
    %16 = vector.load %arg5[%c0_8, %c0_9] : memref<256x128xbf16, #tpu.memory_space<vmem>>, vector<256x128xbf16>
    tpu.vector_store %arg5[%c0_8, %c0_9], %15 {strides = array<i32>} : memref<256x128xbf16, #tpu.memory_space<vmem>>, vector<256x128xbf16>,
    return
  }
  func.func @transform_0(%arg0: i32) -> (i32, i32) {
    %c0_i32 = arith.constant 0 : i32
    %c0_i32_0 = arith.constant 0 : i32
    return %arg0, %c0_i32 : i32, i32
  }
  func.func @transform_1(%arg0: i32) -> (i32, i32) {
    %c0_i32 = arith.constant 0 : i32
    %c0_i32_0 = arith.constant 0 : i32
    return %arg0, %c0_i32 : i32, i32
  }
  func.func @transform_2(%arg0: i32) -> (i32, i32) {
    %c0_i32 = arith.constant 0 : i32
    %c0_i32_0 = arith.constant 0 : i32
    %c0_i32_1 = arith.constant 0 : i32
    return %c0_i32, %c0_i32_0 : i32, i32
  }
  func.func @transform_3(%arg0: i32) -> (i32, i32) {
    %c0_i32 = arith.constant 0 : i32
    %c0_i32_0 = arith.constant 0 : i32
    %c0_i32_1 = arith.constant 0 : i32
    return %c0_i32, %c0_i32_0 : i32, i32
  }
  func.func @transform_4(%arg0: i32) -> (i32, i32) {
    %c0_i32 = arith.constant 0 : i32
    %c0_i32_0 = arith.constant 0 : i32
    return %arg0, %c0_i32 : i32, i32
  }
}

module attributes {stable_mosaic.version = 11 : i64} {
  func.func @_csp_tail_kernel(%arg0: i32, %arg1: memref<256x128xbf16, #tpu.memory_space<vmem>>, %arg2: memref<256x128xbf16, #tpu.memory_space<vmem>>, %arg3: memref<128x128xbf16, #tpu.memory_space<vmem>>, %arg4: memref<1x128xf32, #tpu.memory_space<vmem>>, %arg5: memref<128x128xbf16, #tpu.memory_space<vmem>>, %arg6: memref<1x128xf32, #tpu.memory_space<vmem>>, %arg7: memref<128x128xbf16, #tpu.memory_space<vmem>>, %arg8: memref<128x128xbf16, #tpu.memory_space<vmem>>, %arg9: memref<1x128xf32, #tpu.memory_space<vmem>>, %arg10: memref<256x128xf32, #tpu.memory_space<vmem>>) attributes {dimension_semantics = [#tpu.dimension_semantics<parallel>], iteration_bounds = array<i64: 2>, scalar_prefetch = 0 : i64, scratch_operands = 0 : i64, tpu.core_type = #tpu.core_type<tc>, window_params = [{transform_indices = @transform_0, window_bounds = array<i64: 256, 128>}, {transform_indices = @transform_1, window_bounds = array<i64: 256, 128>}, {pipeline_mode = #tpu.pipeline_mode<synchronous>, transform_indices = @transform_2, window_bounds = array<i64: 128, 128>}, {pipeline_mode = #tpu.pipeline_mode<synchronous>, transform_indices = @transform_3, window_bounds = array<i64: 1, 128>}, {pipeline_mode = #tpu.pipeline_mode<synchronous>, transform_indices = @transform_4, window_bounds = array<i64: 128, 128>}, {pipeline_mode = #tpu.pipeline_mode<synchronous>, transform_indices = @transform_5, window_bounds = array<i64: 1, 128>}, {pipeline_mode = #tpu.pipeline_mode<synchronous>, transform_indices = @transform_6, window_bounds = array<i64: 128, 128>}, {pipeline_mode = #tpu.pipeline_mode<synchronous>, transform_indices = @transform_7, window_bounds = array<i64: 128, 128>}, {pipeline_mode = #tpu.pipeline_mode<synchronous>, transform_indices = @transform_8, window_bounds = array<i64: 1, 128>}, {transform_indices = @transform_9, window_bounds = array<i64: 256, 128>}]} {
    %c0 = arith.constant 0 : index
    %c0_0 = arith.constant 0 : index
    %0 = vector.load %arg1[%c0, %c0_0] : memref<256x128xbf16, #tpu.memory_space<vmem>>, vector<256x128xbf16>
    %c0_1 = arith.constant 0 : index
    %c0_2 = arith.constant 0 : index
    %1 = vector.load %arg3[%c0_1, %c0_2] : memref<128x128xbf16, #tpu.memory_space<vmem>>, vector<128x128xbf16>
    %cst = arith.constant dense<0.000000e+00> : vector<256x128xf32>
    %2 = tpu.matmul %0, %1, %cst {dimension_numbers = #tpu.dot_dimension_numbers<[1], [0], [0], [1], [0, 0, 1, 1], [], []>} : vector<256x128xbf16>, vector<128x128xbf16>, vector<256x128xf32> -> vector<256x128xf32>
    %c0_3 = arith.constant 0 : index
    %c0_4 = arith.constant 0 : index
    %3 = vector.load %arg4[%c0_3, %c0_4] : memref<1x128xf32, #tpu.memory_space<vmem>>, vector<1x128xf32>
    %4 = vector.broadcast %3 : vector<1x128xf32> to vector<256x128xf32>
    %5 = arith.addf %2, %4 : vector<256x128xf32>
    %6 = arith.negf %5 : vector<256x128xf32>
    %7 = math.exp %6 : vector<256x128xf32>
    %cst_5 = arith.constant 1.000000e+00 : f32
    %8 = vector.broadcast %cst_5 : f32 to vector<256x128xf32>
    %9 = arith.addf %8, %7 : vector<256x128xf32>
    %10 = arith.divf %8, %9 : vector<256x128xf32>
    %11 = arith.mulf %5, %10 : vector<256x128xf32>
    %c0_6 = arith.constant 0 : index
    %c0_7 = arith.constant 0 : index
    %12 = vector.load %arg2[%c0_6, %c0_7] : memref<256x128xbf16, #tpu.memory_space<vmem>>, vector<256x128xbf16>
    %c0_8 = arith.constant 0 : index
    %c0_9 = arith.constant 0 : index
    %13 = vector.load %arg5[%c0_8, %c0_9] : memref<128x128xbf16, #tpu.memory_space<vmem>>, vector<128x128xbf16>
    %cst_10 = arith.constant dense<0.000000e+00> : vector<256x128xf32>
    %14 = tpu.matmul %12, %13, %cst_10 {dimension_numbers = #tpu.dot_dimension_numbers<[1], [0], [0], [1], [0, 0, 1, 1], [], []>} : vector<256x128xbf16>, vector<128x128xbf16>, vector<256x128xf32> -> vector<256x128xf32>
    %c0_11 = arith.constant 0 : index
    %c0_12 = arith.constant 0 : index
    %15 = vector.load %arg6[%c0_11, %c0_12] : memref<1x128xf32, #tpu.memory_space<vmem>>, vector<1x128xf32>
    %16 = vector.broadcast %15 : vector<1x128xf32> to vector<256x128xf32>
    %17 = arith.addf %14, %16 : vector<256x128xf32>
    %18 = arith.negf %17 : vector<256x128xf32>
    %19 = math.exp %18 : vector<256x128xf32>
    %cst_13 = arith.constant 1.000000e+00 : f32
    %20 = vector.broadcast %cst_13 : f32 to vector<256x128xf32>
    %21 = arith.addf %20, %19 : vector<256x128xf32>
    %22 = arith.divf %20, %21 : vector<256x128xf32>
    %23 = arith.mulf %17, %22 : vector<256x128xf32>
    %24 = arith.truncf %11 : vector<256x128xf32> to vector<256x128xbf16>
    %c0_14 = arith.constant 0 : index
    %c0_15 = arith.constant 0 : index
    %25 = vector.load %arg7[%c0_14, %c0_15] : memref<128x128xbf16, #tpu.memory_space<vmem>>, vector<128x128xbf16>
    %cst_16 = arith.constant dense<0.000000e+00> : vector<256x128xf32>
    %26 = tpu.matmul %24, %25, %cst_16 {dimension_numbers = #tpu.dot_dimension_numbers<[1], [0], [0], [1], [0, 0, 1, 1], [], []>} : vector<256x128xbf16>, vector<128x128xbf16>, vector<256x128xf32> -> vector<256x128xf32>
    %27 = arith.truncf %23 : vector<256x128xf32> to vector<256x128xbf16>
    %c0_17 = arith.constant 0 : index
    %c0_18 = arith.constant 0 : index
    %28 = vector.load %arg8[%c0_17, %c0_18] : memref<128x128xbf16, #tpu.memory_space<vmem>>, vector<128x128xbf16>
    %cst_19 = arith.constant dense<0.000000e+00> : vector<256x128xf32>
    %29 = tpu.matmul %27, %28, %cst_19 {dimension_numbers = #tpu.dot_dimension_numbers<[1], [0], [0], [1], [0, 0, 1, 1], [], []>} : vector<256x128xbf16>, vector<128x128xbf16>, vector<256x128xf32> -> vector<256x128xf32>
    %30 = arith.addf %26, %29 : vector<256x128xf32>
    %c0_20 = arith.constant 0 : index
    %c0_21 = arith.constant 0 : index
    %31 = vector.load %arg9[%c0_20, %c0_21] : memref<1x128xf32, #tpu.memory_space<vmem>>, vector<1x128xf32>
    %32 = vector.broadcast %31 : vector<1x128xf32> to vector<256x128xf32>
    %33 = arith.addf %30, %32 : vector<256x128xf32>
    %34 = arith.negf %33 : vector<256x128xf32>
    %35 = math.exp %34 : vector<256x128xf32>
    %cst_22 = arith.constant 1.000000e+00 : f32
    %36 = vector.broadcast %cst_22 : f32 to vector<256x128xf32>
    %37 = arith.addf %36, %35 : vector<256x128xf32>
    %38 = arith.divf %36, %37 : vector<256x128xf32>
    %39 = arith.mulf %33, %38 : vector<256x128xf32>
    %c0_23 = arith.constant 0 : index
    %c0_24 = arith.constant 0 : index
    %40 = vector.load %arg10[%c0_23, %c0_24] : memref<256x128xf32, #tpu.memory_space<vmem>>, vector<256x128xf32>
    tpu.vector_store %arg10[%c0_23, %c0_24], %39 {strides = array<i32>} : memref<256x128xf32, #tpu.memory_space<vmem>>, vector<256x128xf32>,
    return
  }
  func.func @transform_0(%arg0: i32) -> (i32, i32) {
    %c0_i32 = arith.constant 0 : i32
    %c0_i32_0 = arith.constant 0 : i32
    return %arg0, %c0_i32 : i32, i32
  }
  func.func @transform_1(%arg0: i32) -> (i32, i32) {
    %c0_i32 = arith.constant 0 : i32
    %c0_i32_0 = arith.constant 0 : i32
    return %arg0, %c0_i32 : i32, i32
  }
  func.func @transform_2(%arg0: i32) -> (i32, i32) {
    %c0_i32 = arith.constant 0 : i32
    %c0_i32_0 = arith.constant 0 : i32
    %c0_i32_1 = arith.constant 0 : i32
    return %c0_i32, %c0_i32_0 : i32, i32
  }
  func.func @transform_3(%arg0: i32) -> (i32, i32) {
    %c0_i32 = arith.constant 0 : i32
    %c0_i32_0 = arith.constant 0 : i32
    %c0_i32_1 = arith.constant 0 : i32
    return %c0_i32, %c0_i32_0 : i32, i32
  }
  func.func @transform_4(%arg0: i32) -> (i32, i32) {
    %c0_i32 = arith.constant 0 : i32
    %c0_i32_0 = arith.constant 0 : i32
    %c0_i32_1 = arith.constant 0 : i32
    return %c0_i32, %c0_i32_0 : i32, i32
  }
  func.func @transform_5(%arg0: i32) -> (i32, i32) {
    %c0_i32 = arith.constant 0 : i32
    %c0_i32_0 = arith.constant 0 : i32
    %c0_i32_1 = arith.constant 0 : i32
    return %c0_i32, %c0_i32_0 : i32, i32
  }
  func.func @transform_6(%arg0: i32) -> (i32, i32) {
    %c0_i32 = arith.constant 0 : i32
    %c0_i32_0 = arith.constant 0 : i32
    %c0_i32_1 = arith.constant 0 : i32
    return %c0_i32, %c0_i32_0 : i32, i32
  }
  func.func @transform_7(%arg0: i32) -> (i32, i32) {
    %c0_i32 = arith.constant 0 : i32
    %c0_i32_0 = arith.constant 0 : i32
    %c0_i32_1 = arith.constant 0 : i32
    return %c0_i32, %c0_i32_0 : i32, i32
  }
  func.func @transform_8(%arg0: i32) -> (i32, i32) {
    %c0_i32 = arith.constant 0 : i32
    %c0_i32_0 = arith.constant 0 : i32
    %c0_i32_1 = arith.constant 0 : i32
    return %c0_i32, %c0_i32_0 : i32, i32
  }
  func.func @transform_9(%arg0: i32) -> (i32, i32) {
    %c0_i32 = arith.constant 0 : i32
    %c0_i32_0 = arith.constant 0 : i32
    return %arg0, %c0_i32 : i32, i32
  }
}

</mosaic_0001>

<bundles_post_ra>
// kernel: _lambda_.4
= control target key start
LH: loop header
LB: loop body
LE: loop exit
PB: predicated region body
PF: predicated region fallthrough
CT: control target
= control target key end

     0   :  { %s1667_s12 = smov 0   ;;  %s2554_s0 = inlined_call_operand.vmem [shape: bf16[512,128], index: 0, kind: input, shape index: {}]   ;;  %s2555_s1 = inlined_call_operand.vmem [shape: bf16[128,128], index: 1, kind: input, shape index: {}]   ;;  %s2556_s2 = inlined_call_operand.vmem [shape: f32[1,128], index: 2, kind: input, shape index: {}]   ;;  %s2557_s3 = inlined_call_operand.vmem [shape: bf16[512,128], index: 3, kind: output, shape index: {}]  }
   0x1 LB: > { %s1219_s13 = sadd.s32 4294967295, %s1645_s12   ;;  %p1223_p0 = scmp.ge.s32.totalorder %s1645_s12, 1  ;;  %s1645_s12 = sphi %s1667_s12, %s13_s12  }
   0x2   : > { %p138_p1 = scmp.lt.s32.totalorder %s1645_s12, 3 }
   0x4   : > { %p139_p2 = pnand %p1223_p0, %p138_p1 }
   0x5   : > { %s1224_s22 = sshll.u32 (!%p139_p2), %s1219_s13, 5 }
   0x6   : > { %142 = sbr.rel (%p139_p2) target bundleno = 334 (0x14e), region = 32  ;;  %p163_p3 = scmp.lt.s32.totalorder (!%p139_p2), %s1224_s22, 63 }
   0xb   : > { %v1381_v0 = vld [vmem:[%s2555_s1 + $0x38] sm:$0xff]  ;;  %v1380_v1 = vld [vmem:[%s2555_s1 + $0x30] sm:$0xff]  ;;  %v1379_v2 = vld [vmem:[%s2555_s1 + $0x28] sm:$0xff]  ;;  %s2631_s22 = smov (!%p163_p3, %s1224_s22), 63 }
   0xc   : > { %370 = vmatpush.bf16.msra.mxu0 %v1381_v0  ;;  %1477 = vmatpush.bf16.msra.mxu1 %v1381_v0  ;;  %v1378_v3 = vld [vmem:[%s2555_s1 + $0x20] sm:$0xff]  ;;  %v1377_v4 = vld [vmem:[%s2555_s1 + $0x18] sm:$0xff]  ;;  %v1376_v5 = vld [vmem:[%s2555_s1 + $0x10] sm:$0xff]  ;;  %s1225_s29 = sshll.u32 %s2631_s22, 2 }
   0xd   : > { %1478 = vmatpush.bf16.msra.mxu2 %v1381_v0  ;;  %1479 = vmatpush.bf16.msra.mxu3 %v1381_v0  ;;  %v1375_v6 = vld [vmem:[%s2555_s1 + $0x8] sm:$0xff]  ;;  %v1374_v7 = vld [vmem:[%s2555_s1] sm:$0xff]  ;;  %s1707_s7 = scalar_lea.vmem %s2554_s0, %s1225_s29  ;;  %s1950_s13 = scalar_lea.vmem %s2557_s3, %s1225_s29 }
   0xe   : > { %v1358_v8 = vld [vmem:[%s1707_s7] sm:$0xff]  ;;  %v1359_v12 = vld [vmem:[%s1707_s7 + $0x8] sm:$0xff]  ;;  %v1360_v16 = vld [vmem:[%s1707_s7 + $0x10] sm:$0xff] }
   0xf   : > { %v1362_v9 = vld [vmem:[%s1707_s7 + $0x20] sm:$0xff]  ;;  %v1363_v13 = vld [vmem:[%s1707_s7 + $0x28] sm:$0xff]  ;;  %v1364_v17 = vld [vmem:[%s1707_s7 + $0x30] sm:$0xff] }
  0x10   : > { %371 = vmatpush.bf16.msra.mxu0 %v1380_v1  ;;  %1480 = vmatpush.bf16.msra.mxu1 %v1380_v1  ;;  %v1366_v10 = vld [vmem:[%s1707_s7 + $0x40] sm:$0xff]  ;;  %v1367_v14 = vld [vmem:[%s1707_s7 + $0x48] sm:$0xff]  ;;  %v1368_v18 = vld [vmem:[%s1707_s7 + $0x50] sm:$0xff] }
  0x11   : > { %1481 = vmatpush.bf16.msra.mxu2 %v1380_v1  ;;  %1482 = vmatpush.bf16.msra.mxu3 %v1380_v1  ;;  %v1370_v11 = vld [vmem:[%s1707_s7 + $0x60] sm:$0xff]  ;;  %v1371_v15 = vld [vmem:[%s1707_s7 + $0x68] sm:$0xff]  ;;  %v1372_v19 = vld [vmem:[%s1707_s7 + $0x70] sm:$0xff] }
  0x12   : > { %v1361_v20 = vld [vmem:[%s1707_s7 + $0x18] sm:$0xff]  ;;  %v1728_v24 = vld [vmem:[%s2556_s2] ss:$0 sm:$0xff] }
  0x13   : > { %v1365_v21 = vld [vmem:[%s1707_s7 + $0x38] sm:$0xff] }
  0x14   : > { %372 = vmatpush.bf16.msra.mxu0 %v1379_v2  ;;  %1483 = vmatpush.bf16.msra.mxu1 %v1379_v2  ;;  %v1369_v22 = vld [vmem:[%s1707_s7 + $0x58] sm:$0xff] }
  0x15   : > { %1484 = vmatpush.bf16.msra.mxu2 %v1379_v2  ;;  %1485 = vmatpush.bf16.msra.mxu3 %v1379_v2  ;;  %v1373_v23 = vld [vmem:[%s1707_s7 + $0x78] sm:$0xff] }
  0x18   : > { %373 = vmatpush.bf16.msra.mxu0 %v1378_v3  ;;  %1486 = vmatpush.bf16.msra.mxu1 %v1378_v3 }
  0x19   : > { %1487 = vmatpush.bf16.msra.mxu2 %v1378_v3  ;;  %1488 = vmatpush.bf16.msra.mxu3 %v1378_v3 }
  0x1c   : > { %374 = vmatpush.bf16.msra.mxu0 %v1377_v4  ;;  %1489 = vmatpush.bf16.msra.mxu1 %v1377_v4 }
  0x1d   : > { %1490 = vmatpush.bf16.msra.mxu2 %v1377_v4  ;;  %1491 = vmatpush.bf16.msra.mxu3 %v1377_v4 }
  0x20   : > { %375 = vmatpush.bf16.msra.mxu0 %v1376_v5  ;;  %1492 = vmatpush.bf16.msra.mxu1 %v1376_v5 }
  0x21   : > { %1493 = vmatpush.bf16.msra.mxu2 %v1376_v5  ;;  %1494 = vmatpush.bf16.msra.mxu3 %v1376_v5 }
  0x24   : > { %376 = vmatpush.bf16.msra.mxu0 %v1375_v6  ;;  %1495 = vmatpush.bf16.msra.mxu1 %v1375_v6 }
  0x25   : > { %1496 = vmatpush.bf16.msra.mxu2 %v1375_v6  ;;  %1497 = vmatpush.bf16.msra.mxu3 %v1375_v6 }
  0x28   : > { %377 = vmatpush.bf16.msra.mxu0 %v1374_v7  ;;  %1498 = vmatpush.bf16.msra.mxu1 %v1374_v7 }
  0x29   : > { %1499 = vmatpush.bf16.msra.mxu2 %v1374_v7  ;;  %1500 = vmatpush.bf16.msra.mxu3 %v1374_v7 }
  0x2b   : > { %378 = vmatmul.bf16.vlgmr.msra.gmra.mxu0 %v1358_v8  ;;  %398 = vmatmul.bf16.vlgmr.msra.gmra.mxu1 %v1362_v9 }
  0x2c   : > { %418 = vmatmul.bf16.vlgmr.msra.gmra.mxu2 %v1366_v10  ;;  %438 = vmatmul.bf16.vlgmr.msra.gmra.mxu3 %v1370_v11 }
  0x3b   : > { %383 = vmatmul.bf16.gmra.mxu0 %v1359_v12  ;;  %403 = vmatmul.bf16.gmra.mxu1 %v1363_v13 }
  0x3c   : > { %423 = vmatmul.bf16.gmra.mxu2 %v1367_v14  ;;  %443 = vmatmul.bf16.gmra.mxu3 %v1371_v15 }
  0x4b   : > { %388 = vmatmul.bf16.gmra.mxu0 %v1360_v16  ;;  %408 = vmatmul.bf16.gmra.mxu1 %v1364_v17 }
  0x4c   : > { %428 = vmatmul.bf16.gmra.mxu2 %v1368_v18  ;;  %448 = vmatmul.bf16.gmra.mxu3 %v1372_v19 }
  0x5b   : > { %393 = vmatmul.bf16.gmra.mxu0 %v1361_v20  ;;  %413 = vmatmul.bf16.gmra.mxu1 %v1365_v21 }
  0x5c   : > { %433 = vmatmul.bf16.gmra.mxu2 %v1369_v22  ;;  %453 = vmatmul.bf16.gmra.mxu3 %v1373_v23 }
  0xa8   : > { %v379_v25 = vpop.f32.mrf.mxu0  ;;  %v399_v26 = vpop.f32.mrf.mxu1 }
  0xa9   : > { %v1731_v27 = vadd.f32 %v1728_v24, %v379_v25  ;;  %v1734_v28 = vadd.f32 %v1728_v24, %v399_v26 }
  0xab   : > { %v1324_v29 = vmul.f32 -1.442695, %v1731_v27  ;;  %v1332_v30 = vmul.f32 -1.442695, %v1734_v28 }
  0xad   : > { %1510 = vpow2.f32 %v1324_v29 }
  0xae   : > { %1512 = vpow2.f32 %v1332_v30 }
  0xaf   : > { %v419_v31 = vpop.f32.mrf.mxu2  ;;  %v439_v32 = vpop.f32.mrf.mxu3 }
  0xb0   : > { %v1739_v33 = vadd.f32 %v1728_v24, %v419_v31  ;;  %v1742_v34 = vadd.f32 %v1728_v24, %v439_v32  ;;  %v381_v35 = vpop.f32.mrf.mxu0  ;;  %v401_v36 = vpop.f32.mrf.mxu1 }
  0xb1   : > { %v1745_v37 = vadd.f32 %v1728_v24, %v381_v35  ;;  %v1748_v38 = vadd.f32 %v1728_v24, %v401_v36 }
  0xb2   : > { %v1340_v39 = vmul.f32 -1.442695, %v1739_v33  ;;  %v1348_v40 = vmul.f32 -1.442695, %v1742_v34 }
  0xb3   : > { %v1511_v41 = vpop.eup %1510  ;;  %v1325_v44 = vmul.f32 -1.442695, %v1745_v37  ;;  %v1333_v46 = vmul.f32 -1.442695, %v1748_v38 }
  0xb4   : > { %v1513_v42 = vpop.eup %1512  ;;  %v1752_v43 = vadd.f32 1.0, %v1511_v41  ;;  %1514 = vpow2.f32 %v1340_v39 }
  0xb5   : > { %v1755_v45 = vadd.f32 1.0, %v1513_v42  ;;  %1516 = vpow2.f32 %v1348_v40 }
  0xb6   : > { %1518 = vrcp.f32 %v1752_v43  ;;  %v596_v59 = vand.u32 2147483647, %v1752_v43  ;;  %v598_v60 = vand.u32 2147483648, %v1752_v43  ;;  %vm592_vm0 = vweird.f32 %v1752_v43 }
  0xb7   : > { %1520 = vrcp.f32 %v1755_v45  ;;  %v421_v47 = vpop.f32.mrf.mxu2  ;;  %v441_v48 = vpop.f32.mrf.mxu3  ;;  %vm712_vm1 = vweird.f32 %v1755_v45  ;;  %v716_v4 = vand.u32 2147483647, %v1755_v45  ;;  %v718_v5 = vand.u32 2147483648, %v1755_v45 }
  0xb8   : > { %1522 = vpow2.f32 %v1325_v44  ;;  %v1761_v49 = vadd.f32 %v1728_v24, %v421_v47  ;;  %v1764_v51 = vadd.f32 %v1728_v24, %v441_v48  ;;  %v384_v61 = vpop.f32.mrf.mxu0  ;;  %v404_v62 = vpop.f32.mrf.mxu1  ;;  %vm1795_vm2 = vcmp.eq.f32.partialorder %v596_v59, 8.507059e+37 }
  0xb9   : > { %1524 = vpow2.f32 %v1333_v46  ;;  %v1789_v7 = vadd.f32 %v1728_v24, %v384_v61  ;;  %v1792_v8 = vadd.f32 %v1728_v24, %v404_v62  ;;  %v599_v11 = vor.u32 1.1754944e-38, %v598_v60 }
  0xba   : > { %v1515_v50 = vpop.eup %1514  ;;  %v1341_v56 = vmul.f32 -1.442695, %v1761_v49  ;;  %v1349_v1 = vmul.f32 -1.442695, %v1764_v51  ;;  %vm1809_vm4 = vcmp.eq.f32.partialorder %v716_v4, 8.507059e+37  ;;  %v719_v21 = vor.u32 1.1754944e-38, %v718_v5 }
  0xbb   : > { %v1517_v52 = vpop.eup %1516  ;;  %v1766_v53 = vadd.f32 1.0, %v1515_v50  ;;  %v1326_v23 = vmul.f32 -1.442695, %v1789_v7  ;;  %v1820_v25 = vmul.f32 -1.442695, %v1792_v8 }
  0xbc   : > { %v1768_v54 = vpop.eup %1518  ;;  %v1770_v55 = vadd.f32 1.0, %v1517_v52 }
  0xbd   : > { %v1773_v57 = vpop.eup %1520  ;;  %v588_v58 = vmul.f32 %v1768_v54, %v1752_v43  ;;  %1526 = vrcp.f32 %v1766_v53  ;;  %vm593_vm3 = vweird.f32 %v1768_v54  ;;  %v836_v15 = vand.u32 2147483647, %v1766_v53 }
  0xbe   : > { %v1523_v63 = vpop.eup %1522  ;;  %v708_v0 = vmul.f32 %v1773_v57, %v1755_v45  ;;  %1528 = vrcp.f32 %v1770_v55  ;;  %v838_v19 = vand.u32 2147483648, %v1766_v53  ;;  %v958_v20 = vand.u32 2147483648, %v1770_v55  ;;  %vm1832_vm7 = vmor %vm592_vm0, %vm593_vm3 }
  0xbf   : > { %v1525_v2 = vpop.eup %1524  ;;  %v589_v3 = vsub.f32 1.0, %v588_v58  ;;  %1530 = vpow2.f32 %v1341_v56  ;;  %v1799_v12 = vadd.f32 1.0, %v1523_v63  ;;  %v424_v26 = vpop.f32.mrf.mxu2  ;;  %vm713_vm5 = vweird.f32 %v1773_v57 }
  0xc0   : > { %v709_v6 = vsub.f32 1.0, %v708_v0  ;;  %v1801_v13 = vadd.f32 1.0, %v1525_v2  ;;  %1532 = vpow2.f32 %v1349_v1  ;;  %vm832_vm6 = vweird.f32 %v1766_v53  ;;  %vm1857_vm10 = vmor %vm712_vm1, %vm713_vm5 }
  0xc1   : > { %v590_v9 = vmul.f32 %v1768_v54, %v589_v3  ;;  %1534 = vrcp.f32 %v1799_v12  ;;  %v956_v39 = vand.u32 2147483647, %v1770_v55  ;;  %v611_v40 = vand.u32 2147483647, %v1799_v12 }
  0xc2   : > { %v710_v14 = vmul.f32 %v1773_v57, %v709_v6  ;;  %1536 = vrcp.f32 %v1801_v13  ;;  %vm1843_vm8 = vcmp.eq.f32.partialorder %v836_v15, 8.507059e+37  ;;  %v839_v43 = vor.u32 1.1754944e-38, %v838_v19 }
  0xc3   : > { %v1806_v16 = vpop.eup %1526  ;;  %v591_v17 = vadd.f32 %v1768_v54, %v590_v9  ;;  %vm952_vm9 = vweird.f32 %v1770_v55  ;;  %v1848_v44 = vor.u32 1.1754944e-38, %v958_v20  ;;  %v1851_v46 = vadd.f32 %v1728_v24, %v424_v26 }
  0xc4   : > { %v828_v22 = vmul.f32 %v1806_v16, %v1766_v53  ;;  %v1822_v29 = vpop.eup %1528  ;;  %v711_v30 = vadd.f32 %v1773_v57, %v710_v14  ;;  %vm833_vm11 = vweird.f32 %v1806_v16  ;;  %vm607_vm12 = vweird.f32 %v1799_v12 }
  0xc5   : > { %v1531_v31 = vpop.eup %1530  ;;  %v948_v36 = vmul.f32 %v1822_v29, %v1770_v55  ;;  %v595_v41 = vsel %vm1832_vm7, %v1768_v54, %v591_v17  ;;  %v613_v58 = vand.u32 2147483648, %v1799_v12  ;;  %1538 = vpow2.f32 %v1326_v23  ;;  %vm1894_vm15 = vmor %vm832_vm6, %vm833_vm11 }
  0xc6   : > { %v829_v35 = vsub.f32 1.0, %v828_v22  ;;  %v1533_v47 = vpop.eup %1532  ;;  %v715_v56 = vsel %vm1857_vm10, %v1773_v57, %v711_v30  ;;  %v1868_v59 = vadd.f32 1.0, %v1531_v31  ;;  %v600_v45 = vsel %vm1795_vm2, %v599_v11, %v595_v41 }
  0xc7   : > { %v949_v52 = vsub.f32 1.0, %v948_v36  ;;  %v1535_v54 = vpop.eup %1534  ;;  %vm1875_vm13 = vcmp.eq.f32.partialorder %v611_v40, 8.507059e+37  ;;  %vm1879_vm14 = vcmp.eq.f32.partialorder %v956_v39, 8.507059e+37  ;;  %v731_v1 = vand.u32 2147483647, %v1801_v13 }
  0xc8   : > { %v830_v50 = vmul.f32 %v1806_v16, %v829_v35  ;;  %v603_v62 = vmul.f32 %v1535_v54, %v1799_v12  ;;  %v1537_v0 = vpop.eup %1536  ;;  %v733_v2 = vand.u32 2147483648, %v1801_v13  ;;  %1540 = vrcp.f32 %v1868_v59 }
  0xc9   : > { %v950_v61 = vmul.f32 %v1822_v29, %v949_v52  ;;  %v1886_v3 = vadd.f32 1.0, %v1533_v47  ;;  %v720_v4 = vsel %vm1809_vm4, %v719_v21, %v715_v56  ;;  %v723_v9 = vmul.f32 %v1537_v0, %v1801_v13  ;;  %v386_v47 = vpop.f32.mrf.mxu0 }
  0xca   : > { %v831_v60 = vadd.f32 %v1806_v16, %v830_v50  ;;  %v604_v6 = vsub.f32 1.0, %v603_v62  ;;  %vm727_vm0 = vweird.f32 %v1801_v13  ;;  %v1067_v10 = vmul.f32 %v600_v45, %v1731_v27 }
  0xcb   : > { %v951_v14 = vadd.f32 %v1822_v29, %v950_v61  ;;  %vm953_vm1 = vweird.f32 %v1822_v29  ;;  %vm608_vm2 = vweird.f32 %v1535_v54  ;;  %v614_v15 = vor.u32 1.1754944e-38, %v613_v58  ;;  %v1539_v18 = vpop.eup %1538 }
  0xcc   : > { %v835_v11 = vsel %vm1894_vm15, %v1806_v16, %v831_v60  ;;  %v605_v53 = vmul.f32 %v1535_v54, %v604_v6  ;;  %v724_v17 = vsub.f32 1.0, %v723_v9  ;;  %v1075_v19 = vmul.f32 %v720_v4, %v1734_v28  ;;  %vm1916_vm4 = vmor %vm952_vm9, %vm953_vm1  ;;  %v426_v4 = vpop.f32.mrf.mxu2 }
  0xcd   : > { %vm1907_vm3 = vcmp.eq.f32.partialorder %v731_v1, 8.507059e+37  ;;  %v734_v27 = vor.u32 1.1754944e-38, %v733_v2  ;;  %1542 = vrcp.f32 %v1886_v3  ;;  %v840_v16 = vsel %vm1843_vm8, %v839_v43, %v835_v11  ;;  %vm609_vm6 = vmor %vm607_vm12, %vm608_vm2 }
  0xce   : > { %v606_v22 = vadd.f32 %v1535_v54, %v605_v53  ;;  %v725_v23 = vmul.f32 %v1537_v0, %v724_v17  ;;  %vm728_vm5 = vweird.f32 %v1537_v0  ;;  %v1541_v28 = vpop.eup %1540  ;;  %v955_v26 = vsel %vm1916_vm4, %v1822_v29, %v951_v14 }
  0xcf   : > { %vm847_vm7 = vweird.f32 %v1868_v59  ;;  %v1927_v30 = vadd.f32 1.0, %v1539_v18  ;;  %1544 = vpow2.f32 %v1820_v25  ;;  %v843_v32 = vmul.f32 %v1541_v28, %v1868_v59  ;;  %vm729_vm8 = vmor %vm727_vm0, %vm728_vm5  ;;  %v444_v25 = vpop.f32.mrf.mxu3 }
  0xd0   : > { %v610_v55 = vsel %vm609_vm6, %v1535_v54, %v606_v22  ;;  %v726_v31 = vadd.f32 %v1537_v0, %v725_v23  ;;  %v851_v35 = vand.u32 2147483647, %v1868_v59  ;;  %v1933_v36 = vmul.f32 %v840_v16, %v1739_v33 }
  0xd1   : > { %v615_v12 = vsel %vm1875_vm13, %v614_v15, %v610_v55  ;;  %v853_v29 = vand.u32 2147483648, %v1868_v59  ;;  %1546 = vrcp.f32 %v1927_v30  ;;  %v960_v39 = vsel %vm1879_vm14, %v1848_v44, %v955_v26  ;;  %v389_v55 = vpop.f32.mrf.mxu0 }
  0xd2   : > { %v1068_v40 = vmul.f32 %v615_v12, %v1745_v37  ;;  %v730_v41 = vsel %vm729_vm8, %v1537_v0, %v726_v31  ;;  %v844_v33 = vsub.f32 1.0, %v843_v32  ;;  %vm848_vm9 = vweird.f32 %v1541_v28 }
  0xd3   : > { %v1543_v42 = vpop.eup %1542  ;;  %v735_v13 = vsel %vm1907_vm3, %v734_v27, %v730_v41  ;;  %v971_v43 = vand.u32 2147483647, %v1886_v3  ;;  %v1342_v44 = vmul.f32 -1.442695, %v1851_v46  ;;  %vm1958_vm10 = vcmp.eq.f32.partialorder %v851_v35, 8.507059e+37  ;;  %vm849_vm11 = vmor %vm847_vm7, %vm848_vm9 }
  0xd4   : > { %v1385_v37 = vpack.c.bf16 %v1068_v40, %v1067_v10  ;;  %v1076_v48 = vmul.f32 %v735_v13, %v1748_v38  ;;  %v845_v50 = vmul.f32 %v1541_v28, %v844_v33  ;;  %v963_v52 = vmul.f32 %v1543_v42, %v1886_v3  ;;  %v406_v38 = vpop.f32.mrf.mxu1 }
  0xd5   : > { %v1545_v54 = vpop.eup %1544  ;;  %v854_v58 = vor.u32 1.1754944e-38, %v853_v29  ;;  %v973_v45 = vand.u32 2147483648, %v1886_v3  ;;  %1548 = vpow2.f32 %v1342_v44  ;;  %vm967_vm12 = vweird.f32 %v1886_v3 }
  0xd6   : > { %1386 = vst [vmem:[%s1950_s13] sm:$0xff] %v1385_v37   ;;  %v1405_v60 = vpack.c.bf16 %v1076_v48, %v1075_v19  ;;  %v846_v61 = vadd.f32 %v1541_v28, %v845_v50  ;;  %v964_v62 = vsub.f32 1.0, %v963_v52  ;;  %v1964_v63 = vadd.f32 1.0, %v1545_v54 }
  0xd7   : > { %v1966_v0 = vpop.eup %1546  ;;  %vm1972_vm13 = vcmp.eq.f32.partialorder %v971_v43, 8.507059e+37  ;;  %v1977_v1 = vadd.f32 %v1728_v24, %v444_v25  ;;  %v1980_v2 = vadd.f32 %v1728_v24, %v386_v47  ;;  %vm968_vm14 = vweird.f32 %v1543_v42  ;;  %v446_v21 = vpop.f32.mrf.mxu3 }
  0xd8   : > { %1465 = vst [vmem:[%s1950_s13 + $0x20] sm:$0xff] %v1405_v60   ;;  %v850_v5 = vsel %vm849_vm11, %v1541_v28, %v846_v61  ;;  %v965_v6 = vmul.f32 %v1543_v42, %v964_v62  ;;  %v618_v59 = vmul.f32 %v1966_v0, %v1927_v30  ;;  %v974_v10 = vor.u32 1.1754944e-38, %v973_v45  ;;  %vm969_vm15 = vmor %vm967_vm12, %vm968_vm14 }
  0xd9   : > { %v855_v9 = vsel %vm1958_vm10, %v854_v58, %v850_v5  ;;  %1550 = vrcp.f32 %v1964_v63  ;;  %v1989_v11 = vadd.f32 %v1728_v24, %v406_v38  ;;  %v1993_v17 = vadd.f32 %v1728_v24, %v426_v4  ;;  %v429_v38 = vpop.f32.mrf.mxu2 }
  0xda   : > { %v1084_v14 = vmul.f32 %v855_v9, %v1761_v49  ;;  %v966_v53 = vadd.f32 %v1543_v42, %v965_v6  ;;  %v619_v15 = vsub.f32 1.0, %v618_v59  ;;  %v1091_v19 = vmul.f32 %v960_v39, %v1742_v34  ;;  %v391_v59 = vpop.f32.mrf.mxu0 }
  0xdb   : > { %v1549_v18 = vpop.eup %1548  ;;  %v626_v20 = vand.u32 2147483647, %v1927_v30  ;;  %v1350_v27 = vmul.f32 -1.442695, %v1977_v1  ;;  %v1327_v16 = vmul.f32 -1.442695, %v1980_v2  ;;  %v2013_v35 = vadd.f32 %v1728_v24, %v446_v21 }
  0xdc   : > { %v1425_v49 = vpack.c.bf16 %v1084_v14, %v1933_v36  ;;  %v970_v22 = vsel %vm969_vm15, %v1543_v42, %v966_v53  ;;  %v620_v23 = vmul.f32 %v1966_v0, %v619_v15  ;;  %v628_v28 = vand.u32 2147483648, %v1927_v30  ;;  %v409_v40 = vpop.f32.mrf.mxu1 }
  0xdd   : > { %v975_v34 = vsel %vm1972_vm13, %v974_v10, %v970_v22  ;;  %v2006_v26 = vadd.f32 1.0, %v1549_v18  ;;  %1552 = vpow2.f32 %v1350_v27  ;;  %v1335_v3 = vmul.f32 -1.442695, %v1989_v11 }
  0xde   : > { %1469 = vst [vmem:[%s1950_s13 + $0x40] sm:$0xff] %v1425_v49   ;;  %v1092_v31 = vmul.f32 %v975_v34, %v1764_v51  ;;  %1554 = vpow2.f32 %v1327_v16  ;;  %v1343_v32 = vmul.f32 -1.442695, %v1993_v17  ;;  %v621_v12 = vadd.f32 %v1966_v0, %v620_v23 }
  0xdf   : > { %v2015_v36 = vpop.eup %1550  ;;  %vm622_vm0 = vweird.f32 %v1927_v30  ;;  %vm623_vm1 = vweird.f32 %v1966_v0  ;;  %1556 = vrcp.f32 %v2006_v26  ;;  %vm2023_vm2 = vcmp.eq.f32.partialorder %v626_v20, 8.507059e+37 }
  0xe0   : > { %v1445_v29 = vpack.c.bf16 %v1092_v31, %v1091_v19  ;;  %v738_v51 = vmul.f32 %v2015_v36, %v1964_v63  ;;  %v746_v39 = vand.u32 2147483647, %v1964_v63  ;;  %1558 = vpow2.f32 %v1335_v3  ;;  %vm2029_vm3 = vmor %vm622_vm0, %vm623_vm1 }
  0xe1   : > { %v629_v30 = vor.u32 1.1754944e-38, %v628_v28  ;;  %1560 = vpow2.f32 %v1343_v32  ;;  %v1351_v42 = vmul.f32 -1.442695, %v2013_v35  ;;  %v625_v43 = vsel %vm2029_vm3, %v1966_v0, %v621_v12  ;;  %v449_v0 = vpop.f32.mrf.mxu3 }
  0xe2   : > { %1473 = vst [vmem:[%s1950_s13 + $0x60] sm:$0xff] %v1445_v29   ;;  %v739_v33 = vsub.f32 1.0, %v738_v51  ;;  %v748_v44 = vand.u32 2147483648, %v1964_v63  ;;  %v866_v47 = vand.u32 2147483647, %v2006_v26  ;;  %v2040_v37 = vadd.f32 %v1728_v24, %v389_v55  ;;  %v394_v10 = vpop.f32.mrf.mxu0 }
  0xe3   : > { %v1553_v13 = vpop.eup %1552  ;;  %v868_v52 = vand.u32 2147483648, %v2006_v26  ;;  %1562 = vpow2.f32 %v1351_v42  ;;  %vm742_vm4 = vweird.f32 %v1964_v63  ;;  %vm743_vm5 = vweird.f32 %v2015_v36 }
  0xe4   : > { %v1555_v48 = vpop.eup %1554  ;;  %v740_v50 = vmul.f32 %v2015_v36, %v739_v33  ;;  %v2044_v54 = vadd.f32 1.0, %v1553_v13  ;;  %vm2048_vm6 = vcmp.eq.f32.partialorder %v746_v39, 8.507059e+37  ;;  %v630_v60 = vsel %vm2023_vm2, %v629_v30, %v625_v43  ;;  %vm2068_vm7 = vmor %vm742_vm4, %vm743_vm5  ;;  %v411_v28 = vpop.f32.mrf.mxu1 }
  0xe5   : > { %v1557_v56 = vpop.eup %1556  ;;  %v2052_v45 = vadd.f32 1.0, %v1555_v48  ;;  %v749_v4 = vor.u32 1.1754944e-38, %v748_v44  ;;  %v1328_v5 = vmul.f32 -1.442695, %v2040_v37  ;;  %v2062_v6 = vadd.f32 %v1728_v24, %v409_v40 }
  0xe6   : > { %v741_v61 = vadd.f32 %v2015_v36, %v740_v50  ;;  %v858_v62 = vmul.f32 %v1557_v56, %v2006_v26  ;;  %1564 = vrcp.f32 %v2044_v54  ;;  %v1559_v57 = vpop.eup %1558  ;;  %vm862_vm8 = vweird.f32 %v2006_v26 }
  0xe7   : > { %1566 = vrcp.f32 %v2052_v45  ;;  %v1561_v9 = vpop.eup %1560  ;;  %vm2073_vm9 = vcmp.eq.f32.partialorder %v866_v47, 8.507059e+37  ;;  %v869_v15 = vor.u32 1.1754944e-38, %v868_v52  ;;  %v2078_v18 = vmul.f32 %v630_v60, %v1789_v7 }
  0xe8   : > { %v859_v14 = vsub.f32 1.0, %v858_v62  ;;  %v745_v19 = vsel %vm2068_vm7, %v2015_v36, %v741_v61  ;;  %v2084_v63 = vadd.f32 %v1728_v24, %v429_v38  ;;  %v2087_v20 = vadd.f32 %v1728_v24, %v449_v0 }
  0xe9   : > { %v1563_v27 = vpop.eup %1562  ;;  %vm863_vm10 = vweird.f32 %v1557_v56  ;;  %v2089_v21 = vadd.f32 1.0, %v1559_v57  ;;  %v2092_v49 = vadd.f32 %v1728_v24, %v391_v59  ;;  %v988_v7 = vand.u32 2147483648, %v2044_v54 }
  0xea   : > { %v860_v16 = vmul.f32 %v1557_v56, %v859_v14  ;;  %v2095_v22 = vadd.f32 1.0, %v1561_v9  ;;  %1568 = vpow2.f32 %v1328_v5  ;;  %v1336_v23 = vmul.f32 -1.442695, %v2062_v6  ;;  %vm864_vm11 = vmor %vm862_vm8, %vm863_vm10 }
  0xeb   : > { %v750_v3 = vsel %vm2048_vm6, %v749_v4, %v745_v19  ;;  %v641_v31 = vand.u32 2147483647, %v2052_v45  ;;  %1570 = vrcp.f32 %v2089_v21  ;;  %v643_v12 = vand.u32 2147483648, %v2052_v45 }
  0xec   : > { %v2098_v34 = vpop.eup %1564  ;;  %v861_v55 = vadd.f32 %v1557_v56, %v860_v16  ;;  %1572 = vrcp.f32 %v2095_v22  ;;  %v2110_v29 = vadd.f32 1.0, %v1563_v27  ;;  %v986_v25 = vand.u32 2147483647, %v2044_v54 }
  0xed   : > { %v1567_v32 = vpop.eup %1566  ;;  %v978_v36 = vmul.f32 %v2098_v34, %v2044_v54  ;;  %v2115_v40 = vadd.f32 %v1728_v24, %v411_v28  ;;  %vm637_vm12 = vweird.f32 %v2052_v45  ;;  %v761_v26 = vand.u32 2147483647, %v2089_v21 }
  0xee   : > { %v865_v51 = vsel %vm864_vm11, %v1557_v56, %v861_v55  ;;  %v633_v39 = vmul.f32 %v1567_v32, %v2052_v45  ;;  %v763_v30 = vand.u32 2147483648, %v2089_v21  ;;  %v2121_v33 = vmul.f32 %v750_v3, %v1792_v8 }
  0xef   : > { %v979_v41 = vsub.f32 1.0, %v978_v36  ;;  %v870_v42 = vsel %vm2073_vm9, %v869_v15, %v865_v51  ;;  %vm982_vm13 = vweird.f32 %v2044_v54  ;;  %v2126_v13 = vor.u32 1.1754944e-38, %v988_v7 }
  0xf0   : > { %v634_v43 = vsub.f32 1.0, %v633_v39  ;;  %v1569_v44 = vpop.eup %1568  ;;  %vm2128_vm14 = vcmp.eq.f32.partialorder %v641_v31, 8.507059e+37  ;;  %v644_v48 = vor.u32 1.1754944e-38, %v643_v12  ;;  %vm757_vm15 = vweird.f32 %v2089_v21 }
  0xf1   : > { %1574 = vrcp.f32 %v2110_v29  ;;  %v1571_v8 = vpop.eup %1570  ;;  %v980_v50 = vmul.f32 %v2098_v34, %v979_v41  ;;  %vm983_vm0 = vweird.f32 %v2098_v34  ;;  %vm638_vm1 = vweird.f32 %v1567_v32 }
  0xf2   : > { %v635_v52 = vmul.f32 %v1567_v32, %v634_v43  ;;  %v1573_v56 = vpop.eup %1572  ;;  %v2137_v58 = vmul.f32 %v870_v42, %v1851_v46  ;;  %v753_v60 = vmul.f32 %v1571_v8, %v2089_v21  ;;  %vm2140_vm2 = vcmp.eq.f32.partialorder %v761_v26, 8.507059e+37  ;;  %vm639_vm4 = vmor %vm637_vm12, %vm638_vm1 }
  0xf3   : > { %v764_v62 = vor.u32 1.1754944e-38, %v763_v30  ;;  %vm877_vm3 = vweird.f32 %v2095_v22  ;;  %v873_v0 = vmul.f32 %v1573_v56, %v2095_v22  ;;  %v881_v57 = vand.u32 2147483647, %v2095_v22  ;;  %vm2168_vm8 = vmor %vm982_vm13, %vm983_vm0 }
  0xf4   : > { %v636_v38 = vadd.f32 %v1567_v32, %v635_v52  ;;  %v883_v4 = vand.u32 2147483648, %v2095_v22  ;;  %v754_v46 = vsub.f32 1.0, %v753_v60  ;;  %v1001_v5 = vand.u32 2147483647, %v2110_v29 }
  0xf5   : > { %v2151_v59 = vadd.f32 1.0, %v1569_v44  ;;  %1576 = vpow2.f32 %v1336_v23  ;;  %v981_v9 = vadd.f32 %v2098_v34, %v980_v50  ;;  %vm2154_vm5 = vcmp.eq.f32.partialorder %v986_v25, 8.507059e+37 }
  0xf6   : > { %v640_v14 = vsel %vm639_vm4, %v1567_v32, %v636_v38  ;;  %v874_v53 = vsub.f32 1.0, %v873_v0  ;;  %v1344_v15 = vmul.f32 -1.442695, %v2084_v63  ;;  %v755_v27 = vmul.f32 %v1571_v8, %v754_v46 }
  0xf7   : > { %v1575_v19 = vpop.eup %1574  ;;  %v645_v45 = vsel %vm2128_vm14, %v644_v48, %v640_v14  ;;  %vm758_vm6 = vweird.f32 %v1571_v8  ;;  %1578 = vrcp.f32 %v2151_v59  ;;  %vm878_vm7 = vweird.f32 %v1573_v56 }
  0xf8   : > { %v1070_v16 = vmul.f32 %v645_v45, %v1980_v2  ;;  %v875_v7 = vmul.f32 %v1573_v56, %v874_v53  ;;  %v993_v23 = vmul.f32 %v1575_v19, %v2110_v29  ;;  %v756_v3 = vadd.f32 %v1571_v8, %v755_v27  ;;  %vm759_vm10 = vmor %vm757_vm15, %vm758_vm6 }
  0xf9   : > { %vm2172_vm9 = vcmp.eq.f32.partialorder %v881_v57, 8.507059e+37  ;;  %v884_v31 = vor.u32 1.1754944e-38, %v883_v4  ;;  %v1003_v2 = vand.u32 2147483648, %v2110_v29  ;;  %1580 = vpow2.f32 %v1344_v15  ;;  %vm879_vm11 = vmor %vm877_vm3, %vm878_vm7 }
  0xfa   : > { %v1390_v32 = vpack.c.bf16 %v1070_v16, %v2078_v18  ;;  %v876_v36 = vadd.f32 %v1573_v56, %v875_v7  ;;  %v994_v54 = vsub.f32 1.0, %v993_v23  ;;  %v985_v51 = vsel %vm2168_vm8, %v2098_v34, %v981_v9 }
  0xfb   : > { %v1577_v12 = vpop.eup %1576  ;;  %v760_v25 = vsel %vm759_vm10, %v1571_v8, %v756_v3  ;;  %vm998_vm12 = vweird.f32 %v1575_v19  ;;  %v1352_v39 = vmul.f32 -1.442695, %v2087_v20  ;;  %v1329_v22 = vmul.f32 -1.442695, %v2092_v49 }
  0xfc   : > { %1462 = vst [vmem:[%s1950_s13 + $0x8] sm:$0xff] %v1390_v32   ;;  %v765_v18 = vsel %vm2140_vm2, %v764_v62, %v760_v25  ;;  %v880_v21 = vsel %vm879_vm11, %v1573_v56, %v876_v36  ;;  %v995_v41 = vmul.f32 %v1575_v19, %v994_v54  ;;  %v2190_v26 = vadd.f32 1.0, %v1577_v12  ;;  %v431_v62 = vpop.f32.mrf.mxu2  ;;  %v414_v12 = vpop.f32.mrf.mxu1 }
  0xfd   : > { %v2192_v30 = vpop.eup %1578  ;;  %v1078_v34 = vmul.f32 %v765_v18, %v1989_v11  ;;  %v885_v42 = vsel %vm2172_vm9, %v884_v31, %v880_v21  ;;  %1582 = vpow2.f32 %v1352_v39  ;;  %vm997_vm13 = vweird.f32 %v2110_v29 }
  0xfe   : > { %v1086_v43 = vmul.f32 %v885_v42, %v1993_v17  ;;  %v996_v44 = vadd.f32 %v1575_v19, %v995_v41  ;;  %v648_v47 = vmul.f32 %v2192_v30, %v2151_v59  ;;  %v990_v11 = vsel %vm2154_vm5, %v2126_v13, %v985_v51  ;;  %vm999_vm14 = vmor %vm997_vm13, %vm998_vm12 }
  0xff   : > { %v1410_v48 = vpack.c.bf16 %v1078_v34, %v2121_v33  ;;  %v1004_v8 = vor.u32 1.1754944e-38, %v1003_v2  ;;  %1584 = vrcp.f32 %v2190_v26  ;;  %v1581_v50 = vpop.eup %1580  ;;  %vm1002_vm15 = vcmp.eq.f32.partialorder %v1001_v5, 8.507059e+37 }
 0x100   : > { %v1430_v17 = vpack.c.bf16 %v1086_v43, %v2137_v58  ;;  %v1000_v52 = vsel %vm999_vm14, %v1575_v19, %v996_v44  ;;  %v649_v29 = vsub.f32 1.0, %v648_v47  ;;  %v2210_v60 = vadd.f32 1.0, %v1581_v50 }
 0x101   : > { %1466 = vst [vmem:[%s1950_s13 + $0x28] sm:$0xff] %v1410_v48   ;;  %v1005_v56 = vsel %vm1002_vm15, %v1004_v8, %v1000_v52  ;;  %1586 = vpow2.f32 %v1329_v22  ;;  %v1093_v13 = vmul.f32 %v990_v11, %v1977_v1  ;;  %v1337_v61 = vmul.f32 -1.442695, %v2115_v40  ;;  %v451_v1 = vpop.f32.mrf.mxu3 }
 0x102   : > { %1470 = vst [vmem:[%s1950_s13 + $0x48] sm:$0xff] %v1430_v17   ;;  %v1094_v33 = vmul.f32 %v1005_v56, %v2013_v35  ;;  %v650_v58 = vmul.f32 %v2192_v30, %v649_v29  ;;  %v2223_v46 = vadd.f32 %v1728_v24, %v431_v62  ;;  %vm652_vm0 = vweird.f32 %v2151_v59 }
 0x103   : > { %v1583_v38 = vpop.eup %1582  ;;  %1588 = vpow2.f32 %v1337_v61  ;;  %vm653_vm1 = vweird.f32 %v2192_v30  ;;  %v2235_v19 = vadd.f32 %v1728_v24, %v451_v1  ;;  %v656_v45 = vand.u32 2147483647, %v2151_v59 }
 0x104   : > { %v1450_v0 = vpack.c.bf16 %v1094_v33, %v1093_v13  ;;  %1590 = vrcp.f32 %v2210_v60  ;;  %v2220_v4 = vadd.f32 1.0, %v1583_v38  ;;  %v651_v9 = vadd.f32 %v2192_v30, %v650_v58  ;;  %vm2249_vm2 = vmor %vm652_vm0, %vm653_vm1 }
 0x105   : > { %v2217_v57 = vpop.eup %1584  ;;  %v1345_v15 = vmul.f32 -1.442695, %v2223_v46  ;;  %v658_v27 = vand.u32 2147483648, %v2151_v59  ;;  %v776_v7 = vand.u32 2147483647, %v2190_v26  ;;  %v2243_v23 = vadd.f32 %v1728_v24, %v394_v10 }
 0x106   : > { %1474 = vst [vmem:[%s1950_s13 + $0x68] sm:$0xff] %v1450_v0   ;;  %v768_v35 = vmul.f32 %v2217_v57, %v2190_v26  ;;  %1592 = vrcp.f32 %v2220_v4  ;;  %v778_v55 = vand.u32 2147483648, %v2190_v26  ;;  %v655_v2 = vsel %vm2249_vm2, %v2192_v30, %v651_v9  ;;  %v434_v0 = vpop.f32.mrf.mxu2 }
 0x107   : > { %v1587_v5 = vpop.eup %1586  ;;  %v1353_v36 = vmul.f32 -1.442695, %v2235_v19  ;;  %vm657_vm3 = vcmp.eq.f32.partialorder %v656_v45, 8.507059e+37  ;;  %v659_v54 = vor.u32 1.1754944e-38, %v658_v27  ;;  %vm772_vm4 = vweird.f32 %v2190_v26 }
 0x108   : > { %v769_v14 = vsub.f32 1.0, %v768_v35  ;;  %v2231_v53 = vadd.f32 1.0, %v1587_v5  ;;  %v898_v59 = vand.u32 2147483648, %v2210_v60  ;;  %vm2263_vm5 = vcmp.eq.f32.partialorder %v776_v7, 8.507059e+37 }
 0x109   : > { %v1589_v16 = vpop.eup %1588  ;;  %v1330_v39 = vmul.f32 -1.442695, %v2243_v23  ;;  %v660_v21 = vsel %vm657_vm3, %v659_v54, %v655_v2  ;;  %vm773_vm6 = vweird.f32 %v2217_v57  ;;  %v779_v41 = vor.u32 1.1754944e-38, %v778_v55  ;;  %v454_v1 = vpop.f32.mrf.mxu3 }
 0x10a   : > { %1594 = vrcp.f32 %v2231_v53  ;;  %v2245_v28 = vpop.eup %1590  ;;  %v2254_v31 = vadd.f32 1.0, %v1589_v16  ;;  %v770_v32 = vmul.f32 %v2217_v57, %v769_v14  ;;  %v896_v30 = vand.u32 2147483647, %v2210_v60  ;;  %vm2295_vm7 = vmor %vm772_vm4, %vm773_vm6 }
 0x10b   : > { %1596 = vpow2.f32 %v1345_v15  ;;  %v888_v25 = vmul.f32 %v2245_v28, %v2210_v60  ;;  %v671_v22 = vand.u32 2147483647, %v2231_v53  ;;  %v2278_v43 = vadd.f32 %v1728_v24, %v414_v12 }
 0x10c   : > { %1598 = vrcp.f32 %v2254_v31  ;;  %v2271_v18 = vpop.eup %1592  ;;  %v771_v42 = vadd.f32 %v2217_v57, %v770_v32  ;;  %v2280_v44 = vor.u32 1.1754944e-38, %v898_v59  ;;  %v1016_v47 = vand.u32 2147483647, %v2220_v4 }
 0x10d   : > { %1600 = vpow2.f32 %v1353_v36  ;;  %v673_v48 = vand.u32 2147483648, %v2231_v53  ;;  %v889_v50 = vsub.f32 1.0, %v888_v25  ;;  %v1008_v17 = vmul.f32 %v2271_v18, %v2220_v4 }
 0x10e   : > { %1602 = vpow2.f32 %v1330_v39  ;;  %v1338_v52 = vmul.f32 -1.442695, %v2278_v43  ;;  %v2289_v29 = vmul.f32 %v660_v21, %v2040_v37  ;;  %v1018_v13 = vand.u32 2147483648, %v2220_v4 }
 0x10f   : > { %v775_v38 = vsel %vm2295_vm7, %v2217_v57, %v771_v42  ;;  %vm892_vm8 = vweird.f32 %v2210_v60  ;;  %vm893_vm9 = vweird.f32 %v2245_v28  ;;  %vm667_vm10 = vweird.f32 %v2231_v53 }
 0x110   : > { %v1595_v34 = vpop.eup %1594  ;;  %vm2308_vm11 = vcmp.eq.f32.partialorder %v671_v22, 8.507059e+37  ;;  %1604 = vpow2.f32 %v1338_v52  ;;  %v890_v57 = vmul.f32 %v2245_v28, %v889_v50  ;;  %v1009_v5 = vsub.f32 1.0, %v1008_v17  ;;  %v396_v22 = vpop.f32.mrf.mxu0 }
 0x111   : > { %v663_v11 = vmul.f32 %v1595_v34, %v2231_v53  ;;  %v1597_v8 = vpop.eup %1596  ;;  %vm668_vm12 = vweird.f32 %v1595_v34  ;;  %vm1013_vm13 = vweird.f32 %v2271_v18  ;;  %v674_v9 = vor.u32 1.1754944e-38, %v673_v48 }
 0x112   : > { %v2300_v61 = vadd.f32 1.0, %v1597_v8  ;;  %v1599_v62 = vpop.eup %1598  ;;  %v780_v10 = vsel %vm2263_vm5, %v779_v41, %v775_v38  ;;  %v791_v45 = vand.u32 2147483647, %v2254_v31  ;;  %vm1012_vm14 = vweird.f32 %v2220_v4  ;;  %vm669_vm15 = vmor %vm667_vm10, %vm668_vm12 }
 0x113   : > { %v664_v33 = vsub.f32 1.0, %v663_v11  ;;  %v783_v58 = vmul.f32 %v1599_v62, %v2254_v31  ;;  %v1601_v35 = vpop.eup %1600  ;;  %v793_v16 = vand.u32 2147483648, %v2254_v31  ;;  %v2327_v3 = vadd.f32 %v1728_v24, %v434_v0  ;;  %vm2352_vm5 = vmor %vm892_vm8, %vm893_vm9  ;;  %v416_v11 = vpop.f32.mrf.mxu1 }
 0x114   : > { %1606 = vrcp.f32 %v2300_v61  ;;  %v1603_v27 = vpop.eup %1602  ;;  %v2324_v7 = vadd.f32 1.0, %v1601_v35  ;;  %v2330_v55 = vadd.f32 %v1728_v24, %v454_v1  ;;  %vm2332_vm0 = vcmp.eq.f32.partialorder %v896_v30, 8.507059e+37  ;;  %vm2386_vm8 = vmor %vm1012_vm14, %vm1013_vm13 }
 0x115   : > { %v665_v26 = vmul.f32 %v1595_v34, %v664_v33  ;;  %v784_v15 = vsub.f32 1.0, %v783_v58  ;;  %vm788_vm1 = vweird.f32 %v1599_v62  ;;  %v2336_v54 = vadd.f32 1.0, %v1603_v27 }
 0x116   : > { %v891_v53 = vadd.f32 %v2245_v28, %v890_v57  ;;  %v1010_v59 = vmul.f32 %v2271_v18, %v1009_v5  ;;  %1608 = vrcp.f32 %v2324_v7  ;;  %v1605_v24 = vpop.eup %1604  ;;  %v1079_v51 = vmul.f32 %v780_v10, %v2062_v6 }
 0x117   : > { %v666_v14 = vadd.f32 %v1595_v34, %v665_v26  ;;  %v785_v36 = vmul.f32 %v1599_v62, %v784_v15  ;;  %vm787_vm2 = vweird.f32 %v2254_v31  ;;  %vm792_vm4 = vcmp.eq.f32.partialorder %v791_v45, 8.507059e+37 }
 0x118   : > { %vm789_vm3 = vmor %vm787_vm2, %vm788_vm1  ;;  %v794_v41 = vor.u32 1.1754944e-38, %v793_v16  ;;  %1610 = vrcp.f32 %v2336_v54  ;;  %v1346_v30 = vmul.f32 -1.442695, %v2327_v3  ;;  %v1354_v42 = vmul.f32 -1.442695, %v2330_v55 }
 0x119   : > { %v670_v32 = vsel %vm669_vm15, %v1595_v34, %v666_v14  ;;  %v786_v39 = vadd.f32 %v1599_v62, %v785_v36  ;;  %v895_v48 = vsel %vm2352_vm5, %v2245_v28, %v891_v53  ;;  %v1011_v8 = vadd.f32 %v2271_v18, %v1010_v59 }
 0x11a   : > { %v675_v12 = vsel %vm2308_vm11, %v674_v9, %v670_v32  ;;  %v1607_v21 = vpop.eup %1606  ;;  %v911_v50 = vand.u32 2147483647, %v2300_v61  ;;  %vm2366_vm6 = vcmp.eq.f32.partialorder %v1016_v47, 8.507059e+37  ;;  %v913_v56 = vand.u32 2147483648, %v2300_v61 }
 0x11b   : > { %v1072_v25 = vmul.f32 %v675_v12, %v2092_v49  ;;  %v790_v31 = vsel %vm789_vm3, %v1599_v62, %v786_v39  ;;  %v903_v34 = vmul.f32 %v1607_v21, %v2300_v61  ;;  %v2373_v33 = vadd.f32 1.0, %v1605_v24  ;;  %v1638_v62 = vld [vmem:[%s2556_s2] ss:$0 sm:$0xff]  ;;  %v436_v39 = vpop.f32.mrf.mxu2 }
 0x11c   : > { %v795_v60 = vsel %vm792_vm4, %v794_v41, %v790_v31  ;;  %v1609_v28 = vpop.eup %1608  ;;  %vm908_vm7 = vweird.f32 %v1607_v21  ;;  %1612 = vpow2.f32 %v1346_v30  ;;  %v2378_v47 = vadd.f32 %v1638_v62, %v396_v22 }
 0x11d   : > { %v1395_v49 = vpack.c.bf16 %v1072_v25, %v2289_v29  ;;  %v1080_v52 = vmul.f32 %v795_v60, %v2115_v40  ;;  %v904_v29 = vsub.f32 1.0, %v903_v34  ;;  %v2380_v38 = vadd.f32 %v1638_v62, %v416_v11 }
 0x11e   : > { %v1023_v58 = vmul.f32 %v1609_v28, %v2324_v7  ;;  %1614 = vpow2.f32 %v1354_v42  ;;  %v2391_v0 = vpop.eup %1610  ;;  %v900_v1 = vsel %vm2332_vm0, %v2280_v44, %v895_v48  ;;  %v1015_v35 = vsel %vm2386_vm8, %v2271_v18, %v1011_v8 }
 0x11f   : > { %1463 = vst [vmem:[%s1950_s13 + $0x10] sm:$0xff] %v1395_v49   ;;  %v1415_v37 = vpack.c.bf16 %v1080_v52, %v1079_v51  ;;  %v905_v26 = vmul.f32 %v1607_v21, %v904_v29  ;;  %vm907_vm9 = vweird.f32 %v2300_v61  ;;  %1616 = vrcp.f32 %v2373_v33 }
 0x120   : > { %vm912_vm10 = vcmp.eq.f32.partialorder %v911_v50, 8.507059e+37  ;;  %v1024_v5 = vsub.f32 1.0, %v1023_v58  ;;  %v1031_v9 = vand.u32 2147483647, %v2324_v7  ;;  %vm909_vm11 = vmor %vm907_vm9, %vm908_vm7  ;;  %v914_v10 = vor.u32 1.1754944e-38, %v913_v56 }
 0x121   : > { %1467 = vst [vmem:[%s1950_s13 + $0x30] sm:$0xff] %v1415_v37   ;;  %v906_v57 = vadd.f32 %v1607_v21, %v905_v26  ;;  %v1033_v14 = vand.u32 2147483648, %v2324_v7  ;;  %v1331_v44 = vmul.f32 -1.442695, %v2378_v47  ;;  %v1339_v15 = vmul.f32 -1.442695, %v2380_v38 }
 0x122   : > { %v1025_v45 = vmul.f32 %v1609_v28, %v1024_v5  ;;  %vm1028_vm12 = vweird.f32 %v1609_v28  ;;  %v678_v61 = vmul.f32 %v2391_v0, %v2336_v54  ;;  %v1613_v27 = vpop.eup %1612  ;;  %v1087_v16 = vmul.f32 %v900_v1, %v2084_v63 }
 0x123   : > { %v910_v18 = vsel %vm909_vm11, %v1607_v21, %v906_v57  ;;  %v1019_v2 = vor.u32 1.1754944e-38, %v1018_v13  ;;  %1618 = vpow2.f32 %v1331_v44  ;;  %vm1027_vm13 = vweird.f32 %v2324_v7 }
 0x124   : > { %v915_v32 = vsel %vm912_vm10, %v914_v10, %v910_v18  ;;  %v1615_v36 = vpop.eup %1614  ;;  %v1026_v59 = vadd.f32 %v1609_v28, %v1025_v45  ;;  %1620 = vpow2.f32 %v1339_v15  ;;  %vm1029_vm14 = vmor %vm1027_vm13, %vm1028_vm12  ;;  %vm1032_vm15 = vcmp.eq.f32.partialorder %v1031_v9, 8.507059e+37 }
 0x125   : > { %v1088_v53 = vmul.f32 %v915_v32, %v2223_v46  ;;  %v2414_v12 = vpop.eup %1616  ;;  %v1020_v24 = vsel %vm2366_vm6, %v1019_v2, %v1015_v35  ;;  %v1034_v63 = vor.u32 1.1754944e-38, %v1033_v14  ;;  %v679_v51 = vsub.f32 1.0, %v678_v61  ;;  %v456_v46 = vpop.f32.mrf.mxu3 }
 0x126   : > { %v1030_v13 = vsel %vm1029_vm14, %v1609_v28, %v1026_v59  ;;  %v2418_v25 = vadd.f32 1.0, %v1613_v27  ;;  %v798_v7 = vmul.f32 %v2414_v12, %v2373_v33  ;;  %v1095_v41 = vmul.f32 %v1020_v24, %v2087_v20 }
 0x127   : > { %v1435_v4 = vpack.c.bf16 %v1088_v53, %v1087_v16  ;;  %v1035_v21 = vsel %vm1032_vm15, %v1034_v63, %v1030_v13  ;;  %v2425_v6 = vadd.f32 1.0, %v1615_v36  ;;  %v2427_v31 = vadd.f32 %v1638_v62, %v436_v39 }
 0x128   : > { %v1096_v30 = vmul.f32 %v1035_v21, %v2235_v19  ;;  %v2429_v34 = vadd.f32 %v1638_v62, %v456_v46  ;;  %v680_v11 = vmul.f32 %v2391_v0, %v679_v51  ;;  %1622 = vrcp.f32 %v2418_v25 }
 0x129   : > { %1471 = vst [vmem:[%s1950_s13 + $0x50] sm:$0xff] %v1435_v4   ;;  %v1619_v49 = vpop.eup %1618  ;;  %v799_v8 = vsub.f32 1.0, %v798_v7  ;;  %1624 = vrcp.f32 %v2425_v6  ;;  %vm682_vm0 = vweird.f32 %v2336_v54  ;;  %v688_v19 = vand.u32 2147483648, %v2336_v54 }
 0x12a   : > { %v1621_v42 = vpop.eup %1620  ;;  %v1455_v22 = vpack.c.bf16 %v1096_v30, %v1095_v41  ;;  %v2433_v48 = vadd.f32 1.0, %v1619_v49  ;;  %v1347_v60 = vmul.f32 -1.442695, %v2427_v31  ;;  %v681_v50 = vadd.f32 %v2391_v0, %v680_v11 }
 0x12b   : > { %v2435_v20 = vadd.f32 1.0, %v1621_v42  ;;  %vm683_vm1 = vweird.f32 %v2391_v0  ;;  %v1355_v17 = vmul.f32 -1.442695, %v2429_v34  ;;  %v800_v52 = vmul.f32 %v2414_v12, %v799_v8 }
 0x12c   : > { %1475 = vst [vmem:[%s1950_s13 + $0x70] sm:$0xff] %v1455_v22   ;;  %1626 = vrcp.f32 %v2433_v48  ;;  %v686_v56 = vand.u32 2147483647, %v2336_v54  ;;  %vm2451_vm2 = vmor %vm682_vm0, %vm683_vm1  ;;  %v806_v62 = vand.u32 2147483647, %v2373_v33  ;;  %v808_v40 = vand.u32 2147483648, %v2373_v33 }
 0x12d   : > { %1628 = vrcp.f32 %v2435_v20  ;;  %v685_v26 = vsel %vm2451_vm2, %v2391_v0, %v681_v50  ;;  %v689_v58 = vor.u32 1.1754944e-38, %v688_v19  ;;  %v801_v54 = vadd.f32 %v2414_v12, %v800_v52 }
 0x12e   : > { %v2448_v29 = vpop.eup %1622  ;;  %1630 = vpow2.f32 %v1347_v60  ;;  %vm802_vm3 = vweird.f32 %v2373_v33  ;;  %vm803_vm4 = vweird.f32 %v2414_v12  ;;  %vm687_vm5 = vcmp.eq.f32.partialorder %v686_v56, 8.507059e+37 }
 0x12f   : > { %v2457_v37 = vpop.eup %1624  ;;  %1632 = vpow2.f32 %v1355_v17  ;;  %v918_v35 = vmul.f32 %v2448_v29, %v2418_v25  ;;  %v690_v9 = vsel %vm687_vm5, %v689_v58, %v685_v26  ;;  %vm2468_vm6 = vcmp.eq.f32.partialorder %v806_v62, 8.507059e+37  ;;  %vm2473_vm7 = vmor %vm802_vm3, %vm803_vm4 }
 0x130   : > { %v809_v0 = vor.u32 1.1754944e-38, %v808_v40  ;;  %v1038_v33 = vmul.f32 %v2457_v37, %v2425_v6  ;;  %vm697_vm8 = vweird.f32 %v2433_v48  ;;  %v701_v18 = vand.u32 2147483647, %v2433_v48 }
 0x131   : > { %v805_v61 = vsel %vm2473_vm7, %v2414_v12, %v801_v54  ;;  %v919_v27 = vsub.f32 1.0, %v918_v35  ;;  %v703_v16 = vand.u32 2147483648, %v2433_v48  ;;  %v823_v53 = vand.u32 2147483648, %v2435_v20 }
 0x132   : > { %v1627_v1 = vpop.eup %1626  ;;  %v821_v63 = vand.u32 2147483647, %v2435_v20  ;;  %v1039_v13 = vsub.f32 1.0, %v1038_v33  ;;  %vm817_vm11 = vweird.f32 %v2435_v20  ;;  %v810_v12 = vsel %vm2468_vm6, %v809_v0, %v805_v61 }
 0x133   : > { %v1629_v57 = vpop.eup %1628  ;;  %v693_v5 = vmul.f32 %v1627_v1, %v2433_v48  ;;  %vm698_vm9 = vweird.f32 %v1627_v1  ;;  %v704_v39 = vor.u32 1.1754944e-38, %v703_v16  ;;  %v920_v21 = vmul.f32 %v2448_v29, %v919_v27 }
 0x134   : > { %v813_v14 = vmul.f32 %v1629_v57, %v2435_v20  ;;  %v1631_v45 = vpop.eup %1630  ;;  %vm818_vm10 = vweird.f32 %v1629_v57  ;;  %vm699_vm12 = vmor %vm697_vm8, %vm698_vm9  ;;  %vm702_vm13 = vcmp.eq.f32.partialorder %v701_v18, 8.507059e+37  ;;  %v824_v41 = vor.u32 1.1754944e-38, %v823_v53 }
 0x135   : > { %v694_v15 = vsub.f32 1.0, %v693_v5  ;;  %v1633_v32 = vpop.eup %1632  ;;  %v2486_v59 = vadd.f32 1.0, %v1631_v45  ;;  %vm819_vm14 = vmor %vm817_vm11, %vm818_vm10  ;;  %v926_v30 = vand.u32 2147483647, %v2418_v25  ;;  %vm822_vm15 = vcmp.eq.f32.partialorder %v821_v63, 8.507059e+37 }
 0x136   : > { %v814_v2 = vsub.f32 1.0, %v813_v14  ;;  %v2489_v4 = vadd.f32 1.0, %v1633_v32  ;;  %v1073_v22 = vmul.f32 %v690_v9, %v2243_v23  ;;  %v1040_v11 = vmul.f32 %v2457_v37, %v1039_v13 }
 0x137   : > { %v695_v36 = vmul.f32 %v1627_v1, %v694_v15  ;;  %1634 = vrcp.f32 %v2486_v59  ;;  %v1081_v20 = vmul.f32 %v810_v12, %v2278_v43  ;;  %v928_v19 = vand.u32 2147483648, %v2418_v25 }
 0x138   : > { %v815_v24 = vmul.f32 %v1629_v57, %v814_v2  ;;  %1636 = vrcp.f32 %v2489_v4  ;;  %v921_v17 = vadd.f32 %v2448_v29, %v920_v21  ;;  %vm923_vm0 = vweird.f32 %v2448_v29 }
 0x139   : > { %v696_v51 = vadd.f32 %v1627_v1, %v695_v36  ;;  %vm922_vm1 = vweird.f32 %v2418_v25  ;;  %vm2511_vm2 = vcmp.eq.f32.partialorder %v926_v30, 8.507059e+37  ;;  %v1041_v43 = vadd.f32 %v2457_v37, %v1040_v11 }
 0x13a   : > { %v816_v46 = vadd.f32 %v1629_v57, %v815_v24  ;;  %vm1043_vm3 = vweird.f32 %v2457_v37  ;;  %vm2519_vm4 = vmor %vm922_vm1, %vm923_vm0  ;;  %v929_v40 = vor.u32 1.1754944e-38, %v928_v19  ;;  %v1046_v25 = vand.u32 2147483647, %v2425_v6 }
 0x13b   : > { %v700_v7 = vsel %vm699_vm12, %v1627_v1, %v696_v51  ;;  %v1048_v26 = vand.u32 2147483648, %v2425_v6  ;;  %v925_v1 = vsel %vm2519_vm4, %v2448_v29, %v921_v17  ;;  %vm1042_vm5 = vweird.f32 %v2425_v6 }
 0x13c   : > { %v705_v49 = vsel %vm702_vm13, %v704_v39, %v700_v7  ;;  %v820_v42 = vsel %vm819_vm14, %v1629_v57, %v816_v46  ;;  %v943_v54 = vand.u32 2147483648, %v2486_v59  ;;  %vm2531_vm6 = vmor %vm1042_vm5, %vm1043_vm3  ;;  %v941_v9 = vand.u32 2147483647, %v2486_v59 }
 0x13d   : > { %v1074_v48 = vmul.f32 %v705_v49, %v2378_v47  ;;  %v825_v8 = vsel %vm822_vm15, %v824_v41, %v820_v42  ;;  %v1635_v50 = vpop.eup %1634  ;;  %v1063_v10 = vand.u32 2147483648, %v2489_v4  ;;  %v1045_v0 = vsel %vm2531_vm6, %v2457_v37, %v1041_v43 }
 0x13e   : > { %v1082_v60 = vmul.f32 %v825_v8, %v2380_v38  ;;  %v1637_v23 = vpop.eup %1636  ;;  %v933_v47 = vmul.f32 %v1635_v50, %v2486_v59  ;;  %vm938_vm7 = vweird.f32 %v1635_v50  ;;  %v1061_v6 = vand.u32 2147483647, %v2489_v4 }
 0x13f   : > { %v1400_v52 = vpack.c.bf16 %v1074_v48, %v1073_v22  ;;  %v1053_v38 = vmul.f32 %v1637_v23, %v2489_v4  ;;  %vm1058_vm8 = vweird.f32 %v1637_v23  ;;  %vm1047_vm9 = vcmp.eq.f32.partialorder %v1046_v25, 8.507059e+37 }
 0x140   : > { %v1420_v56 = vpack.c.bf16 %v1082_v60, %v1081_v20  ;;  %v934_v58 = vsub.f32 1.0, %v933_v47  ;;  %v1049_v14 = vor.u32 1.1754944e-38, %v1048_v26  ;;  %vm937_vm10 = vweird.f32 %v2486_v59 }
 0x141   : > { %1464 = vst [vmem:[%s1950_s13 + $0x18] sm:$0xff] %v1400_v52   ;;  %v1054_v35 = vsub.f32 1.0, %v1053_v38  ;;  %v930_v33 = vsel %vm2511_vm2, %v929_v40, %v925_v1  ;;  %vm939_vm11 = vmor %vm937_vm10, %vm938_vm7  ;;  %v944_v15 = vor.u32 1.1754944e-38, %v943_v54  ;;  %vm1057_vm12 = vweird.f32 %v2489_v4 }
 0x142   : > { %1468 = vst [vmem:[%s1950_s13 + $0x38] sm:$0xff] %v1420_v56   ;;  %v935_v5 = vmul.f32 %v1635_v50, %v934_v58  ;;  %v1050_v45 = vsel %vm1047_vm9, %v1049_v14, %v1045_v0  ;;  %vm942_vm13 = vcmp.eq.f32.partialorder %v941_v9, 8.507059e+37  ;;  %vm1059_vm14 = vmor %vm1057_vm12, %vm1058_vm8  ;;  %v1064_v61 = vor.u32 1.1754944e-38, %v1063_v10 }
 0x143   : > { %v1055_v29 = vmul.f32 %v1637_v23, %v1054_v35  ;;  %vm1062_vm15 = vcmp.eq.f32.partialorder %v1061_v6, 8.507059e+37  ;;  %v1089_v2 = vmul.f32 %v930_v33, %v2327_v3  ;;  %v1097_v53 = vmul.f32 %v1050_v45, %v2330_v55 }
 0x144   : > { %v936_v44 = vadd.f32 %v1635_v50, %v935_v5 }
 0x145   : > { %v1056_v18 = vadd.f32 %v1637_v23, %v1055_v29 }
 0x146   : > { %v940_v37 = vsel %vm939_vm11, %v1635_v50, %v936_v44 }
 0x147   : > { %v945_v27 = vsel %vm942_vm13, %v944_v15, %v940_v37  ;;  %v1060_v16 = vsel %vm1059_vm14, %v1637_v23, %v1056_v18 }
 0x148   : > { %v1090_v32 = vmul.f32 %v945_v27, %v2427_v31  ;;  %v1065_v36 = vsel %vm1062_vm15, %v1064_v61, %v1060_v16 }
 0x149   : > { %v1098_v59 = vmul.f32 %v1065_v36, %v2429_v34 }
 0x14a   : > { %v1440_v24 = vpack.c.bf16 %v1090_v32, %v1089_v2 }
 0x14b   : > { %v1460_v63 = vpack.c.bf16 %v1098_v59, %v1097_v53 }
 0x14c   : > { %1472 = vst [vmem:[%s1950_s13 + $0x58] sm:$0xff] %v1440_v24  }
 0x14d   : > { %1476 = vst [vmem:[%s1950_s13 + $0x78] sm:$0xff] %v1460_v63  }
 0x14e PF: > { %s13_s12 = sadd.s32 1, %s1645_s12  }
 0x14f   : > { %p10_p4 = scmp.ge.s32.totalorder %s13_s12, 4  }
 0x151   :  { %12 = sbr.rel (!%p10_p4) target bundleno = 1 (0x1), region = 62 }

// kernel: _lambda_.5
= control target key start
LH: loop header
LB: loop body
LE: loop exit
PB: predicated region body
PF: predicated region fallthrough
CT: control target
= control target key end

     0   :  { %s4622_s12 = smov 0   ;;  %s5828_s0 = inlined_call_operand.vmem [shape: bf16[512,1152], index: 0, kind: input, shape index: {}]   ;;  %s5829_s1 = inlined_call_operand.vmem [shape: bf16[1152,128], index: 1, kind: input, shape index: {}]   ;;  %s5830_s2 = inlined_call_operand.vmem [shape: f32[1,128], index: 2, kind: input, shape index: {}]   ;;  %s5831_s3 = inlined_call_operand.vmem [shape: bf16[512,128], index: 3, kind: output, shape index: {}]  }
   0x1 LB: > { %s3214_s13 = sadd.s32 4294967295, %s4600_s12   ;;  %p3218_p0 = scmp.ge.s32.totalorder %s4600_s12, 1  ;;  %s4600_s12 = sphi %s4622_s12, %s13_s12  }
   0x2   : > { %p139_p1 = scmp.lt.s32.totalorder %s4600_s12, 3 }
   0x4   : > { %p140_p2 = pnand %p3218_p0, %p139_p1 }
   0x5   : > { %s3219_s20 = sshll.u32 (!%p140_p2), %s3214_s13, 5 }
   0x6   : > { %143 = sbr.rel (%p140_p2) target bundleno = 782 (0x30e), region = 32  ;;  %p165_p3 = scmp.lt.s32.totalorder (!%p140_p2), %s3219_s20, 63 }
   0xb   : > { %v4272_v0 = vld [vmem:[%s5829_s1 + $0x38] sm:$0xff]  ;;  %v4271_v1 = vld [vmem:[%s5829_s1 + $0x30] sm:$0xff]  ;;  %v4270_v2 = vld [vmem:[%s5829_s1 + $0x28] sm:$0xff]  ;;  %s5859_s20 = smov (!%p165_p3, %s3219_s20), 63 }
   0xc   : > { %4432 = vmatpush.bf16.msra.mxu1 %v4272_v0  ;;  %4433 = vmatpush.bf16.msra.mxu2 %v4272_v0  ;;  %v4269_v3 = vld [vmem:[%s5829_s1 + $0x20] sm:$0xff]  ;;  %v4268_v4 = vld [vmem:[%s5829_s1 + $0x18] sm:$0xff]  ;;  %v4267_v5 = vld [vmem:[%s5829_s1 + $0x10] sm:$0xff]  ;;  %s4456_s27 = smul.u32 36, %s5859_s20  ;;  %s3222_s19 = sshll.u32 %s5859_s20, 2 }
   0xd   : > { %4434 = vmatpush.bf16.msra.mxu3 %v4272_v0  ;;  %1653 = vmatpush.bf16.msra.mxu0 %v4272_v0  ;;  %v4266_v6 = vld [vmem:[%s5829_s1 + $0x8] sm:$0xff]  ;;  %v4265_v7 = vld [vmem:[%s5829_s1] sm:$0xff]  ;;  %v4288_v16 = vld [vmem:[%s5829_s1 + $0xb8] sm:$0xff]  ;;  %s5374_s22 = scalar_lea.vmem %s5831_s3, %s3222_s19 }
   0xe   : > { %s4657_s5 = scalar_lea.vmem %s5828_s0, %s4456_s27  ;;  %v4296_v17 = vld [vmem:[%s5829_s1 + $0xf8] sm:$0xff]  ;;  %v4287_v24 = vld [vmem:[%s5829_s1 + $0xb0] sm:$0xff]  ;;  %v4286_v28 = vld [vmem:[%s5829_s1 + $0xa8] sm:$0xff] }
   0xf   : > { %v3369_v8 = vld [vmem:[%s4657_s5 + $0x120] sm:$0xf]  ;;  %v4161_v9 = vld [vmem:[%s4657_s5 + $0x140] sm:$0xf0]  ;;  %v4280_v22 = vld [vmem:[%s5829_s1 + $0x78] sm:$0xff] }
  0x10   : > { %4435 = vmatpush.bf16.msra.mxu1 %v4271_v1  ;;  %4436 = vmatpush.bf16.msra.mxu2 %v4271_v1  ;;  %v3513_v10 = vld [vmem:[%s4657_s5 + $0x240] sm:$0xf]  ;;  %v4197_v11 = vld [vmem:[%s4657_s5 + $0x260] sm:$0xf0]  ;;  %v3370_v18 = vor.u32 %v4161_v9, %v3369_v8  ;;  %v4304_v23 = vld [vmem:[%s5829_s1 + $0x138] sm:$0xff] }
  0x11   : > { %4437 = vmatpush.bf16.msra.mxu3 %v4271_v1  ;;  %1654 = vmatpush.bf16.msra.mxu0 %v4271_v1  ;;  %v3657_v12 = vld [vmem:[%s4657_s5 + $0x360] sm:$0xf]  ;;  %v4233_v13 = vld [vmem:[%s4657_s5 + $0x380] sm:$0xf0]  ;;  %v3514_v19 = vor.u32 %v4197_v11, %v3513_v10  ;;  %v4295_v25 = vld [vmem:[%s5829_s1 + $0xf0] sm:$0xff] }
  0x12   : > { %v3225_v14 = vld [vmem:[%s4657_s5] sm:$0xf]  ;;  %v4125_v15 = vld [vmem:[%s4657_s5 + $0x20] sm:$0xf0]  ;;  %v3658_v20 = vor.u32 %v4233_v13, %v3657_v12  ;;  %v4279_v26 = vld [vmem:[%s5829_s1 + $0x70] sm:$0xff] }
  0x13   : > { %v3226_v21 = vor.u32 %v4125_v15, %v3225_v14  ;;  %v4303_v27 = vld [vmem:[%s5829_s1 + $0x130] sm:$0xff]  ;;  %v4294_v29 = vld [vmem:[%s5829_s1 + $0xe8] sm:$0xff]  ;;  %v4285_v33 = vld [vmem:[%s5829_s1 + $0xa0] sm:$0xff] }
  0x14   : > { %4438 = vmatpush.bf16.msra.mxu1 %v4270_v2  ;;  %4439 = vmatpush.bf16.msra.mxu2 %v4270_v2  ;;  %v4278_v30 = vld [vmem:[%s5829_s1 + $0x68] sm:$0xff]  ;;  %v4293_v34 = vld [vmem:[%s5829_s1 + $0xe0] sm:$0xff]  ;;  %v4284_v44 = vld [vmem:[%s5829_s1 + $0x98] sm:$0xff] }
  0x15   : > { %4440 = vmatpush.bf16.msra.mxu3 %v4270_v2  ;;  %1655 = vmatpush.bf16.msra.mxu0 %v4270_v2  ;;  %v4302_v31 = vld [vmem:[%s5829_s1 + $0x128] sm:$0xff]  ;;  %v4277_v42 = vld [vmem:[%s5829_s1 + $0x60] sm:$0xff]  ;;  %v4292_v45 = vld [vmem:[%s5829_s1 + $0xd8] sm:$0xff] }
  0x16   : > { %v3405_v32 = vld [vmem:[%s4657_s5 + $0x168] sm:$0xf]  ;;  %v4170_v35 = vld [vmem:[%s4657_s5 + $0x188] sm:$0xf0]  ;;  %v4301_v43 = vld [vmem:[%s5829_s1 + $0x120] sm:$0xff] }
  0x17   : > { %v3549_v36 = vld [vmem:[%s4657_s5 + $0x288] sm:$0xf]  ;;  %v4206_v37 = vld [vmem:[%s4657_s5 + $0x2a8] sm:$0xf0]  ;;  %v3406_v46 = vor.u32 %v4170_v35, %v3405_v32  ;;  %v4276_v50 = vld [vmem:[%s5829_s1 + $0x58] sm:$0xff] }
  0x18   : > { %4441 = vmatpush.bf16.msra.mxu1 %v4269_v3  ;;  %4442 = vmatpush.bf16.msra.mxu2 %v4269_v3  ;;  %v3693_v38 = vld [vmem:[%s4657_s5 + $0x3a8] sm:$0xf]  ;;  %v4242_v39 = vld [vmem:[%s4657_s5 + $0x3c8] sm:$0xf0]  ;;  %v3550_v47 = vor.u32 %v4206_v37, %v3549_v36  ;;  %v4300_v51 = vld [vmem:[%s5829_s1 + $0x118] sm:$0xff] }
  0x19   : > { %4443 = vmatpush.bf16.msra.mxu3 %v4269_v3  ;;  %1656 = vmatpush.bf16.msra.mxu0 %v4269_v3  ;;  %v3261_v40 = vld [vmem:[%s4657_s5 + $0x48] sm:$0xf]  ;;  %v4134_v41 = vld [vmem:[%s4657_s5 + $0x68] sm:$0xf0]  ;;  %v3694_v48 = vor.u32 %v4242_v39, %v3693_v38  ;;  %v4283_v52 = vld [vmem:[%s5829_s1 + $0x90] sm:$0xff] }
  0x1a   : > { %v3262_v49 = vor.u32 %v4134_v41, %v3261_v40  ;;  %v4291_v53 = vld [vmem:[%s5829_s1 + $0xd0] sm:$0xff]  ;;  %v4282_v56 = vld [vmem:[%s5829_s1 + $0x88] sm:$0xff]  ;;  %v4281_v61 = vld [vmem:[%s5829_s1 + $0x80] sm:$0xff] }
  0x1b   : > { %v4275_v54 = vld [vmem:[%s5829_s1 + $0x50] sm:$0xff]  ;;  %v4290_v57 = vld [vmem:[%s5829_s1 + $0xc8] sm:$0xff]  ;;  %v4289_v62 = vld [vmem:[%s5829_s1 + $0xc0] sm:$0xff] }
  0x1c   : > { %4444 = vmatpush.bf16.msra.mxu1 %v4268_v4  ;;  %4445 = vmatpush.bf16.msra.mxu2 %v4268_v4  ;;  %v4299_v55 = vld [vmem:[%s5829_s1 + $0x110] sm:$0xff]  ;;  %v4274_v58 = vld [vmem:[%s5829_s1 + $0x48] sm:$0xff]  ;;  %v4320_v12 = vld [vmem:[%s5829_s1 + $0x1b8] sm:$0xff] }
  0x1d   : > { %4446 = vmatpush.bf16.msra.mxu3 %v4268_v4  ;;  %1657 = vmatpush.bf16.msra.mxu0 %v4268_v4  ;;  %v4298_v59 = vld [vmem:[%s5829_s1 + $0x108] sm:$0xff]  ;;  %v3441_v60 = vld [vmem:[%s4657_s5 + $0x1b0] sm:$0xf]  ;;  %v4179_v63 = vld [vmem:[%s4657_s5 + $0x1d0] sm:$0xf0] }
  0x1e   : > { %v3585_v0 = vld [vmem:[%s4657_s5 + $0x2d0] sm:$0xf]  ;;  %v4215_v1 = vld [vmem:[%s4657_s5 + $0x2f0] sm:$0xf0]  ;;  %v3442_v8 = vor.u32 %v4179_v63, %v3441_v60  ;;  %v4328_v13 = vld [vmem:[%s5829_s1 + $0x1f8] sm:$0xff] }
  0x1f   : > { %v3729_v2 = vld [vmem:[%s4657_s5 + $0x3f0] sm:$0xf]  ;;  %v4251_v3 = vld [vmem:[%s4657_s5 + $0x410] sm:$0xf0]  ;;  %v3586_v9 = vor.u32 %v4215_v1, %v3585_v0  ;;  %v4312_v14 = vld [vmem:[%s5829_s1 + $0x178] sm:$0xff] }
  0x20   : > { %4447 = vmatpush.bf16.msra.mxu1 %v4267_v5  ;;  %4448 = vmatpush.bf16.msra.mxu2 %v4267_v5  ;;  %v3297_v4 = vld [vmem:[%s4657_s5 + $0x90] sm:$0xf]  ;;  %v3730_v10 = vor.u32 %v4251_v3, %v3729_v2  ;;  %v4336_v15 = vld [vmem:[%s5829_s1 + $0x238] sm:$0xff]  ;;  %v4122_v32 = vld [vmem:[%s4657_s5 + $0xc] sm:$0xf] }
  0x21   : > { %4449 = vmatpush.bf16.msra.mxu3 %v4267_v5  ;;  %1658 = vmatpush.bf16.msra.mxu0 %v4267_v5  ;;  %v4143_v5 = vld [vmem:[%s4657_s5 + $0xb0] sm:$0xf0]  ;;  %v4140_v60 = vld [vmem:[%s4657_s5 + $0x9c] sm:$0xf]  ;;  %v4145_v63 = vld [vmem:[%s4657_s5 + $0xc0] sm:$0xf0] }
  0x22   : > { %v3298_v11 = vor.u32 %v4143_v5, %v3297_v4  ;;  %v4127_v35 = vld [vmem:[%s4657_s5 + $0x30] sm:$0xf0]  ;;  %v4318_v4 = vld [vmem:[%s5829_s1 + $0x1a8] sm:$0xff] }
  0x23   : > { %v4319_v40 = vld [vmem:[%s5829_s1 + $0x1b0] sm:$0xff]  ;;  %v4326_v5 = vld [vmem:[%s5829_s1 + $0x1e8] sm:$0xff] }
  0x24   : > { %4450 = vmatpush.bf16.msra.mxu1 %v4266_v6  ;;  %4451 = vmatpush.bf16.msra.mxu2 %v4266_v6  ;;  %v4327_v41 = vld [vmem:[%s5829_s1 + $0x1f0] sm:$0xff] }
  0x25   : > { %4452 = vmatpush.bf16.msra.mxu3 %v4266_v6  ;;  %1659 = vmatpush.bf16.msra.mxu0 %v4266_v6  ;;  %v4273_v6 = vld [vmem:[%s5829_s1 + $0x40] sm:$0xff] }
  0x28   : > { %4453 = vmatpush.bf16.msra.mxu1 %v4265_v7  ;;  %4454 = vmatpush.bf16.msra.mxu2 %v4265_v7 }
  0x29   : > { %4455 = vmatpush.bf16.msra.mxu3 %v4265_v7  ;;  %1660 = vmatpush.bf16.msra.mxu0 %v4265_v7  ;;  %v4297_v7 = vld [vmem:[%s5829_s1 + $0x100] sm:$0xff] }
  0x2b   : > { %1681 = vmatmul.bf16.vlgmr.msra.gmra.mxu1 %v3370_v18  ;;  %1701 = vmatmul.bf16.vlgmr.msra.gmra.mxu2 %v3514_v19  ;;  %v3621_v18 = vld [vmem:[%s4657_s5 + $0x318] sm:$0xf]  ;;  %v4224_v19 = vld [vmem:[%s4657_s5 + $0x338] sm:$0xf0] }
  0x2c   : > { %1831 = vmatpush.bf16.msrb.mxu2 %v4288_v16  ;;  %1721 = vmatmul.bf16.vlgmr.msra.gmra.mxu3 %v3658_v20  ;;  %v3477_v16 = vld [vmem:[%s4657_s5 + $0x1f8] sm:$0xf] }
  0x2d   : > { %1920 = vmatpush.bf16.msrb.mxu3 %v4296_v17  ;;  %1661 = vmatmul.bf16.vlgmr.msra.gmra.mxu0 %v3226_v21  ;;  %v4188_v17 = vld [vmem:[%s4657_s5 + $0x218] sm:$0xf0]  ;;  %v3765_v20 = vld [vmem:[%s4657_s5 + $0x438] sm:$0xf] }
  0x2e   : > { %1742 = vmatpush.bf16.msrb.mxu1 %v4280_v22  ;;  %2009 = vmatpush.bf16.msrb.mxu0 %v4304_v23  ;;  %v4260_v21 = vld [vmem:[%s4657_s5 + $0x458] sm:$0xf0]  ;;  %v3333_v22 = vld [vmem:[%s4657_s5 + $0xd8] sm:$0xf] }
  0x2f   : > { %v4152_v23 = vld [vmem:[%s4657_s5 + $0xf8] sm:$0xf0] }
  0x30   : > { %1832 = vmatpush.bf16.msrb.mxu2 %v4287_v24  ;;  %v3478_v24 = vor.u32 %v4188_v17, %v3477_v16 }
  0x31   : > { %1921 = vmatpush.bf16.msrb.mxu3 %v4295_v25  ;;  %v3622_v25 = vor.u32 %v4224_v19, %v3621_v18 }
  0x32   : > { %1743 = vmatpush.bf16.msrb.mxu1 %v4279_v26  ;;  %2010 = vmatpush.bf16.msrb.mxu0 %v4303_v27  ;;  %v3766_v26 = vor.u32 %v4260_v21, %v3765_v20  ;;  %v3334_v27 = vor.u32 %v4152_v23, %v3333_v22  ;;  %v4861_v20 = vld [vmem:[%s5830_s2] ss:$0 sm:$0xff]  ;;  %v4157_v21 = vld [vmem:[%s4657_s5 + $0x124] sm:$0xf]  ;;  %v3371_v22 = vld [vmem:[%s4657_s5 + $0x144] sm:$0xf0] }
  0x33   : > { %v3377_v23 = vld [vmem:[%s4657_s5 + $0x128] sm:$0xf] }
  0x34   : > { %1833 = vmatpush.bf16.msrb.mxu2 %v4286_v28  ;;  %v4121_v28 = vld [vmem:[%s4657_s5 + $0x4] sm:$0xf] }
  0x35   : > { %1922 = vmatpush.bf16.msrb.mxu3 %v4294_v29  ;;  %v3227_v29 = vld [vmem:[%s4657_s5 + $0x24] sm:$0xf0] }
  0x36   : > { %1744 = vmatpush.bf16.msrb.mxu1 %v4278_v30  ;;  %2011 = vmatpush.bf16.msrb.mxu0 %v4302_v31  ;;  %v3233_v30 = vld [vmem:[%s4657_s5 + $0x8] sm:$0xf]  ;;  %v4126_v31 = vld [vmem:[%s4657_s5 + $0x28] sm:$0xf0]  ;;  %v3230_v36 = vor.u32 %v4121_v28, %v3227_v29  ;;  %v4163_v28 = vld [vmem:[%s4657_s5 + $0x150] sm:$0xf0]  ;;  %v3374_v29 = vor.u32 %v4157_v21, %v3371_v22 }
  0x37   : > { %v3234_v37 = vor.u32 %v4126_v31, %v3233_v30 }
  0x38   : > { %1834 = vmatpush.bf16.msrb.mxu2 %v4285_v33  ;;  %v3235_v33 = vld [vmem:[%s4657_s5 + $0x2c] sm:$0xf0] }
  0x39   : > { %1923 = vmatpush.bf16.msrb.mxu3 %v4293_v34  ;;  %v3241_v34 = vld [vmem:[%s4657_s5 + $0x10] sm:$0xf]  ;;  %v3238_v38 = vor.u32 %v4122_v32, %v3235_v33 }
  0x3a   : > { %1745 = vmatpush.bf16.msrb.mxu1 %v4277_v42  ;;  %2012 = vmatpush.bf16.msrb.mxu0 %v4301_v43  ;;  %v3242_v39 = vor.u32 %v4127_v35, %v3241_v34  ;;  %v4311_v42 = vld [vmem:[%s5829_s1 + $0x170] sm:$0xff] }
  0x3b   : > { %1686 = vmatmul.bf16.gmra.mxu1 %v3406_v46  ;;  %1706 = vmatmul.bf16.gmra.mxu2 %v3550_v47  ;;  %v4335_v43 = vld [vmem:[%s5829_s1 + $0x230] sm:$0xff] }
  0x3c   : > { %1835 = vmatpush.bf16.msrb.mxu2 %v4284_v44  ;;  %1726 = vmatmul.bf16.gmra.mxu3 %v3694_v48  ;;  %v4130_v44 = vld [vmem:[%s4657_s5 + $0x4c] sm:$0xf]  ;;  %v3269_v46 = vld [vmem:[%s4657_s5 + $0x50] sm:$0xf]  ;;  %v4135_v47 = vld [vmem:[%s4657_s5 + $0x70] sm:$0xf0] }
  0x3d   : > { %1924 = vmatpush.bf16.msrb.mxu3 %v4292_v45  ;;  %1666 = vmatmul.bf16.gmra.mxu0 %v3262_v49  ;;  %v3263_v45 = vld [vmem:[%s4657_s5 + $0x6c] sm:$0xf0]  ;;  %v4131_v48 = vld [vmem:[%s4657_s5 + $0x54] sm:$0xf]  ;;  %v3271_v49 = vld [vmem:[%s4657_s5 + $0x74] sm:$0xf0] }
  0x3e   : > { %1746 = vmatpush.bf16.msrb.mxu1 %v4276_v50  ;;  %2013 = vmatpush.bf16.msrb.mxu0 %v4300_v51  ;;  %v3277_v50 = vld [vmem:[%s4657_s5 + $0x58] sm:$0xf]  ;;  %v4136_v51 = vld [vmem:[%s4657_s5 + $0x78] sm:$0xf0] }
  0x40   : > { %1836 = vmatpush.bf16.msrb.mxu2 %v4283_v52  ;;  %v3266_v52 = vor.u32 %v4130_v44, %v3263_v45 }
  0x41   : > { %1925 = vmatpush.bf16.msrb.mxu3 %v4291_v53  ;;  %v3270_v53 = vor.u32 %v4135_v47, %v3269_v46  ;;  %v4333_v46 = vld [vmem:[%s5829_s1 + $0x220] sm:$0xff]  ;;  %v4166_v47 = vld [vmem:[%s4657_s5 + $0x16c] sm:$0xf] }
  0x42   : > { %1747 = vmatpush.bf16.msrb.mxu1 %v4275_v54  ;;  %2014 = vmatpush.bf16.msrb.mxu0 %v4299_v55  ;;  %v3274_v54 = vor.u32 %v4131_v48, %v3271_v49  ;;  %v3278_v55 = vor.u32 %v4136_v51, %v3277_v50  ;;  %v3407_v48 = vld [vmem:[%s4657_s5 + $0x18c] sm:$0xf0]  ;;  %v4171_v50 = vld [vmem:[%s4657_s5 + $0x190] sm:$0xf0] }
  0x43   : > { %v3413_v49 = vld [vmem:[%s4657_s5 + $0x170] sm:$0xf]  ;;  %v4167_v51 = vld [vmem:[%s4657_s5 + $0x174] sm:$0xf] }
  0x44   : > { %1837 = vmatpush.bf16.msrb.mxu2 %v4282_v56  ;;  %v4139_v56 = vld [vmem:[%s4657_s5 + $0x94] sm:$0xf] }
  0x45   : > { %1926 = vmatpush.bf16.msrb.mxu3 %v4290_v57  ;;  %v3299_v57 = vld [vmem:[%s4657_s5 + $0xb4] sm:$0xf0] }
  0x46   : > { %1748 = vmatpush.bf16.msrb.mxu1 %v4274_v58  ;;  %2015 = vmatpush.bf16.msrb.mxu0 %v4298_v59  ;;  %v3305_v58 = vld [vmem:[%s4657_s5 + $0x98] sm:$0xf]  ;;  %v4144_v59 = vld [vmem:[%s4657_s5 + $0xb8] sm:$0xf0]  ;;  %v3302_v0 = vor.u32 %v4139_v56, %v3299_v57 }
  0x47   : > { %v3306_v1 = vor.u32 %v4144_v59, %v3305_v58  ;;  %v3410_v58 = vor.u32 %v4166_v47, %v3407_v48  ;;  %v3414_v59 = vor.u32 %v4171_v50, %v3413_v49  ;;  %v3479_v47 = vld [vmem:[%s4657_s5 + $0x21c] sm:$0xf0]  ;;  %v4189_v49 = vld [vmem:[%s4657_s5 + $0x220] sm:$0xf0] }
  0x48   : > { %1838 = vmatpush.bf16.msrb.mxu2 %v4281_v61  ;;  %v3307_v61 = vld [vmem:[%s4657_s5 + $0xbc] sm:$0xf0]  ;;  %v4185_v50 = vld [vmem:[%s4657_s5 + $0x204] sm:$0xf] }
  0x49   : > { %1927 = vmatpush.bf16.msrb.mxu3 %v4289_v62  ;;  %v3313_v62 = vld [vmem:[%s4657_s5 + $0xa0] sm:$0xf]  ;;  %v3310_v2 = vor.u32 %v4140_v60, %v3307_v61 }
  0x4a   : > { %1749 = vmatpush.bf16.msrb.mxu1 %v4273_v6  ;;  %2016 = vmatpush.bf16.msrb.mxu0 %v4297_v7  ;;  %v3314_v3 = vor.u32 %v4145_v63, %v3313_v62  ;;  %v4310_v6 = vld [vmem:[%s5829_s1 + $0x168] sm:$0xff]  ;;  %v3485_v48 = vld [vmem:[%s4657_s5 + $0x200] sm:$0xf] }
  0x4b   : > { %1691 = vmatmul.bf16.gmra.mxu1 %v3442_v8  ;;  %1711 = vmatmul.bf16.gmra.mxu2 %v3586_v9  ;;  %v4334_v7 = vld [vmem:[%s5829_s1 + $0x228] sm:$0xff]  ;;  %v4148_v8 = vld [vmem:[%s4657_s5 + $0xdc] sm:$0xf]  ;;  %v3335_v9 = vld [vmem:[%s4657_s5 + $0xfc] sm:$0xf0] }
  0x4c   : > { %1731 = vmatmul.bf16.gmra.mxu3 %v3730_v10  ;;  %2187 = vmatpush.bf16.msra.mxu2 %v4320_v12  ;;  %v3341_v10 = vld [vmem:[%s4657_s5 + $0xe0] sm:$0xf]  ;;  %v4149_v12 = vld [vmem:[%s4657_s5 + $0xe4] sm:$0xf]  ;;  %v3338_v16 = vor.u32 %v4148_v8, %v3335_v9  ;;  %v4175_v9 = vld [vmem:[%s4657_s5 + $0x1b4] sm:$0xf] }
  0x4d   : > { %1671 = vmatmul.bf16.gmra.mxu0 %v3298_v11  ;;  %2276 = vmatpush.bf16.msra.mxu3 %v4328_v13  ;;  %v4153_v11 = vld [vmem:[%s4657_s5 + $0x100] sm:$0xf0]  ;;  %v3343_v13 = vld [vmem:[%s4657_s5 + $0x104] sm:$0xf0] }
  0x4e   : > { %2098 = vmatpush.bf16.msra.mxu1 %v4312_v14  ;;  %2365 = vmatpush.bf16.msra.mxu0 %v4336_v15  ;;  %v3349_v14 = vld [vmem:[%s4657_s5 + $0xe8] sm:$0xf]  ;;  %v4154_v15 = vld [vmem:[%s4657_s5 + $0x108] sm:$0xf0]  ;;  %v3342_v17 = vor.u32 %v4153_v11, %v3341_v10  ;;  %v3346_v18 = vor.u32 %v4149_v12, %v3343_v13  ;;  %v3443_v10 = vld [vmem:[%s4657_s5 + $0x1d4] sm:$0xf0] }
  0x4f   : > { %v3350_v19 = vor.u32 %v4154_v15, %v3349_v14  ;;  %v3449_v11 = vld [vmem:[%s4657_s5 + $0x1b8] sm:$0xf]  ;;  %v4180_v12 = vld [vmem:[%s4657_s5 + $0x1d8] sm:$0xf0]  ;;  %v3451_v14 = vld [vmem:[%s4657_s5 + $0x1dc] sm:$0xf0]  ;;  %v3446_v21 = vor.u32 %v4175_v9, %v3443_v10 }
  0x50   : > { %2188 = vmatpush.bf16.msra.mxu2 %v4319_v40  ;;  %v4176_v13 = vld [vmem:[%s4657_s5 + $0x1bc] sm:$0xf]  ;;  %v3457_v15 = vld [vmem:[%s4657_s5 + $0x1c0] sm:$0xf]  ;;  %v3450_v22 = vor.u32 %v4180_v12, %v3449_v11 }
  0x51   : > { %2277 = vmatpush.bf16.msra.mxu3 %v4327_v41 }
  0x52   : > { %2099 = vmatpush.bf16.msra.mxu1 %v4311_v42  ;;  %2366 = vmatpush.bf16.msra.mxu0 %v4335_v43  ;;  %v4309_v43 = vld [vmem:[%s5829_s1 + $0x160] sm:$0xff] }
  0x54   : > { %2189 = vmatpush.bf16.msra.mxu2 %v4318_v4 }
  0x55   : > { %2278 = vmatpush.bf16.msra.mxu3 %v4326_v5 }
  0x56   : > { %2100 = vmatpush.bf16.msra.mxu1 %v4310_v6  ;;  %2367 = vmatpush.bf16.msra.mxu0 %v4334_v7 }
  0x5a   : > { %2101 = vmatpush.bf16.msra.mxu1 %v4309_v43  ;;  %2368 = vmatpush.bf16.msra.mxu0 %v4333_v46  ;;  %v4332_v43 = vld [vmem:[%s5829_s1 + $0x218] sm:$0xff] }
  0x5b   : > { %1696 = vmatmul.bf16.gmra.mxu1 %v3478_v24  ;;  %1716 = vmatmul.bf16.gmra.mxu2 %v3622_v25  ;;  %v4162_v24 = vld [vmem:[%s4657_s5 + $0x148] sm:$0xf0]  ;;  %v4184_v46 = vld [vmem:[%s4657_s5 + $0x1fc] sm:$0xf] }
  0x5c   : > { %1736 = vmatmul.bf16.gmra.mxu3 %v3766_v26  ;;  %v4158_v25 = vld [vmem:[%s4657_s5 + $0x12c] sm:$0xf]  ;;  %v3379_v26 = vld [vmem:[%s4657_s5 + $0x14c] sm:$0xf0]  ;;  %v3378_v30 = vor.u32 %v4162_v24, %v3377_v23 }
  0x5d   : > { %1676 = vmatmul.bf16.gmra.mxu0 %v3334_v27  ;;  %v3385_v27 = vld [vmem:[%s4657_s5 + $0x130] sm:$0xf]  ;;  %v3382_v32 = vor.u32 %v4158_v25, %v3379_v26  ;;  %v3454_v25 = vor.u32 %v4176_v13, %v3451_v14 }
  0x5e   : > { %v3386_v33 = vor.u32 %v4163_v28, %v3385_v27  ;;  %2369 = vmatpush.bf16.msra.mxu0 %v4332_v43 }
  0x6b   : > { %1750 = vmatmul.bf16.vlgmr.msrb.gmra.mxu1 %v3230_v36  ;;  %1839 = vmatmul.bf16.vlgmr.msrb.gmra.mxu2 %v3234_v37  ;;  %v4317_v36 = vld [vmem:[%s5829_s1 + $0x1a0] sm:$0xff] }
  0x6c   : > { %1928 = vmatmul.bf16.vlgmr.msrb.gmra.mxu3 %v3238_v38  ;;  %v4325_v37 = vld [vmem:[%s5829_s1 + $0x1e0] sm:$0xff]  ;;  %2190 = vmatpush.bf16.msra.mxu2 %v4317_v36 }
  0x6d   : > { %2017 = vmatmul.bf16.vlgmr.msrb.gmra.mxu0 %v3242_v39  ;;  %2279 = vmatpush.bf16.msra.mxu3 %v4325_v37 }
  0x7b   : > { %1755 = vmatmul.bf16.gmra.mxu1 %v3266_v52  ;;  %1844 = vmatmul.bf16.gmra.mxu2 %v3270_v53  ;;  %v3415_v52 = vld [vmem:[%s4657_s5 + $0x194] sm:$0xf0] }
  0x7c   : > { %1933 = vmatmul.bf16.gmra.mxu3 %v3274_v54  ;;  %v3421_v53 = vld [vmem:[%s4657_s5 + $0x178] sm:$0xf]  ;;  %v4172_v54 = vld [vmem:[%s4657_s5 + $0x198] sm:$0xf0]  ;;  %v3418_v62 = vor.u32 %v4167_v51, %v3415_v52  ;;  %v3487_v51 = vld [vmem:[%s4657_s5 + $0x224] sm:$0xf0] }
  0x7d   : > { %2022 = vmatmul.bf16.gmra.mxu0 %v3278_v55  ;;  %v3422_v63 = vor.u32 %v4172_v54, %v3421_v53  ;;  %v3493_v52 = vld [vmem:[%s4657_s5 + $0x208] sm:$0xf]  ;;  %v4190_v53 = vld [vmem:[%s4657_s5 + $0x228] sm:$0xf0] }
  0x8b   : > { %1760 = vmatmul.bf16.gmra.mxu1 %v3302_v0  ;;  %1849 = vmatmul.bf16.gmra.mxu2 %v3306_v1 }
  0x8c   : > { %1938 = vmatmul.bf16.gmra.mxu3 %v3310_v2 }
  0x8d   : > { %2027 = vmatmul.bf16.gmra.mxu0 %v3314_v3 }
  0x9b   : > { %1765 = vmatmul.bf16.gmra.mxu1 %v3338_v16  ;;  %1854 = vmatmul.bf16.gmra.mxu2 %v3342_v17  ;;  %v4181_v16 = vld [vmem:[%s4657_s5 + $0x1e0] sm:$0xf0] }
  0x9c   : > { %1943 = vmatmul.bf16.gmra.mxu3 %v3346_v18  ;;  %v3458_v26 = vor.u32 %v4181_v16, %v3457_v15  ;;  %v4193_v16 = vld [vmem:[%s4657_s5 + $0x244] sm:$0xf] }
  0x9d   : > { %2032 = vmatmul.bf16.gmra.mxu0 %v3350_v19 }
  0xa8   : > { %v1682_v31 = vpop.f32.mrf.mxu1 }
  0xa9   : > { %v4872_v34 = vadd.f32 %v4861_v20, %v1682_v31 }
  0xaa   : > { %v4874_v35 = vpop.f32.mrf.mxu0 }
  0xab   : > { %1770 = vmatmul.bf16.gmra.mxu1 %v3374_v29  ;;  %1859 = vmatmul.bf16.gmra.mxu2 %v3378_v30  ;;  %v4316_v29 = vld [vmem:[%s5829_s1 + $0x198] sm:$0xff] }
  0xac   : > { %1948 = vmatmul.bf16.gmra.mxu3 %v3382_v32  ;;  %v4324_v30 = vld [vmem:[%s5829_s1 + $0x1d8] sm:$0xff]  ;;  %2191 = vmatpush.bf16.msra.mxu2 %v4316_v29 }
  0xad   : > { %2037 = vmatmul.bf16.gmra.mxu0 %v3386_v33  ;;  %2280 = vmatpush.bf16.msra.mxu3 %v4324_v30  ;;  %v1663_v30 = vadd.f32 %v4861_v20, %v4874_v35  ;;  %v4315_v35 = vld [vmem:[%s5829_s1 + $0x190] sm:$0xff] }
  0xae   : > { %v1702_v38 = vpop.f32.mrf.mxu2 }
  0xaf   : > { %v4883_v39 = vadd.f32 %v4861_v20, %v1702_v38  ;;  %v1722_v40 = vpop.f32.mrf.mxu3 }
  0xb0   : > { %v4886_v41 = vadd.f32 %v4861_v20, %v1722_v40  ;;  %v1684_v42 = vpop.f32.mrf.mxu1  ;;  %2192 = vmatpush.bf16.msra.mxu2 %v4315_v35 }
  0xb1   : > { %v4892_v44 = vadd.f32 %v4861_v20, %v1684_v42  ;;  %v4308_v42 = vld [vmem:[%s5829_s1 + $0x158] sm:$0xff] }
  0xb2   : > { %v4894_v45 = vpop.f32.mrf.mxu0  ;;  %2102 = vmatpush.bf16.msra.mxu1 %v4308_v42 }
  0xb6   : > { %v1704_v55 = vpop.f32.mrf.mxu2 }
  0xb7   : > { %v4908_v56 = vadd.f32 %v4861_v20, %v1704_v55  ;;  %v1724_v57 = vpop.f32.mrf.mxu3 }
  0xb8   : > { %v4911_v60 = vadd.f32 %v4861_v20, %v1724_v57  ;;  %v1687_v61 = vpop.f32.mrf.mxu1 }
  0xb9   : > { %v4914_v0 = vadd.f32 %v4861_v20, %v1687_v61 }
  0xba   : > { %v4916_v1 = vpop.f32.mrf.mxu0 }
  0xbb   : > { %1775 = vmatmul.bf16.gmra.mxu1 %v3410_v58  ;;  %1864 = vmatmul.bf16.gmra.mxu2 %v3414_v59  ;;  %v3482_v58 = vor.u32 %v4184_v46, %v3479_v47  ;;  %v3486_v59 = vor.u32 %v4189_v49, %v3485_v48 }
  0xbc   : > { %1953 = vmatmul.bf16.gmra.mxu3 %v3418_v62 }
  0xbd   : > { %2042 = vmatmul.bf16.gmra.mxu0 %v3422_v63  ;;  %v3490_v63 = vor.u32 %v4185_v50, %v3487_v51  ;;  %v4323_v51 = vld [vmem:[%s5829_s1 + $0x1d0] sm:$0xff] }
  0xbe   : > { %v1707_v2 = vpop.f32.mrf.mxu2  ;;  %2281 = vmatpush.bf16.msra.mxu3 %v4323_v51 }
  0xbf   : > { %v4919_v3 = vadd.f32 %v4861_v20, %v1707_v2  ;;  %v1727_v4 = vpop.f32.mrf.mxu3  ;;  %v3494_v2 = vor.u32 %v4190_v53, %v3493_v52  ;;  %v1665_v53 = vadd.f32 %v4861_v20, %v4894_v45  ;;  %v3551_v45 = vld [vmem:[%s4657_s5 + $0x2ac] sm:$0xf0] }
  0xc0   : > { %v4922_v5 = vadd.f32 %v4861_v20, %v1727_v4  ;;  %v1689_v6 = vpop.f32.mrf.mxu1 }
  0xc1   : > { %v4925_v7 = vadd.f32 %v4861_v20, %v1689_v6 }
  0xc2   : > { %v4927_v8 = vpop.f32.mrf.mxu0 }
  0xc3   : > { %v1670_v51 = vadd.f32 %v4861_v20, %v4927_v8 }
  0xc6   : > { %v1709_v17 = vpop.f32.mrf.mxu2 }
  0xc7   : > { %v4938_v18 = vadd.f32 %v4861_v20, %v1709_v17  ;;  %v1729_v19 = vpop.f32.mrf.mxu3  ;;  %v3515_v17 = vld [vmem:[%s4657_s5 + $0x264] sm:$0xf0] }
  0xc8   : > { %v4941_v23 = vadd.f32 %v4861_v20, %v1729_v19  ;;  %v1692_v24 = vpop.f32.mrf.mxu1  ;;  %v3521_v19 = vld [vmem:[%s4657_s5 + $0x248] sm:$0xf] }
  0xc9   : > { %v4944_v27 = vadd.f32 %v4861_v20, %v1692_v24  ;;  %v3523_v24 = vld [vmem:[%s4657_s5 + $0x26c] sm:$0xf0] }
  0xca   : > { %v4946_v28 = vpop.f32.mrf.mxu0 }
  0xcb   : > { %1780 = vmatmul.bf16.gmra.mxu1 %v3446_v21  ;;  %1869 = vmatmul.bf16.gmra.mxu2 %v3450_v22  ;;  %v4198_v21 = vld [vmem:[%s4657_s5 + $0x268] sm:$0xf0]  ;;  %v1673_v8 = vadd.f32 %v4861_v20, %v4946_v28 }
  0xcc   : > { %1958 = vmatmul.bf16.gmra.mxu3 %v3454_v25  ;;  %v4194_v22 = vld [vmem:[%s4657_s5 + $0x24c] sm:$0xf]  ;;  %v3529_v25 = vld [vmem:[%s4657_s5 + $0x250] sm:$0xf]  ;;  %v3522_v42 = vor.u32 %v4198_v21, %v3521_v19  ;;  %v4203_v19 = vld [vmem:[%s4657_s5 + $0x294] sm:$0xf] }
  0xcd   : > { %2047 = vmatmul.bf16.gmra.mxu0 %v3458_v26  ;;  %v4199_v26 = vld [vmem:[%s4657_s5 + $0x270] sm:$0xf0]  ;;  %v3526_v47 = vor.u32 %v4194_v22, %v3523_v24  ;;  %v3559_v21 = vld [vmem:[%s4657_s5 + $0x2b4] sm:$0xf0]  ;;  %v4208_v24 = vld [vmem:[%s4657_s5 + $0x2b8] sm:$0xf0] }
  0xce   : > { %v1712_v31 = vpop.f32.mrf.mxu2  ;;  %v3530_v48 = vor.u32 %v4199_v26, %v3529_v25  ;;  %v3565_v22 = vld [vmem:[%s4657_s5 + $0x298] sm:$0xf]  ;;  %v1668_v26 = vadd.f32 %v4861_v20, %v4916_v1  ;;  %v4314_v28 = vld [vmem:[%s5829_s1 + $0x188] sm:$0xff] }
  0xcf   : > { %v4955_v32 = vadd.f32 %v4861_v20, %v1712_v31  ;;  %v1732_v33 = vpop.f32.mrf.mxu3  ;;  %2193 = vmatpush.bf16.msra.mxu2 %v4314_v28 }
  0xd0   : > { %v4958_v36 = vadd.f32 %v4861_v20, %v1732_v33  ;;  %v1694_v37 = vpop.f32.mrf.mxu1 }
  0xd1   : > { %v4961_v38 = vadd.f32 %v4861_v20, %v1694_v37  ;;  %v3518_v37 = vor.u32 %v4193_v16, %v3515_v17  ;;  %v3557_v16 = vld [vmem:[%s4657_s5 + $0x290] sm:$0xf]  ;;  %v4207_v17 = vld [vmem:[%s4657_s5 + $0x2b0] sm:$0xf0] }
  0xd2   : > { %v4963_v40 = vpop.f32.mrf.mxu0 }
  0xd6   : > { %v1714_v54 = vpop.f32.mrf.mxu2 }
  0xd7   : > { %v4980_v55 = vadd.f32 %v4861_v20, %v1714_v54  ;;  %v1734_v57 = vpop.f32.mrf.mxu3 }
  0xd8   : > { %v4983_v61 = vadd.f32 %v4861_v20, %v1734_v57  ;;  %v1697_v62 = vpop.f32.mrf.mxu1 }
  0xd9   : > { %v4986_v4 = vadd.f32 %v4861_v20, %v1697_v62 }
  0xda   : > { %v4988_v6 = vpop.f32.mrf.mxu0 }
  0xdb   : > { %1785 = vmatmul.bf16.gmra.mxu1 %v3482_v58  ;;  %1874 = vmatmul.bf16.gmra.mxu2 %v3486_v59 }
  0xdc   : > { %1963 = vmatmul.bf16.gmra.mxu3 %v3490_v63 }
  0xdd   : > { %2052 = vmatmul.bf16.gmra.mxu0 %v3494_v2  ;;  %v4307_v2 = vld [vmem:[%s5829_s1 + $0x150] sm:$0xff] }
  0xde   : > { %v1717_v9 = vpop.f32.mrf.mxu2  ;;  %2103 = vmatpush.bf16.msra.mxu1 %v4307_v2  ;;  %v3587_v2 = vld [vmem:[%s4657_s5 + $0x2f4] sm:$0xf0] }
  0xdf   : > { %v4991_v10 = vadd.f32 %v4861_v20, %v1717_v9  ;;  %v1737_v11 = vpop.f32.mrf.mxu3  ;;  %v4331_v9 = vld [vmem:[%s5829_s1 + $0x210] sm:$0xff] }
  0xe0   : > { %v4994_v12 = vadd.f32 %v4861_v20, %v1737_v11  ;;  %v1699_v13 = vpop.f32.mrf.mxu1  ;;  %v4202_v11 = vld [vmem:[%s4657_s5 + $0x28c] sm:$0xf]  ;;  %2370 = vmatpush.bf16.msra.mxu0 %v4331_v9  ;;  %v3593_v9 = vld [vmem:[%s4657_s5 + $0x2d8] sm:$0xf] }
  0xe1   : > { %v4997_v14 = vadd.f32 %v4861_v20, %v1699_v13 }
  0xe2   : > { %v4999_v15 = vpop.f32.mrf.mxu0 }
  0xe6   : > { %v1719_v29 = vpop.f32.mrf.mxu2 }
  0xe7   : > { %v5012_v31 = vadd.f32 %v4861_v20, %v1719_v29  ;;  %v1739_v33 = vpop.f32.mrf.mxu3 }
  0xe8   : > { %v5015_v43 = vadd.f32 %v4861_v20, %v1739_v33  ;;  %v1751_v46 = vpop.f32.mrf.mxu1  ;;  %v3554_v33 = vor.u32 %v4202_v11, %v3551_v45  ;;  %v4216_v11 = vld [vmem:[%s4657_s5 + $0x2f8] sm:$0xf0] }
  0xe9   : > { %v1752_v49 = vadd.f32 %v1751_v46, %v1663_v30  ;;  %v3562_v46 = vor.u32 %v4203_v19, %v3559_v21  ;;  %v4212_v45 = vld [vmem:[%s4657_s5 + $0x2dc] sm:$0xf]  ;;  %v4217_v19 = vld [vmem:[%s4657_s5 + $0x300] sm:$0xf0] }
  0xea   : > { %v2018_v50 = vpop.f32.mrf.mxu0 }
  0xeb   : > { %1790 = vmatmul.bf16.gmra.mxu1 %v3518_v37  ;;  %1879 = vmatmul.bf16.gmra.mxu2 %v3522_v42  ;;  %v3558_v37 = vor.u32 %v4207_v17, %v3557_v16  ;;  %v3595_v16 = vld [vmem:[%s4657_s5 + $0x2fc] sm:$0xf0] }
  0xec   : > { %1968 = vmatmul.bf16.gmra.mxu3 %v3526_v47  ;;  %v3566_v47 = vor.u32 %v4208_v24, %v3565_v22  ;;  %v3601_v17 = vld [vmem:[%s4657_s5 + $0x2e0] sm:$0xf] }
  0xed   : > { %2057 = vmatmul.bf16.gmra.mxu0 %v3530_v48 }
  0xee   : > { %v1840_v52 = vpop.f32.mrf.mxu2 }
  0xef   : > { %v1841_v54 = vadd.f32 %v1840_v52, %v1752_v49  ;;  %v1929_v57 = vpop.f32.mrf.mxu3 }
  0xf0   : > { %v1753_v58 = vpop.f32.mrf.mxu1 }
  0xf1   : > { %v1930_v59 = vadd.f32 %v1929_v57, %v1841_v54  ;;  %v1754_v62 = vadd.f32 %v1753_v58, %v1665_v53 }
  0xf2   : > { %v2020_v63 = vpop.f32.mrf.mxu0 }
  0xf3   : > { %v5033_v13 = vadd.f32 %v2018_v50, %v1930_v59 }
  0xf6   : > { %v1842_v25 = vpop.f32.mrf.mxu2 }
  0xf7   : > { %v1843_v29 = vadd.f32 %v1842_v25, %v1754_v62  ;;  %v1931_v30 = vpop.f32.mrf.mxu3  ;;  %v4211_v62 = vld [vmem:[%s4657_s5 + $0x2d4] sm:$0xf] }
  0xf8   : > { %v1756_v42 = vpop.f32.mrf.mxu1  ;;  %v3590_v25 = vor.u32 %v4211_v62, %v3587_v2  ;;  %v4220_v62 = vld [vmem:[%s4657_s5 + $0x31c] sm:$0xf] }
  0xf9   : > { %v1932_v48 = vadd.f32 %v1931_v30, %v1843_v29  ;;  %v1757_v49 = vadd.f32 %v1756_v42, %v1668_v26  ;;  %v3594_v26 = vor.u32 %v4216_v11, %v3593_v9  ;;  %v3598_v30 = vor.u32 %v4212_v45, %v3595_v16  ;;  %v3629_v9 = vld [vmem:[%s4657_s5 + $0x320] sm:$0xf]  ;;  %v4225_v11 = vld [vmem:[%s4657_s5 + $0x340] sm:$0xf0]  ;;  %v3631_v16 = vld [vmem:[%s4657_s5 + $0x344] sm:$0xf0] }
  0xfa   : > { %v2023_v50 = vpop.f32.mrf.mxu0  ;;  %v4221_v45 = vld [vmem:[%s4657_s5 + $0x324] sm:$0xf] }
  0xfb   : > { %1795 = vmatmul.bf16.gmra.mxu1 %v3554_v33  ;;  %1884 = vmatmul.bf16.gmra.mxu2 %v3558_v37  ;;  %v5043_v35 = vadd.f32 %v2020_v63, %v1932_v48  ;;  %v3602_v33 = vor.u32 %v4217_v19, %v3601_v17  ;;  %v4322_v48 = vld [vmem:[%s5829_s1 + $0x1c8] sm:$0xff] }
  0xfc   : > { %1973 = vmatmul.bf16.gmra.mxu3 %v3562_v46  ;;  %v3637_v17 = vld [vmem:[%s4657_s5 + $0x328] sm:$0xf]  ;;  %v4226_v19 = vld [vmem:[%s4657_s5 + $0x348] sm:$0xf0] }
  0xfd   : > { %2062 = vmatmul.bf16.gmra.mxu0 %v3566_v47  ;;  %2282 = vmatpush.bf16.msra.mxu3 %v4322_v48  ;;  %v1680_v48 = vadd.f32 %v4861_v20, %v4999_v15 }
  0xfe   : > { %v1845_v1 = vpop.f32.mrf.mxu2 }
  0xff   : > { %v1846_v52 = vadd.f32 %v1845_v1, %v1757_v49  ;;  %v1934_v53 = vpop.f32.mrf.mxu3 }
 0x100   : > { %v1758_v54 = vpop.f32.mrf.mxu1 }
 0x101   : > { %v1935_v57 = vadd.f32 %v1934_v53, %v1846_v52  ;;  %v1759_v58 = vadd.f32 %v1758_v54, %v1670_v51 }
 0x102   : > { %v2025_v59 = vpop.f32.mrf.mxu0 }
 0x103   : > { %v5049_v63 = vadd.f32 %v2023_v50, %v1935_v57  ;;  %v1675_v50 = vadd.f32 %v4861_v20, %v4963_v40  ;;  %v3623_v40 = vld [vmem:[%s4657_s5 + $0x33c] sm:$0xf0] }
 0x106   : > { %v1847_v21 = vpop.f32.mrf.mxu2 }
 0x107   : > { %v1848_v22 = vadd.f32 %v1847_v21, %v1759_v58  ;;  %v1936_v24 = vpop.f32.mrf.mxu3  ;;  %v4306_v58 = vld [vmem:[%s5829_s1 + $0x148] sm:$0xff] }
 0x108   : > { %v1761_v29 = vpop.f32.mrf.mxu1  ;;  %2104 = vmatpush.bf16.msra.mxu1 %v4306_v58  ;;  %v3659_v58 = vld [vmem:[%s4657_s5 + $0x384] sm:$0xf0] }
 0x109   : > { %v1937_v37 = vadd.f32 %v1936_v24, %v1848_v22  ;;  %v1762_v42 = vadd.f32 %v1761_v29, %v1673_v8  ;;  %v1678_v8 = vadd.f32 %v4861_v20, %v4988_v6 }
 0x10a   : > { %v2028_v46 = vpop.f32.mrf.mxu0 }
 0x10b   : > { %1800 = vmatmul.bf16.gmra.mxu1 %v3590_v25  ;;  %1889 = vmatmul.bf16.gmra.mxu2 %v3594_v26  ;;  %v5059_v47 = vadd.f32 %v2025_v59, %v1937_v37  ;;  %v4330_v59 = vld [vmem:[%s5829_s1 + $0x208] sm:$0xff]  ;;  %v3626_v25 = vor.u32 %v4220_v62, %v3623_v40  ;;  %v3630_v26 = vor.u32 %v4225_v11, %v3629_v9  ;;  %v3667_v9 = vld [vmem:[%s4657_s5 + $0x38c] sm:$0xf0] }
 0x10c   : > { %1978 = vmatmul.bf16.gmra.mxu3 %v3598_v30  ;;  %2371 = vmatpush.bf16.msra.mxu0 %v4330_v59  ;;  %v3634_v30 = vor.u32 %v4221_v45, %v3631_v16  ;;  %v3665_v59 = vld [vmem:[%s4657_s5 + $0x368] sm:$0xf]  ;;  %v4234_v62 = vld [vmem:[%s4657_s5 + $0x388] sm:$0xf0]  ;;  %v3673_v11 = vld [vmem:[%s4657_s5 + $0x370] sm:$0xf] }
 0x10d   : > { %2067 = vmatmul.bf16.gmra.mxu0 %v3602_v33  ;;  %v3638_v33 = vor.u32 %v4226_v19, %v3637_v17  ;;  %v4230_v40 = vld [vmem:[%s4657_s5 + $0x36c] sm:$0xf]  ;;  %v4235_v45 = vld [vmem:[%s4657_s5 + $0x390] sm:$0xf0]  ;;  %v3666_v15 = vor.u32 %v4234_v62, %v3665_v59  ;;  %v3703_v62 = vld [vmem:[%s4657_s5 + $0x3d4] sm:$0xf0] }
 0x10e   : > { %v1850_v49 = vpop.f32.mrf.mxu2  ;;  %v4239_v59 = vld [vmem:[%s4657_s5 + $0x3b4] sm:$0xf] }
 0x10f   : > { %v1851_v1 = vadd.f32 %v1850_v49, %v1762_v42  ;;  %v1939_v51 = vpop.f32.mrf.mxu3 }
 0x110   : > { %v1763_v52 = vpop.f32.mrf.mxu1 }
 0x111   : > { %v1940_v53 = vadd.f32 %v1939_v51, %v1851_v1  ;;  %v1764_v54 = vadd.f32 %v1763_v52, %v1675_v50 }
 0x112   : > { %v2030_v57 = vpop.f32.mrf.mxu0 }
 0x113   : > { %v5077_v2 = vadd.f32 %v2028_v46, %v1940_v53 }
 0x116   : > { %v1852_v21 = vpop.f32.mrf.mxu2 }
 0x117   : > { %v1853_v22 = vadd.f32 %v1852_v21, %v1764_v54  ;;  %v1941_v24 = vpop.f32.mrf.mxu3  ;;  %v4229_v54 = vld [vmem:[%s4657_s5 + $0x364] sm:$0xf] }
 0x118   : > { %v1766_v29 = vpop.f32.mrf.mxu1  ;;  %v3662_v20 = vor.u32 %v4229_v54, %v3659_v58  ;;  %v3701_v54 = vld [vmem:[%s4657_s5 + $0x3b0] sm:$0xf]  ;;  %v4243_v58 = vld [vmem:[%s4657_s5 + $0x3d0] sm:$0xf0] }
 0x119   : > { %v1942_v37 = vadd.f32 %v1941_v24, %v1853_v22  ;;  %v1767_v42 = vadd.f32 %v1766_v29, %v1678_v8  ;;  %v3670_v8 = vor.u32 %v4230_v40, %v3667_v9  ;;  %v3674_v22 = vor.u32 %v4235_v45, %v3673_v11  ;;  %v4244_v40 = vld [vmem:[%s4657_s5 + $0x3d8] sm:$0xf0] }
 0x11a   : > { %v2033_v46 = vpop.f32.mrf.mxu0 }
 0x11b   : > { %1805 = vmatmul.bf16.gmra.mxu1 %v3626_v25  ;;  %1894 = vmatmul.bf16.gmra.mxu2 %v3630_v26  ;;  %v5087_v28 = vadd.f32 %v2030_v57, %v1942_v37 }
 0x11c   : > { %1983 = vmatmul.bf16.gmra.mxu3 %v3634_v30  ;;  %v4313_v30 = vld [vmem:[%s5829_s1 + $0x180] sm:$0xff] }
 0x11d   : > { %2072 = vmatmul.bf16.gmra.mxu0 %v3638_v33  ;;  %v4321_v33 = vld [vmem:[%s5829_s1 + $0x1c0] sm:$0xff]  ;;  %2194 = vmatpush.bf16.msra.mxu2 %v4313_v30 }
 0x11e   : > { %v1855_v6 = vpop.f32.mrf.mxu2  ;;  %2283 = vmatpush.bf16.msra.mxu3 %v4321_v33 }
 0x11f   : > { %v1856_v49 = vadd.f32 %v1855_v6, %v1767_v42  ;;  %v1944_v50 = vpop.f32.mrf.mxu3 }
 0x120   : > { %v1768_v1 = vpop.f32.mrf.mxu1 }
 0x121   : > { %v1945_v51 = vadd.f32 %v1944_v50, %v1856_v49  ;;  %v1769_v52 = vadd.f32 %v1768_v1, %v1680_v48  ;;  %v4305_v50 = vld [vmem:[%s5829_s1 + $0x140] sm:$0xff] }
 0x122   : > { %v2035_v53 = vpop.f32.mrf.mxu0  ;;  %v4329_v1 = vld [vmem:[%s5829_s1 + $0x200] sm:$0xff]  ;;  %2105 = vmatpush.bf16.msra.mxu1 %v4305_v50  ;;  %v4248_v50 = vld [vmem:[%s4657_s5 + $0x3fc] sm:$0xf] }
 0x123   : > { %v5093_v57 = vadd.f32 %v2033_v46, %v1945_v51  ;;  %v4238_v51 = vld [vmem:[%s4657_s5 + $0x3ac] sm:$0xf]  ;;  %2372 = vmatpush.bf16.msra.mxu0 %v4329_v1  ;;  %v3739_v1 = vld [vmem:[%s4657_s5 + $0x41c] sm:$0xf0] }
 0x126   : > { %v1857_v16 = vpop.f32.mrf.mxu2 }
 0x127   : > { %v1858_v17 = vadd.f32 %v1857_v16, %v1769_v52  ;;  %v1946_v19 = vpop.f32.mrf.mxu3  ;;  %v3695_v52 = vld [vmem:[%s4657_s5 + $0x3cc] sm:$0xf0] }
 0x128   : > { %v1771_v21 = vpop.f32.mrf.mxu1  ;;  %v3698_v16 = vor.u32 %v4238_v51, %v3695_v52  ;;  %v3745_v51 = vld [vmem:[%s4657_s5 + $0x400] sm:$0xf]  ;;  %v4253_v52 = vld [vmem:[%s4657_s5 + $0x420] sm:$0xf0] }
 0x129   : > { %v1947_v24 = vadd.f32 %v1946_v19, %v1858_v17  ;;  %v1772_v25 = vadd.f32 %v1771_v21, %v4872_v34  ;;  %v3702_v17 = vor.u32 %v4243_v58, %v3701_v54 }
 0x12a   : > { %v2038_v26 = vpop.f32.mrf.mxu0 }
 0x12b   : > { %1810 = vmatmul.bf16.gmra.mxu1 %v3662_v20  ;;  %1899 = vmatmul.bf16.gmra.mxu2 %v3666_v15  ;;  %v5102_v29 = vadd.f32 %v2035_v53, %v1947_v24  ;;  %v3706_v20 = vor.u32 %v4239_v59, %v3703_v62 }
 0x12c   : > { %1988 = vmatmul.bf16.gmra.mxu3 %v3670_v8 }
 0x12d   : > { %2077 = vmatmul.bf16.gmra.mxu0 %v3674_v22 }
 0x12e   : > { %v1860_v37 = vpop.f32.mrf.mxu2 }
 0x12f   : > { %v1861_v34 = vadd.f32 %v1860_v37, %v1772_v25  ;;  %v1949_v42 = vpop.f32.mrf.mxu3 }
 0x130   : > { %v1773_v46 = vpop.f32.mrf.mxu1 }
 0x131   : > { %v1950_v6 = vadd.f32 %v1949_v42, %v1861_v34  ;;  %v1774_v48 = vadd.f32 %v1773_v46, %v4892_v44  ;;  %v3709_v44 = vld [vmem:[%s4657_s5 + $0x3b8] sm:$0xf]  ;;  %v4247_v42 = vld [vmem:[%s4657_s5 + $0x3f4] sm:$0xf] }
 0x132   : > { %v2040_v49 = vpop.f32.mrf.mxu0  ;;  %v3710_v15 = vor.u32 %v4244_v40, %v3709_v44  ;;  %v3731_v46 = vld [vmem:[%s4657_s5 + $0x414] sm:$0xf0] }
 0x133   : > { %v5119_v53 = vadd.f32 %v2038_v26, %v1950_v6  ;;  %v3734_v62 = vor.u32 %v4247_v42, %v3731_v46  ;;  %v3781_v42 = vld [vmem:[%s4657_s5 + $0x448] sm:$0xf]  ;;  %v4262_v46 = vld [vmem:[%s4657_s5 + $0x468] sm:$0xf0] }
 0x136   : > { %v1862_v9 = vpop.f32.mrf.mxu2 }
 0x137   : > { %v1863_v11 = vadd.f32 %v1862_v9, %v1774_v48  ;;  %v1951_v45 = vpop.f32.mrf.mxu3  ;;  %v3737_v48 = vld [vmem:[%s4657_s5 + $0x3f8] sm:$0xf]  ;;  %v3742_v9 = vor.u32 %v4248_v50, %v3739_v1 }
 0x138   : > { %v1776_v19 = vpop.f32.mrf.mxu1 }
 0x139   : > { %v1952_v21 = vadd.f32 %v1951_v45, %v1863_v11  ;;  %v1777_v8 = vadd.f32 %v1776_v19, %v4914_v0  ;;  %v3746_v11 = vor.u32 %v4253_v52, %v3745_v51 }
 0x13a   : > { %v2043_v22 = vpop.f32.mrf.mxu0 }
 0x13b   : > { %1815 = vmatmul.bf16.gmra.mxu1 %v3698_v16  ;;  %1904 = vmatmul.bf16.gmra.mxu2 %v3702_v17  ;;  %v5128_v24 = vadd.f32 %v2040_v49, %v1952_v21  ;;  %v4252_v49 = vld [vmem:[%s4657_s5 + $0x418] sm:$0xf0] }
 0x13c   : > { %1993 = vmatmul.bf16.gmra.mxu3 %v3706_v20  ;;  %v3738_v44 = vor.u32 %v4252_v49, %v3737_v48 }
 0x13d   : > { %2082 = vmatmul.bf16.gmra.mxu0 %v3710_v15 }
 0x13e   : > { %v1865_v25 = vpop.f32.mrf.mxu2 }
 0x13f   : > { %v1866_v26 = vadd.f32 %v1865_v25, %v1777_v8  ;;  %v1954_v30 = vpop.f32.mrf.mxu3  ;;  %v4256_v25 = vld [vmem:[%s4657_s5 + $0x43c] sm:$0xf] }
 0x140   : > { %v1778_v33 = vpop.f32.mrf.mxu1 }
 0x141   : > { %v1955_v37 = vadd.f32 %v1954_v30, %v1866_v26  ;;  %v1779_v0 = vadd.f32 %v1778_v33, %v4925_v7  ;;  %v3767_v26 = vld [vmem:[%s4657_s5 + $0x45c] sm:$0xf0] }
 0x142   : > { %v2045_v34 = vpop.f32.mrf.mxu0  ;;  %v3773_v33 = vld [vmem:[%s4657_s5 + $0x440] sm:$0xf]  ;;  %v3770_v1 = vor.u32 %v4256_v25, %v3767_v26  ;;  %v4129_v26 = vld [vmem:[%s4657_s5 + $0x40] sm:$0xf0] }
 0x143   : > { %v5133_v6 = vadd.f32 %v2043_v22, %v1955_v37  ;;  %v4261_v37 = vld [vmem:[%s4657_s5 + $0x460] sm:$0xf0]  ;;  %v3257_v25 = vld [vmem:[%s4657_s5 + $0x20] sm:$0xf] }
 0x144   : > { %v3774_v51 = vor.u32 %v4261_v37, %v3773_v33 }
 0x146   : > { %v1867_v54 = vpop.f32.mrf.mxu2 }
 0x147   : > { %v1868_v58 = vadd.f32 %v1867_v54, %v1779_v0  ;;  %v1956_v59 = vpop.f32.mrf.mxu3  ;;  %v4257_v0 = vld [vmem:[%s4657_s5 + $0x444] sm:$0xf] }
 0x148   : > { %v1781_v40 = vpop.f32.mrf.mxu1 }
 0x149   : > { %v1957_v7 = vadd.f32 %v1956_v59, %v1868_v58  ;;  %v1782_v45 = vadd.f32 %v1781_v40, %v4944_v27  ;;  %v3782_v58 = vor.u32 %v4262_v46, %v3781_v42 }
 0x14a   : > { %v2048_v16 = vpop.f32.mrf.mxu0 }
 0x14b   : > { %1820 = vmatmul.bf16.gmra.mxu1 %v3734_v62  ;;  %1909 = vmatmul.bf16.gmra.mxu2 %v3738_v44  ;;  %v5142_v17 = vadd.f32 %v2045_v34, %v1957_v7  ;;  %v3775_v34 = vld [vmem:[%s4657_s5 + $0x464] sm:$0xf0] }
 0x14c   : > { %1998 = vmatmul.bf16.gmra.mxu3 %v3742_v9  ;;  %v3778_v54 = vor.u32 %v4257_v0, %v3775_v34 }
 0x14d   : > { %2087 = vmatmul.bf16.gmra.mxu0 %v3746_v11 }
 0x14e   : > { %v1870_v19 = vpop.f32.mrf.mxu2 }
 0x14f   : > { %v1871_v20 = vadd.f32 %v1870_v19, %v1782_v45  ;;  %v1959_v15 = vpop.f32.mrf.mxu3  ;;  %v4123_v19 = vld [vmem:[%s4657_s5 + $0x14] sm:$0xf] }
 0x150   : > { %v1783_v21 = vpop.f32.mrf.mxu1 }
 0x151   : > { %v1960_v8 = vadd.f32 %v1959_v15, %v1871_v20  ;;  %v1784_v27 = vadd.f32 %v1783_v21, %v4961_v38  ;;  %v3243_v20 = vld [vmem:[%s4657_s5 + $0x34] sm:$0xf0] }
 0x152   : > { %v2050_v22 = vpop.f32.mrf.mxu0  ;;  %v3249_v21 = vld [vmem:[%s4657_s5 + $0x18] sm:$0xf]  ;;  %v3246_v34 = vor.u32 %v4123_v19, %v3243_v20  ;;  %v3293_v19 = vld [vmem:[%s4657_s5 + $0x68] sm:$0xf]  ;;  %v4138_v20 = vld [vmem:[%s4657_s5 + $0x88] sm:$0xf0] }
 0x153   : > { %v5147_v30 = vadd.f32 %v2048_v16, %v1960_v8  ;;  %v4128_v8 = vld [vmem:[%s4657_s5 + $0x38] sm:$0xf0] }
 0x154   : > { %v3250_v42 = vor.u32 %v4128_v8, %v3249_v21 }
 0x156   : > { %v1872_v48 = vpop.f32.mrf.mxu2 }
 0x157   : > { %v1873_v49 = vadd.f32 %v1872_v48, %v1784_v27  ;;  %v1961_v50 = vpop.f32.mrf.mxu3  ;;  %v4124_v27 = vld [vmem:[%s4657_s5 + $0x1c] sm:$0xf] }
 0x158   : > { %v1786_v52 = vpop.f32.mrf.mxu1 }
 0x159   : > { %v1962_v38 = vadd.f32 %v1961_v50, %v1873_v49  ;;  %v1787_v59 = vadd.f32 %v1786_v52, %v4986_v4  ;;  %v3258_v49 = vor.u32 %v4129_v26, %v3257_v25 }
 0x15a   : > { %v2053_v62 = vpop.f32.mrf.mxu0 }
 0x15b   : > { %1825 = vmatmul.bf16.gmra.mxu1 %v3770_v1  ;;  %1914 = vmatmul.bf16.gmra.mxu2 %v3774_v51  ;;  %v5156_v44 = vadd.f32 %v2050_v22, %v1962_v38  ;;  %v3251_v22 = vld [vmem:[%s4657_s5 + $0x3c] sm:$0xf0] }
 0x15c   : > { %2003 = vmatmul.bf16.gmra.mxu3 %v3778_v54  ;;  %v3254_v48 = vor.u32 %v4124_v27, %v3251_v22 }
 0x15d   : > { %2092 = vmatmul.bf16.gmra.mxu0 %v3782_v58 }
 0x15e   : > { %v1875_v40 = vpop.f32.mrf.mxu2 }
 0x15f   : > { %v1876_v9 = vadd.f32 %v1875_v40, %v1787_v59  ;;  %v1964_v11 = vpop.f32.mrf.mxu3  ;;  %v4132_v40 = vld [vmem:[%s4657_s5 + $0x5c] sm:$0xf] }
 0x160   : > { %v1788_v7 = vpop.f32.mrf.mxu1 }
 0x161   : > { %v1965_v45 = vadd.f32 %v1964_v11, %v1876_v9  ;;  %v1789_v4 = vadd.f32 %v1788_v7, %v4997_v14  ;;  %v3279_v9 = vld [vmem:[%s4657_s5 + $0x7c] sm:$0xf0] }
 0x162   : > { %v2055_v16 = vpop.f32.mrf.mxu0  ;;  %v3285_v7 = vld [vmem:[%s4657_s5 + $0x60] sm:$0xf]  ;;  %v3282_v22 = vor.u32 %v4132_v40, %v3279_v9  ;;  %v3329_v40 = vld [vmem:[%s4657_s5 + $0xb0] sm:$0xf]  ;;  %v4147_v9 = vld [vmem:[%s4657_s5 + $0xd0] sm:$0xf0] }
 0x163   : > { %v5161_v15 = vadd.f32 %v2053_v62, %v1965_v45  ;;  %v4137_v45 = vld [vmem:[%s4657_s5 + $0x80] sm:$0xf0] }
 0x164   : > { %v3286_v25 = vor.u32 %v4137_v45, %v3285_v7 }
 0x166   : > { %v1877_v33 = vpop.f32.mrf.mxu2 }
 0x167   : > { %v1878_v37 = vadd.f32 %v1877_v33, %v1789_v4  ;;  %v1966_v0 = vpop.f32.mrf.mxu3  ;;  %v4133_v4 = vld [vmem:[%s4657_s5 + $0x64] sm:$0xf] }
 0x168   : > { %v1791_v46 = vpop.f32.mrf.mxu1 }
 0x169   : > { %v1967_v14 = vadd.f32 %v1966_v0, %v1878_v37  ;;  %v1792_v50 = vadd.f32 %v1791_v46, %v4883_v39  ;;  %v3294_v37 = vor.u32 %v4138_v20, %v3293_v19 }
 0x16a   : > { %v2058_v1 = vpop.f32.mrf.mxu0 }
 0x16b   : > { %2106 = vmatmul.bf16.vlgmr.msra.gmra.mxu1 %v3246_v34  ;;  %2195 = vmatmul.bf16.vlgmr.msra.gmra.mxu2 %v3250_v42  ;;  %v5170_v51 = vadd.f32 %v2055_v16, %v1967_v14  ;;  %v3287_v16 = vld [vmem:[%s4657_s5 + $0x84] sm:$0xf0] }
 0x16c   : > { %2284 = vmatmul.bf16.vlgmr.msra.gmra.mxu3 %v3254_v48  ;;  %v3290_v33 = vor.u32 %v4133_v4, %v3287_v16 }
 0x16d   : > { %2373 = vmatmul.bf16.vlgmr.msra.gmra.mxu0 %v3258_v49 }
 0x16e   : > { %v1880_v52 = vpop.f32.mrf.mxu2 }
 0x16f   : > { %v1881_v54 = vadd.f32 %v1880_v52, %v1792_v50  ;;  %v1969_v58 = vpop.f32.mrf.mxu3  ;;  %v4141_v52 = vld [vmem:[%s4657_s5 + $0xa4] sm:$0xf] }
 0x170   : > { %v1793_v38 = vpop.f32.mrf.mxu1 }
 0x171   : > { %v1970_v59 = vadd.f32 %v1969_v58, %v1881_v54  ;;  %v1794_v39 = vadd.f32 %v1793_v38, %v4908_v56  ;;  %v3315_v54 = vld [vmem:[%s4657_s5 + $0xc4] sm:$0xf0] }
 0x172   : > { %v2060_v62 = vpop.f32.mrf.mxu0  ;;  %v3321_v38 = vld [vmem:[%s4657_s5 + $0xa8] sm:$0xf]  ;;  %v3318_v16 = vor.u32 %v4141_v52, %v3315_v54  ;;  %v3365_v52 = vld [vmem:[%s4657_s5 + $0xf8] sm:$0xf]  ;;  %v4156_v54 = vld [vmem:[%s4657_s5 + $0x118] sm:$0xf0] }
 0x173   : > { %v5175_v11 = vadd.f32 %v2058_v1, %v1970_v59  ;;  %v4146_v59 = vld [vmem:[%s4657_s5 + $0xc8] sm:$0xf0] }
 0x174   : > { %v3322_v19 = vor.u32 %v4146_v59, %v3321_v38 }
 0x176   : > { %v1882_v21 = vpop.f32.mrf.mxu2 }
 0x177   : > { %v1883_v8 = vadd.f32 %v1882_v21, %v1794_v39  ;;  %v1971_v27 = vpop.f32.mrf.mxu3  ;;  %v4142_v39 = vld [vmem:[%s4657_s5 + $0xac] sm:$0xf] }
 0x178   : > { %v1796_v26 = vpop.f32.mrf.mxu1 }
 0x179   : > { %v1972_v56 = vadd.f32 %v1971_v27, %v1883_v8  ;;  %v1797_v0 = vadd.f32 %v1796_v26, %v4919_v3  ;;  %v3330_v8 = vor.u32 %v4147_v9, %v3329_v40 }
 0x17a   : > { %v2063_v34 = vpop.f32.mrf.mxu0 }
 0x17b   : > { %2111 = vmatmul.bf16.gmra.mxu1 %v3282_v22  ;;  %2200 = vmatmul.bf16.gmra.mxu2 %v3286_v25  ;;  %v5184_v42 = vadd.f32 %v2060_v62, %v1972_v56  ;;  %v3323_v62 = vld [vmem:[%s4657_s5 + $0xcc] sm:$0xf0] }
 0x17c   : > { %2289 = vmatmul.bf16.gmra.mxu3 %v3290_v33  ;;  %v3326_v21 = vor.u32 %v4142_v39, %v3323_v62 }
 0x17d   : > { %2378 = vmatmul.bf16.gmra.mxu0 %v3294_v37 }
 0x17e   : > { %v1885_v46 = vpop.f32.mrf.mxu2 }
 0x17f   : > { %v1886_v48 = vadd.f32 %v1885_v46, %v1797_v0  ;;  %v1974_v49 = vpop.f32.mrf.mxu3  ;;  %v4150_v46 = vld [vmem:[%s4657_s5 + $0xec] sm:$0xf] }
 0x180   : > { %v1798_v14 = vpop.f32.mrf.mxu1 }
 0x181   : > { %v1975_v50 = vadd.f32 %v1974_v49, %v1886_v48  ;;  %v1799_v3 = vadd.f32 %v1798_v14, %v4938_v18  ;;  %v3351_v48 = vld [vmem:[%s4657_s5 + $0x10c] sm:$0xf0] }
 0x182   : > { %v2065_v1 = vpop.f32.mrf.mxu0  ;;  %v3357_v14 = vld [vmem:[%s4657_s5 + $0xf0] sm:$0xf]  ;;  %v3354_v62 = vor.u32 %v4150_v46, %v3351_v48  ;;  %v3401_v46 = vld [vmem:[%s4657_s5 + $0x140] sm:$0xf]  ;;  %v4165_v48 = vld [vmem:[%s4657_s5 + $0x160] sm:$0xf0] }
 0x183   : > { %v5189_v58 = vadd.f32 %v2063_v34, %v1975_v50  ;;  %v4155_v50 = vld [vmem:[%s4657_s5 + $0x110] sm:$0xf0] }
 0x184   : > { %v3358_v40 = vor.u32 %v4155_v50, %v3357_v14 }
 0x186   : > { %v1887_v7 = vpop.f32.mrf.mxu2 }
 0x187   : > { %v1888_v45 = vadd.f32 %v1887_v7, %v1799_v3  ;;  %v1976_v4 = vpop.f32.mrf.mxu3  ;;  %v4151_v3 = vld [vmem:[%s4657_s5 + $0xf4] sm:$0xf] }
 0x188   : > { %v1801_v20 = vpop.f32.mrf.mxu1 }
 0x189   : > { %v1977_v18 = vadd.f32 %v1976_v4, %v1888_v45  ;;  %v1802_v27 = vadd.f32 %v1801_v20, %v4955_v32  ;;  %v3366_v45 = vor.u32 %v4156_v54, %v3365_v52 }
 0x18a   : > { %v2068_v22 = vpop.f32.mrf.mxu0 }
 0x18b   : > { %2116 = vmatmul.bf16.gmra.mxu1 %v3318_v16  ;;  %2205 = vmatmul.bf16.gmra.mxu2 %v3322_v19  ;;  %v5198_v25 = vadd.f32 %v2065_v1, %v1977_v18  ;;  %v3359_v1 = vld [vmem:[%s4657_s5 + $0x114] sm:$0xf0] }
 0x18c   : > { %2294 = vmatmul.bf16.gmra.mxu3 %v3326_v21  ;;  %v3362_v7 = vor.u32 %v4151_v3, %v3359_v1 }
 0x18d   : > { %2383 = vmatmul.bf16.gmra.mxu0 %v3330_v8 }
 0x18e   : > { %v1890_v26 = vpop.f32.mrf.mxu2 }
 0x18f   : > { %v1891_v33 = vadd.f32 %v1890_v26, %v1802_v27  ;;  %v1979_v37 = vpop.f32.mrf.mxu3  ;;  %v4159_v26 = vld [vmem:[%s4657_s5 + $0x134] sm:$0xf] }
 0x190   : > { %v1803_v56 = vpop.f32.mrf.mxu1 }
 0x191   : > { %v1980_v0 = vadd.f32 %v1979_v37, %v1891_v33  ;;  %v1804_v32 = vadd.f32 %v1803_v56, %v4980_v55  ;;  %v3387_v33 = vld [vmem:[%s4657_s5 + $0x154] sm:$0xf0] }
 0x192   : > { %v2070_v34 = vpop.f32.mrf.mxu0  ;;  %v3393_v56 = vld [vmem:[%s4657_s5 + $0x138] sm:$0xf]  ;;  %v3390_v1 = vor.u32 %v4159_v26, %v3387_v33  ;;  %v3437_v26 = vld [vmem:[%s4657_s5 + $0x188] sm:$0xf]  ;;  %v4174_v33 = vld [vmem:[%s4657_s5 + $0x1a8] sm:$0xf0] }
 0x193   : > { %v5203_v49 = vadd.f32 %v2068_v22, %v1980_v0  ;;  %v4164_v0 = vld [vmem:[%s4657_s5 + $0x158] sm:$0xf0] }
 0x194   : > { %v3394_v52 = vor.u32 %v4164_v0, %v3393_v56 }
 0x196   : > { %v1892_v38 = vpop.f32.mrf.mxu2 }
 0x197   : > { %v1893_v59 = vadd.f32 %v1892_v38, %v1804_v32  ;;  %v1981_v39 = vpop.f32.mrf.mxu3  ;;  %v4160_v32 = vld [vmem:[%s4657_s5 + $0x13c] sm:$0xf] }
 0x198   : > { %v1806_v9 = vpop.f32.mrf.mxu1 }
 0x199   : > { %v1982_v55 = vadd.f32 %v1981_v39, %v1893_v59  ;;  %v1807_v4 = vadd.f32 %v1806_v9, %v4991_v10  ;;  %v3402_v59 = vor.u32 %v4165_v48, %v3401_v46 }
 0x19a   : > { %v2073_v16 = vpop.f32.mrf.mxu0 }
 0x19b   : > { %2121 = vmatmul.bf16.gmra.mxu1 %v3354_v62  ;;  %2210 = vmatmul.bf16.gmra.mxu2 %v3358_v40  ;;  %v5212_v19 = vadd.f32 %v2070_v34, %v1982_v55  ;;  %v3395_v34 = vld [vmem:[%s4657_s5 + $0x15c] sm:$0xf0] }
 0x19c   : > { %2299 = vmatmul.bf16.gmra.mxu3 %v3362_v7  ;;  %v3398_v38 = vor.u32 %v4160_v32, %v3395_v34 }
 0x19d   : > { %2388 = vmatmul.bf16.gmra.mxu0 %v3366_v45 }
 0x19e   : > { %v1895_v20 = vpop.f32.mrf.mxu2 }
 0x19f   : > { %v1896_v21 = vadd.f32 %v1895_v20, %v1807_v4  ;;  %v1984_v8 = vpop.f32.mrf.mxu3  ;;  %v4168_v20 = vld [vmem:[%s4657_s5 + $0x17c] sm:$0xf] }
 0x1a0   : > { %v1808_v18 = vpop.f32.mrf.mxu1 }
 0x1a1   : > { %v1985_v27 = vadd.f32 %v1984_v8, %v1896_v21  ;;  %v1809_v10 = vadd.f32 %v1808_v18, %v5012_v31  ;;  %v3423_v21 = vld [vmem:[%s4657_s5 + $0x19c] sm:$0xf0] }
 0x1a2   : > { %v2075_v22 = vpop.f32.mrf.mxu0  ;;  %v3429_v18 = vld [vmem:[%s4657_s5 + $0x180] sm:$0xf]  ;;  %v3426_v34 = vor.u32 %v4168_v20, %v3423_v21  ;;  %v3473_v20 = vld [vmem:[%s4657_s5 + $0x1d0] sm:$0xf]  ;;  %v4183_v21 = vld [vmem:[%s4657_s5 + $0x1f0] sm:$0xf0] }
 0x1a3   : > { %v5217_v37 = vadd.f32 %v2073_v16, %v1985_v27  ;;  %v4173_v27 = vld [vmem:[%s4657_s5 + $0x1a0] sm:$0xf0] }
 0x1a4   : > { %v3430_v46 = vor.u32 %v4173_v27, %v3429_v18 }
 0x1a6   : > { %v1897_v14 = vpop.f32.mrf.mxu2 }
 0x1a7   : > { %v1898_v50 = vadd.f32 %v1897_v14, %v1809_v10  ;;  %v1986_v3 = vpop.f32.mrf.mxu3  ;;  %v4169_v10 = vld [vmem:[%s4657_s5 + $0x184] sm:$0xf] }
 0x1a8   : > { %v1811_v54 = vpop.f32.mrf.mxu1 }
 0x1a9   : > { %v1987_v31 = vadd.f32 %v1986_v3, %v1898_v50  ;;  %v1812_v39 = vadd.f32 %v1811_v54, %v4886_v41  ;;  %v3438_v50 = vor.u32 %v4174_v33, %v3437_v26 }
 0x1aa   : > { %v2078_v62 = vpop.f32.mrf.mxu0 }
 0x1ab   : > { %2126 = vmatmul.bf16.gmra.mxu1 %v3390_v1  ;;  %2215 = vmatmul.bf16.gmra.mxu2 %v3394_v52  ;;  %v5226_v40 = vadd.f32 %v2075_v22, %v1987_v31  ;;  %v3431_v22 = vld [vmem:[%s4657_s5 + $0x1a4] sm:$0xf0] }
 0x1ac   : > { %2304 = vmatmul.bf16.gmra.mxu3 %v3398_v38  ;;  %v3434_v14 = vor.u32 %v4169_v10, %v3431_v22 }
 0x1ad   : > { %2393 = vmatmul.bf16.gmra.mxu0 %v3402_v59 }
 0x1ae   : > { %v1900_v9 = vpop.f32.mrf.mxu2 }
 0x1af   : > { %v1901_v7 = vadd.f32 %v1900_v9, %v1812_v39  ;;  %v1989_v45 = vpop.f32.mrf.mxu3  ;;  %v4177_v9 = vld [vmem:[%s4657_s5 + $0x1c4] sm:$0xf] }
 0x1b0   : > { %v1813_v55 = vpop.f32.mrf.mxu1 }
 0x1b1   : > { %v1990_v4 = vadd.f32 %v1989_v45, %v1901_v7  ;;  %v1814_v41 = vadd.f32 %v1813_v55, %v4911_v60  ;;  %v3459_v7 = vld [vmem:[%s4657_s5 + $0x1e4] sm:$0xf0] }
 0x1b2   : > { %v2080_v16 = vpop.f32.mrf.mxu0  ;;  %v3465_v55 = vld [vmem:[%s4657_s5 + $0x1c8] sm:$0xf]  ;;  %v3462_v22 = vor.u32 %v4177_v9, %v3459_v7  ;;  %v3509_v9 = vld [vmem:[%s4657_s5 + $0x218] sm:$0xf]  ;;  %v4192_v7 = vld [vmem:[%s4657_s5 + $0x238] sm:$0xf0] }
 0x1b3   : > { %v5231_v8 = vadd.f32 %v2078_v62, %v1990_v4  ;;  %v4182_v4 = vld [vmem:[%s4657_s5 + $0x1e8] sm:$0xf0] }
 0x1b4   : > { %v3466_v26 = vor.u32 %v4182_v4, %v3465_v55 }
 0x1b6   : > { %v1902_v56 = vpop.f32.mrf.mxu2 }
 0x1b7   : > { %v1903_v0 = vadd.f32 %v1902_v56, %v1814_v41  ;;  %v1991_v32 = vpop.f32.mrf.mxu3  ;;  %v4178_v41 = vld [vmem:[%s4657_s5 + $0x1cc] sm:$0xf] }
 0x1b8   : > { %v1816_v48 = vpop.f32.mrf.mxu1 }
 0x1b9   : > { %v1992_v60 = vadd.f32 %v1991_v32, %v1903_v0  ;;  %v1817_v3 = vadd.f32 %v1816_v48, %v4922_v5  ;;  %v3474_v0 = vor.u32 %v4183_v21, %v3473_v20 }
 0x1ba   : > { %v2083_v1 = vpop.f32.mrf.mxu0 }
 0x1bb   : > { %2131 = vmatmul.bf16.gmra.mxu1 %v3426_v34  ;;  %2220 = vmatmul.bf16.gmra.mxu2 %v3430_v46  ;;  %v5240_v52 = vadd.f32 %v2080_v16, %v1992_v60  ;;  %v3467_v16 = vld [vmem:[%s4657_s5 + $0x1ec] sm:$0xf0] }
 0x1bc   : > { %2309 = vmatmul.bf16.gmra.mxu3 %v3434_v14  ;;  %v3470_v56 = vor.u32 %v4178_v41, %v3467_v16 }
 0x1bd   : > { %2398 = vmatmul.bf16.gmra.mxu0 %v3438_v50 }
 0x1be   : > { %v1905_v54 = vpop.f32.mrf.mxu2 }
 0x1bf   : > { %v1906_v38 = vadd.f32 %v1905_v54, %v1817_v3  ;;  %v1994_v59 = vpop.f32.mrf.mxu3  ;;  %v4186_v54 = vld [vmem:[%s4657_s5 + $0x20c] sm:$0xf] }
 0x1c0   : > { %v1818_v31 = vpop.f32.mrf.mxu1 }
 0x1c1   : > { %v1995_v39 = vadd.f32 %v1994_v59, %v1906_v38  ;;  %v1819_v5 = vadd.f32 %v1818_v31, %v4941_v23  ;;  %v3495_v38 = vld [vmem:[%s4657_s5 + $0x22c] sm:$0xf0] }
 0x1c2   : > { %v2085_v62 = vpop.f32.mrf.mxu0  ;;  %v3501_v31 = vld [vmem:[%s4657_s5 + $0x210] sm:$0xf]  ;;  %v3498_v16 = vor.u32 %v4186_v54, %v3495_v38  ;;  %v3545_v54 = vld [vmem:[%s4657_s5 + $0x260] sm:$0xf]  ;;  %v4201_v38 = vld [vmem:[%s4657_s5 + $0x280] sm:$0xf0] }
 0x1c3   : > { %v5245_v45 = vadd.f32 %v2083_v1, %v1995_v39  ;;  %v4191_v39 = vld [vmem:[%s4657_s5 + $0x230] sm:$0xf0] }
 0x1c4   : > { %v3502_v20 = vor.u32 %v4191_v39, %v3501_v31 }
 0x1c6   : > { %v1907_v18 = vpop.f32.mrf.mxu2 }
 0x1c7   : > { %v1908_v27 = vadd.f32 %v1907_v18, %v1819_v5  ;;  %v1996_v10 = vpop.f32.mrf.mxu3  ;;  %v4187_v5 = vld [vmem:[%s4657_s5 + $0x214] sm:$0xf] }
 0x1c8   : > { %v1821_v33 = vpop.f32.mrf.mxu1 }
 0x1c9   : > { %v1997_v23 = vadd.f32 %v1996_v10, %v1908_v27  ;;  %v1822_v32 = vadd.f32 %v1821_v33, %v4958_v36  ;;  %v3510_v27 = vor.u32 %v4192_v7, %v3509_v9 }
 0x1ca   : > { %v2088_v34 = vpop.f32.mrf.mxu0 }
 0x1cb   : > { %2136 = vmatmul.bf16.gmra.mxu1 %v3462_v22  ;;  %2225 = vmatmul.bf16.gmra.mxu2 %v3466_v26  ;;  %v5254_v46 = vadd.f32 %v2085_v62, %v1997_v23  ;;  %v3503_v62 = vld [vmem:[%s4657_s5 + $0x234] sm:$0xf0] }
 0x1cc   : > { %2314 = vmatmul.bf16.gmra.mxu3 %v3470_v56  ;;  %v3506_v18 = vor.u32 %v4187_v5, %v3503_v62 }
 0x1cd   : > { %2403 = vmatmul.bf16.gmra.mxu0 %v3474_v0 }
 0x1ce   : > { %v1910_v48 = vpop.f32.mrf.mxu2 }
 0x1cf   : > { %v1911_v14 = vadd.f32 %v1910_v48, %v1822_v32  ;;  %v1999_v50 = vpop.f32.mrf.mxu3  ;;  %v4195_v48 = vld [vmem:[%s4657_s5 + $0x254] sm:$0xf] }
 0x1d0   : > { %v1823_v60 = vpop.f32.mrf.mxu1 }
 0x1d1   : > { %v2000_v3 = vadd.f32 %v1999_v50, %v1911_v14  ;;  %v1824_v36 = vadd.f32 %v1823_v60, %v4983_v61  ;;  %v3531_v14 = vld [vmem:[%s4657_s5 + $0x274] sm:$0xf0] }
 0x1d2   : > { %v2090_v1 = vpop.f32.mrf.mxu0  ;;  %v3537_v60 = vld [vmem:[%s4657_s5 + $0x258] sm:$0xf]  ;;  %v3534_v62 = vor.u32 %v4195_v48, %v3531_v14  ;;  %v3581_v14 = vld [vmem:[%s4657_s5 + $0x2a8] sm:$0xf] }
 0x1d3   : > { %v5259_v59 = vadd.f32 %v2088_v34, %v2000_v3  ;;  %v4200_v3 = vld [vmem:[%s4657_s5 + $0x278] sm:$0xf0] }
 0x1d4   : > { %v3538_v9 = vor.u32 %v4200_v3, %v3537_v60  ;;  %v4210_v60 = vld [vmem:[%s4657_s5 + $0x2c8] sm:$0xf0] }
 0x1d6   : > { %v1912_v55 = vpop.f32.mrf.mxu2 }
 0x1d7   : > { %v1913_v4 = vadd.f32 %v1912_v55, %v1824_v36  ;;  %v2001_v41 = vpop.f32.mrf.mxu3  ;;  %v4196_v36 = vld [vmem:[%s4657_s5 + $0x25c] sm:$0xf] }
 0x1d8   : > { %v1826_v21 = vpop.f32.mrf.mxu1 }
 0x1d9   : > { %v2002_v61 = vadd.f32 %v2001_v41, %v1913_v4  ;;  %v1827_v10 = vadd.f32 %v1826_v21, %v4994_v12  ;;  %v3546_v4 = vor.u32 %v4201_v38, %v3545_v54 }
 0x1da   : > { %v2093_v22 = vpop.f32.mrf.mxu0 }
 0x1db   : > { %2141 = vmatmul.bf16.gmra.mxu1 %v3498_v16  ;;  %2230 = vmatmul.bf16.gmra.mxu2 %v3502_v20  ;;  %v5268_v26 = vadd.f32 %v2090_v1, %v2002_v61  ;;  %v3539_v1 = vld [vmem:[%s4657_s5 + $0x27c] sm:$0xf0] }
 0x1dc   : > { %2319 = vmatmul.bf16.gmra.mxu3 %v3506_v18  ;;  %v3542_v55 = vor.u32 %v4196_v36, %v3539_v1 }
 0x1dd   : > { %2408 = vmatmul.bf16.gmra.mxu0 %v3510_v27 }
 0x1de   : > { %v1915_v33 = vpop.f32.mrf.mxu2 }
 0x1df   : > { %v1916_v56 = vadd.f32 %v1915_v33, %v1827_v10  ;;  %v2004_v0 = vpop.f32.mrf.mxu3 }
 0x1e0   : > { %v1828_v23 = vpop.f32.mrf.mxu1 }
 0x1e1   : > { %v2005_v32 = vadd.f32 %v2004_v0, %v1916_v56  ;;  %v1829_v12 = vadd.f32 %v1828_v23, %v5015_v43  ;;  %v4204_v56 = vld [vmem:[%s4657_s5 + $0x29c] sm:$0xf]  ;;  %v3567_v0 = vld [vmem:[%s4657_s5 + $0x2bc] sm:$0xf0] }
 0x1e2   : > { %v2095_v34 = vpop.f32.mrf.mxu0  ;;  %v3573_v23 = vld [vmem:[%s4657_s5 + $0x2a0] sm:$0xf]  ;;  %v3570_v54 = vor.u32 %v4204_v56, %v3567_v0  ;;  %v3603_v56 = vld [vmem:[%s4657_s5 + $0x304] sm:$0xf0] }
 0x1e3   : > { %v5273_v50 = vadd.f32 %v2093_v22, %v2005_v32  ;;  %v4209_v32 = vld [vmem:[%s4657_s5 + $0x2c0] sm:$0xf0]  ;;  %v3609_v0 = vld [vmem:[%s4657_s5 + $0x2e8] sm:$0xf] }
 0x1e4   : > { %v3574_v38 = vor.u32 %v4209_v32, %v3573_v23  ;;  %v4214_v23 = vld [vmem:[%s4657_s5 + $0x2ec] sm:$0xf]  ;;  %v3611_v32 = vld [vmem:[%s4657_s5 + $0x30c] sm:$0xf0] }
 0x1e6   : > { %v1917_v31 = vpop.f32.mrf.mxu2 }
 0x1e7   : > { %v1918_v39 = vadd.f32 %v1917_v31, %v1829_v12  ;;  %v2006_v5 = vpop.f32.mrf.mxu3  ;;  %v4205_v12 = vld [vmem:[%s4657_s5 + $0x2a4] sm:$0xf] }
 0x1e8   : > { %v2107_v7 = vpop.f32.mrf.mxu1 }
 0x1e9   : > { %v2007_v43 = vadd.f32 %v2006_v5, %v1918_v39  ;;  %v2108_v20 = vadd.f32 %v2107_v7, %v5033_v13  ;;  %v3582_v5 = vor.u32 %v4210_v60, %v3581_v14  ;;  %v4219_v14 = vld [vmem:[%s4657_s5 + $0x310] sm:$0xf0] }
 0x1ea   : > { %v2374_v41 = vpop.f32.mrf.mxu0 }
 0x1eb   : > { %2146 = vmatmul.bf16.gmra.mxu1 %v3534_v62  ;;  %2235 = vmatmul.bf16.gmra.mxu2 %v3538_v9  ;;  %v5281_v16 = vadd.f32 %v2095_v34, %v2007_v43  ;;  %v3575_v34 = vld [vmem:[%s4657_s5 + $0x2c4] sm:$0xf0] }
 0x1ec   : > { %2324 = vmatmul.bf16.gmra.mxu3 %v3542_v55  ;;  %v3578_v39 = vor.u32 %v4205_v12, %v3575_v34 }
 0x1ed   : > { %2413 = vmatmul.bf16.gmra.mxu0 %v3546_v4 }
 0x1ee   : > { %v2196_v21 = vpop.f32.mrf.mxu2 }
 0x1ef   : > { %v2197_v18 = vadd.f32 %v2196_v21, %v2108_v20  ;;  %v2285_v27 = vpop.f32.mrf.mxu3 }
 0x1f0   : > { %v2109_v61 = vpop.f32.mrf.mxu1 }
 0x1f1   : > { %v2286_v10 = vadd.f32 %v2285_v27, %v2197_v18  ;;  %v2110_v13 = vadd.f32 %v2109_v61, %v5043_v35 }
 0x1f2   : > { %v2376_v22 = vpop.f32.mrf.mxu0 }
 0x1f3   : > { %v5284_v33 = vadd.f32 %v2374_v41, %v2286_v10 }
 0x1f5   : > { %v4087_v48 = vmul.f32 -1.442695, %v5284_v33 }
 0x1f6   : > { %v2198_v3 = vpop.f32.mrf.mxu2 }
 0x1f7   : > { %4466 = vpow2.f32 %v4087_v48  ;;  %v2199_v36 = vadd.f32 %v2198_v3, %v2110_v13  ;;  %v2287_v1 = vpop.f32.mrf.mxu3  ;;  %v3617_v13 = vld [vmem:[%s4657_s5 + $0x2f0] sm:$0xf] }
 0x1f8   : > { %v2112_v31 = vpop.f32.mrf.mxu1 }
 0x1f9   : > { %v2288_v62 = vadd.f32 %v2287_v1, %v2199_v36  ;;  %v2113_v4 = vadd.f32 %v2112_v31, %v5049_v63  ;;  %v4218_v63 = vld [vmem:[%s4657_s5 + $0x308] sm:$0xf0] }
 0x1fa   : > { %v2379_v9 = vpop.f32.mrf.mxu0 }
 0x1fb   : > { %v5296_v7 = vadd.f32 %v2376_v22, %v2288_v62  ;;  %2151 = vmatmul.bf16.gmra.mxu1 %v3570_v54  ;;  %2240 = vmatmul.bf16.gmra.mxu2 %v3574_v38  ;;  %v4213_v22 = vld [vmem:[%s4657_s5 + $0x2e4] sm:$0xf]  ;;  %v3614_v62 = vor.u32 %v4214_v23, %v3611_v32  ;;  %v4222_v23 = vld [vmem:[%s4657_s5 + $0x32c] sm:$0xf] }
 0x1fc   : > { %2329 = vmatmul.bf16.gmra.mxu3 %v3578_v39  ;;  %v3606_v1 = vor.u32 %v4213_v22, %v3603_v56  ;;  %v3610_v39 = vor.u32 %v4218_v63, %v3609_v0 }
 0x1fd   : > { %2418 = vmatmul.bf16.gmra.mxu0 %v3582_v5  ;;  %v4467_v35 = vpop.eup %4466  ;;  %v4088_v55 = vmul.f32 -1.442695, %v5296_v7 }
 0x1fe   : > { %v5300_v43 = vadd.f32 1.0, %v4467_v35  ;;  %v2201_v41 = vpop.f32.mrf.mxu2 }
 0x1ff   : > { %4468 = vpow2.f32 %v4088_v55  ;;  %v2202_v20 = vadd.f32 %v2201_v41, %v2113_v4  ;;  %v2290_v21 = vpop.f32.mrf.mxu3 }
 0x200   : > { %4470 = vrcp.f32 %v5300_v43  ;;  %v2114_v18 = vpop.f32.mrf.mxu1  ;;  %v2593_v32 = vand.u32 2147483648, %v5300_v43  ;;  %vm2587_vm1 = vweird.f32 %v5300_v43 }
 0x201   : > { %v2291_v27 = vadd.f32 %v2290_v21, %v2202_v20  ;;  %v2115_v48 = vadd.f32 %v2114_v18, %v5059_v47  ;;  %v3618_v47 = vor.u32 %v4219_v14, %v3617_v13  ;;  %v2591_v13 = vand.u32 2147483647, %v5300_v43 }
 0x202   : > { %v2381_v61 = vpop.f32.mrf.mxu0 }
 0x203   : > { %v5303_v10 = vadd.f32 %v2379_v9, %v2291_v27  ;;  %vm2592_vm4 = vcmp.eq.f32.partialorder %v2591_v13, 8.507059e+37 }
 0x205   : > { %v4469_v12 = vpop.eup %4468  ;;  %v4089_v34 = vmul.f32 -1.442695, %v5303_v10 }
 0x206   : > { %v5315_v60 = vpop.eup %4470  ;;  %v5317_v3 = vadd.f32 1.0, %v4469_v12  ;;  %v2203_v36 = vpop.f32.mrf.mxu2 }
 0x207   : > { %v2583_v54 = vmul.f32 %v5315_v60, %v5300_v43  ;;  %4472 = vpow2.f32 %v4089_v34  ;;  %v2204_v38 = vadd.f32 %v2203_v36, %v2115_v48  ;;  %v2292_v31 = vpop.f32.mrf.mxu3  ;;  %vm2588_vm0 = vweird.f32 %v5315_v60  ;;  %v3639_v34 = vld [vmem:[%s4657_s5 + $0x34c] sm:$0xf0] }
 0x208   : > { %4474 = vrcp.f32 %v5317_v3  ;;  %v2117_v5 = vpop.f32.mrf.mxu1  ;;  %v3645_v48 = vld [vmem:[%s4657_s5 + $0x330] sm:$0xf]  ;;  %vm5342_vm2 = vmor %vm2587_vm1, %vm2588_vm0  ;;  %vm2602_vm5 = vweird.f32 %v5317_v3 }
 0x209   : > { %v2584_v9 = vsub.f32 1.0, %v2583_v54  ;;  %v2293_v35 = vadd.f32 %v2292_v31, %v2204_v38  ;;  %v2118_v0 = vadd.f32 %v2117_v5, %v5077_v2  ;;  %v4227_v54 = vld [vmem:[%s4657_s5 + $0x350] sm:$0xf0]  ;;  %v2606_v38 = vand.u32 2147483647, %v5317_v3 }
 0x20a   : > { %v2384_v55 = vpop.f32.mrf.mxu0  ;;  %v2608_v31 = vand.u32 2147483648, %v5317_v3 }
 0x20b   : > { %v2585_v4 = vmul.f32 %v5315_v60, %v2584_v9  ;;  %v5323_v41 = vadd.f32 %v2381_v61, %v2293_v35  ;;  %2156 = vmatmul.bf16.gmra.mxu1 %v3606_v1  ;;  %2245 = vmatmul.bf16.gmra.mxu2 %v3610_v39  ;;  %v2594_v9 = vor.u32 1.1754944e-38, %v2593_v32  ;;  %v3642_v35 = vor.u32 %v4222_v23, %v3639_v34 }
 0x20c   : > { %2334 = vmatmul.bf16.gmra.mxu3 %v3614_v62  ;;  %v4223_v62 = vld [vmem:[%s4657_s5 + $0x334] sm:$0xf]  ;;  %vm2607_vm7 = vcmp.eq.f32.partialorder %v2606_v38, 8.507059e+37 }
 0x20d   : > { %2423 = vmatmul.bf16.gmra.mxu0 %v3618_v47  ;;  %v4473_v20 = vpop.eup %4472  ;;  %v4090_v21 = vmul.f32 -1.442695, %v5323_v41  ;;  %v2586_v56 = vadd.f32 %v5315_v60, %v2585_v4  ;;  %v3647_v47 = vld [vmem:[%s4657_s5 + $0x354] sm:$0xf0]  ;;  %v3646_v4 = vor.u32 %v4227_v54, %v3645_v48 }
 0x20e   : > { %v4475_v18 = vpop.eup %4474  ;;  %v5327_v27 = vadd.f32 1.0, %v4473_v20  ;;  %v2206_v22 = vpop.f32.mrf.mxu2  ;;  %v3650_v32 = vor.u32 %v4223_v62, %v3647_v47 }
 0x20f   : > { %v2598_v61 = vmul.f32 %v4475_v18, %v5317_v3  ;;  %4476 = vpow2.f32 %v4090_v21  ;;  %v2295_v63 = vpop.f32.mrf.mxu3  ;;  %v2207_v36 = vadd.f32 %v2206_v22, %v2118_v0  ;;  %v2590_v43 = vsel %vm5342_vm2, %v5315_v60, %v2586_v56  ;;  %v4228_v0 = vld [vmem:[%s4657_s5 + $0x358] sm:$0xf0] }
 0x210   : > { %4478 = vrcp.f32 %v5327_v27  ;;  %v2119_v12 = vpop.f32.mrf.mxu1  ;;  %vm2603_vm3 = vweird.f32 %v4475_v18  ;;  %v2595_v60 = vsel %vm2592_vm4, %v2594_v9, %v2590_v43  ;;  %v2609_v56 = vor.u32 1.1754944e-38, %v2608_v31 }
 0x211   : > { %v2599_v14 = vsub.f32 1.0, %v2598_v61  ;;  %v2296_v5 = vadd.f32 %v2295_v63, %v2207_v36  ;;  %v3653_v61 = vld [vmem:[%s4657_s5 + $0x338] sm:$0xf]  ;;  %vm2604_vm6 = vmor %vm2602_vm5, %vm2603_vm3  ;;  %v3062_v31 = vmul.f32 %v2595_v60, %v5284_v33  ;;  %vm2617_vm9 = vweird.f32 %v5327_v27 }
 0x212   : > { %v2386_v1 = vpop.f32.mrf.mxu0  ;;  %v3654_v54 = vor.u32 %v4228_v0, %v3653_v61  ;;  %v2621_v61 = vand.u32 2147483647, %v5327_v27 }
 0x213   : > { %v2600_v39 = vmul.f32 %v4475_v18, %v2599_v14  ;;  %v5354_v22 = vadd.f32 %v2384_v55, %v2296_v5  ;;  %v2120_v14 = vadd.f32 %v2119_v12, %v5087_v28 }
 0x214   : > { %vm2622_vm12 = vcmp.eq.f32.partialorder %v2621_v61, 8.507059e+37 }
 0x215   : > { %v4477_v20 = vpop.eup %4476  ;;  %v2601_v21 = vadd.f32 %v4475_v18, %v2600_v39  ;;  %v4091_v55 = vmul.f32 -1.442695, %v5354_v22 }
 0x216   : > { %v5358_v2 = vpop.eup %4478  ;;  %v5361_v63 = vadd.f32 1.0, %v4477_v20  ;;  %v2208_v23 = vpop.f32.mrf.mxu2 }
 0x217   : > { %v2605_v34 = vsel %vm2604_vm6, %v4475_v18, %v2601_v21  ;;  %v2613_v3 = vmul.f32 %v5358_v2, %v5327_v27  ;;  %v2297_v48 = vpop.f32.mrf.mxu3  ;;  %v2209_v38 = vadd.f32 %v2208_v23, %v2120_v14  ;;  %vm2618_vm8 = vweird.f32 %v5358_v2 }
 0x218   : > { %v2610_v13 = vsel %vm2607_vm7, %v2609_v56, %v2605_v34  ;;  %4480 = vrcp.f32 %v5361_v63  ;;  %v2122_v36 = vpop.f32.mrf.mxu1  ;;  %vm5390_vm10 = vmor %vm2617_vm9, %vm2618_vm8  ;;  %vm2632_vm13 = vweird.f32 %v5361_v63 }
 0x219   : > { %v3063_v43 = vmul.f32 %v2610_v13, %v5296_v7  ;;  %v2614_v39 = vsub.f32 1.0, %v2613_v3  ;;  %4482 = vpow2.f32 %v4091_v55  ;;  %v2298_v28 = vadd.f32 %v2297_v48, %v2209_v38  ;;  %v4231_v48 = vld [vmem:[%s4657_s5 + $0x374] sm:$0xf] }
 0x21a   : > { %v2389_v18 = vpop.f32.mrf.mxu0  ;;  %v2123_v33 = vadd.f32 %v2122_v36, %v5093_v57  ;;  %v2623_v57 = vand.u32 2147483648, %v5327_v27  ;;  %v2636_v3 = vand.u32 2147483647, %v5361_v63  ;;  %v2638_v55 = vand.u32 2147483648, %v5361_v63  ;;  %v3675_v36 = vld [vmem:[%s4657_s5 + $0x394] sm:$0xf0] }
 0x21b   : > { %v4340_v5 = vpack.c.bf16 %v3063_v43, %v3062_v31  ;;  %v2615_v62 = vmul.f32 %v5358_v2, %v2614_v39  ;;  %2161 = vmatmul.bf16.gmra.mxu1 %v3642_v35  ;;  %2250 = vmatmul.bf16.gmra.mxu2 %v3646_v4  ;;  %v5381_v47 = vadd.f32 %v2386_v1, %v2298_v28  ;;  %v4236_v31 = vld [vmem:[%s4657_s5 + $0x398] sm:$0xf0]  ;;  %v3683_v39 = vld [vmem:[%s4657_s5 + $0x39c] sm:$0xf0] }
 0x21c   : > { %2339 = vmatmul.bf16.gmra.mxu3 %v3650_v32  ;;  %v2624_v43 = vor.u32 1.1754944e-38, %v2623_v57  ;;  %v3689_v28 = vld [vmem:[%s4657_s5 + $0x380] sm:$0xf]  ;;  %vm2637_vm15 = vcmp.eq.f32.partialorder %v2636_v3, 8.507059e+37 }
 0x21d   : > { %2428 = vmatmul.bf16.gmra.mxu0 %v3654_v54  ;;  %4341 = vst [vmem:[%s5374_s22] sm:$0xff] %v4340_v5   ;;  %v2616_v12 = vadd.f32 %v5358_v2, %v2615_v62  ;;  %v4092_v60 = vmul.f32 -1.442695, %v5381_v47  ;;  %v3681_v54 = vld [vmem:[%s4657_s5 + $0x378] sm:$0xf] }
 0x21e   : > { %v4481_v7 = vpop.eup %4480  ;;  %v2211_v9 = vpop.f32.mrf.mxu2 }
 0x21f   : > { %v4483_v20 = vpop.eup %4482  ;;  %v2628_v35 = vmul.f32 %v4481_v7, %v5361_v63  ;;  %v2212_v4 = vadd.f32 %v2211_v9, %v2123_v33  ;;  %v2300_v21 = vpop.f32.mrf.mxu3  ;;  %v2620_v27 = vsel %vm5390_vm10, %v5358_v2, %v2616_v12  ;;  %vm2633_vm11 = vweird.f32 %v4481_v7  ;;  %v4232_v2 = vld [vmem:[%s4657_s5 + $0x37c] sm:$0xf]  ;;  %v4237_v33 = vld [vmem:[%s4657_s5 + $0x3a0] sm:$0xf0] }
 0x220   : > { %v5387_v0 = vadd.f32 1.0, %v4483_v20  ;;  %v2124_v1 = vpop.f32.mrf.mxu1  ;;  %v2625_v12 = vsel %vm2622_vm12, %v2624_v43, %v2620_v27  ;;  %vm2634_vm14 = vmor %vm2632_vm13, %vm2633_vm11  ;;  %v3678_v20 = vor.u32 %v4231_v48, %v3675_v36  ;;  %v3686_v56 = vor.u32 %v4232_v2, %v3683_v39 }
 0x221   : > { %v2629_v23 = vsub.f32 1.0, %v2628_v35  ;;  %v2301_v32 = vadd.f32 %v2300_v21, %v2212_v4  ;;  %v2125_v62 = vadd.f32 %v2124_v1, %v5102_v29  ;;  %v3682_v35 = vor.u32 %v4236_v31, %v3681_v54 }
 0x222   : > { %v2391_v34 = vpop.f32.mrf.mxu0  ;;  %4484 = vrcp.f32 %v5387_v0  ;;  %v3690_v29 = vor.u32 %v4237_v33, %v3689_v28  ;;  %vm2647_vm1 = vweird.f32 %v5387_v0 }
 0x223   : > { %v2630_v13 = vmul.f32 %v4481_v7, %v2629_v23  ;;  %4486 = vpow2.f32 %v4092_v60  ;;  %v5401_v14 = vadd.f32 %v2389_v18, %v2301_v32  ;;  %v2639_v18 = vor.u32 1.1754944e-38, %v2638_v55 }
 0x224   : > { %v3064_v23 = vmul.f32 %v2625_v12, %v5303_v10  ;;  %v4245_v12 = vld [vmem:[%s4657_s5 + $0x3e0] sm:$0xf0] }
 0x225   : > { %v2631_v38 = vadd.f32 %v4481_v7, %v2630_v13  ;;  %v4093_v5 = vmul.f32 -1.442695, %v5401_v14 }
 0x226   : > { %v2213_v9 = vpop.f32.mrf.mxu2 }
 0x227   : > { %v2635_v4 = vsel %vm2634_vm14, %v4481_v7, %v2631_v38  ;;  %4488 = vpow2.f32 %v4093_v5  ;;  %v2214_v21 = vadd.f32 %v2213_v9, %v2125_v62  ;;  %v2302_v61 = vpop.f32.mrf.mxu3  ;;  %v4240_v5 = vld [vmem:[%s4657_s5 + $0x3bc] sm:$0xf]  ;;  %v3711_v62 = vld [vmem:[%s4657_s5 + $0x3dc] sm:$0xf0] }
 0x228   : > { %v5414_v57 = vpop.eup %4484  ;;  %v2640_v63 = vsel %vm2637_vm15, %v2639_v18, %v2635_v4  ;;  %v2127_v60 = vpop.f32.mrf.mxu1 }
 0x229   : > { %v4487_v1 = vpop.eup %4486  ;;  %v3065_v32 = vmul.f32 %v2640_v63, %v5323_v41  ;;  %v2643_v27 = vmul.f32 %v5414_v57, %v5387_v0  ;;  %v2303_v7 = vadd.f32 %v2302_v61, %v2214_v21  ;;  %v2128_v54 = vadd.f32 %v2127_v60, %v5119_v53  ;;  %v3717_v53 = vld [vmem:[%s4657_s5 + $0x3c0] sm:$0xf]  ;;  %v3725_v63 = vld [vmem:[%s4657_s5 + $0x3c8] sm:$0xf] }
 0x22a   : > { %v2394_v3 = vpop.f32.mrf.mxu0  ;;  %v5420_v55 = vadd.f32 1.0, %v4487_v1  ;;  %vm2648_vm0 = vweird.f32 %v5414_v57  ;;  %v3714_v61 = vor.u32 %v4240_v5, %v3711_v62  ;;  %v2651_v60 = vand.u32 2147483647, %v5387_v0  ;;  %v4246_v1 = vld [vmem:[%s4657_s5 + $0x3e8] sm:$0xf0] }
 0x22b   : > { %v4345_v48 = vpack.c.bf16 %v3065_v32, %v3064_v23  ;;  %v2644_v13 = vsub.f32 1.0, %v2643_v27  ;;  %v5422_v36 = vadd.f32 %v2391_v34, %v2303_v7  ;;  %2166 = vmatmul.bf16.gmra.mxu1 %v3678_v20  ;;  %2255 = vmatmul.bf16.gmra.mxu2 %v3682_v35  ;;  %v4241_v20 = vld [vmem:[%s4657_s5 + $0x3c4] sm:$0xf]  ;;  %v3719_v35 = vld [vmem:[%s4657_s5 + $0x3e4] sm:$0xf0]  ;;  %vm5448_vm2 = vmor %vm2647_vm1, %vm2648_vm0 }
 0x22c   : > { %4490 = vrcp.f32 %v5420_v55  ;;  %2344 = vmatmul.bf16.gmra.mxu3 %v3686_v56  ;;  %v2653_v56 = vand.u32 2147483648, %v5387_v0  ;;  %v2666_v7 = vand.u32 2147483647, %v5420_v55  ;;  %v2668_v0 = vand.u32 2147483648, %v5420_v55 }
 0x22d   : > { %2433 = vmatmul.bf16.gmra.mxu0 %v3690_v29  ;;  %v4489_v10 = vpop.eup %4488  ;;  %4417 = vst [vmem:[%s5374_s22 + $0x8] sm:$0xff] %v4345_v48   ;;  %v4094_v41 = vmul.f32 -1.442695, %v5422_v36  ;;  %v2645_v31 = vmul.f32 %v5414_v57, %v2644_v13  ;;  %v3718_v29 = vor.u32 %v4245_v12, %v3717_v53  ;;  %v3722_v48 = vor.u32 %v4241_v20, %v3719_v35 }
 0x22e   : > { %v5429_v34 = vadd.f32 1.0, %v4489_v10  ;;  %v2216_v43 = vpop.f32.mrf.mxu2  ;;  %vm2652_vm4 = vcmp.eq.f32.partialorder %v2651_v60, 8.507059e+37  ;;  %v2654_v5 = vor.u32 1.1754944e-38, %v2653_v56  ;;  %vm2662_vm5 = vweird.f32 %v5420_v55 }
 0x22f   : > { %4492 = vpow2.f32 %v4094_v41  ;;  %v2217_v2 = vadd.f32 %v2216_v43, %v2128_v54  ;;  %v2305_v39 = vpop.f32.mrf.mxu3  ;;  %v2646_v9 = vadd.f32 %v5414_v57, %v2645_v31  ;;  %vm2667_vm7 = vcmp.eq.f32.partialorder %v2666_v7, 8.507059e+37 }
 0x230   : > { %4494 = vrcp.f32 %v5429_v34  ;;  %v2129_v38 = vpop.f32.mrf.mxu1  ;;  %vm2677_vm9 = vweird.f32 %v5429_v34 }
 0x231   : > { %v2306_v28 = vadd.f32 %v2305_v39, %v2217_v2  ;;  %v2650_v10 = vsel %vm5448_vm2, %v5414_v57, %v2646_v9  ;;  %v2130_v54 = vadd.f32 %v2129_v38, %v5128_v24  ;;  %v3726_v57 = vor.u32 %v4246_v1, %v3725_v63 }
 0x232   : > { %v2396_v33 = vpop.f32.mrf.mxu0  ;;  %v4491_v18 = vpop.eup %4490  ;;  %v2655_v38 = vsel %vm2652_vm4, %v2654_v5, %v2650_v10  ;;  %v2669_v9 = vor.u32 1.1754944e-38, %v2668_v0  ;;  %v2681_v10 = vand.u32 2147483647, %v5429_v34 }
 0x233   : > { %v2658_v4 = vmul.f32 %v4491_v18, %v5420_v55  ;;  %v5441_v21 = vadd.f32 %v2394_v3, %v2306_v28  ;;  %vm2663_vm3 = vweird.f32 %v4491_v18  ;;  %v3066_v55 = vmul.f32 %v2655_v38, %v5354_v22  ;;  %v4250_v38 = vld [vmem:[%s4657_s5 + $0x40c] sm:$0xf] }
 0x234   : > { %vm2664_vm6 = vmor %vm2662_vm5, %vm2663_vm3  ;;  %v2683_v22 = vand.u32 2147483648, %v5429_v34  ;;  %vm2682_vm12 = vcmp.eq.f32.partialorder %v2681_v10, 8.507059e+37 }
 0x235   : > { %v4493_v23 = vpop.eup %4492  ;;  %v2659_v27 = vsub.f32 1.0, %v2658_v4  ;;  %v4095_v3 = vmul.f32 -1.442695, %v5441_v21 }
 0x236   : > { %v5454_v13 = vpop.eup %4494  ;;  %v5460_v41 = vadd.f32 1.0, %v4493_v23  ;;  %v2218_v31 = vpop.f32.mrf.mxu2 }
 0x237   : > { %v2660_v43 = vmul.f32 %v4491_v18, %v2659_v27  ;;  %v2673_v2 = vmul.f32 %v5454_v13, %v5429_v34  ;;  %4496 = vpow2.f32 %v4095_v3  ;;  %v2307_v39 = vpop.f32.mrf.mxu3  ;;  %v2219_v12 = vadd.f32 %v2218_v31, %v2130_v54  ;;  %v4249_v3 = vld [vmem:[%s4657_s5 + $0x404] sm:$0xf] }
 0x238   : > { %4498 = vrcp.f32 %v5460_v41  ;;  %v2132_v62 = vpop.f32.mrf.mxu1  ;;  %vm2678_vm8 = vweird.f32 %v5454_v13  ;;  %vm2692_vm13 = vweird.f32 %v5460_v41 }
 0x239   : > { %v2661_v28 = vadd.f32 %v4491_v18, %v2660_v43  ;;  %v2674_v53 = vsub.f32 1.0, %v2673_v2  ;;  %v2308_v4 = vadd.f32 %v2307_v39, %v2219_v12  ;;  %vm5489_vm10 = vmor %vm2677_vm9, %vm2678_vm8  ;;  %v2696_v43 = vand.u32 2147483647, %v5460_v41 }
 0x23a   : > { %v2399_v24 = vpop.f32.mrf.mxu0  ;;  %v2698_v2 = vand.u32 2147483648, %v5460_v41 }
 0x23b   : > { %v2665_v20 = vsel %vm2664_vm6, %v4491_v18, %v2661_v28  ;;  %v2675_v35 = vmul.f32 %v5454_v13, %v2674_v53  ;;  %2171 = vmatmul.bf16.gmra.mxu1 %v3714_v61  ;;  %2260 = vmatmul.bf16.gmra.mxu2 %v3718_v29  ;;  %v5471_v1 = vadd.f32 %v2396_v33, %v2308_v4  ;;  %v2684_v28 = vor.u32 1.1754944e-38, %v2683_v22  ;;  %v3761_v4 = vld [vmem:[%s4657_s5 + $0x410] sm:$0xf] }
 0x23c   : > { %v2670_v60 = vsel %vm2667_vm7, %v2669_v9, %v2665_v20  ;;  %2349 = vmatmul.bf16.gmra.mxu3 %v3722_v48  ;;  %v3747_v48 = vld [vmem:[%s4657_s5 + $0x424] sm:$0xf0]  ;;  %v3755_v9 = vld [vmem:[%s4657_s5 + $0x42c] sm:$0xf0]  ;;  %vm2697_vm15 = vcmp.eq.f32.partialorder %v2696_v43, 8.507059e+37 }
 0x23d   : > { %2438 = vmatmul.bf16.gmra.mxu0 %v3726_v57  ;;  %v4497_v63 = vpop.eup %4496  ;;  %v3067_v56 = vmul.f32 %v2670_v60, %v5381_v47  ;;  %v2676_v61 = vadd.f32 %v5454_v13, %v2675_v35  ;;  %v2133_v47 = vadd.f32 %v2132_v62, %v5133_v6  ;;  %v4096_v54 = vmul.f32 -1.442695, %v5471_v1  ;;  %v3753_v62 = vld [vmem:[%s4657_s5 + $0x408] sm:$0xf]  ;;  %v4254_v57 = vld [vmem:[%s4657_s5 + $0x428] sm:$0xf0] }
 0x23e   : > { %v4499_v18 = vpop.eup %4498  ;;  %v5473_v23 = vadd.f32 1.0, %v4497_v63  ;;  %v2221_v32 = vpop.f32.mrf.mxu2  ;;  %v3750_v12 = vor.u32 %v4249_v3, %v3747_v48  ;;  %v4255_v60 = vld [vmem:[%s4657_s5 + $0x430] sm:$0xf0] }
 0x23f   : > { %v4350_v27 = vpack.c.bf16 %v3067_v56, %v3066_v55  ;;  %v2688_v29 = vmul.f32 %v4499_v18, %v5460_v41  ;;  %v2310_v7 = vpop.f32.mrf.mxu3  ;;  %v2222_v39 = vadd.f32 %v2221_v32, %v2133_v47  ;;  %v2680_v34 = vsel %vm5489_vm10, %v5454_v13, %v2676_v61 }
 0x240   : > { %4500 = vrcp.f32 %v5473_v23  ;;  %v2134_v33 = vpop.f32.mrf.mxu1  ;;  %vm2693_vm11 = vweird.f32 %v4499_v18  ;;  %v2685_v63 = vsel %vm2682_vm12, %v2684_v28, %v2680_v34  ;;  %v2699_v55 = vor.u32 1.1754944e-38, %v2698_v2 }
 0x241   : > { %4418 = vst [vmem:[%s5374_s22 + $0x10] sm:$0xff] %v4350_v27   ;;  %v2689_v0 = vsub.f32 1.0, %v2688_v29  ;;  %4502 = vpow2.f32 %v4096_v54  ;;  %v2311_v53 = vadd.f32 %v2310_v7, %v2222_v39  ;;  %v2135_v35 = vadd.f32 %v2134_v33, %v5142_v17  ;;  %vm2694_vm14 = vmor %vm2692_vm13, %vm2693_vm11 }
 0x242   : > { %v2401_v31 = vpop.f32.mrf.mxu0  ;;  %v3754_v27 = vor.u32 %v4254_v57, %v3753_v62  ;;  %v3758_v33 = vor.u32 %v4250_v38, %v3755_v9  ;;  %v3762_v3 = vor.u32 %v4255_v60, %v3761_v4  ;;  %v4258_v62 = vld [vmem:[%s4657_s5 + $0x44c] sm:$0xf]  ;;  %v3783_v57 = vld [vmem:[%s4657_s5 + $0x46c] sm:$0xf0]  ;;  %v4259_v60 = vld [vmem:[%s4657_s5 + $0x454] sm:$0xf]  ;;  %vm2707_vm1 = vweird.f32 %v5473_v23 }
 0x243   : > { %v2690_v5 = vmul.f32 %v4499_v18, %v2689_v0  ;;  %v5509_v56 = vadd.f32 %v2399_v24, %v2311_v53  ;;  %v3068_v24 = vmul.f32 %v2685_v63, %v5401_v14  ;;  %v3791_v63 = vld [vmem:[%s4657_s5 + $0x474] sm:$0xf0] }
 0x245   : > { %v2691_v20 = vadd.f32 %v4499_v18, %v2690_v5  ;;  %v4097_v22 = vmul.f32 -1.442695, %v5509_v56 }
 0x246   : > { %v5506_v13 = vpop.eup %4500  ;;  %v2223_v32 = vpop.f32.mrf.mxu2 }
 0x247   : > { %v2695_v61 = vsel %vm2694_vm14, %v4499_v18, %v2691_v20  ;;  %v2703_v29 = vmul.f32 %v5506_v13, %v5473_v23  ;;  %v2224_v41 = vadd.f32 %v2223_v32, %v2135_v35  ;;  %v2312_v7 = vpop.f32.mrf.mxu3  ;;  %v4503_v48 = vpop.eup %4502  ;;  %4504 = vpow2.f32 %v4097_v22  ;;  %v3789_v20 = vld [vmem:[%s4657_s5 + $0x450] sm:$0xf]  ;;  %v4263_v35 = vld [vmem:[%s4657_s5 + $0x470] sm:$0xf0] }
 0x248   : > { %v2700_v17 = vsel %vm2697_vm15, %v2699_v55, %v2695_v61  ;;  %v2137_v47 = vpop.f32.mrf.mxu1  ;;  %v5516_v54 = vadd.f32 1.0, %v4503_v48  ;;  %vm2708_vm0 = vweird.f32 %v5506_v13  ;;  %v2713_v61 = vand.u32 2147483648, %v5473_v23 }
 0x249   : > { %v3069_v10 = vmul.f32 %v2700_v17, %v5422_v36  ;;  %v2313_v0 = vadd.f32 %v2312_v7, %v2224_v41  ;;  %v2704_v43 = vsub.f32 1.0, %v2703_v29  ;;  %v2138_v36 = vadd.f32 %v2137_v47, %v5147_v30  ;;  %vm5545_vm2 = vmor %vm2707_vm1, %vm2708_vm0 }
 0x24a   : > { %v2404_v18 = vpop.f32.mrf.mxu0  ;;  %4506 = vrcp.f32 %v5516_v54  ;;  %v3786_v30 = vor.u32 %v4258_v62, %v3783_v57  ;;  %v3790_v41 = vor.u32 %v4263_v35, %v3789_v20  ;;  %v3794_v47 = vor.u32 %v4259_v60, %v3791_v63 }
 0x24b   : > { %v4355_v6 = vpack.c.bf16 %v3069_v10, %v3068_v24  ;;  %v5518_v2 = vadd.f32 %v2401_v31, %v2313_v0  ;;  %2176 = vmatmul.bf16.gmra.mxu1 %v3750_v12  ;;  %2265 = vmatmul.bf16.gmra.mxu2 %v3754_v27  ;;  %v2705_v34 = vmul.f32 %v5506_v13, %v2704_v43  ;;  %v2711_v27 = vand.u32 2147483647, %v5473_v23 }
 0x24c   : > { %2354 = vmatmul.bf16.gmra.mxu3 %v3758_v33  ;;  %v3797_v33 = vld [vmem:[%s4657_s5 + $0x458] sm:$0xf]  ;;  %v2726_v24 = vand.u32 2147483647, %v5516_v54  ;;  %v2728_v10 = vand.u32 2147483648, %v5516_v54  ;;  %vm2722_vm5 = vweird.f32 %v5516_v54 }
 0x24d   : > { %2443 = vmatmul.bf16.gmra.mxu0 %v3762_v3  ;;  %4419 = vst [vmem:[%s5374_s22 + $0x18] sm:$0xff] %v4355_v6   ;;  %v4098_v14 = vmul.f32 -1.442695, %v5518_v2  ;;  %v4505_v28 = vpop.eup %4504  ;;  %v2706_v55 = vadd.f32 %v5506_v13, %v2705_v34  ;;  %v4264_v3 = vld [vmem:[%s4657_s5 + $0x478] sm:$0xf0]  ;;  %vm2712_vm4 = vcmp.eq.f32.partialorder %v2711_v27, 8.507059e+37 }
 0x24e   : > { %v2226_v39 = vpop.f32.mrf.mxu2  ;;  %v5527_v12 = vadd.f32 1.0, %v4505_v28  ;;  %v3798_v34 = vor.u32 %v4264_v3, %v3797_v33  ;;  %vm2727_vm7 = vcmp.eq.f32.partialorder %v2726_v24, 8.507059e+37 }
 0x24f   : > { %4508 = vpow2.f32 %v4098_v14  ;;  %v2227_v31 = vadd.f32 %v2226_v39, %v2138_v36  ;;  %v2315_v5 = vpop.f32.mrf.mxu3  ;;  %v2714_v36 = vor.u32 1.1754944e-38, %v2713_v61 }
 0x250   : > { %v2139_v53 = vpop.f32.mrf.mxu1  ;;  %v4507_v4 = vpop.eup %4506  ;;  %4510 = vrcp.f32 %v5527_v12  ;;  %vm2737_vm9 = vweird.f32 %v5527_v12 }
 0x251   : > { %v2316_v38 = vadd.f32 %v2315_v5, %v2227_v31  ;;  %v2718_v32 = vmul.f32 %v4507_v4, %v5516_v54  ;;  %v2140_v22 = vadd.f32 %v2139_v53, %v5156_v44  ;;  %v2710_v44 = vsel %vm5545_vm2, %v5506_v13, %v2706_v55 }
 0x252   : > { %v2406_v9 = vpop.f32.mrf.mxu0  ;;  %vm2723_vm3 = vweird.f32 %v4507_v4  ;;  %v2715_v28 = vsel %vm2712_vm4, %v2714_v36, %v2710_v44  ;;  %v2729_v13 = vor.u32 1.1754944e-38, %v2728_v10 }
 0x253   : > { %v5539_v29 = vadd.f32 %v2404_v18, %v2316_v38  ;;  %v2719_v17 = vsub.f32 1.0, %v2718_v32  ;;  %vm2724_vm6 = vmor %vm2722_vm5, %vm2723_vm3  ;;  %v3070_v54 = vmul.f32 %v2715_v28, %v5441_v21 }
 0x255   : > { %v4509_v7 = vpop.eup %4508  ;;  %v4099_v18 = vmul.f32 -1.442695, %v5539_v29  ;;  %v2720_v23 = vmul.f32 %v4507_v4, %v2719_v17 }
 0x256   : > { %v5551_v0 = vadd.f32 1.0, %v4509_v7  ;;  %v2228_v6 = vpop.f32.mrf.mxu2  ;;  %v4511_v31 = vpop.eup %4510 }
 0x257   : > { %v2229_v43 = vadd.f32 %v2228_v6, %v2140_v22  ;;  %v2317_v14 = vpop.f32.mrf.mxu3  ;;  %v2721_v5 = vadd.f32 %v4507_v4, %v2720_v23  ;;  %v2733_v53 = vmul.f32 %v4511_v31, %v5527_v12  ;;  %vm2738_vm8 = vweird.f32 %v4511_v31 }
 0x258   : > { %4512 = vrcp.f32 %v5551_v0  ;;  %v2142_v39 = vpop.f32.mrf.mxu1  ;;  %vm5574_vm10 = vmor %vm2737_vm9, %vm2738_vm8  ;;  %v2756_v24 = vand.u32 2147483647, %v5551_v0  ;;  %v2758_v10 = vand.u32 2147483648, %v5551_v0  ;;  %vm2752_vm13 = vweird.f32 %v5551_v0 }
 0x259   : > { %4514 = vpow2.f32 %v4099_v18  ;;  %v2318_v62 = vadd.f32 %v2317_v14, %v2229_v43  ;;  %v2725_v38 = vsel %vm2724_vm6, %v4507_v4, %v2721_v5  ;;  %v2734_v60 = vsub.f32 1.0, %v2733_v53 }
 0x25a   : > { %v2409_v57 = vpop.f32.mrf.mxu0  ;;  %v2730_v35 = vsel %vm2727_vm7, %v2729_v13, %v2725_v38  ;;  %v2741_v4 = vand.u32 2147483647, %v5527_v12  ;;  %vm2757_vm15 = vcmp.eq.f32.partialorder %v2756_v24, 8.507059e+37 }
 0x25b   : > { %v5561_v20 = vadd.f32 %v2406_v9, %v2318_v62  ;;  %2181 = vmatmul.bf16.gmra.mxu1 %v3786_v30  ;;  %2270 = vmatmul.bf16.gmra.mxu2 %v3790_v41  ;;  %v3071_v63 = vmul.f32 %v2730_v35, %v5471_v1  ;;  %v2735_v27 = vmul.f32 %v4511_v31, %v2734_v60  ;;  %v2743_v1 = vand.u32 2147483648, %v5527_v12 }
 0x25c   : > { %2359 = vmatmul.bf16.gmra.mxu3 %v3794_v47  ;;  %v2143_v9 = vadd.f32 %v2142_v39, %v5161_v15  ;;  %vm2742_vm12 = vcmp.eq.f32.partialorder %v2741_v4, 8.507059e+37 }
 0x25d   : > { %2448 = vmatmul.bf16.gmra.mxu0 %v3798_v34  ;;  %v4100_v55 = vmul.f32 -1.442695, %v5561_v20  ;;  %v4360_v41 = vpack.c.bf16 %v3071_v63, %v3070_v54  ;;  %v2736_v21 = vadd.f32 %v4511_v31, %v2735_v27  ;;  %v2744_v12 = vor.u32 1.1754944e-38, %v2743_v1 }
 0x25e   : > { %v4513_v32 = vpop.eup %4512  ;;  %v2231_v61 = vpop.f32.mrf.mxu2  ;;  %v2759_v34 = vor.u32 1.1754944e-38, %v2758_v10 }
 0x25f   : > { %v4515_v30 = vpop.eup %4514  ;;  %v2748_v7 = vmul.f32 %v4513_v32, %v5551_v0  ;;  %4516 = vpow2.f32 %v4100_v55  ;;  %v2320_v17 = vpop.f32.mrf.mxu3  ;;  %v2232_v47 = vadd.f32 %v2231_v61, %v2143_v9  ;;  %4420 = vst [vmem:[%s5374_s22 + $0x20] sm:$0xff] %v4360_v41   ;;  %v2740_v18 = vsel %vm5574_vm10, %v4511_v31, %v2736_v21 }
 0x260   : > { %v5570_v22 = vadd.f32 1.0, %v4515_v30  ;;  %v2144_v33 = vpop.f32.mrf.mxu1  ;;  %vm2753_vm11 = vweird.f32 %v4513_v32  ;;  %v2745_v39 = vsel %vm2742_vm12, %v2744_v12, %v2740_v18 }
 0x261   : > { %v2749_v3 = vsub.f32 1.0, %v2748_v7  ;;  %v2321_v44 = vadd.f32 %v2320_v17, %v2232_v47  ;;  %v2145_v36 = vadd.f32 %v2144_v33, %v5170_v51  ;;  %vm2754_vm14 = vmor %vm2752_vm13, %vm2753_vm11 }
 0x262   : > { %v2411_v15 = vpop.f32.mrf.mxu0  ;;  %4518 = vrcp.f32 %v5570_v22  ;;  %vm2767_vm1 = vweird.f32 %v5570_v22  ;;  %v2773_v1 = vand.u32 2147483648, %v5570_v22  ;;  %v2771_v33 = vand.u32 2147483647, %v5570_v22 }
 0x263   : > { %v2750_v6 = vmul.f32 %v4513_v32, %v2749_v3  ;;  %v5584_v14 = vadd.f32 %v2409_v57, %v2321_v44  ;;  %v3072_v57 = vmul.f32 %v2745_v39, %v5509_v56 }
 0x264   : > { %v2774_v44 = vor.u32 1.1754944e-38, %v2773_v1  ;;  %vm2772_vm4 = vcmp.eq.f32.partialorder %v2771_v33, 8.507059e+37 }
 0x265   : > { %v4517_v23 = vpop.eup %4516  ;;  %v2751_v43 = vadd.f32 %v4513_v32, %v2750_v6  ;;  %v4101_v31 = vmul.f32 -1.442695, %v5584_v14 }
 0x266   : > { %v2563_v5 = vadd.f32 1.0, %v4517_v23  ;;  %v2233_v62 = vpop.f32.mrf.mxu2 }
 0x267   : > { %v2755_v28 = vsel %vm2754_vm14, %v4513_v32, %v2751_v43  ;;  %v2234_v13 = vadd.f32 %v2233_v62, %v2145_v36  ;;  %v2322_v53 = vpop.f32.mrf.mxu3 }
 0x268   : > { %v4519_v38 = vpop.eup %4518  ;;  %v2760_v35 = vsel %vm2757_vm15, %v2759_v34, %v2755_v28  ;;  %4520 = vrcp.f32 %v2563_v5  ;;  %v2147_v0 = vpop.f32.mrf.mxu1  ;;  %v2786_v24 = vand.u32 2147483647, %v2563_v5  ;;  %v2788_v10 = vand.u32 2147483648, %v2563_v5 }
 0x269   : > { %v3073_v51 = vmul.f32 %v2760_v35, %v5518_v2  ;;  %v2763_v60 = vmul.f32 %v4519_v38, %v5570_v22  ;;  %4522 = vpow2.f32 %v4101_v31  ;;  %v2323_v63 = vadd.f32 %v2322_v53, %v2234_v13 }
 0x26a   : > { %v2414_v54 = vpop.f32.mrf.mxu0  ;;  %v2148_v9 = vadd.f32 %v2147_v0, %v5175_v11  ;;  %vm2768_vm0 = vweird.f32 %v4519_v38  ;;  %vm2782_vm5 = vweird.f32 %v2563_v5  ;;  %v2789_v39 = vor.u32 1.1754944e-38, %v2788_v10 }
 0x26b   : > { %v4365_v55 = vpack.c.bf16 %v3073_v51, %v3072_v57  ;;  %v2764_v32 = vsub.f32 1.0, %v2763_v60  ;;  %v5591_v27 = vadd.f32 %v2411_v15, %v2323_v63  ;;  %vm2769_vm2 = vmor %vm2767_vm1, %vm2768_vm0  ;;  %vm2787_vm7 = vcmp.eq.f32.partialorder %v2786_v24, 8.507059e+37 }
 0x26d   : > { %4421 = vst [vmem:[%s5374_s22 + $0x28] sm:$0xff] %v4365_v55   ;;  %v2765_v4 = vmul.f32 %v4519_v38, %v2764_v32  ;;  %v4102_v30 = vmul.f32 -1.442695, %v5591_v27 }
 0x26e   : > { %v4521_v61 = vpop.eup %4520  ;;  %v2236_v41 = vpop.f32.mrf.mxu2 }
 0x26f   : > { %v2766_v56 = vadd.f32 %v4519_v38, %v2765_v4  ;;  %v2778_v2 = vmul.f32 %v4521_v61, %v2563_v5  ;;  %v2237_v7 = vadd.f32 %v2236_v41, %v2148_v9  ;;  %v2325_v17 = vpop.f32.mrf.mxu3  ;;  %v4523_v21 = vpop.eup %4522  ;;  %4524 = vpow2.f32 %v4102_v30 }
 0x270   : > { %v2149_v47 = vpop.f32.mrf.mxu1  ;;  %v5599_v11 = vadd.f32 1.0, %v4523_v21  ;;  %vm2783_vm3 = vweird.f32 %v4521_v61 }
 0x271   : > { %v2779_v3 = vsub.f32 1.0, %v2778_v2  ;;  %v2326_v15 = vadd.f32 %v2325_v17, %v2237_v7  ;;  %v2770_v18 = vsel %vm2769_vm2, %v4519_v38, %v2766_v56  ;;  %v2150_v22 = vadd.f32 %v2149_v47, %v5184_v42  ;;  %vm2784_vm6 = vmor %vm2782_vm5, %vm2783_vm3 }
 0x272   : > { %v2416_v48 = vpop.f32.mrf.mxu0  ;;  %4526 = vrcp.f32 %v5599_v11  ;;  %v2775_v36 = vsel %vm2772_vm4, %v2774_v44, %v2770_v18  ;;  %v2803_v21 = vand.u32 2147483648, %v5599_v11  ;;  %vm2797_vm9 = vweird.f32 %v5599_v11 }
 0x273   : > { %v2780_v6 = vmul.f32 %v4521_v61, %v2779_v3  ;;  %v5602_v12 = vadd.f32 %v2414_v54, %v2326_v15  ;;  %v3074_v5 = vmul.f32 %v2775_v36, %v5539_v29  ;;  %v2801_v1 = vand.u32 2147483647, %v5599_v11 }
 0x275   : > { %v2781_v23 = vadd.f32 %v4521_v61, %v2780_v6  ;;  %v4525_v43 = vpop.eup %4524  ;;  %v4103_v34 = vmul.f32 -1.442695, %v5602_v12  ;;  %v2804_v6 = vor.u32 1.1754944e-38, %v2803_v21  ;;  %vm2802_vm12 = vcmp.eq.f32.partialorder %v2801_v1, 8.507059e+37 }
 0x276   : > { %v2238_v62 = vpop.f32.mrf.mxu2  ;;  %v2565_v31 = vadd.f32 1.0, %v4525_v43 }
 0x277   : > { %v2785_v28 = vsel %vm2784_vm6, %v4521_v61, %v2781_v23  ;;  %v2239_v13 = vadd.f32 %v2238_v62, %v2150_v22  ;;  %v2327_v53 = vpop.f32.mrf.mxu3  ;;  %4528 = vpow2.f32 %v4103_v34 }
 0x278   : > { %v2790_v38 = vsel %vm2787_vm7, %v2789_v39, %v2785_v28  ;;  %v2152_v35 = vpop.f32.mrf.mxu1  ;;  %v4527_v0 = vpop.eup %4526  ;;  %4530 = vrcp.f32 %v2565_v31  ;;  %v2816_v15 = vand.u32 2147483647, %v2565_v31  ;;  %vm2812_vm13 = vweird.f32 %v2565_v31 }
 0x279   : > { %v3075_v42 = vmul.f32 %v2790_v38, %v5561_v20  ;;  %v2793_v51 = vmul.f32 %v4527_v0, %v5599_v11  ;;  %v2328_v60 = vadd.f32 %v2327_v53, %v2239_v13  ;;  %v2153_v32 = vadd.f32 %v2152_v35, %v5189_v58 }
 0x27a   : > { %v2419_v57 = vpop.f32.mrf.mxu0  ;;  %vm2798_vm8 = vweird.f32 %v4527_v0  ;;  %vm2817_vm15 = vcmp.eq.f32.partialorder %v2816_v15, 8.507059e+37 }
 0x27b   : > { %v4370_v54 = vpack.c.bf16 %v3075_v42, %v3074_v5  ;;  %v2794_v63 = vsub.f32 1.0, %v2793_v51  ;;  %v5609_v55 = vadd.f32 %v2416_v48, %v2328_v60  ;;  %vm5620_vm10 = vmor %vm2797_vm9, %vm2798_vm8  ;;  %v2818_v48 = vand.u32 2147483648, %v2565_v31 }
 0x27d   : > { %4422 = vst [vmem:[%s5374_s22 + $0x30] sm:$0xff] %v4370_v54   ;;  %v4529_v4 = vpop.eup %4528  ;;  %v2795_v9 = vmul.f32 %v4527_v0, %v2794_v63  ;;  %v4104_v61 = vmul.f32 -1.442695, %v5609_v55  ;;  %v2819_v34 = vor.u32 1.1754944e-38, %v2818_v48 }
 0x27e   : > { %v2241_v30 = vpop.f32.mrf.mxu2  ;;  %v4531_v29 = vpop.eup %4530  ;;  %v5614_v41 = vadd.f32 1.0, %v4529_v4 }
 0x27f   : > { %v2242_v20 = vadd.f32 %v2241_v30, %v2153_v32  ;;  %v2330_v56 = vpop.f32.mrf.mxu3  ;;  %v2796_v2 = vadd.f32 %v4527_v0, %v2795_v9  ;;  %v2808_v7 = vmul.f32 %v4531_v29, %v2565_v31  ;;  %4532 = vpow2.f32 %v4104_v61 }
 0x280   : > { %v2154_v17 = vpop.f32.mrf.mxu1  ;;  %4534 = vrcp.f32 %v5614_v41  ;;  %vm2813_vm11 = vweird.f32 %v4531_v29  ;;  %vm2827_vm1 = vweird.f32 %v5614_v41 }
 0x281   : > { %v2809_v47 = vsub.f32 1.0, %v2808_v7  ;;  %v2331_v33 = vadd.f32 %v2330_v56, %v2242_v20  ;;  %v2800_v24 = vsel %vm5620_vm10, %v4527_v0, %v2796_v2  ;;  %v2155_v44 = vadd.f32 %v2154_v17, %v5198_v25  ;;  %vm2814_vm14 = vmor %vm2812_vm13, %vm2813_vm11 }
 0x282   : > { %v2421_v58 = vpop.f32.mrf.mxu0  ;;  %v2805_v39 = vsel %vm2802_vm12, %v2804_v6, %v2800_v24  ;;  %v2833_v2 = vand.u32 2147483648, %v5614_v41  ;;  %v2831_v7 = vand.u32 2147483647, %v5614_v41 }
 0x283   : > { %v2810_v10 = vmul.f32 %v4531_v29, %v2809_v47  ;;  %v5626_v18 = vadd.f32 %v2419_v57, %v2331_v33  ;;  %v3076_v0 = vmul.f32 %v2805_v39, %v5584_v14 }
 0x284   : > { %v2834_v48 = vor.u32 1.1754944e-38, %v2833_v2  ;;  %vm2832_vm4 = vcmp.eq.f32.partialorder %v2831_v7, 8.507059e+37 }
 0x285   : > { %v4533_v23 = vpop.eup %4532  ;;  %v2811_v11 = vadd.f32 %v4531_v29, %v2810_v10  ;;  %v4105_v22 = vmul.f32 -1.442695, %v5626_v18 }
 0x286   : > { %v2243_v43 = vpop.f32.mrf.mxu2  ;;  %v4535_v36 = vpop.eup %4534  ;;  %v5630_v62 = vadd.f32 1.0, %v4533_v23 }
 0x287   : > { %v2244_v28 = vadd.f32 %v2243_v43, %v2155_v44  ;;  %v2332_v13 = vpop.f32.mrf.mxu3  ;;  %v2815_v53 = vsel %vm2814_vm14, %v4531_v29, %v2811_v11  ;;  %v2823_v25 = vmul.f32 %v4535_v36, %v5614_v41  ;;  %4536 = vpow2.f32 %v4105_v22 }
 0x288   : > { %v2157_v38 = vpop.f32.mrf.mxu1  ;;  %v2820_v35 = vsel %vm2817_vm15, %v2819_v34, %v2815_v53  ;;  %4538 = vrcp.f32 %v5630_v62  ;;  %vm2828_vm0 = vweird.f32 %v4535_v36  ;;  %v2846_v1 = vand.u32 2147483647, %v5630_v62 }
 0x289   : > { %v3077_v5 = vmul.f32 %v2820_v35, %v5591_v27  ;;  %v2824_v42 = vsub.f32 1.0, %v2823_v25  ;;  %v2333_v57 = vadd.f32 %v2332_v13, %v2244_v28  ;;  %v2158_v63 = vadd.f32 %v2157_v38, %v5203_v49  ;;  %vm5648_vm2 = vmor %vm2827_vm1, %vm2828_vm0 }
 0x28a   : > { %v2424_v31 = vpop.f32.mrf.mxu0  ;;  %v2848_v47 = vand.u32 2147483648, %v5630_v62  ;;  %vm2842_vm5 = vweird.f32 %v5630_v62  ;;  %vm2847_vm7 = vcmp.eq.f32.partialorder %v2846_v1, 8.507059e+37 }
 0x28b   : > { %v4375_v51 = vpack.c.bf16 %v3077_v5, %v3076_v0  ;;  %v2825_v60 = vmul.f32 %v4535_v36, %v2824_v42  ;;  %v5636_v54 = vadd.f32 %v2421_v58, %v2333_v57 }
 0x28c   : > { %v2849_v22 = vor.u32 1.1754944e-38, %v2848_v47 }
 0x28d   : > { %v4537_v32 = vpop.eup %4536  ;;  %4423 = vst [vmem:[%s5374_s22 + $0x38] sm:$0xff] %v4375_v51   ;;  %v4106_v4 = vmul.f32 -1.442695, %v5636_v54  ;;  %v2826_v20 = vadd.f32 %v4535_v36, %v2825_v60 }
 0x28e   : > { %v2246_v9 = vpop.f32.mrf.mxu2  ;;  %v4539_v61 = vpop.eup %4538  ;;  %v5641_v30 = vadd.f32 1.0, %v4537_v32 }
 0x28f   : > { %v2247_v29 = vadd.f32 %v2246_v9, %v2158_v63  ;;  %v2335_v14 = vpop.f32.mrf.mxu3  ;;  %v2838_v27 = vmul.f32 %v4539_v61, %v5630_v62  ;;  %4540 = vpow2.f32 %v4106_v4  ;;  %v2830_v33 = vsel %vm5648_vm2, %v4535_v36, %v2826_v20 }
 0x290   : > { %v2159_v56 = vpop.f32.mrf.mxu1  ;;  %4542 = vrcp.f32 %v5641_v30  ;;  %vm2843_vm3 = vweird.f32 %v4539_v61  ;;  %v2835_v11 = vsel %vm2832_vm4, %v2834_v48, %v2830_v33  ;;  %vm2857_vm9 = vweird.f32 %v5641_v30 }
 0x291   : > { %v2839_v17 = vsub.f32 1.0, %v2838_v27  ;;  %v2336_v21 = vadd.f32 %v2335_v14, %v2247_v29  ;;  %v2160_v41 = vadd.f32 %v2159_v56, %v5212_v19  ;;  %vm2844_vm6 = vmor %vm2842_vm5, %vm2843_vm3  ;;  %v3078_v53 = vmul.f32 %v2835_v11, %v5602_v12 }
 0x292   : > { %v2426_v49 = vpop.f32.mrf.mxu0  ;;  %v2863_v29 = vand.u32 2147483648, %v5641_v30  ;;  %v2861_v14 = vand.u32 2147483647, %v5641_v30 }
 0x293   : > { %v2840_v3 = vmul.f32 %v4539_v61, %v2839_v17  ;;  %v5656_v15 = vadd.f32 %v2424_v31, %v2336_v21 }
 0x294   : > { %v2864_v58 = vor.u32 1.1754944e-38, %v2863_v29  ;;  %vm2862_vm12 = vcmp.eq.f32.partialorder %v2861_v14, 8.507059e+37 }
 0x295   : > { %v4541_v24 = vpop.eup %4540  ;;  %v2841_v10 = vadd.f32 %v4539_v61, %v2840_v3  ;;  %v4107_v6 = vmul.f32 -1.442695, %v5656_v15 }
 0x296   : > { %v2248_v44 = vpop.f32.mrf.mxu2  ;;  %v4543_v23 = vpop.eup %4542  ;;  %v5661_v43 = vadd.f32 1.0, %v4541_v24 }
 0x297   : > { %v2249_v36 = vadd.f32 %v2248_v44, %v2160_v41  ;;  %v2337_v39 = vpop.f32.mrf.mxu3  ;;  %v2845_v34 = vsel %vm2844_vm6, %v4539_v61, %v2841_v10  ;;  %v2853_v19 = vmul.f32 %v4543_v23, %v5641_v30  ;;  %4544 = vpow2.f32 %v4107_v6 }
 0x298   : > { %v2162_v28 = vpop.f32.mrf.mxu1  ;;  %v2850_v13 = vsel %vm2847_vm7, %v2849_v22, %v2845_v34  ;;  %4546 = vrcp.f32 %v5661_v43  ;;  %vm2858_vm8 = vweird.f32 %v4543_v23  ;;  %v2876_v2 = vand.u32 2147483647, %v5661_v43 }
 0x299   : > { %v3079_v25 = vmul.f32 %v2850_v13, %v5609_v55  ;;  %v2854_v38 = vsub.f32 1.0, %v2853_v19  ;;  %v2338_v35 = vadd.f32 %v2337_v39, %v2249_v36  ;;  %v2163_v42 = vadd.f32 %v2162_v28, %v5217_v37  ;;  %vm5679_vm10 = vmor %vm2857_vm9, %vm2858_vm8 }
 0x29a   : > { %v2429_v62 = vpop.f32.mrf.mxu0  ;;  %vm2872_vm13 = vweird.f32 %v5661_v43  ;;  %vm2877_vm15 = vcmp.eq.f32.partialorder %v2876_v2, 8.507059e+37 }
 0x29b   : > { %v4380_v31 = vpack.c.bf16 %v3079_v25, %v3078_v53  ;;  %v2855_v0 = vmul.f32 %v4543_v23, %v2854_v38  ;;  %v5667_v5 = vadd.f32 %v2426_v49, %v2338_v35  ;;  %v2878_v49 = vand.u32 2147483648, %v5661_v43 }
 0x29d   : > { %v4545_v57 = vpop.eup %4544  ;;  %4424 = vst [vmem:[%s5374_s22 + $0x40] sm:$0xff] %v4380_v31   ;;  %v4108_v51 = vmul.f32 -1.442695, %v5667_v5  ;;  %v2856_v9 = vadd.f32 %v4543_v23, %v2855_v0  ;;  %v2879_v24 = vor.u32 1.1754944e-38, %v2878_v49 }
 0x29e   : > { %v2251_v60 = vpop.f32.mrf.mxu2  ;;  %v4547_v63 = vpop.eup %4546  ;;  %v5672_v32 = vadd.f32 1.0, %v4545_v57 }
 0x29f   : > { %v2252_v4 = vadd.f32 %v2251_v60, %v2163_v42  ;;  %v2340_v12 = vpop.f32.mrf.mxu3  ;;  %v2868_v55 = vmul.f32 %v4547_v63, %v5661_v43  ;;  %4548 = vpow2.f32 %v4108_v51  ;;  %v2860_v7 = vsel %vm5679_vm10, %v4543_v23, %v2856_v9 }
 0x2a0   : > { %v2164_v61 = vpop.f32.mrf.mxu1  ;;  %4550 = vrcp.f32 %v5672_v32  ;;  %vm2873_vm11 = vweird.f32 %v4547_v63  ;;  %v2865_v41 = vsel %vm2862_vm12, %v2864_v58, %v2860_v7  ;;  %v2893_v60 = vand.u32 2147483648, %v5672_v32 }
 0x2a1   : > { %v2869_v20 = vsub.f32 1.0, %v2868_v55  ;;  %v2341_v27 = vadd.f32 %v2340_v12, %v2252_v4  ;;  %v2165_v30 = vadd.f32 %v2164_v61, %v5226_v40  ;;  %vm2874_vm14 = vmor %vm2872_vm13, %vm2873_vm11  ;;  %v3080_v36 = vmul.f32 %v2865_v41, %v5626_v18 }
 0x2a2   : > { %v2431_v37 = vpop.f32.mrf.mxu0  ;;  %vm2887_vm1 = vweird.f32 %v5672_v32 }
 0x2a3   : > { %v2870_v17 = vmul.f32 %v4547_v63, %v2869_v20  ;;  %v5687_v21 = vadd.f32 %v2429_v62, %v2341_v27  ;;  %v2894_v20 = vor.u32 1.1754944e-38, %v2893_v60 }
 0x2a5   : > { %v4549_v1 = vpop.eup %4548  ;;  %v2871_v47 = vadd.f32 %v4547_v63, %v2870_v17  ;;  %v4109_v33 = vmul.f32 -1.442695, %v5687_v21 }
 0x2a6   : > { %v2253_v3 = vpop.f32.mrf.mxu2  ;;  %v4551_v48 = vpop.eup %4550  ;;  %v5692_v10 = vadd.f32 1.0, %v4549_v1 }
 0x2a7   : > { %v2254_v6 = vadd.f32 %v2253_v3, %v2165_v30  ;;  %v2342_v44 = vpop.f32.mrf.mxu3  ;;  %v2875_v23 = vsel %vm2874_vm14, %v4547_v63, %v2871_v47  ;;  %v2883_v40 = vmul.f32 %v4551_v48, %v5672_v32  ;;  %4552 = vpow2.f32 %v4109_v33 }
 0x2a8   : > { %v2167_v11 = vpop.f32.mrf.mxu1  ;;  %v2880_v22 = vsel %vm2877_vm15, %v2879_v24, %v2875_v23  ;;  %4554 = vrcp.f32 %v5692_v10  ;;  %vm2888_vm0 = vweird.f32 %v4551_v48  ;;  %v2891_v63 = vand.u32 2147483647, %v5672_v32 }
 0x2a9   : > { %v3081_v39 = vmul.f32 %v2880_v22, %v5636_v54  ;;  %v2884_v34 = vsub.f32 1.0, %v2883_v40  ;;  %v2343_v19 = vadd.f32 %v2342_v44, %v2254_v6  ;;  %v2168_v53 = vadd.f32 %v2167_v11, %v5231_v8  ;;  %vm5710_vm2 = vmor %vm2887_vm1, %vm2888_vm0 }
 0x2aa   : > { %v2434_v43 = vpop.f32.mrf.mxu0  ;;  %v2906_v55 = vand.u32 2147483647, %v5692_v10  ;;  %v2908_v61 = vand.u32 2147483648, %v5692_v10  ;;  %vm2892_vm4 = vcmp.eq.f32.partialorder %v2891_v63, 8.507059e+37  ;;  %vm2902_vm5 = vweird.f32 %v5692_v10 }
 0x2ab   : > { %v4385_v28 = vpack.c.bf16 %v3081_v39, %v3080_v36  ;;  %v2885_v13 = vmul.f32 %v4551_v48, %v2884_v34  ;;  %v5698_v62 = vadd.f32 %v2431_v37, %v2343_v19 }
 0x2ac   : > { %v2909_v58 = vor.u32 1.1754944e-38, %v2908_v61  ;;  %vm2907_vm7 = vcmp.eq.f32.partialorder %v2906_v55, 8.507059e+37 }
 0x2ad   : > { %v4553_v25 = vpop.eup %4552  ;;  %4425 = vst [vmem:[%s5374_s22 + $0x48] sm:$0xff] %v4385_v28   ;;  %v4110_v38 = vmul.f32 -1.442695, %v5698_v62  ;;  %v2886_v57 = vadd.f32 %v4551_v48, %v2885_v13 }
 0x2ae   : > { %v2256_v35 = vpop.f32.mrf.mxu2  ;;  %v4555_v31 = vpop.eup %4554  ;;  %v5703_v0 = vadd.f32 1.0, %v4553_v25 }
 0x2af   : > { %v2257_v42 = vadd.f32 %v2256_v35, %v2168_v53  ;;  %v2345_v18 = vpop.f32.mrf.mxu3  ;;  %v2898_v54 = vmul.f32 %v4555_v31, %v5692_v10  ;;  %4556 = vpow2.f32 %v4110_v38  ;;  %v2890_v29 = vsel %vm5710_vm2, %v4551_v48, %v2886_v57 }
 0x2b0   : > { %v2169_v51 = vpop.f32.mrf.mxu1  ;;  %4558 = vrcp.f32 %v5703_v0  ;;  %vm2903_vm3 = vweird.f32 %v4555_v31  ;;  %v2895_v17 = vsel %vm2892_vm4, %v2894_v20, %v2890_v29  ;;  %v2923_v25 = vand.u32 2147483648, %v5703_v0 }
 0x2b1   : > { %v2899_v4 = vsub.f32 1.0, %v2898_v54  ;;  %v2346_v12 = vadd.f32 %v2345_v18, %v2257_v42  ;;  %v2170_v32 = vadd.f32 %v2169_v51, %v5240_v52  ;;  %vm2904_vm6 = vmor %vm2902_vm5, %vm2903_vm3  ;;  %v3082_v24 = vmul.f32 %v2895_v17, %v5656_v15 }
 0x2b2   : > { %v2436_v8 = vpop.f32.mrf.mxu0  ;;  %vm2917_vm9 = vweird.f32 %v5703_v0 }
 0x2b3   : > { %v2900_v37 = vmul.f32 %v4555_v31, %v2899_v4  ;;  %v5718_v14 = vadd.f32 %v2434_v43, %v2346_v12 }
 0x2b5   : > { %v4557_v27 = vpop.eup %4556  ;;  %v2901_v56 = vadd.f32 %v4555_v31, %v2900_v37  ;;  %v4111_v2 = vmul.f32 -1.442695, %v5718_v14 }
 0x2b6   : > { %v2258_v49 = vpop.f32.mrf.mxu2  ;;  %v4559_v7 = vpop.eup %4558  ;;  %v5723_v30 = vadd.f32 1.0, %v4557_v27 }
 0x2b7   : > { %v2259_v1 = vadd.f32 %v2258_v49, %v2170_v32  ;;  %v2347_v47 = vpop.f32.mrf.mxu3  ;;  %v2905_v33 = vsel %vm2904_vm6, %v4555_v31, %v2901_v56  ;;  %v2913_v52 = vmul.f32 %v4559_v7, %v5703_v0  ;;  %4560 = vpow2.f32 %v4111_v2 }
 0x2b8   : > { %v2172_v3 = vpop.f32.mrf.mxu1  ;;  %v2910_v48 = vsel %vm2907_vm7, %v2909_v58, %v2905_v33  ;;  %4562 = vrcp.f32 %v5723_v30  ;;  %vm2918_vm8 = vweird.f32 %v4559_v7  ;;  %v2936_v42 = vand.u32 2147483647, %v5723_v30 }
 0x2b9   : > { %v3083_v10 = vmul.f32 %v2910_v48, %v5667_v5  ;;  %v2914_v6 = vsub.f32 1.0, %v2913_v52  ;;  %v2348_v44 = vadd.f32 %v2347_v47, %v2259_v1  ;;  %v2173_v22 = vadd.f32 %v2172_v3, %v5245_v45  ;;  %vm5741_vm10 = vmor %vm2917_vm9, %vm2918_vm8 }
 0x2ba   : > { %v2439_v41 = vpop.f32.mrf.mxu0  ;;  %v2921_v45 = vand.u32 2147483647, %v5703_v0  ;;  %v2938_v18 = vand.u32 2147483648, %v5723_v30  ;;  %vm2932_vm13 = vweird.f32 %v5723_v30  ;;  %vm2937_vm15 = vcmp.eq.f32.partialorder %v2936_v42, 8.507059e+37 }
 0x2bb   : > { %v4390_v23 = vpack.c.bf16 %v3083_v10, %v3082_v24  ;;  %v2915_v40 = vmul.f32 %v4559_v7, %v2914_v6  ;;  %v5729_v11 = vadd.f32 %v2436_v8, %v2348_v44  ;;  %v2924_v8 = vor.u32 1.1754944e-38, %v2923_v25 }
 0x2bc   : > { %vm2922_vm12 = vcmp.eq.f32.partialorder %v2921_v45, 8.507059e+37  ;;  %v2939_v29 = vor.u32 1.1754944e-38, %v2938_v18 }
 0x2bd   : > { %v4561_v43 = vpop.eup %4560  ;;  %4426 = vst [vmem:[%s5374_s22 + $0x50] sm:$0xff] %v4390_v23   ;;  %v4112_v36 = vmul.f32 -1.442695, %v5729_v11  ;;  %v2916_v13 = vadd.f32 %v4559_v7, %v2915_v40 }
 0x2be   : > { %v2261_v39 = vpop.f32.mrf.mxu2  ;;  %v4563_v34 = vpop.eup %4562  ;;  %v5734_v19 = vadd.f32 1.0, %v4561_v43 }
 0x2bf   : > { %v2262_v28 = vadd.f32 %v2261_v39, %v2173_v22  ;;  %v2350_v15 = vpop.f32.mrf.mxu3  ;;  %v2928_v5 = vmul.f32 %v4563_v34, %v5723_v30  ;;  %4564 = vpow2.f32 %v4112_v36  ;;  %v2920_v54 = vsel %vm5741_vm10, %v4559_v7, %v2916_v13 }
 0x2c0   : > { %v2174_v53 = vpop.f32.mrf.mxu1  ;;  %4566 = vrcp.f32 %v5734_v19  ;;  %vm2933_vm11 = vweird.f32 %v4563_v34  ;;  %v2925_v61 = vsel %vm2922_vm12, %v2924_v8, %v2920_v54  ;;  %v2953_v40 = vand.u32 2147483648, %v5734_v19 }
 0x2c1   : > { %v2929_v38 = vsub.f32 1.0, %v2928_v5  ;;  %v2351_v35 = vadd.f32 %v2350_v15, %v2262_v28  ;;  %v2175_v0 = vadd.f32 %v2174_v53, %v5254_v46  ;;  %vm2934_vm14 = vmor %vm2932_vm13, %vm2933_vm11  ;;  %v3084_v49 = vmul.f32 %v2925_v61, %v5687_v21 }
 0x2c2   : > { %v2441_v57 = vpop.f32.mrf.mxu0  ;;  %vm2947_vm1 = vweird.f32 %v5734_v19  ;;  %v2954_v5 = vor.u32 1.1754944e-38, %v2953_v40 }
 0x2c3   : > { %v2930_v51 = vmul.f32 %v4563_v34, %v2929_v38  ;;  %v5749_v60 = vadd.f32 %v2439_v41, %v2351_v35 }
 0x2c5   : > { %v4565_v63 = vpop.eup %4564  ;;  %v2931_v4 = vadd.f32 %v4563_v34, %v2930_v51  ;;  %v4113_v12 = vmul.f32 -1.442695, %v5749_v60 }
 0x2c6   : > { %v2263_v9 = vpop.f32.mrf.mxu2  ;;  %v4567_v55 = vpop.eup %4566  ;;  %v5754_v37 = vadd.f32 1.0, %v4565_v63 }
 0x2c7   : > { %v2264_v20 = vadd.f32 %v2263_v9, %v2175_v0  ;;  %v2352_v32 = vpop.f32.mrf.mxu3  ;;  %v2935_v27 = vsel %vm2934_vm14, %v4563_v34, %v2931_v4  ;;  %v2943_v46 = vmul.f32 %v4567_v55, %v5734_v19  ;;  %4568 = vpow2.f32 %v4113_v12 }
 0x2c8   : > { %v2177_v56 = vpop.f32.mrf.mxu1  ;;  %v2940_v2 = vsel %vm2937_vm15, %v2939_v29, %v2935_v27  ;;  %4570 = vrcp.f32 %v5754_v37  ;;  %vm2948_vm0 = vweird.f32 %v4567_v55  ;;  %v2966_v39 = vand.u32 2147483647, %v5754_v37 }
 0x2c9   : > { %v3085_v7 = vmul.f32 %v2940_v2, %v5698_v62  ;;  %v2944_v17 = vsub.f32 1.0, %v2943_v46  ;;  %v2353_v58 = vadd.f32 %v2352_v32, %v2264_v20  ;;  %v2178_v33 = vadd.f32 %v2177_v56, %v5259_v59  ;;  %vm5772_vm2 = vmor %vm2947_vm1, %vm2948_vm0 }
 0x2ca   : > { %v2444_v52 = vpop.f32.mrf.mxu0  ;;  %v2951_v59 = vand.u32 2147483647, %v5734_v19  ;;  %v2968_v34 = vand.u32 2147483648, %v5754_v37  ;;  %vm2962_vm5 = vweird.f32 %v5754_v37  ;;  %vm2967_vm7 = vcmp.eq.f32.partialorder %v2966_v39, 8.507059e+37 }
 0x2cb   : > { %v4395_v30 = vpack.c.bf16 %v3085_v7, %v3084_v49  ;;  %v2945_v1 = vmul.f32 %v4567_v55, %v2944_v17  ;;  %v5760_v47 = vadd.f32 %v2441_v57, %v2353_v58 }
 0x2cc   : > { %vm2952_vm4 = vcmp.eq.f32.partialorder %v2951_v59, 8.507059e+37  ;;  %v2969_v42 = vor.u32 1.1754944e-38, %v2968_v34 }
 0x2cd   : > { %v4569_v3 = vpop.eup %4568  ;;  %4427 = vst [vmem:[%s5374_s22 + $0x58] sm:$0xff] %v4395_v30   ;;  %v4114_v48 = vmul.f32 -1.442695, %v5760_v47  ;;  %v2946_v62 = vadd.f32 %v4567_v55, %v2945_v1 }
 0x2ce   : > { %v2266_v41 = vpop.f32.mrf.mxu2  ;;  %v4571_v24 = vpop.eup %4570  ;;  %v5765_v10 = vadd.f32 1.0, %v4569_v3 }
 0x2cf   : > { %v2267_v21 = vadd.f32 %v2266_v41, %v2178_v33  ;;  %v2355_v6 = vpop.f32.mrf.mxu3  ;;  %v2958_v44 = vmul.f32 %v4571_v24, %v5754_v37  ;;  %4572 = vpow2.f32 %v4114_v48  ;;  %v2950_v28 = vsel %vm5772_vm2, %v4567_v55, %v2946_v62 }
 0x2d0   : > { %v2179_v23 = vpop.f32.mrf.mxu1  ;;  %4574 = vrcp.f32 %v5765_v10  ;;  %vm2963_vm3 = vweird.f32 %v4571_v24  ;;  %v2955_v31 = vsel %vm2952_vm4, %v2954_v5, %v2950_v28  ;;  %v2983_v17 = vand.u32 2147483648, %v5765_v10 }
 0x2d1   : > { %v2959_v22 = vsub.f32 1.0, %v2958_v44  ;;  %v2356_v43 = vadd.f32 %v2355_v6, %v2267_v21  ;;  %v2180_v19 = vadd.f32 %v2179_v23, %v5268_v26  ;;  %vm2964_vm6 = vmor %vm2962_vm5, %vm2963_vm3  ;;  %v3086_v4 = vmul.f32 %v2955_v31, %v5718_v14 }
 0x2d2   : > { %v2446_v57 = vpop.f32.mrf.mxu0  ;;  %vm2977_vm9 = vweird.f32 %v5765_v10  ;;  %v2984_v6 = vor.u32 1.1754944e-38, %v2983_v17 }
 0x2d3   : > { %v2960_v15 = vmul.f32 %v4571_v24, %v2959_v22  ;;  %v5780_v13 = vadd.f32 %v2444_v52, %v2356_v43 }
 0x2d5   : > { %v4573_v53 = vpop.eup %4572  ;;  %v2961_v25 = vadd.f32 %v4571_v24, %v2960_v15  ;;  %v4115_v45 = vmul.f32 -1.442695, %v5780_v13 }
 0x2d6   : > { %v2268_v38 = vpop.f32.mrf.mxu2  ;;  %v4575_v35 = vpop.eup %4574  ;;  %v2577_v18 = vadd.f32 1.0, %v4573_v53 }
 0x2d7   : > { %v2269_v54 = vadd.f32 %v2268_v38, %v2180_v19  ;;  %v2357_v51 = vpop.f32.mrf.mxu3  ;;  %v2965_v8 = vsel %vm2964_vm6, %v4571_v24, %v2961_v25  ;;  %v2973_v26 = vmul.f32 %v4575_v35, %v5765_v10  ;;  %4576 = vpow2.f32 %v4115_v45 }
 0x2d8   : > { %v2182_v0 = vpop.f32.mrf.mxu1  ;;  %v2970_v63 = vsel %vm2967_vm7, %v2969_v42, %v2965_v8  ;;  %4578 = vrcp.f32 %v2577_v18  ;;  %vm2978_vm8 = vweird.f32 %v4575_v35  ;;  %v2996_v3 = vand.u32 2147483647, %v2577_v18 }
 0x2d9   : > { %v3087_v12 = vmul.f32 %v2970_v63, %v5729_v11  ;;  %v2974_v9 = vsub.f32 1.0, %v2973_v26  ;;  %v2358_v55 = vadd.f32 %v2357_v51, %v2269_v54  ;;  %v2183_v20 = vadd.f32 %v2182_v0, %v5273_v50  ;;  %vm5799_vm10 = vmor %vm2977_vm9, %vm2978_vm8 }
 0x2da   : > { %v2449_v58 = vpop.f32.mrf.mxu0  ;;  %v2981_v50 = vand.u32 2147483647, %v5765_v10  ;;  %v2998_v48 = vand.u32 2147483648, %v2577_v18  ;;  %vm2992_vm13 = vweird.f32 %v2577_v18  ;;  %vm2997_vm15 = vcmp.eq.f32.partialorder %v2996_v3, 8.507059e+37 }
 0x2db   : > { %v4400_v61 = vpack.c.bf16 %v3087_v12, %v3086_v4  ;;  %v2975_v29 = vmul.f32 %v4575_v35, %v2974_v9  ;;  %v5788_v37 = vadd.f32 %v2446_v57, %v2358_v55 }
 0x2dc   : > { %vm2982_vm12 = vcmp.eq.f32.partialorder %v2981_v50, 8.507059e+37  ;;  %v2999_v43 = vor.u32 1.1754944e-38, %v2998_v48 }
 0x2dd   : > { %v4577_v32 = vpop.eup %4576  ;;  %4428 = vst [vmem:[%s5374_s22 + $0x60] sm:$0xff] %v4400_v61   ;;  %v4116_v27 = vmul.f32 -1.442695, %v5788_v37  ;;  %v2976_v7 = vadd.f32 %v4575_v35, %v2975_v29 }
 0x2de   : > { %v2271_v46 = vpop.f32.mrf.mxu2  ;;  %v4579_v56 = vpop.eup %4578  ;;  %v5793_v2 = vadd.f32 1.0, %v4577_v32 }
 0x2df   : > { %v2272_v49 = vadd.f32 %v2271_v46, %v2183_v20  ;;  %v2360_v14 = vpop.f32.mrf.mxu3  ;;  %v2988_v11 = vmul.f32 %v4579_v56, %v2577_v18  ;;  %4580 = vpow2.f32 %v4116_v27  ;;  %v2980_v41 = vsel %vm5799_vm10, %v4575_v35, %v2976_v7 }
 0x2e0   : > { %4582 = vrcp.f32 %v5793_v2  ;;  %v2184_v33 = vpop.f32.mrf.mxu1  ;;  %vm2993_vm11 = vweird.f32 %v4579_v56  ;;  %v2985_v22 = vsel %vm2982_vm12, %v2984_v6, %v2980_v41  ;;  %vm3007_vm1 = vweird.f32 %v5793_v2 }
 0x2e1   : > { %v2989_v30 = vsub.f32 1.0, %v2988_v11  ;;  %v2361_v1 = vadd.f32 %v2360_v14, %v2272_v49  ;;  %v2185_v62 = vadd.f32 %v2184_v33, %v5281_v16  ;;  %vm2994_vm14 = vmor %vm2992_vm13, %vm2993_vm11  ;;  %v3088_v5 = vmul.f32 %v2985_v22, %v5749_v60 }
 0x2e2   : > { %v2451_v45 = vpop.f32.mrf.mxu0  ;;  %v3013_v60 = vand.u32 2147483648, %v5793_v2 }
 0x2e3   : > { %v2990_v24 = vmul.f32 %v4579_v56, %v2989_v30  ;;  %v5805_v21 = vadd.f32 %v2449_v58, %v2361_v1 }
 0x2e4   : > { %v3014_v9 = vor.u32 1.1754944e-38, %v3013_v60 }
 0x2e5   : > { %v4581_v10 = vpop.eup %4580  ;;  %v2991_v44 = vadd.f32 %v4579_v56, %v2990_v24  ;;  %v4117_v23 = vmul.f32 -1.442695, %v5805_v21 }
 0x2e6   : > { %v2273_v40 = vpop.f32.mrf.mxu2  ;;  %v4583_v59 = vpop.eup %4582  ;;  %v2579_v36 = vadd.f32 1.0, %v4581_v10 }
 0x2e7   : > { %v2274_v39 = vadd.f32 %v2273_v40, %v2185_v62  ;;  %v2995_v34 = vsel %vm2994_vm14, %v4579_v56, %v2991_v44  ;;  %v3003_v28 = vmul.f32 %v4583_v59, %v5793_v2  ;;  %4584 = vpow2.f32 %v4117_v23  ;;  %v2362_v15 = vpop.f32.mrf.mxu3 }
 0x2e8   : > { %v3000_v16 = vsel %vm2997_vm15, %v2999_v43, %v2995_v34  ;;  %4586 = vrcp.f32 %v2579_v36  ;;  %vm3008_vm0 = vweird.f32 %v4583_v59  ;;  %v3028_v0 = vand.u32 2147483648, %v2579_v36 }
 0x2e9   : > { %v3089_v19 = vmul.f32 %v3000_v16, %v5760_v47  ;;  %v3004_v53 = vsub.f32 1.0, %v3003_v28  ;;  %v2363_v25 = vadd.f32 %v2362_v15, %v2274_v39  ;;  %v3011_v47 = vand.u32 2147483647, %v5793_v2  ;;  %vm3009_vm2 = vmor %vm3007_vm1, %vm3008_vm0 }
 0x2ea   : > { %v3026_v12 = vand.u32 2147483647, %v2579_v36  ;;  %vm3022_vm5 = vweird.f32 %v2579_v36  ;;  %v3029_v32 = vor.u32 1.1754944e-38, %v3028_v0 }
 0x2eb   : > { %v4405_v38 = vpack.c.bf16 %v3089_v19, %v3088_v5  ;;  %v3005_v35 = vmul.f32 %v4583_v59, %v3004_v53  ;;  %v5812_v31 = vadd.f32 %v2451_v45, %v2363_v25  ;;  %vm3012_vm4 = vcmp.eq.f32.partialorder %v3011_v47, 8.507059e+37 }
 0x2ec   : > { %vm3027_vm7 = vcmp.eq.f32.partialorder %v3026_v12, 8.507059e+37 }
 0x2ed   : > { %v4585_v42 = vpop.eup %4584  ;;  %4429 = vst [vmem:[%s5374_s22 + $0x68] sm:$0xff] %v4405_v38   ;;  %v4118_v18 = vmul.f32 -1.442695, %v5812_v31  ;;  %v3006_v51 = vadd.f32 %v4583_v59, %v3005_v35 }
 0x2ee   : > { %v4587_v57 = vpop.eup %4586  ;;  %v2580_v54 = vadd.f32 1.0, %v4585_v42 }
 0x2ef   : > { %v3018_v8 = vmul.f32 %v4587_v57, %v2579_v36  ;;  %4588 = vpow2.f32 %v4118_v18  ;;  %v3010_v63 = vsel %vm3009_vm2, %v4583_v59, %v3006_v51  ;;  %vm3023_vm3 = vweird.f32 %v4587_v57 }
 0x2f0   : > { %4590 = vrcp.f32 %v2580_v54  ;;  %v3015_v20 = vsel %vm3012_vm4, %v3014_v9, %v3010_v63  ;;  %vm3024_vm6 = vmor %vm3022_vm5, %vm3023_vm3  ;;  %v3043_v1 = vand.u32 2147483648, %v2580_v54  ;;  %vm3037_vm9 = vweird.f32 %v2580_v54 }
 0x2f1   : > { %v3019_v26 = vsub.f32 1.0, %v3018_v8  ;;  %v3090_v49 = vmul.f32 %v3015_v20, %v5780_v13  ;;  %v3041_v33 = vand.u32 2147483647, %v2580_v54 }
 0x2f3   : > { %v3020_v4 = vmul.f32 %v4587_v57, %v3019_v26  ;;  %vm3042_vm12 = vcmp.eq.f32.partialorder %v3041_v33, 8.507059e+37 }
 0x2f5   : > { %v4589_v55 = vpop.eup %4588  ;;  %v3021_v61 = vadd.f32 %v4587_v57, %v3020_v4 }
 0x2f6   : > { %v4591_v29 = vpop.eup %4590  ;;  %v2581_v27 = vadd.f32 1.0, %v4589_v55 }
 0x2f7   : > { %v3025_v46 = vsel %vm3024_vm6, %v4587_v57, %v3021_v61  ;;  %v3033_v56 = vmul.f32 %v4591_v29, %v2580_v54  ;;  %vm3038_vm8 = vweird.f32 %v4591_v29 }
 0x2f8   : > { %v3030_v2 = vsel %vm3027_vm7, %v3029_v32, %v3025_v46  ;;  %4592 = vrcp.f32 %v2581_v27  ;;  %vm3039_vm10 = vmor %vm3037_vm9, %vm3038_vm8  ;;  %v3058_v3 = vand.u32 2147483648, %v2581_v27  ;;  %v3056_v13 = vand.u32 2147483647, %v2581_v27 }
 0x2f9   : > { %v3091_v14 = vmul.f32 %v3030_v2, %v5788_v37  ;;  %v3034_v7 = vsub.f32 1.0, %v3033_v56  ;;  %v3044_v37 = vor.u32 1.1754944e-38, %v3043_v1  ;;  %vm3052_vm13 = vweird.f32 %v2581_v27 }
 0x2fa   : > { %v3059_v62 = vor.u32 1.1754944e-38, %v3058_v3  ;;  %vm3057_vm15 = vcmp.eq.f32.partialorder %v3056_v13, 8.507059e+37 }
 0x2fb   : > { %v4410_v11 = vpack.c.bf16 %v3091_v14, %v3090_v49  ;;  %v3035_v17 = vmul.f32 %v4591_v29, %v3034_v7 }
 0x2fd   : > { %4430 = vst [vmem:[%s5374_s22 + $0x70] sm:$0xff] %v4410_v11   ;;  %v3036_v50 = vadd.f32 %v4591_v29, %v3035_v17 }
 0x2fe   : > { %v4593_v58 = vpop.eup %4592 }
 0x2ff   : > { %v3048_v30 = vmul.f32 %v4593_v58, %v2581_v27  ;;  %v3040_v48 = vsel %vm3039_vm10, %v4591_v29, %v3036_v50  ;;  %vm3053_vm11 = vweird.f32 %v4593_v58 }
 0x300   : > { %v3045_v6 = vsel %vm3042_vm12, %v3044_v37, %v3040_v48  ;;  %vm3054_vm14 = vmor %vm3052_vm13, %vm3053_vm11 }
 0x301   : > { %v3049_v52 = vsub.f32 1.0, %v3048_v30  ;;  %v3092_v23 = vmul.f32 %v3045_v6, %v5805_v21 }
 0x303   : > { %v3050_v41 = vmul.f32 %v4593_v58, %v3049_v52 }
 0x305   : > { %v3051_v24 = vadd.f32 %v4593_v58, %v3050_v41 }
 0x307   : > { %v3055_v10 = vsel %vm3054_vm14, %v4593_v58, %v3051_v24 }
 0x308   : > { %v3060_v44 = vsel %vm3057_vm15, %v3059_v62, %v3055_v10 }
 0x309   : > { %v3093_v40 = vmul.f32 %v3060_v44, %v5812_v31 }
 0x30b   : > { %v4415_v59 = vpack.c.bf16 %v3093_v40, %v3092_v23 }
 0x30d   : > { %4431 = vst [vmem:[%s5374_s22 + $0x78] sm:$0xff] %v4415_v59  }
 0x30e PF: > { %s13_s12 = sadd.s32 1, %s4600_s12  }
 0x30f   : > { %p10_p4 = scmp.ge.s32.totalorder %s13_s12, 4  }
 0x311   :  { %12 = sbr.rel (!%p10_p4) target bundleno = 1 (0x1), region = 62 }

// kernel: _lambda_.7
= control target key start
LH: loop header
LB: loop body
LE: loop exit
PB: predicated region body
PF: predicated region fallthrough
CT: control target
= control target key end

     0   :  { %14 = vsyncpa [#allocation3], 0  ;;  %s7078_s0 = inlined_call_operand.vmem [shape: bf16[512,128], index: 0, kind: input, shape index: {}]   ;;  %s7079_s1 = inlined_call_operand.vmem [shape: bf16[512,128], index: 1, kind: input, shape index: {}]   ;;  %s7080_s2 = inlined_call_operand.vmem [shape: bf16[128,128], index: 2, kind: input, shape index: {}]   ;;  %s7081_s3 = inlined_call_operand.vmem [shape: f32[1,128], index: 3, kind: input, shape index: {}]   ;;  %s7082_s4 = inlined_call_operand.vmem [shape: bf16[128,128], index: 4, kind: input, shape index: {}]   ;;  %s7083_s5 = inlined_call_operand.vmem [shape: f32[1,128], index: 5, kind: input, shape index: {}]   ;;  %s7084_s6 = inlined_call_operand.vmem [shape: bf16[128,128], index: 6, kind: input, shape index: {}]   ;;  %s7085_s7 = inlined_call_operand.vmem [shape: bf16[128,128], index: 7, kind: input, shape index: {}]   ;;  %s7086_s8 = inlined_call_operand.vmem [shape: f32[1,128], index: 8, kind: input, shape index: {}]   ;;  %s7087_s9 = inlined_call_operand.hbm [shape: f32[512,128], index: 9, kind: output, shape index: {}]  }
   0x1   :  { %16 = vsyncpa [#allocation3 + $0x1], 0  ;;  %s4324_s30 = smov 0   ;;  %s4326_s10 = smov 0  }
   0x2   :  { %s4328_s11 = smov 0   ;;  %s4330_s12 = smov 0  }
   0x3 LB: > { %s4345_s13 = sadd.s32 4294967295, %s4270_s12   ;;  %s3342_s14 = sadd.s32 4294967294, %s4270_s12   ;;  %s4270_s12 = sphi %s4330_s12, %s7299_s12   ;;  %s4266_s11 = sphi %s4328_s11, %s7298_s11   ;;  %s4262_s10 = sphi %s4326_s10, %s7297_s10   ;;  %s4258_s30 = sphi %s4324_s30, %s7296_s30  }
   0x4   : > { %s4349_s15 = sadd.s32 1, %s4270_s12   ;;  %s228_s16 = sadd.s32 1, %s4266_s11 }
   0x5   : > { %s225_s17 = ssub.s32 %s4270_s12, %s4349_s15  ;;  %p238_p0 = scmp.ne.s32.totalorder %s4266_s11, %s4262_s10 }
   0x6   : > { %p226_p1 = scmp.eq.s32.totalorder %s225_s17, 0  ;;  %p239_p2 = scmp.eq.s32.totalorder %s4345_s13, 1 }
   0x7   : > { %p244_p3 = scmp.ne.s32.totalorder %s4262_s10, %s4258_s30  ;;  %p245_p4 = scmp.eq.s32.totalorder %s3342_s14, 1 }
   0x8   : > { %s4360_s18 = scalar_select %p226_p1, %s4266_s11, %s228_s16  }
   0x9   : > { %p4362_p5 = por %p239_p2, %p238_p0  ;;  %p4366_p6 = por %p245_p4, %p244_p3 }
   0xa   : > { %7088 = sst [smem:[#allocation5_spill]] %s4360_s18  ;;  %p3345_p7 = scmp.ge.s32.totalorder %s4270_s12, 1 }
   0xb   : > { %p302_p8 = scmp.lt.s32.totalorder %s4270_s12, 3 }
   0xd   : > { %p303_p9 = pnand %p3345_p7, %p302_p8 }
   0xe   : > { %s3347_s25 = sshll.u32 (!%p303_p9), %s4345_s13, 5  ;;  %s340_s21 = sand.u32 (!%p303_p9), 1, %s4262_s10  }
   0xf   : > { %306 = sbr.rel (%p303_p9) target bundleno = 726 (0x2d6), region = 56  ;;  %p344_p10 = scmp.lt.s32.totalorder (!%p303_p9), %s3347_s25, 63 }
  0x10   : > { %s5895_s23 = sshll.u32 (!%p303_p9), %s340_s21, 8  ;;  %s3772_s16 = sshll.u32 (!%p303_p9), %s4345_s13, 8 }
  0x11   : > { %s5928_s18 = scalar_lea.vmem (!%p303_p9), [#allocation2], %s5895_s23  ;;  %s3264_s24 = scalar_lea.hbm (!%p303_p9), %s7087_s9, %s3772_s16 }
  0x12   : > { %s3265_s26 = sshll.u32 (!%p303_p9), %s5928_s18, 4  ;;  %s3267_s13 = sshll.u32 (!%p303_p9), %s3264_s24, 4  ;;  %s3266_s26 = int_to_ptr.vmem [resolvable:$true] %s3265_s26  ;;  %s3268_s13 = int_to_ptr.hbm [resolvable:$true] %s3267_s13 }
  0x13   : > { %s4222_s28 = sshra.s32 (!%p303_p9), %s3268_s13, 4  ;;  %s4223_s28 = int_to_ptr.hbm [resolvable:$true] %s4222_s28 }
  0x14   : > { %v3731_v0 = vld [vmem:[%s7080_s2 + $0x38] sm:$0xff]  ;;  %v3730_v2 = vld [vmem:[%s7080_s2 + $0x30] sm:$0xff]  ;;  %v3729_v4 = vld [vmem:[%s7080_s2 + $0x28] sm:$0xff]  ;;  %s7301_s25 = smov (!%p344_p10, %s3347_s25), 63  ;;  %s4224_s29 = scalar_lea.hbm %s4223_s28, 256 }
  0x15   : > { %v3755_v1 = vld [vmem:[%s7082_s4 + $0x38] sm:$0xff]  ;;  %552 = vmatpush.bf16.msra.mxu0 %v3731_v0  ;;  %v3754_v3 = vld [vmem:[%s7082_s4 + $0x30] sm:$0xff]  ;;  %v3753_v5 = vld [vmem:[%s7082_s4 + $0x28] sm:$0xff]  ;;  %s3348_s27 = sshll.u32 %s7301_s25, 2  ;;  %p4225_p11 = scmp.ne.s32.totalorder %s4223_s28, %s4224_s29 }
  0x16   : > { %1477 = vmatpush.bf16.msra.mxu1 %v3755_v1  ;;  %v3728_v6 = vld [vmem:[%s7080_s2 + $0x20] sm:$0xff]  ;;  %v3727_v8 = vld [vmem:[%s7080_s2 + $0x18] sm:$0xff]  ;;  %v3726_v10 = vld [vmem:[%s7080_s2 + $0x10] sm:$0xff]  ;;  %s4424_s22 = scalar_lea.vmem %s7078_s0, %s3348_s27  ;;  %s4429_s25 = scalar_lea.vmem %s7079_s1, %s3348_s27 }
  0x17   : > { %v3752_v7 = vld [vmem:[%s7082_s4 + $0x20] sm:$0xff]  ;;  %v3751_v9 = vld [vmem:[%s7082_s4 + $0x18] sm:$0xff]  ;;  %v3750_v11 = vld [vmem:[%s7082_s4 + $0x10] sm:$0xff]  ;;  %s3253_s27 = scalar_lea.sflag [#allocation3], %s340_s21  ;;  %p4226_p12 = pnand %p4225_p11, %p4362_p5 }
  0x18   : > { %v3725_v12 = vld [vmem:[%s7080_s2 + $0x8] sm:$0xff]  ;;  %v3724_v14 = vld [vmem:[%s7080_s2] sm:$0xff]  ;;  %v3710_v20 = vld [vmem:[%s4424_s22 + $0x10] sm:$0xff]  ;;  %p4229_p0 = scmp.lt.s32.totalorder %s4223_s28, %s7087_s9 }
  0x19   : > { %553 = vmatpush.bf16.msra.mxu0 %v3730_v2  ;;  %v3749_v13 = vld [vmem:[%s7082_s4 + $0x8] sm:$0xff]  ;;  %v3748_v15 = vld [vmem:[%s7082_s4] sm:$0xff]  ;;  %v3734_v21 = vld [vmem:[%s4429_s25 + $0x10] sm:$0xff]  ;;  %p4227_p13 = pneg %p4226_p12 }
  0x1a   : > { %1478 = vmatpush.bf16.msra.mxu1 %v3754_v3  ;;  %v3708_v16 = vld [vmem:[%s4424_s22] sm:$0xff]  ;;  %v3709_v18 = vld [vmem:[%s4424_s22 + $0x8] sm:$0xff]  ;;  %v3711_v22 = vld [vmem:[%s4424_s22 + $0x18] sm:$0xff] }
  0x1b   : > { %v3732_v17 = vld [vmem:[%s4429_s25] sm:$0xff]  ;;  %v3733_v19 = vld [vmem:[%s4429_s25 + $0x8] sm:$0xff]  ;;  %v3735_v23 = vld [vmem:[%s4429_s25 + $0x18] sm:$0xff] }
  0x1c   : > { %v3712_v24 = vld [vmem:[%s4424_s22 + $0x20] sm:$0xff]  ;;  %v3713_v26 = vld [vmem:[%s4424_s22 + $0x28] sm:$0xff]  ;;  %v3714_v28 = vld [vmem:[%s4424_s22 + $0x30] sm:$0xff] }
  0x1d   : > { %554 = vmatpush.bf16.msra.mxu0 %v3729_v4  ;;  %v3736_v25 = vld [vmem:[%s4429_s25 + $0x20] sm:$0xff]  ;;  %v3737_v27 = vld [vmem:[%s4429_s25 + $0x28] sm:$0xff]  ;;  %v3738_v29 = vld [vmem:[%s4429_s25 + $0x30] sm:$0xff] }
  0x1e   : > { %1479 = vmatpush.bf16.msra.mxu1 %v3753_v5  ;;  %v3771_v30 = vld [vmem:[%s7085_s7 + $0x38] sm:$0xff]  ;;  %v3770_v34 = vld [vmem:[%s7085_s7 + $0x30] sm:$0xff]  ;;  %v3769_v36 = vld [vmem:[%s7085_s7 + $0x28] sm:$0xff] }
  0x1f   : > { %v3763_v31 = vld [vmem:[%s7084_s6 + $0x38] sm:$0xff]  ;;  %2318 = vmatpush.bf16.msra.mxu2 %v3771_v30  ;;  %v3762_v35 = vld [vmem:[%s7084_s6 + $0x30] sm:$0xff]  ;;  %v3761_v37 = vld [vmem:[%s7084_s6 + $0x28] sm:$0xff] }
  0x20   : > { %v3715_v32 = vld [vmem:[%s4424_s22 + $0x38] sm:$0xff]  ;;  %2455 = vmatpush.bf16.msra.mxu3 %v3763_v31  ;;  %v3768_v38 = vld [vmem:[%s7085_s7 + $0x20] sm:$0xff]  ;;  %v3766_v50 = vld [vmem:[%s7085_s7 + $0x10] sm:$0xff] }
  0x21   : > { %555 = vmatpush.bf16.msra.mxu0 %v3728_v6  ;;  %v3739_v33 = vld [vmem:[%s4429_s25 + $0x38] sm:$0xff]  ;;  %v3760_v39 = vld [vmem:[%s7084_s6 + $0x20] sm:$0xff]  ;;  %v3758_v51 = vld [vmem:[%s7084_s6 + $0x10] sm:$0xff] }
  0x22   : > { %1480 = vmatpush.bf16.msra.mxu1 %v3752_v7  ;;  %v4474_v40 = vld [vmem:[%s7081_s3] ss:$0 sm:$0xff]  ;;  %v3767_v42 = vld [vmem:[%s7085_s7 + $0x18] sm:$0xff]  ;;  %v3765_v54 = vld [vmem:[%s7085_s7 + $0x8] sm:$0xff] }
  0x23   : > { %2319 = vmatpush.bf16.msra.mxu2 %v3770_v34  ;;  %v4479_v41 = vld [vmem:[%s7083_s5] ss:$0 sm:$0xff]  ;;  %v3759_v43 = vld [vmem:[%s7084_s6 + $0x18] sm:$0xff]  ;;  %v3757_v55 = vld [vmem:[%s7084_s6 + $0x8] sm:$0xff] }
  0x24   : > { %2456 = vmatpush.bf16.msra.mxu3 %v3762_v35  ;;  %v3716_v44 = vld [vmem:[%s4424_s22 + $0x40] sm:$0xff]  ;;  %v3717_v4 = vld [vmem:[%s4424_s22 + $0x48] sm:$0xff] }
  0x25   : > { %556 = vmatpush.bf16.msra.mxu0 %v3727_v8  ;;  %v3740_v45 = vld [vmem:[%s4429_s25 + $0x40] sm:$0xff]  ;;  %v3741_v5 = vld [vmem:[%s4429_s25 + $0x48] sm:$0xff] }
  0x26   : > { %1481 = vmatpush.bf16.msra.mxu1 %v3751_v9  ;;  %v3764_v62 = vld [vmem:[%s7085_s7] sm:$0xff] }
  0x27   : > { %2320 = vmatpush.bf16.msra.mxu2 %v3769_v36  ;;  %v3756_v63 = vld [vmem:[%s7084_s6] sm:$0xff] }
  0x28   : > { %2457 = vmatpush.bf16.msra.mxu3 %v3761_v37 }
  0x29   : > { %557 = vmatpush.bf16.msra.mxu0 %v3726_v10 }
  0x2a   : > { %1482 = vmatpush.bf16.msra.mxu1 %v3750_v11 }
  0x2b   : > { %2321 = vmatpush.bf16.msra.mxu2 %v3768_v38 }
  0x2c   : > { %2458 = vmatpush.bf16.msra.mxu3 %v3760_v39 }
  0x2d   : > { %558 = vmatpush.bf16.msra.mxu0 %v3725_v12 }
  0x2e   : > { %1483 = vmatpush.bf16.msra.mxu1 %v3749_v13 }
  0x2f   : > { %2322 = vmatpush.bf16.msra.mxu2 %v3767_v42  ;;  %v3718_v42 = vld [vmem:[%s4424_s22 + $0x50] sm:$0xff] }
  0x30   : > { %2459 = vmatpush.bf16.msra.mxu3 %v3759_v43  ;;  %v3742_v43 = vld [vmem:[%s4429_s25 + $0x50] sm:$0xff] }
  0x31   : > { %559 = vmatpush.bf16.msra.mxu0 %v3724_v14 }
  0x32   : > { %1484 = vmatpush.bf16.msra.mxu1 %v3748_v15 }
  0x33   : > { %2323 = vmatpush.bf16.msra.mxu2 %v3766_v50 }
  0x34   : > { %560 = vmatmul.bf16.vlgmr.msra.gmra.mxu0 %v3708_v16  ;;  %2460 = vmatpush.bf16.msra.mxu3 %v3758_v51 }
  0x35   : > { %1485 = vmatmul.bf16.vlgmr.msra.gmra.mxu1 %v3732_v17 }
  0x37   : > { %2324 = vmatpush.bf16.msra.mxu2 %v3765_v54 }
  0x38   : > { %2461 = vmatpush.bf16.msra.mxu3 %v3757_v55 }
  0x3b   : > { %2325 = vmatpush.bf16.msra.mxu2 %v3764_v62 }
  0x3c   : > { %2462 = vmatpush.bf16.msra.mxu3 %v3756_v63 }
  0x44   : > { %565 = vmatmul.bf16.gmra.mxu0 %v3709_v18 }
  0x45   : > { %1490 = vmatmul.bf16.gmra.mxu1 %v3733_v19 }
  0x54   : > { %570 = vmatmul.bf16.gmra.mxu0 %v3710_v20 }
  0x55   : > { %1495 = vmatmul.bf16.gmra.mxu1 %v3734_v21 }
  0x64   : > { %575 = vmatmul.bf16.gmra.mxu0 %v3711_v22 }
  0x65   : > { %1500 = vmatmul.bf16.gmra.mxu1 %v3735_v23 }
  0x74   : > { %580 = vmatmul.bf16.gmra.mxu0 %v3712_v24 }
  0x75   : > { %1505 = vmatmul.bf16.gmra.mxu1 %v3736_v25 }
  0x84   : > { %585 = vmatmul.bf16.gmra.mxu0 %v3713_v26 }
  0x85   : > { %1510 = vmatmul.bf16.gmra.mxu1 %v3737_v27 }
  0x94   : > { %590 = vmatmul.bf16.gmra.mxu0 %v3714_v28 }
  0x95   : > { %1515 = vmatmul.bf16.gmra.mxu1 %v3738_v29 }
  0xa4   : > { %595 = vmatmul.bf16.gmra.mxu0 %v3715_v32 }
  0xa5   : > { %1520 = vmatmul.bf16.gmra.mxu1 %v3739_v33 }
  0xb1   : > { %v561_v46 = vpop.f32.mrf.mxu0 }
  0xb2   : > { %v1486_v47 = vpop.f32.mrf.mxu1  ;;  %v4490_v48 = vadd.f32 %v4474_v40, %v561_v46 }
  0xb3   : > { %v4493_v49 = vadd.f32 %v4479_v41, %v1486_v47 }
  0xb4   : > { %v3447_v52 = vmul.f32 -1.442695, %v4490_v48  ;;  %600 = vmatmul.bf16.gmra.mxu0 %v3716_v44 }
  0xb5   : > { %v3575_v53 = vmul.f32 -1.442695, %v4493_v49  ;;  %1525 = vmatmul.bf16.gmra.mxu1 %v3740_v45 }
  0xb6   : > { %3817 = vpow2.f32 %v3447_v52 }
  0xb7   : > { %3819 = vpow2.f32 %v3575_v53 }
  0xb9   : > { %v563_v56 = vpop.f32.mrf.mxu0 }
  0xba   : > { %v1488_v57 = vpop.f32.mrf.mxu1  ;;  %v4510_v58 = vadd.f32 %v4474_v40, %v563_v56 }
  0xbb   : > { %v4513_v59 = vadd.f32 %v4479_v41, %v1488_v57 }
  0xbc   : > { %v3818_v60 = vpop.eup %3817  ;;  %v3448_v61 = vmul.f32 -1.442695, %v4510_v58 }
  0xbd   : > { %v3820_v0 = vpop.eup %3819  ;;  %v4522_v1 = vadd.f32 1.0, %v3818_v60  ;;  %v3576_v2 = vmul.f32 -1.442695, %v4513_v59 }
  0xbe   : > { %v4525_v3 = vadd.f32 1.0, %v3820_v0  ;;  %3821 = vpow2.f32 %v3448_v61 }
  0xbf   : > { %3823 = vrcp.f32 %v4522_v1  ;;  %v780_v27 = vand.u32 2147483648, %v4522_v1  ;;  %v778_v30 = vand.u32 2147483647, %v4522_v1  ;;  %vm774_vm0 = vweird.f32 %v4522_v1 }
  0xc0   : > { %3825 = vrcp.f32 %v4525_v3  ;;  %v1703_v31 = vand.u32 2147483647, %v4525_v3  ;;  %v1705_v35 = vand.u32 2147483648, %v4525_v3  ;;  %vm1699_vm1 = vweird.f32 %v4525_v3 }
  0xc1   : > { %3827 = vpow2.f32 %v3576_v2  ;;  %v566_v6 = vpop.f32.mrf.mxu0  ;;  %v781_v38 = vor.u32 1.1754944e-38, %v780_v27  ;;  %vm4577_vm2 = vcmp.eq.f32.partialorder %v778_v30, 8.507059e+37 }
  0xc2   : > { %v1491_v7 = vpop.f32.mrf.mxu1  ;;  %v4532_v8 = vadd.f32 %v4474_v40, %v566_v6  ;;  %vm4581_vm3 = vcmp.eq.f32.partialorder %v1703_v31, 8.507059e+37  ;;  %v1706_v54 = vor.u32 1.1754944e-38, %v1705_v35 }
  0xc3   : > { %v4535_v9 = vadd.f32 %v4479_v41, %v1491_v7 }
  0xc4   : > { %v3822_v10 = vpop.eup %3821  ;;  %v3449_v11 = vmul.f32 -1.442695, %v4532_v8  ;;  %605 = vmatmul.bf16.gmra.mxu0 %v3717_v4 }
  0xc5   : > { %v3577_v12 = vmul.f32 -1.442695, %v4535_v9  ;;  %1530 = vmatmul.bf16.gmra.mxu1 %v3741_v5  ;;  %v4539_v13 = vpop.eup %3823  ;;  %v4541_v14 = vadd.f32 1.0, %v3822_v10 }
  0xc6   : > { %v4543_v15 = vpop.eup %3825  ;;  %v770_v16 = vmul.f32 %v4539_v13, %v4522_v1  ;;  %3829 = vpow2.f32 %v3449_v11  ;;  %vm775_vm4 = vweird.f32 %v4539_v13 }
  0xc7   : > { %v3828_v17 = vpop.eup %3827  ;;  %v1695_v18 = vmul.f32 %v4543_v15, %v4525_v3  ;;  %3831 = vrcp.f32 %v4541_v14  ;;  %vm1700_vm5 = vweird.f32 %v4543_v15  ;;  %vm789_vm6 = vweird.f32 %v4541_v14  ;;  %vm4607_vm7 = vmor %vm774_vm0, %vm775_vm4 }
  0xc8   : > { %v4550_v19 = vadd.f32 1.0, %v3828_v17  ;;  %3833 = vpow2.f32 %v3577_v12  ;;  %v771_v22 = vsub.f32 1.0, %v770_v16  ;;  %v793_v62 = vand.u32 2147483647, %v4541_v14  ;;  %vm4621_vm8 = vmor %vm1699_vm1, %vm1700_vm5 }
  0xc9   : > { %v568_v20 = vpop.f32.mrf.mxu0  ;;  %v1696_v25 = vsub.f32 1.0, %v1695_v18  ;;  %v795_v10 = vand.u32 2147483648, %v4541_v14 }
  0xca   : > { %v1493_v21 = vpop.f32.mrf.mxu1  ;;  %3835 = vrcp.f32 %v4550_v19  ;;  %v4554_v23 = vadd.f32 %v4474_v40, %v568_v20  ;;  %v772_v34 = vmul.f32 %v4539_v13, %v771_v22  ;;  %v1718_v61 = vand.u32 2147483647, %v4550_v19 }
  0xcb   : > { %v4557_v24 = vadd.f32 %v4479_v41, %v1493_v21  ;;  %v1697_v36 = vmul.f32 %v4543_v15, %v1696_v25  ;;  %v1720_v2 = vand.u32 2147483648, %v4550_v19  ;;  %vm1714_vm11 = vweird.f32 %v4550_v19 }
  0xcc   : > { %v3830_v26 = vpop.eup %3829  ;;  %v3450_v28 = vmul.f32 -1.442695, %v4554_v23  ;;  %v773_v53 = vadd.f32 %v4539_v13, %v772_v34  ;;  %vm4638_vm12 = vcmp.eq.f32.partialorder %v793_v62, 8.507059e+37  ;;  %vm4644_vm13 = vcmp.eq.f32.partialorder %v1718_v61, 8.507059e+37 }
  0xcd   : > { %v4561_v29 = vpop.eup %3831  ;;  %v3578_v32 = vmul.f32 -1.442695, %v4557_v24  ;;  %v4573_v39 = vadd.f32 1.0, %v3830_v26  ;;  %v1698_v56 = vadd.f32 %v4543_v15, %v1697_v36  ;;  %v1721_v25 = vor.u32 1.1754944e-38, %v1720_v2 }
  0xce   : > { %v3834_v33 = vpop.eup %3833  ;;  %3837 = vpow2.f32 %v3450_v28  ;;  %v785_v52 = vmul.f32 %v4561_v29, %v4541_v14  ;;  %v777_v6 = vsel %vm4607_vm7, %v4539_v13, %v773_v53  ;;  %vm790_vm9 = vweird.f32 %v4561_v29 }
  0xcf   : > { %v4585_v46 = vadd.f32 1.0, %v3834_v33  ;;  %3839 = vpow2.f32 %v3578_v32  ;;  %v1702_v12 = vsel %vm4621_vm8, %v4543_v15, %v1698_v56  ;;  %vm791_vm14 = vmor %vm789_vm6, %vm790_vm9  ;;  %v796_v30 = vor.u32 1.1754944e-38, %v795_v10 }
  0xd0   : > { %v4570_v37 = vpop.eup %3835  ;;  %v786_v4 = vsub.f32 1.0, %v785_v52  ;;  %v1707_v27 = vsel %vm4581_vm3, %v1706_v54, %v1702_v12  ;;  %vm804_vm0 = vweird.f32 %v4573_v39 }
  0xd1   : > { %v571_v47 = vpop.f32.mrf.mxu0  ;;  %v1710_v51 = vmul.f32 %v4570_v37, %v4550_v19  ;;  %3841 = vrcp.f32 %v4585_v46  ;;  %vm1715_vm10 = vweird.f32 %v4570_v37  ;;  %v782_v19 = vsel %vm4577_vm2, %v781_v38, %v777_v6 }
  0xd2   : > { %v1496_v50 = vpop.f32.mrf.mxu1  ;;  %v4594_v55 = vadd.f32 %v4474_v40, %v571_v47  ;;  %3843 = vrcp.f32 %v4573_v39  ;;  %v787_v3 = vmul.f32 %v4561_v29, %v786_v4  ;;  %vm1716_vm15 = vmor %vm1714_vm11, %vm1715_vm10  ;;  %v2174_v44 = vmul.f32 %v1707_v27, %v4493_v49 }
  0xd3   : > { %v4600_v57 = vadd.f32 %v4479_v41, %v1496_v50  ;;  %v1711_v60 = vsub.f32 1.0, %v1710_v51  ;;  %v3719_v51 = vld [vmem:[%s4424_s22 + $0x58] sm:$0xff]  ;;  %v1735_v1 = vand.u32 2147483648, %v4585_v46  ;;  %vm1729_vm3 = vweird.f32 %v4585_v46 }
  0xd4   : > { %610 = vmatmul.bf16.gmra.mxu0 %v3718_v42  ;;  %v3451_v0 = vmul.f32 -1.442695, %v4594_v55  ;;  %v3838_v5 = vpop.eup %3837  ;;  %v788_v26 = vadd.f32 %v4561_v29, %v787_v3  ;;  %v1249_v42 = vmul.f32 %v782_v19, %v4490_v48 }
  0xd5   : > { %1535 = vmatmul.bf16.gmra.mxu1 %v3742_v43  ;;  %v1712_v7 = vmul.f32 %v4570_v37, %v1711_v60  ;;  %v3840_v11 = vpop.eup %3839  ;;  %v3579_v13 = vmul.f32 -1.442695, %v4600_v57  ;;  %v4657_v28 = vadd.f32 1.0, %v3838_v5 }
  0xd6   : > { %v4634_v16 = vadd.f32 1.0, %v3840_v11  ;;  %3845 = vpow2.f32 %v3451_v0  ;;  %v792_v33 = vsel %vm791_vm14, %v4561_v29, %v788_v26  ;;  %v1733_v26 = vand.u32 2147483647, %v4585_v46 }
  0xd7   : > { %v1713_v17 = vadd.f32 %v4570_v37, %v1712_v7  ;;  %v4642_v20 = vpop.eup %3841  ;;  %3847 = vpow2.f32 %v3579_v13  ;;  %v797_v36 = vsel %vm4638_vm12, %v796_v30, %v792_v33 }
  0xd8   : > { %v4661_v31 = vpop.eup %3843  ;;  %v1725_v34 = vmul.f32 %v4642_v20, %v4585_v46  ;;  %3849 = vrcp.f32 %v4634_v16  ;;  %v1250_v29 = vmul.f32 %v797_v36, %v4510_v58  ;;  %vm1730_vm1 = vweird.f32 %v4642_v20 }
  0xd9   : > { %v573_v15 = vpop.f32.mrf.mxu0  ;;  %v1717_v14 = vsel %vm1716_vm15, %v4570_v37, %v1713_v17  ;;  %v800_v37 = vmul.f32 %v4661_v31, %v4573_v39  ;;  %3851 = vrcp.f32 %v4657_v28  ;;  %v1750_v13 = vand.u32 2147483648, %v4634_v16  ;;  %vm4726_vm5 = vmor %vm1729_vm3, %vm1730_vm1 }
  0xda   : > { %v1498_v21 = vpop.f32.mrf.mxu1  ;;  %v1722_v35 = vsel %vm4644_vm13, %v1721_v25, %v1717_v14  ;;  %v4683_v45 = vadd.f32 %v4474_v40, %v573_v15  ;;  %v1726_v50 = vsub.f32 1.0, %v1725_v34  ;;  %v2206_v53 = vpack.c.bf16 %v1250_v29, %v1249_v42 }
  0xdb   : > { %v4664_v32 = vadd.f32 %v4479_v41, %v1498_v21  ;;  %v2175_v38 = vmul.f32 %v1722_v35, %v4513_v59  ;;  %v3743_v59 = vld [vmem:[%s4429_s25 + $0x58] sm:$0xff]  ;;  %v801_v58 = vsub.f32 1.0, %v800_v37  ;;  %v1748_v22 = vand.u32 2147483647, %v4634_v16 }
  0xdc   : > { %v3846_v43 = vpop.eup %3845  ;;  %v3452_v49 = vmul.f32 -1.442695, %v4683_v45  ;;  %2463 = vmatmul.bf16.vlgmr.msra.gmra.mxu3 %v2206_v53  ;;  %v1727_v62 = vmul.f32 %v4642_v20, %v1726_v50  ;;  %v808_v25 = vand.u32 2147483647, %v4573_v39  ;;  %vm805_vm4 = vweird.f32 %v4661_v31  ;;  %v3744_v53 = vld [vmem:[%s4429_s25 + $0x60] sm:$0xff] }
  0xdd   : > { %v3580_v47 = vmul.f32 -1.442695, %v4664_v32  ;;  %v3848_v52 = vpop.eup %3847  ;;  %v2238_v48 = vpack.c.bf16 %v2175_v38, %v2174_v44  ;;  %v4688_v61 = vadd.f32 1.0, %v3846_v43  ;;  %v802_v6 = vmul.f32 %v4661_v31, %v801_v58  ;;  %vm4746_vm10 = vmor %vm804_vm0, %vm805_vm4 }
  0xde   : > { %v3850_v60 = vpop.eup %3849  ;;  %v4700_v4 = vadd.f32 1.0, %v3848_v52  ;;  %v1728_v12 = vadd.f32 %v4642_v20, %v1727_v62  ;;  %vm1744_vm6 = vweird.f32 %v4634_v16  ;;  %v1751_v34 = vor.u32 1.1754944e-38, %v1750_v13 }
  0xdf   : > { %3853 = vpow2.f32 %v3580_v47  ;;  %2326 = vmatmul.bf16.vlgmr.msra.gmra.mxu2 %v2238_v48  ;;  %v4698_v2 = vpop.eup %3851  ;;  %v1740_v5 = vmul.f32 %v3850_v60, %v4634_v16  ;;  %vm1745_vm2 = vweird.f32 %v3850_v60  ;;  %v803_v33 = vadd.f32 %v4661_v31, %v802_v6 }
  0xe0   : > { %3855 = vrcp.f32 %v4688_v61  ;;  %v815_v3 = vmul.f32 %v4698_v2, %v4657_v28  ;;  %v1732_v46 = vsel %vm4726_vm5, %v4642_v20, %v1728_v12  ;;  %vm1746_vm7 = vmor %vm1744_vm6, %vm1745_vm2  ;;  %v810_v38 = vand.u32 2147483648, %v4573_v39  ;;  %v3720_v39 = vld [vmem:[%s4424_s22 + $0x60] sm:$0xff] }
  0xe1   : > { %v576_v54 = vpop.f32.mrf.mxu0  ;;  %3857 = vpow2.f32 %v3452_v49  ;;  %v1741_v11 = vsub.f32 1.0, %v1740_v5  ;;  %v1736_v42 = vor.u32 1.1754944e-38, %v1735_v1  ;;  %vm1749_vm8 = vcmp.eq.f32.partialorder %v1748_v22, 8.507059e+37 }
  0xe2   : > { %v1501_v56 = vpop.f32.mrf.mxu1  ;;  %v4693_v63 = vadd.f32 %v4474_v40, %v576_v54  ;;  %v816_v35 = vsub.f32 1.0, %v815_v3  ;;  %vm1734_vm9 = vcmp.eq.f32.partialorder %v1733_v26, 8.507059e+37  ;;  %vm820_vm11 = vweird.f32 %v4698_v2 }
  0xe3   : > { %v4696_v0 = vadd.f32 %v4479_v41, %v1501_v56  ;;  %v1742_v21 = vmul.f32 %v3850_v60, %v1741_v11  ;;  %v1737_v47 = vsel %vm1734_vm9, %v1736_v42, %v1732_v46  ;;  %vm809_vm12 = vcmp.eq.f32.partialorder %v808_v25, 8.507059e+37 }
  0xe4   : > { %615 = vmatmul.bf16.gmra.mxu0 %v3719_v51  ;;  %v3453_v7 = vmul.f32 -1.442695, %v4693_v63  ;;  %v817_v43 = vmul.f32 %v4698_v2, %v816_v35  ;;  %v825_v51 = vand.u32 2147483648, %v4657_v28  ;;  %v811_v56 = vor.u32 1.1754944e-38, %v810_v38 }
  0xe5   : > { %1540 = vmatmul.bf16.gmra.mxu1 %v3743_v59  ;;  %v3581_v10 = vmul.f32 -1.442695, %v4696_v0  ;;  %v3854_v17 = vpop.eup %3853  ;;  %v1743_v30 = vadd.f32 %v3850_v60, %v1742_v21  ;;  %v807_v59 = vsel %vm4746_vm10, %v4661_v31, %v803_v33  ;;  %v823_v58 = vand.u32 2147483647, %v4657_v28 }
  0xe6   : > { %3859 = vpow2.f32 %v3453_v7  ;;  %v4721_v19 = vadd.f32 1.0, %v3854_v17  ;;  %v4731_v14 = vpop.eup %3855  ;;  %v818_v48 = vadd.f32 %v4698_v2, %v817_v43  ;;  %v2176_v5 = vmul.f32 %v1737_v47, %v4535_v9 }
  0xe7   : > { %3861 = vrcp.f32 %v4700_v4  ;;  %v3858_v36 = vpop.eup %3857  ;;  %v1747_v37 = vsel %vm1746_vm7, %v3850_v60, %v1743_v30  ;;  %v830_v50 = vmul.f32 %v4731_v14, %v4688_v61  ;;  %vm819_vm13 = vweird.f32 %v4657_v28 }
  0xe8   : > { %3863 = vpow2.f32 %v3581_v10  ;;  %v1752_v29 = vsel %vm1749_vm8, %v1751_v34, %v1747_v37  ;;  %v4767_v31 = vadd.f32 1.0, %v3858_v36  ;;  %v812_v6 = vsel %vm809_vm12, %v811_v56, %v807_v59  ;;  %vm821_vm14 = vmor %vm819_vm13, %vm820_vm11 }
  0xe9   : > { %v4715_v18 = vpop.f32.mrf.mxu0  ;;  %3865 = vrcp.f32 %v4721_v19  ;;  %v2177_v52 = vmul.f32 %v1752_v29, %v4557_v24  ;;  %v831_v1 = vsub.f32 1.0, %v830_v50  ;;  %v822_v12 = vsel %vm821_vm14, %v4698_v2, %v818_v48 }
  0xea   : > { %v1503_v15 = vpop.f32.mrf.mxu1  ;;  %v826_v13 = vor.u32 1.1754944e-38, %v825_v51  ;;  %vm824_vm15 = vcmp.eq.f32.partialorder %v823_v58, 8.507059e+37  ;;  %v1251_v21 = vmul.f32 %v812_v6, %v4532_v8  ;;  %vm834_vm0 = vweird.f32 %v4688_v61 }
  0xeb   : > { %v4771_v7 = vadd.f32 %v4479_v41, %v1503_v15  ;;  %v2239_v9 = vpack.c.bf16 %v2177_v52, %v2176_v5  ;;  %v832_v26 = vmul.f32 %v4731_v14, %v831_v1  ;;  %v838_v30 = vand.u32 2147483647, %v4688_v61 }
  0xec   : > { %v3860_v16 = vpop.eup %3859  ;;  %v827_v17 = vsel %vm824_vm15, %v826_v13, %v822_v12  ;;  %vm835_vm1 = vweird.f32 %v4731_v14  ;;  %v4816_v43 = vadd.f32 %v4474_v40, %v4715_v18  ;;  %vm1774_vm4 = vweird.f32 %v4721_v19 }
  0xed   : > { %v4740_v44 = vpop.eup %3861  ;;  %v4761_v60 = vadd.f32 1.0, %v3860_v16  ;;  %v3582_v2 = vmul.f32 -1.442695, %v4771_v7  ;;  %v1252_v22 = vmul.f32 %v827_v17, %v4554_v23  ;;  %v840_v23 = vand.u32 2147483648, %v4688_v61  ;;  %vm4833_vm5 = vmor %vm834_vm0, %vm835_vm1 }
  0xee   : > { %v3864_v54 = vpop.eup %3863  ;;  %v1755_v24 = vmul.f32 %v4740_v44, %v4700_v4  ;;  %vm1760_vm2 = vweird.f32 %v4740_v44  ;;  %v833_v29 = vadd.f32 %v4731_v14, %v832_v26  ;;  %v1780_v18 = vand.u32 2147483648, %v4721_v19 }
  0xef   : > { %v4775_v10 = vpop.eup %3865  ;;  %v4777_v11 = vadd.f32 1.0, %v3864_v54  ;;  %3867 = vrcp.f32 %v4761_v60  ;;  %2331 = vmatmul.bf16.gmra.mxu2 %v2239_v9  ;;  %v2207_v33 = vpack.c.bf16 %v1252_v22, %v1251_v21  ;;  %vm1759_vm6 = vweird.f32 %v4700_v4 }
  0xf0   : > { %v1756_v3 = vsub.f32 1.0, %v1755_v24  ;;  %3869 = vrcp.f32 %v4767_v31  ;;  %v1770_v25 = vmul.f32 %v4775_v10, %v4721_v19  ;;  %vm1775_vm3 = vweird.f32 %v4775_v10  ;;  %vm4858_vm8 = vmor %vm1759_vm6, %vm1760_vm2 }
  0xf1   : > { %v581_v49 = vpop.f32.mrf.mxu0  ;;  %3871 = vrcp.f32 %v4777_v11  ;;  %2468 = vmatmul.bf16.gmra.mxu3 %v2207_v33  ;;  %v1763_v56 = vand.u32 2147483647, %v4700_v4  ;;  %v1765_v58 = vand.u32 2147483648, %v4700_v4  ;;  %vm4844_vm7 = vmor %vm1774_vm4, %vm1775_vm3  ;;  %v841_v6 = vor.u32 1.1754944e-38, %v840_v23 }
  0xf2   : > { %v1506_v62 = vpop.f32.mrf.mxu1  ;;  %v4782_v28 = vadd.f32 %v4474_v40, %v581_v49  ;;  %v1757_v35 = vmul.f32 %v4740_v44, %v1756_v3  ;;  %3873 = vpow2.f32 %v3582_v2  ;;  %v1771_v37 = vsub.f32 1.0, %v1770_v25 }
  0xf3   : > { %v4786_v15 = vadd.f32 %v4479_v41, %v1506_v62  ;;  %v837_v62 = vsel %vm4833_vm5, %v4731_v14, %v833_v29  ;;  %v3454_v9 = vmul.f32 -1.442695, %v4816_v43  ;;  %v1781_v14 = vor.u32 1.1754944e-38, %v1780_v18  ;;  %v3745_v29 = vld [vmem:[%s4429_s25 + $0x68] sm:$0xff] }
  0xf4   : > { %620 = vmatmul.bf16.gmra.mxu0 %v3720_v39  ;;  %v3455_v27 = vmul.f32 -1.442695, %v4782_v28  ;;  %v1772_v50 = vmul.f32 %v4775_v10, %v1771_v37  ;;  %v1758_v59 = vadd.f32 %v4740_v44, %v1757_v35  ;;  %vm839_vm9 = vcmp.eq.f32.partialorder %v838_v30, 8.507059e+37  ;;  %v3721_v37 = vld [vmem:[%s4424_s22 + $0x68] sm:$0xff] }
  0xf5   : > { %1545 = vmatmul.bf16.gmra.mxu1 %v3744_v53  ;;  %v3583_v8 = vmul.f32 -1.442695, %v4786_v15  ;;  %v4807_v42 = vpop.eup %3867  ;;  %v1778_v53 = vand.u32 2147483647, %v4721_v19  ;;  %v842_v17 = vsel %vm839_vm9, %v841_v6, %v837_v62  ;;  %v1766_v21 = vor.u32 1.1754944e-38, %v1765_v58 }
  0xf6   : > { %v4811_v16 = vpop.eup %3869  ;;  %3875 = vpow2.f32 %v3455_v27  ;;  %v860_v52 = vmul.f32 %v4807_v42, %v4761_v60  ;;  %v1773_v39 = vadd.f32 %v4775_v10, %v1772_v50  ;;  %v1762_v13 = vsel %vm4858_vm8, %v4740_v44, %v1758_v59 }
  0xf7   : > { %3877 = vpow2.f32 %v3583_v8  ;;  %v4822_v51 = vpop.eup %3871  ;;  %v845_v54 = vmul.f32 %v4811_v16, %v4767_v31  ;;  %vm1779_vm10 = vcmp.eq.f32.partialorder %v1778_v53, 8.507059e+37  ;;  %vm1764_vm11 = vcmp.eq.f32.partialorder %v1763_v56, 8.507059e+37 }
  0xf8   : > { %v3874_v49 = vpop.eup %3873  ;;  %v1785_v19 = vmul.f32 %v4822_v51, %v4777_v11  ;;  %v1777_v5 = vsel %vm4844_vm7, %v4775_v10, %v1773_v39  ;;  %v861_v1 = vsub.f32 1.0, %v860_v52  ;;  %v1767_v30 = vsel %vm1764_vm11, %v1766_v21, %v1762_v13 }
  0xf9   : > { %v583_v46 = vpop.f32.mrf.mxu0  ;;  %v846_v10 = vsub.f32 1.0, %v845_v54  ;;  %v4866_v2 = vadd.f32 1.0, %v3874_v49  ;;  %v1782_v22 = vsel %vm1779_vm10, %v1781_v14, %v1777_v5  ;;  %vm864_vm12 = vweird.f32 %v4761_v60 }
  0xfa   : > { %v1508_v34 = vpop.f32.mrf.mxu1  ;;  %v4802_v36 = vadd.f32 %v4474_v40, %v583_v46  ;;  %v1786_v26 = vsub.f32 1.0, %v1785_v19  ;;  %v862_v33 = vmul.f32 %v4807_v42, %v861_v1  ;;  %v4874_v46 = vmul.f32 %v842_v17, %v4594_v55 }
  0xfb   : > { %v4805_v38 = vadd.f32 %v4479_v41, %v1508_v34  ;;  %v2179_v34 = vmul.f32 %v1782_v22, %v4664_v32  ;;  %v847_v23 = vmul.f32 %v4811_v16, %v846_v10  ;;  %v2178_v55 = vmul.f32 %v1767_v30, %v4600_v57 }
  0xfc   : > { %v3456_v47 = vmul.f32 -1.442695, %v4802_v36  ;;  %v3876_v24 = vpop.eup %3875  ;;  %v1787_v59 = vmul.f32 %v4822_v51, %v1786_v26  ;;  %vm850_vm13 = vweird.f32 %v4811_v16  ;;  %v863_v32 = vadd.f32 %v4807_v42, %v862_v33 }
  0xfd   : > { %v3584_v20 = vmul.f32 -1.442695, %v4805_v38  ;;  %v3878_v12 = vpop.eup %3877  ;;  %v4868_v27 = vadd.f32 1.0, %v3876_v24  ;;  %vm865_vm14 = vweird.f32 %v4807_v42  ;;  %v2240_v18 = vpack.c.bf16 %v2179_v34, %v2178_v55 }
  0xfe   : > { %v4871_v44 = vadd.f32 1.0, %v3878_v12  ;;  %v848_v48 = vadd.f32 %v4811_v16, %v847_v23  ;;  %vm849_vm15 = vweird.f32 %v4767_v31  ;;  %v853_v57 = vand.u32 2147483647, %v4767_v31  ;;  %vm4922_vm3 = vmor %vm864_vm12, %vm865_vm14 }
  0xff   : > { %3879 = vpow2.f32 %v3584_v20  ;;  %v868_v20 = vand.u32 2147483647, %v4761_v60  ;;  %vm4899_vm0 = vmor %vm849_vm15, %vm850_vm13  ;;  %v855_v54 = vand.u32 2147483648, %v4767_v31  ;;  %v1788_v61 = vadd.f32 %v4822_v51, %v1787_v59  ;;  %2336 = vmatmul.bf16.gmra.mxu2 %v2240_v18 }
 0x100   : > { %3881 = vpow2.f32 %v3456_v47  ;;  %v870_v47 = vand.u32 2147483648, %v4761_v60  ;;  %vm1789_vm1 = vweird.f32 %v4777_v11  ;;  %vm1790_vm2 = vweird.f32 %v4822_v51 }
 0x101   : > { %v586_v3 = vpop.f32.mrf.mxu0  ;;  %3883 = vpow2.f32 %v3454_v9  ;;  %v852_v49 = vsel %vm4899_vm0, %v4811_v16, %v848_v48  ;;  %v1793_v5 = vand.u32 2147483647, %v4777_v11  ;;  %v1795_v24 = vand.u32 2147483648, %v4777_v11  ;;  %vm4941_vm5 = vmor %vm1789_vm1, %vm1790_vm2 }
 0x102   : > { %v1511_v35 = vpop.f32.mrf.mxu1  ;;  %3885 = vrcp.f32 %v4866_v2  ;;  %v4905_v56 = vadd.f32 %v4474_v40, %v586_v3  ;;  %v856_v6 = vor.u32 1.1754944e-38, %v855_v54  ;;  %v867_v16 = vsel %vm4922_vm3, %v4807_v42, %v863_v32 }
 0x103   : > { %3887 = vrcp.f32 %v4868_v27  ;;  %v4908_v58 = vadd.f32 %v4479_v41, %v1511_v35  ;;  %v871_v1 = vor.u32 1.1754944e-38, %v870_v47  ;;  %vm854_vm4 = vcmp.eq.f32.partialorder %v853_v57, 8.507059e+37 }
 0x104   : > { %625 = vmatmul.bf16.gmra.mxu0 %v3721_v37  ;;  %3889 = vrcp.f32 %v4871_v44  ;;  %v3457_v60 = vmul.f32 -1.442695, %v4905_v56  ;;  %v857_v13 = vsel %vm854_vm4, %v856_v6, %v852_v49  ;;  %vm869_vm6 = vcmp.eq.f32.partialorder %v868_v20, 8.507059e+37 }
 0x105   : > { %v3880_v25 = vpop.eup %3879  ;;  %1550 = vmatmul.bf16.gmra.mxu1 %v3745_v29  ;;  %v3585_v10 = vmul.f32 -1.442695, %v4908_v58  ;;  %v1792_v3 = vsel %vm4941_vm5, %v4822_v51, %v1788_v61  ;;  %v1254_v17 = vmul.f32 %v857_v13, %v4683_v45  ;;  %v1796_v26 = vor.u32 1.1754944e-38, %v1795_v24 }
 0x106   : > { %v3882_v8 = vpop.eup %3881  ;;  %v4884_v50 = vadd.f32 1.0, %v3880_v25  ;;  %v872_v25 = vsel %vm869_vm6, %v871_v1, %v867_v16  ;;  %vm1794_vm7 = vcmp.eq.f32.partialorder %v1793_v5, 8.507059e+37  ;;  %v900_v37 = vand.u32 2147483648, %v4868_v27 }
 0x107   : > { %v4893_v52 = vadd.f32 1.0, %v3882_v8  ;;  %v3884_v39 = vpop.eup %3883  ;;  %v2208_v51 = vpack.c.bf16 %v1254_v17, %v4874_v46  ;;  %v1797_v8 = vsel %vm1794_vm7, %v1796_v26, %v1792_v3  ;;  %v4972_v35 = vmul.f32 %v872_v25, %v4693_v63 }
 0x108   : > { %3891 = vrcp.f32 %v4884_v50  ;;  %v4916_v19 = vpop.eup %3885  ;;  %v4945_v12 = vadd.f32 1.0, %v3884_v39  ;;  %v1825_v47 = vand.u32 2147483648, %v4871_v44  ;;  %v4980_v59 = vmul.f32 %v1797_v8, %v4696_v0 }
 0x109   : > { %v588_v62 = vpop.f32.mrf.mxu0  ;;  %3893 = vrcp.f32 %v4893_v52  ;;  %v4929_v4 = vpop.eup %3887  ;;  %v1800_v21 = vmul.f32 %v4916_v19, %v4866_v2  ;;  %2473 = vmatmul.bf16.gmra.mxu3 %v2208_v51  ;;  %vm894_vm8 = vweird.f32 %v4868_v27  ;;  %v898_v57 = vand.u32 2147483647, %v4868_v27  ;;  %v5139_v51 = vld [vmem:[%s7081_s3] ss:$0 sm:$0xff] }
 0x10a   : > { %v4935_v9 = vpop.eup %3889  ;;  %v4949_v42 = vadd.f32 %v4474_v40, %v588_v62  ;;  %v1513_v11 = vpop.f32.mrf.mxu1  ;;  %v890_v30 = vmul.f32 %v4929_v4, %v4868_v27  ;;  %3895 = vpow2.f32 %v3457_v60  ;;  %vm1805_vm9 = vweird.f32 %v4916_v19 }
 0x10b   : > { %v1815_v33 = vmul.f32 %v4935_v9, %v4871_v44  ;;  %3897 = vpow2.f32 %v3585_v10  ;;  %v4969_v23 = vadd.f32 %v4479_v41, %v1513_v11  ;;  %v1801_v46 = vsub.f32 1.0, %v1800_v21 }
 0x10c   : > { %3899 = vrcp.f32 %v4945_v12  ;;  %v3458_v34 = vmul.f32 -1.442695, %v4949_v42  ;;  %v891_v20 = vsub.f32 1.0, %v890_v30  ;;  %v1810_v39 = vand.u32 2147483648, %v4866_v2 }
 0x10d   : > { %v3586_v55 = vmul.f32 -1.442695, %v4969_v23  ;;  %v1816_v32 = vsub.f32 1.0, %v1815_v33  ;;  %v1802_v18 = vmul.f32 %v4916_v19, %v1801_v46  ;;  %vm1819_vm10 = vweird.f32 %v4871_v44 }
 0x10e   : > { %v4957_v22 = vpop.eup %3891  ;;  %3901 = vpow2.f32 %v3458_v34  ;;  %v1823_v0 = vand.u32 2147483647, %v4871_v44  ;;  %v1808_v49 = vand.u32 2147483647, %v4866_v2  ;;  %v892_v31 = vmul.f32 %v4929_v4, %v891_v20 }
 0x10f   : > { %v4964_v45 = vpop.eup %3893  ;;  %v1830_v29 = vmul.f32 %v4957_v22, %v4884_v50  ;;  %3903 = vpow2.f32 %v3586_v55  ;;  %v1803_v61 = vadd.f32 %v4916_v19, %v1802_v18  ;;  %v4996_v5 = vor.u32 1.1754944e-38, %v900_v37  ;;  %v3722_v55 = vld [vmem:[%s4424_s22 + $0x70] sm:$0xff] }
 0x110   : > { %v905_v63 = vmul.f32 %v4964_v45, %v4893_v52  ;;  %v3896_v48 = vpop.eup %3895  ;;  %v4998_v24 = vor.u32 1.1754944e-38, %v1825_v47  ;;  %vm1804_vm11 = vweird.f32 %v4866_v2  ;;  %v1817_v6 = vmul.f32 %v4935_v9, %v1816_v32  ;;  %v3746_v32 = vld [vmem:[%s4429_s25 + $0x70] sm:$0xff] }
 0x111   : > { %v3898_v53 = vpop.eup %3897  ;;  %v1831_v54 = vsub.f32 1.0, %v1830_v29  ;;  %v913_v1 = vand.u32 2147483647, %v4893_v52  ;;  %v5003_v60 = vadd.f32 1.0, %v3896_v48  ;;  %vm5007_vm12 = vmor %vm1804_vm11, %vm1805_vm9  ;;  %v915_v10 = vand.u32 2147483648, %v4893_v52  ;;  %v591_v11 = vpop.f32.mrf.mxu0 }
 0x112   : > { %v4993_v62 = vpop.eup %3899  ;;  %v906_v16 = vsub.f32 1.0, %v905_v63  ;;  %v5012_v3 = vadd.f32 1.0, %v3898_v53  ;;  %v1807_v2 = vsel %vm5007_vm12, %v4916_v19, %v1803_v61  ;;  %v1811_v17 = vor.u32 1.1754944e-38, %v1810_v39  ;;  %v1516_v29 = vpop.f32.mrf.mxu1 }
 0x113   : > { %vm5017_vm13 = vcmp.eq.f32.partialorder %v898_v57, 8.507059e+37  ;;  %vm909_vm14 = vweird.f32 %v4893_v52  ;;  %v1832_v25 = vmul.f32 %v4957_v22, %v1831_v54  ;;  %vm1809_vm15 = vcmp.eq.f32.partialorder %v1808_v49, 8.507059e+37 }
 0x114   : > { %v3902_v13 = vpop.eup %3901  ;;  %v875_v30 = vmul.f32 %v4993_v62, %v4945_v12  ;;  %v893_v19 = vadd.f32 %v4929_v4, %v892_v31  ;;  %vm895_vm0 = vweird.f32 %v4929_v4  ;;  %vm5029_vm1 = vcmp.eq.f32.partialorder %v1823_v0, 8.507059e+37  ;;  %630 = vmatmul.bf16.gmra.mxu0 %v3722_v55 }
 0x115   : > { %v5023_v26 = vadd.f32 1.0, %v3902_v13  ;;  %v3904_v33 = vpop.eup %3903  ;;  %vm1834_vm2 = vweird.f32 %v4884_v50  ;;  %v1812_v8 = vsel %vm1809_vm15, %v1811_v17, %v1807_v2  ;;  %v1818_v34 = vadd.f32 %v4935_v9, %v1817_v6  ;;  %vm5048_vm4 = vmor %vm894_vm8, %vm895_vm0  ;;  %1555 = vmatmul.bf16.gmra.mxu1 %v3746_v32 }
 0x116   : > { %vm1820_vm3 = vweird.f32 %v4935_v9  ;;  %v907_v37 = vmul.f32 %v4964_v45, %v906_v16  ;;  %3905 = vrcp.f32 %v5003_v60  ;;  %v5039_v46 = vadd.f32 1.0, %v3904_v33 }
 0x117   : > { %3907 = vrcp.f32 %v5012_v3  ;;  %v2181_v20 = vmul.f32 %v1812_v8, %v4771_v7  ;;  %v876_v47 = vsub.f32 1.0, %v875_v30  ;;  %v1833_v18 = vadd.f32 %v4957_v22, %v1832_v25  ;;  %vm5063_vm6 = vmor %vm1819_vm10, %vm1820_vm3 }
 0x118   : > { %vm1835_vm5 = vweird.f32 %v4957_v22  ;;  %v1838_v48 = vand.u32 2147483647, %v4884_v50  ;;  %3909 = vrcp.f32 %v5023_v26  ;;  %v897_v7 = vsel %vm5048_vm4, %v4929_v4, %v893_v19 }
 0x119   : > { %vm910_vm7 = vweird.f32 %v4964_v45  ;;  %v1840_v57 = vand.u32 2147483648, %v4884_v50  ;;  %3911 = vrcp.f32 %v5039_v46  ;;  %v1822_v4 = vsel %vm5063_vm6, %v4935_v9, %v1818_v34  ;;  %vm5078_vm9 = vmor %vm1834_vm2, %vm1835_vm5 }
 0x11a   : > { %v908_v39 = vadd.f32 %v4964_v45, %v907_v37  ;;  %v2241_v44 = vpack.c.bf16 %v2181_v20, %v4980_v59  ;;  %vm880_vm8 = vweird.f32 %v4993_v62  ;;  %v877_v0 = vmul.f32 %v4993_v62, %v876_v47  ;;  %vm5109_vm11 = vmor %vm909_vm14, %vm910_vm7  ;;  %v1518_v21 = vpop.f32.mrf.mxu1 }
 0x11b   : > { %v883_v54 = vand.u32 2147483647, %v4945_v12  ;;  %v885_v61 = vand.u32 2147483648, %v4945_v12  ;;  %v5086_v9 = vadd.f32 %v4474_v40, %v591_v11  ;;  %v916_v59 = vor.u32 1.1754944e-38, %v915_v10 }
 0x11c   : > { %v5088_v49 = vpop.eup %3905  ;;  %v1837_v50 = vsel %vm5078_vm9, %v4957_v22, %v1833_v18  ;;  %vm5093_vm10 = vcmp.eq.f32.partialorder %v1838_v48, 8.507059e+37  ;;  %2341 = vmatmul.bf16.gmra.mxu2 %v2241_v44  ;;  %v5098_v6 = vadd.f32 %v4479_v41, %v1516_v29  ;;  %v902_v40 = vsel %vm5017_vm13, %v4996_v5, %v897_v7  ;;  %v593_v41 = vpop.f32.mrf.mxu0 }
 0x11d   : > { %v5100_v16 = vpop.eup %3907  ;;  %v1841_v14 = vor.u32 1.1754944e-38, %v1840_v57  ;;  %v878_v13 = vadd.f32 %v4993_v62, %v877_v0  ;;  %vm879_vm12 = vweird.f32 %v4945_v12  ;;  %v1827_v5 = vsel %vm5029_vm1, %v4998_v24, %v1822_v4  ;;  %v3723_v0 = vld [vmem:[%s4424_s22 + $0x78] sm:$0xff] }
 0x11e   : > { %v5115_v10 = vpop.eup %3909  ;;  %v912_v2 = vsel %vm5109_vm11, %v4964_v45, %v908_v39  ;;  %vm881_vm13 = vmor %vm879_vm12, %vm880_vm8  ;;  %v886_v17 = vor.u32 1.1754944e-38, %v885_v61  ;;  %v3459_v11 = vmul.f32 -1.442695, %v5086_v9  ;;  %vm884_vm14 = vcmp.eq.f32.partialorder %v883_v54, 8.507059e+37  ;;  %v3747_v54 = vld [vmem:[%s4429_s25 + $0x78] sm:$0xff]  ;;  %s4228_s25 = scalar_lea.hbm %s7087_s9, 512 }
 0x11f   : > { %v5126_v25 = vpop.eup %3911  ;;  %v1842_v12 = vsel %vm5093_vm10, %v1841_v14, %v1837_v50  ;;  %v882_v30 = vsel %vm881_vm13, %v4993_v62, %v878_v13  ;;  %v3587_v24 = vmul.f32 -1.442695, %v5098_v6  ;;  %v1845_v45 = vmul.f32 %v5100_v16, %v5012_v3  ;;  %p4230_p1 = scmp.lt.s32.totalorder %s4228_s25, %s4224_s29 }
 0x120   : > { %v1860_v33 = vmul.f32 %v5126_v25, %v5039_v46  ;;  %v887_v19 = vsel %vm884_vm14, %v886_v17, %v882_v30  ;;  %v5142_v8 = vadd.f32 %v5139_v51, %v593_v41  ;;  %v5145_v62 = vmul.f32 %v902_v40, %v4782_v28 }
 0x121   : > { %vm914_vm15 = vcmp.eq.f32.partialorder %v913_v1, 8.507059e+37  ;;  %v920_v34 = vmul.f32 %v5088_v49, %v5003_v60  ;;  %v1256_v37 = vmul.f32 %v887_v19, %v4816_v43  ;;  %v935_v20 = vmul.f32 %v5115_v10, %v5023_v26  ;;  %v5162_v43 = vld [vmem:[%s7083_s5] ss:$0 sm:$0xff]  ;;  %p4231_p2 = por %p4230_p1, %p4229_p0 }
 0x122   : > { %v917_v29 = vsel %vm914_vm15, %v916_v59, %v912_v2  ;;  %v1861_v47 = vsub.f32 1.0, %v1860_v33  ;;  %3913 = vpow2.f32 %v3459_v11  ;;  %v2182_v55 = vmul.f32 %v1827_v5, %v4786_v15  ;;  %v1521_v39 = vpop.f32.mrf.mxu1 }
 0x123   : > { %v2183_v32 = vmul.f32 %v1842_v12, %v4805_v38  ;;  %v2209_v28 = vpack.c.bf16 %v1256_v37, %v4972_v35  ;;  %3915 = vpow2.f32 %v3587_v24  ;;  %v1846_v52 = vsub.f32 1.0, %v1845_v45  ;;  %p4232_p3 = pnand %p4231_p2, %p4227_p13 }
 0x124   : > { %v1855_v1 = vand.u32 2147483648, %v5012_v3  ;;  %v3460_v63 = vmul.f32 -1.442695, %v5142_v8  ;;  %v5165_v18 = vadd.f32 %v5162_v43, %v1518_v21  ;;  %v5168_v15 = vmul.f32 %v917_v29, %v4802_v36  ;;  %v596_v7 = vpop.f32.mrf.mxu0  ;;  %635 = vmatmul.bf16.gmra.mxu0 %v3723_v0 }
 0x125   : > { %v921_v38 = vsub.f32 1.0, %v920_v34  ;;  %v928_v35 = vand.u32 2147483647, %v5003_v60  ;;  %v930_v48 = vand.u32 2147483648, %v5003_v60  ;;  %2478 = vmatmul.bf16.gmra.mxu3 %v2209_v28  ;;  %v936_v27 = vsub.f32 1.0, %v935_v20  ;;  %1560 = vmatmul.bf16.gmra.mxu1 %v3747_v54 }
 0x126   : > { %v1862_v57 = vmul.f32 %v5126_v25, %v1861_v47  ;;  %3917 = vpow2.f32 %v3460_v63  ;;  %v3588_v4 = vmul.f32 -1.442695, %v5165_v18  ;;  %vm924_vm0 = vweird.f32 %v5003_v60 }
 0x127   : > { %vm1849_vm1 = vweird.f32 %v5012_v3  ;;  %v1853_v36 = vand.u32 2147483647, %v5012_v3  ;;  %v5178_v44 = vadd.f32 %v5139_v51, %v596_v7  ;;  %v5181_v53 = vadd.f32 %v5162_v43, %v1521_v39 }
 0x128   : > { %v3914_v61 = vpop.eup %3913  ;;  %v1847_v59 = vmul.f32 %v5100_v16, %v1846_v52  ;;  %v1856_v50 = vor.u32 1.1754944e-38, %v1855_v1  ;;  %3919 = vpow2.f32 %v3588_v4  ;;  %v2242_v31 = vpack.c.bf16 %v2183_v32, %v2182_v55 }
 0x129   : > { %v3916_v40 = vpop.eup %3915  ;;  %v922_v22 = vmul.f32 %v5088_v49, %v921_v38  ;;  %vm1865_vm2 = vweird.f32 %v5126_v25  ;;  %v5188_v14 = vadd.f32 1.0, %v3914_v61  ;;  %v3461_v13 = vmul.f32 -1.442695, %v5178_v44 }
 0x12a   : > { %v937_v41 = vmul.f32 %v5115_v10, %v936_v27  ;;  %v1863_v5 = vadd.f32 %v5126_v25, %v1862_v57  ;;  %v5193_v2 = vadd.f32 1.0, %v3916_v40  ;;  %v3589_v17 = vmul.f32 -1.442695, %v5181_v53  ;;  %v1523_v20 = vpop.f32.mrf.mxu1 }
 0x12b   : > { %vm925_vm3 = vweird.f32 %v5088_v49  ;;  %vm1850_vm4 = vweird.f32 %v5100_v16  ;;  %v1870_v11 = vand.u32 2147483648, %v5039_v46  ;;  %3921 = vrcp.f32 %v5188_v14 }
 0x12c   : > { %v3918_v21 = vpop.eup %3917  ;;  %v1848_v12 = vadd.f32 %v5100_v16, %v1847_v59  ;;  %vm1864_vm5 = vweird.f32 %v5039_v46  ;;  %v1868_v30 = vand.u32 2147483647, %v5039_v46  ;;  %3923 = vrcp.f32 %v5193_v2  ;;  %2346 = vmatmul.bf16.gmra.mxu2 %v2242_v31  ;;  %v598_v19 = vpop.f32.mrf.mxu0  ;;  %vm5225_vm8 = vmor %vm1849_vm1, %vm1850_vm4 }
 0x12d   : > { %v923_v24 = vadd.f32 %v5088_v49, %v922_v22  ;;  %vm940_vm6 = vweird.f32 %v5115_v10  ;;  %vm5208_vm7 = vmor %vm1864_vm5, %vm1865_vm2  ;;  %v5212_v33 = vadd.f32 1.0, %v3918_v21  ;;  %3925 = vpow2.f32 %v3461_v13 }
 0x12e   : > { %v3920_v34 = vpop.eup %3919  ;;  %v938_v46 = vadd.f32 %v5115_v10, %v937_v41  ;;  %v1867_v37 = vsel %vm5208_vm7, %v5126_v25, %v1863_v5  ;;  %3927 = vpow2.f32 %v3589_v17  ;;  %v5219_v29 = vadd.f32 %v5139_v51, %v598_v19  ;;  %vm5236_vm10 = vmor %vm924_vm0, %vm925_vm3 }
 0x12f   : > { %vm939_vm9 = vweird.f32 %v5023_v26  ;;  %v945_v55 = vand.u32 2147483648, %v5023_v26  ;;  %v1871_v32 = vor.u32 1.1754944e-38, %v1870_v11  ;;  %3929 = vrcp.f32 %v5212_v33 }
 0x130   : > { %v1852_v3 = vsel %vm5225_vm8, %v5100_v16, %v1848_v12  ;;  %v943_v28 = vand.u32 2147483647, %v5023_v26  ;;  %vm1869_vm11 = vcmp.eq.f32.partialorder %v1868_v30, 8.507059e+37  ;;  %v5244_v52 = vadd.f32 1.0, %v3920_v34  ;;  %vm5253_vm12 = vmor %vm939_vm9, %vm940_vm6 }
 0x131   : > { %v5246_v1 = vpop.eup %3921  ;;  %v927_v63 = vsel %vm5236_vm10, %v5088_v49, %v923_v24  ;;  %v1872_v7 = vsel %vm1869_vm11, %v1871_v32, %v1867_v37  ;;  %v2210_v16 = vpack.c.bf16 %v5168_v15, %v5145_v62  ;;  %v3462_v26 = vmul.f32 -1.442695, %v5219_v29 }
 0x132   : > { %v5260_v27 = vpop.eup %3923  ;;  %v931_v57 = vor.u32 1.1754944e-38, %v930_v48  ;;  %vm1854_vm13 = vcmp.eq.f32.partialorder %v1853_v36, 8.507059e+37  ;;  %v942_v49 = vsel %vm5253_vm12, %v5115_v10, %v938_v46  ;;  %3931 = vrcp.f32 %v5244_v52  ;;  %v1526_v41 = vpop.f32.mrf.mxu1 }
 0x133   : > { %v3926_v4 = vpop.eup %3925  ;;  %vm929_vm14 = vcmp.eq.f32.partialorder %v928_v35, 8.507059e+37  ;;  %v1857_v39 = vsel %vm1854_vm13, %v1856_v50, %v1852_v3  ;;  %v946_v62 = vor.u32 1.1754944e-38, %v945_v55  ;;  %v1875_v15 = vmul.f32 %v5260_v27, %v5193_v2 }
 0x134   : > { %v3928_v0 = vpop.eup %3927  ;;  %v932_v54 = vsel %vm929_vm14, %v931_v57, %v927_v63  ;;  %vm944_vm15 = vcmp.eq.f32.partialorder %v943_v28, 8.507059e+37  ;;  %v2185_v48 = vmul.f32 %v1872_v7, %v4969_v23  ;;  %v950_v36 = vmul.f32 %v5246_v1, %v5188_v14  ;;  %v601_v40 = vpop.f32.mrf.mxu0 }
 0x135   : > { %v5275_v10 = vpop.eup %3929  ;;  %v947_v61 = vsel %vm944_vm15, %v946_v62, %v942_v49  ;;  %v1876_v59 = vsub.f32 1.0, %v1875_v15  ;;  %2483 = vmatmul.bf16.gmra.mxu3 %v2210_v16  ;;  %v5277_v60 = vadd.f32 1.0, %v3926_v4  ;;  %3933 = vpow2.f32 %v3462_v26 }
 0x136   : > { %v2184_v35 = vmul.f32 %v1857_v39, %v4908_v58  ;;  %v965_v50 = vmul.f32 %v5275_v10, %v5212_v33  ;;  %v5282_v31 = vadd.f32 1.0, %v3928_v0  ;;  %v5285_v23 = vadd.f32 %v5162_v43, %v1523_v20 }
 0x137   : > { %v5288_v22 = vmul.f32 %v932_v54, %v4905_v56  ;;  %v1877_v13 = vmul.f32 %v5260_v27, %v1876_v59  ;;  %v5292_v17 = vmul.f32 %v947_v61, %v4949_v42  ;;  %v951_v58 = vsub.f32 1.0, %v950_v36 }
 0x138   : > { %v3932_v5 = vpop.eup %3931  ;;  %v1883_v11 = vand.u32 2147483647, %v5193_v2  ;;  %v2243_v21 = vpack.c.bf16 %v2185_v48, %v2184_v35  ;;  %v1885_v12 = vand.u32 2147483648, %v5193_v2  ;;  %v966_v30 = vsub.f32 1.0, %v965_v50 }
 0x139   : > { %v1890_v24 = vmul.f32 %v3932_v5, %v5244_v52  ;;  %3935 = vrcp.f32 %v5277_v60  ;;  %v1878_v56 = vadd.f32 %v5260_v27, %v1877_v13  ;;  %vm1880_vm0 = vweird.f32 %v5260_v27 }
 0x13a   : > { %3937 = vrcp.f32 %v5282_v31  ;;  %v3590_v42 = vmul.f32 -1.442695, %v5285_v23  ;;  %vm954_vm1 = vweird.f32 %v5188_v14  ;;  %v958_v19 = vand.u32 2147483647, %v5188_v14  ;;  %v1528_v15 = vpop.f32.mrf.mxu1 }
 0x13b   : > { %v3934_v45 = vpop.eup %3933  ;;  %v960_v34 = vand.u32 2147483648, %v5188_v14  ;;  %v1891_v46 = vsub.f32 1.0, %v1890_v24  ;;  %v952_v37 = vmul.f32 %v5246_v1, %v951_v58  ;;  %vm1879_vm2 = vweird.f32 %v5193_v2 }
 0x13c   : > { %v1898_v20 = vand.u32 2147483647, %v5244_v52  ;;  %v1900_v47 = vand.u32 2147483648, %v5244_v52  ;;  %2351 = vmatmul.bf16.gmra.mxu2 %v2243_v21  ;;  %vm5309_vm3 = vmor %vm1879_vm2, %vm1880_vm0  ;;  %vm5313_vm4 = vcmp.eq.f32.partialorder %v1883_v11, 8.507059e+37  ;;  %v967_v25 = vmul.f32 %v5275_v10, %v966_v30  ;;  %v603_v38 = vpop.f32.mrf.mxu0 }
 0x13d   : > { %v1892_v3 = vmul.f32 %v3932_v5, %v1891_v46  ;;  %vm1895_vm5 = vweird.f32 %v3932_v5  ;;  %v1882_v2 = vsel %vm5309_vm3, %v5260_v27, %v1878_v56  ;;  %v1886_v28 = vor.u32 1.1754944e-38, %v1885_v12 }
 0x13e   : > { %v5321_v63 = vadd.f32 1.0, %v3934_v45  ;;  %3939 = vpow2.f32 %v3590_v42  ;;  %vm955_vm6 = vweird.f32 %v5246_v1  ;;  %vm1894_vm7 = vweird.f32 %v5244_v52 }
 0x13f   : > { %v5323_v7 = vpop.eup %3935  ;;  %v1893_v16 = vadd.f32 %v3932_v5, %v1892_v3  ;;  %v2211_v26 = vpack.c.bf16 %v5292_v17, %v5288_v22  ;;  %v953_v49 = vadd.f32 %v5246_v1, %v952_v37  ;;  %vm5332_vm8 = vcmp.eq.f32.partialorder %v958_v19, 8.507059e+37  ;;  %vm1896_vm9 = vmor %vm1894_vm7, %vm1895_vm5 }
 0x140   : > { %v5329_v57 = vpop.eup %3937  ;;  %vm1899_vm10 = vcmp.eq.f32.partialorder %v1898_v20, 8.507059e+37  ;;  %v1901_v4 = vor.u32 1.1754944e-38, %v1900_v47  ;;  %3941 = vrcp.f32 %v5321_v63  ;;  %v1887_v39 = vsel %vm5313_vm4, %v1886_v28, %v1882_v2  ;;  %vm5353_vm12 = vmor %vm954_vm1, %vm955_vm6 }
 0x141   : > { %v968_v52 = vadd.f32 %v5275_v10, %v967_v25  ;;  %vm970_vm11 = vweird.f32 %v5275_v10  ;;  %v1897_v62 = vsel %vm1896_vm9, %v3932_v5, %v1893_v16  ;;  %v980_v54 = vmul.f32 %v5323_v7, %v5277_v60 }
 0x142   : > { %v1902_v0 = vsel %vm1899_vm10, %v1901_v4, %v1897_v62  ;;  %v5344_v48 = vadd.f32 %v5139_v51, %v601_v40  ;;  %v5347_v36 = vadd.f32 %v5162_v43, %v1526_v41  ;;  %vm969_vm13 = vweird.f32 %v5212_v33  ;;  %v1531_v25 = vpop.f32.mrf.mxu1 }
 0x143   : > { %v973_v59 = vand.u32 2147483647, %v5212_v33  ;;  %v975_v35 = vand.u32 2147483648, %v5212_v33  ;;  %v1905_v50 = vmul.f32 %v5329_v57, %v5282_v31  ;;  %v957_v22 = vsel %vm5353_vm12, %v5246_v1, %v953_v49  ;;  %vm5365_vm14 = vmor %vm969_vm13, %vm970_vm11 }
 0x144   : > { %v3940_v40 = vpop.eup %3939  ;;  %v2187_v13 = vmul.f32 %v1902_v0, %v5165_v18  ;;  %v3463_v41 = vmul.f32 -1.442695, %v5344_v48  ;;  %v5372_v5 = vadd.f32 %v5139_v51, %v603_v38  ;;  %v2186_v33 = vmul.f32 %v1887_v39, %v5098_v6  ;;  %v606_v45 = vpop.f32.mrf.mxu0 }
 0x145   : > { %v972_v17 = vsel %vm5365_vm14, %v5275_v10, %v968_v52  ;;  %v5378_v58 = vadd.f32 1.0, %v3940_v40  ;;  %2488 = vmatmul.bf16.gmra.mxu3 %v2211_v26  ;;  %v3591_v1 = vmul.f32 -1.442695, %v5347_v36  ;;  %v981_v21 = vsub.f32 1.0, %v980_v54 }
 0x146   : > { %v5381_v11 = vpop.eup %3941  ;;  %3943 = vpow2.f32 %v3463_v41  ;;  %v3464_v18 = vmul.f32 -1.442695, %v5372_v5  ;;  %v5385_v12 = vadd.f32 %v5162_v43, %v1528_v15  ;;  %v961_v30 = vor.u32 1.1754944e-38, %v960_v34 }
 0x147   : > { %v976_v6 = vor.u32 1.1754944e-38, %v975_v35  ;;  %v1906_v24 = vsub.f32 1.0, %v1905_v50  ;;  %v995_v10 = vmul.f32 %v5381_v11, %v5321_v63  ;;  %vm974_vm15 = vcmp.eq.f32.partialorder %v973_v59, 8.507059e+37 }
 0x148   : > { %v990_v56 = vand.u32 2147483648, %v5277_v60  ;;  %3945 = vrcp.f32 %v5378_v58  ;;  %v2244_v42 = vpack.c.bf16 %v2187_v13, %v2186_v33  ;;  %v962_v19 = vsel %vm5332_vm8, %v961_v30, %v957_v22 }
 0x149   : > { %v977_v46 = vsel %vm974_vm15, %v976_v6, %v972_v17  ;;  %v988_v37 = vand.u32 2147483647, %v5277_v60  ;;  %3947 = vpow2.f32 %v3591_v1  ;;  %v982_v34 = vmul.f32 %v5323_v7, %v981_v21 }
 0x14a   : > { %v996_v20 = vsub.f32 1.0, %v995_v10  ;;  %3949 = vpow2.f32 %v3464_v18  ;;  %v3592_v47 = vmul.f32 -1.442695, %v5385_v12  ;;  %vm984_vm0 = vweird.f32 %v5277_v60 }
 0x14b   : > { %v1907_v55 = vmul.f32 %v5329_v57, %v1906_v24  ;;  %v5399_v32 = vadd.f32 %v5139_v51, %v606_v45  ;;  %v1262_v2 = vmul.f32 %v977_v46, %v5142_v8  ;;  %v991_v28 = vor.u32 1.1754944e-38, %v990_v56  ;;  %v1533_v56 = vpop.f32.mrf.mxu1 }
 0x14c   : > { %v3944_v3 = vpop.eup %3943  ;;  %vm1909_vm1 = vweird.f32 %v5282_v31  ;;  %3951 = vpow2.f32 %v3592_v47  ;;  %2356 = vmatmul.bf16.gmra.mxu2 %v2244_v42  ;;  %v1261_v38 = vmul.f32 %v962_v19, %v5086_v9  ;;  %v1913_v16 = vand.u32 2147483647, %v5282_v31  ;;  %v608_v17 = vpop.f32.mrf.mxu0 }
 0x14d   : > { %v1915_v26 = vand.u32 2147483648, %v5282_v31  ;;  %v5406_v49 = vadd.f32 1.0, %v3944_v3  ;;  %v983_v4 = vadd.f32 %v5323_v7, %v982_v34  ;;  %vm985_vm2 = vweird.f32 %v5323_v7 }
 0x14e   : > { %v5408_v27 = vpop.eup %3945  ;;  %vm5412_vm3 = vcmp.eq.f32.partialorder %v988_v37, 8.507059e+37  ;;  %v997_v39 = vmul.f32 %v5381_v11, %v996_v20  ;;  %v3465_v9 = vmul.f32 -1.442695, %v5399_v32  ;;  %v1908_v62 = vadd.f32 %v5329_v57, %v1907_v55  ;;  %vm5428_vm6 = vmor %vm984_vm0, %vm985_vm2 }
 0x14f   : > { %v3948_v52 = vpop.eup %3947  ;;  %vm1910_vm4 = vweird.f32 %v5329_v57  ;;  %v1920_v15 = vmul.f32 %v5408_v27, %v5378_v58  ;;  %3953 = vrcp.f32 %v5406_v49  ;;  %vm999_vm5 = vweird.f32 %v5321_v63 }
 0x150   : > { %v3950_v0 = vpop.eup %3949  ;;  %v1003_v54 = vand.u32 2147483647, %v5321_v63  ;;  %v1005_v61 = vand.u32 2147483648, %v5321_v63  ;;  %v2212_v59 = vpack.c.bf16 %v1262_v2, %v1261_v38  ;;  %v5432_v40 = vadd.f32 1.0, %v3948_v52  ;;  %vm5446_vm7 = vmor %vm1909_vm1, %vm1910_vm4 }
 0x151   : > { %v1921_v50 = vsub.f32 1.0, %v1920_v15  ;;  %v5434_v22 = vadd.f32 1.0, %v3950_v0  ;;  %v5437_v14 = vadd.f32 %v5162_v43, %v1531_v25  ;;  %v987_v41 = vsel %vm5428_vm6, %v5323_v7, %v983_v4 }
 0x152   : > { %v3952_v13 = vpop.eup %3951  ;;  %v998_v33 = vadd.f32 %v5381_v11, %v997_v39  ;;  %vm1000_vm8 = vweird.f32 %v5381_v11  ;;  %3955 = vpow2.f32 %v3465_v9  ;;  %v1912_v1 = vsel %vm5446_vm7, %v5329_v57, %v1908_v62 }
 0x153   : > { %v1922_v7 = vmul.f32 %v5408_v27, %v1921_v50  ;;  %vm1925_vm9 = vweird.f32 %v5408_v27  ;;  %3957 = vrcp.f32 %v5432_v40  ;;  %vm1924_vm10 = vweird.f32 %v5378_v58  ;;  %vm5466_vm11 = vmor %vm999_vm5, %vm1000_vm8 }
 0x154   : > { %v1928_v31 = vand.u32 2147483647, %v5378_v58  ;;  %v1930_v21 = vand.u32 2147483648, %v5378_v58  ;;  %3959 = vrcp.f32 %v5434_v22  ;;  %v5471_v6 = vadd.f32 1.0, %v3952_v13  ;;  %vm5484_vm14 = vmor %vm1924_vm10, %vm1925_vm9  ;;  %v611_v62 = vpop.f32.mrf.mxu0  ;;  %v1536_v13 = vpop.f32.mrf.mxu1 }
 0x155   : > { %v5462_v18 = vpop.eup %3953  ;;  %v1923_v30 = vadd.f32 %v5408_v27, %v1922_v7  ;;  %2493 = vmatmul.bf16.gmra.mxu3 %v2212_v59  ;;  %v3593_v24 = vmul.f32 -1.442695, %v5437_v14  ;;  %v5475_v10 = vadd.f32 %v5139_v51, %v608_v17  ;;  %vm1914_vm12 = vcmp.eq.f32.partialorder %v1913_v16, 8.507059e+37 }
 0x156   : > { %v1916_v42 = vor.u32 1.1754944e-38, %v1915_v26  ;;  %v1002_v63 = vsel %vm5466_vm11, %v5381_v11, %v998_v33  ;;  %vm1004_vm13 = vcmp.eq.f32.partialorder %v1003_v54, 8.507059e+37  ;;  %v992_v19 = vsel %vm5412_vm3, %v991_v28, %v987_v41 }
 0x157   : > { %v1006_v46 = vor.u32 1.1754944e-38, %v1005_v61  ;;  %v1927_v37 = vsel %vm5484_vm14, %v5408_v27, %v1923_v30  ;;  %3961 = vrcp.f32 %v5471_v6  ;;  %v1931_v20 = vor.u32 1.1754944e-38, %v1930_v21 }
 0x158   : > { %v3956_v11 = vpop.eup %3955  ;;  %v1917_v34 = vsel %vm1914_vm12, %v1916_v42, %v1912_v1  ;;  %v1010_v58 = vmul.f32 %v5462_v18, %v5406_v49  ;;  %v1020_v47 = vand.u32 2147483648, %v5406_v49  ;;  %vm1929_vm15 = vcmp.eq.f32.partialorder %v1928_v31, 8.507059e+37 }
 0x159   : > { %v5497_v55 = vpop.eup %3957  ;;  %v1007_v25 = vsel %vm1004_vm13, %v1006_v46, %v1002_v63  ;;  %3963 = vpow2.f32 %v3593_v24  ;;  %v3466_v3 = vmul.f32 -1.442695, %v5475_v10  ;;  %v1932_v28 = vsel %vm1929_vm15, %v1931_v20, %v1927_v37 }
 0x15a   : > { %v5500_v2 = vpop.eup %3959  ;;  %v1935_v38 = vmul.f32 %v5497_v55, %v5432_v40  ;;  %v1263_v16 = vmul.f32 %v992_v19, %v5178_v44  ;;  %v2188_v26 = vmul.f32 %v1917_v34, %v5181_v53  ;;  %v1018_v27 = vand.u32 2147483647, %v5406_v49 }
 0x15b   : > { %v1025_v4 = vmul.f32 %v5500_v2, %v5434_v22  ;;  %v1264_v8 = vmul.f32 %v1007_v25, %v5219_v29  ;;  %v1011_v39 = vsub.f32 1.0, %v1010_v58  ;;  %v5510_v9 = vor.u32 1.1754944e-38, %v1020_v47 }
 0x15c   : > { %v1936_v52 = vsub.f32 1.0, %v1935_v38  ;;  %v2189_v0 = vmul.f32 %v1932_v28, %v5285_v23  ;;  %v5513_v61 = vadd.f32 1.0, %v3956_v11  ;;  %3965 = vpow2.f32 %v3466_v3  ;;  %v613_v47 = vpop.f32.mrf.mxu0 }
 0x15d   : > { %v3962_v15 = vpop.eup %3961  ;;  %v1026_v54 = vsub.f32 1.0, %v1025_v4  ;;  %vm1939_vm0 = vweird.f32 %v5432_v40  ;;  %v1943_v44 = vand.u32 2147483647, %v5432_v40  ;;  %v5519_v29 = vadd.f32 %v5162_v43, %v1533_v56 }
 0x15e   : > { %v1950_v53 = vmul.f32 %v3962_v15, %v5471_v6  ;;  %vm1014_vm1 = vweird.f32 %v5406_v49  ;;  %v1937_v35 = vmul.f32 %v5497_v55, %v1936_v52  ;;  %v1945_v23 = vand.u32 2147483648, %v5432_v40  ;;  %v1538_v52 = vpop.f32.mrf.mxu1 }
 0x15f   : > { %v3964_v59 = vpop.eup %3963  ;;  %v1027_v50 = vmul.f32 %v5500_v2, %v1026_v54  ;;  %vm1029_vm2 = vweird.f32 %v5434_v22  ;;  %v1012_v41 = vmul.f32 %v5462_v18, %v1011_v39  ;;  %v1958_v33 = vand.u32 2147483647, %v5471_v6 }
 0x160   : > { %v1951_v60 = vsub.f32 1.0, %v1950_v53  ;;  %v5528_v17 = vadd.f32 1.0, %v3964_v59  ;;  %vm1940_vm3 = vweird.f32 %v5497_v55  ;;  %3967 = vrcp.f32 %v5513_v61 }
 0x161   : > { %v2245_v1 = vpack.c.bf16 %v2189_v0, %v2188_v26  ;;  %v2213_v7 = vpack.c.bf16 %v1264_v8, %v1263_v16  ;;  %vm1955_vm4 = vweird.f32 %v3962_v15  ;;  %v1960_v21 = vand.u32 2147483648, %v5471_v6  ;;  %vm5540_vm6 = vmor %vm1939_vm0, %vm1940_vm3 }
 0x162   : > { %v1952_v31 = vmul.f32 %v3962_v15, %v1951_v60  ;;  %v3594_v57 = vmul.f32 -1.442695, %v5519_v29  ;;  %v3966_v30 = vpop.eup %3965  ;;  %v1938_v24 = vadd.f32 %v5497_v55, %v1937_v35  ;;  %v1028_v56 = vadd.f32 %v5500_v2, %v1027_v50 }
 0x163   : > { %vm1030_vm5 = vweird.f32 %v5500_v2  ;;  %3969 = vrcp.f32 %v5528_v17  ;;  %2361 = vmatmul.bf16.gmra.mxu2 %v2245_v1  ;;  %v1033_v63 = vand.u32 2147483647, %v5434_v22  ;;  %v1035_v45 = vand.u32 2147483648, %v5434_v22  ;;  %v2464_v1 = vpop.f32.mrf.mxu3 }
 0x164   : > { %v1953_v19 = vadd.f32 %v3962_v15, %v1952_v31  ;;  %vm1954_vm7 = vweird.f32 %v5471_v6  ;;  %v1013_v46 = vadd.f32 %v5462_v18, %v1012_v41  ;;  %vm1015_vm8 = vweird.f32 %v5462_v18  ;;  %vm5562_vm11 = vmor %vm1029_vm2, %vm1030_vm5  ;;  %v616_v6 = vpop.f32.mrf.mxu0 }
 0x165   : > { %vm5549_vm9 = vcmp.eq.f32.partialorder %v1943_v44, 8.507059e+37  ;;  %vm5554_vm10 = vmor %vm1954_vm7, %vm1955_vm4  ;;  %v5558_v11 = vadd.f32 1.0, %v3966_v30  ;;  %2498 = vmatmul.bf16.gmra.mxu3 %v2213_v7  ;;  %v1961_v20 = vor.u32 1.1754944e-38, %v1960_v21  ;;  %3971 = vpow2.f32 %v3594_v57 }
 0x166   : > { %v1957_v34 = vsel %vm5554_vm10, %v3962_v15, %v1953_v19  ;;  %v5569_v58 = vadd.f32 %v5139_v51, %v611_v62  ;;  %v5571_v25 = vpop.eup %3967  ;;  %v1942_v3 = vsel %vm5540_vm6, %v5497_v55, %v1938_v24  ;;  %v1032_v22 = vsel %vm5562_vm11, %v5500_v2, %v1028_v56  ;;  %vm5584_vm13 = vmor %vm1014_vm1, %vm1015_vm8 }
 0x167   : > { %vm1959_vm12 = vcmp.eq.f32.partialorder %v1958_v33, 8.507059e+37  ;;  %3973 = vrcp.f32 %v5558_v11  ;;  %v1946_v38 = vor.u32 1.1754944e-38, %v1945_v23  ;;  %vm1034_vm14 = vcmp.eq.f32.partialorder %v1033_v63, 8.507059e+37  ;;  %v2327_v33 = vpop.f32.mrf.mxu2 }
 0x168   : > { %v1036_v16 = vor.u32 1.1754944e-38, %v1035_v45  ;;  %v1962_v26 = vsel %vm1959_vm12, %v1961_v20, %v1957_v34  ;;  %v1017_v2 = vsel %vm5584_vm13, %v5462_v18, %v1013_v46  ;;  %v3467_v4 = vmul.f32 -1.442695, %v5569_v58 }
 0x169   : > { %v5588_v55 = vpop.eup %3969  ;;  %v5595_v8 = vadd.f32 %v5162_v43, %v1536_v13  ;;  %v5598_v39 = vadd.f32 %v5139_v51, %v613_v47  ;;  %v1947_v62 = vsel %vm5549_vm9, %v1946_v38, %v1942_v3  ;;  %v1040_v0 = vmul.f32 %v5571_v25, %v5513_v61 }
 0x16a   : > { %v1037_v15 = vsel %vm1034_vm14, %v1036_v16, %v1032_v22  ;;  %v1965_v54 = vmul.f32 %v5588_v55, %v5528_v17  ;;  %vm1019_vm15 = vcmp.eq.f32.partialorder %v1018_v27, 8.507059e+37  ;;  %v2191_v18 = vmul.f32 %v1962_v26, %v5385_v12  ;;  %v1541_v26 = vpop.f32.mrf.mxu1 }
 0x16b   : > { %3975 = vpow2.f32 %v3467_v4  ;;  %v3595_v44 = vmul.f32 -1.442695, %v5595_v8  ;;  %v3972_v53 = vpop.eup %3971  ;;  %v1022_v59 = vsel %vm1019_vm15, %v5510_v9, %v1017_v2  ;;  %v3468_v23 = vmul.f32 -1.442695, %v5598_v39 }
 0x16c   : > { %v1966_v35 = vsub.f32 1.0, %v1965_v54  ;;  %v5613_v50 = vadd.f32 %v5162_v43, %v1538_v52  ;;  %v2190_v41 = vmul.f32 %v1947_v62, %v5347_v36  ;;  %v1266_v49 = vmul.f32 %v1037_v15, %v5372_v5 }
 0x16d   : > { %v5615_v13 = vpop.eup %3973  ;;  %v5619_v27 = vadd.f32 1.0, %v3972_v53  ;;  %3977 = vpow2.f32 %v3595_v44  ;;  %v1041_v12 = vsub.f32 1.0, %v1040_v0  ;;  %v1050_v60 = vand.u32 2147483648, %v5513_v61 }
 0x16e   : > { %v1055_v9 = vmul.f32 %v5615_v13, %v5558_v11  ;;  %3979 = vpow2.f32 %v3468_v23  ;;  %v1265_v7 = vmul.f32 %v1022_v59, %v5344_v48  ;;  %v1973_v31 = vand.u32 2147483647, %v5528_v17  ;;  %v5634_v48 = vld [vmem:[%s7086_s8] ss:$0 sm:$0xff] }
 0x16f   : > { %3981 = vrcp.f32 %v5619_v27  ;;  %v2246_v36 = vpack.c.bf16 %v2191_v18, %v2190_v41  ;;  %v1967_v5 = vmul.f32 %v5588_v55, %v1966_v35  ;;  %v1975_v21 = vand.u32 2147483648, %v5528_v17 }
 0x170   : > { %v3596_v57 = vmul.f32 -1.442695, %v5613_v50  ;;  %vm1044_vm0 = vweird.f32 %v5513_v61  ;;  %v1056_v24 = vsub.f32 1.0, %v1055_v9  ;;  %v2214_v56 = vpack.c.bf16 %v1266_v49, %v1265_v7 }
 0x171   : > { %v3976_v30 = vpop.eup %3975  ;;  %v2465_v42 = vadd.f32 %v2464_v1, %v2327_v33  ;;  %v1042_v63 = vmul.f32 %v5571_v25, %v1041_v12  ;;  %v1048_v45 = vand.u32 2147483647, %v5513_v61  ;;  %vm1045_vm1 = vweird.f32 %v5571_v25 }
 0x172   : > { %v5638_v19 = vadd.f32 1.0, %v3976_v30  ;;  %3983 = vpow2.f32 %v3596_v57  ;;  %v5641_v37 = vor.u32 1.1754944e-38, %v1050_v60  ;;  %vm1969_vm2 = vweird.f32 %v5528_v17  ;;  %vm5698_vm9 = vmor %vm1044_vm0, %vm1045_vm1 }
 0x173   : > { %v3978_v46 = vpop.eup %3977  ;;  %vm5644_vm3 = vcmp.eq.f32.partialorder %v1973_v31, 8.507059e+37  ;;  %2366 = vmatmul.bf16.gmra.mxu2 %v2246_v36  ;;  %v1968_v20 = vadd.f32 %v5588_v55, %v1967_v5  ;;  %vm1970_vm4 = vweird.f32 %v5588_v55  ;;  %v1976_v47 = vor.u32 1.1754944e-38, %v1975_v21 }
 0x174   : > { %v3980_v34 = vpop.eup %3979  ;;  %3985 = vrcp.f32 %v5638_v19  ;;  %v1057_v22 = vmul.f32 %v5615_v13, %v1056_v24  ;;  %v5652_v28 = vadd.f32 1.0, %v3978_v46  ;;  %v5657_v16 = vadd.f32 %v5634_v48, %v2465_v42  ;;  %vm5677_vm8 = vmor %vm1969_vm2, %vm1970_vm4  ;;  %v2329_v24 = vpop.f32.mrf.mxu2 }
 0x175   : > { %v3982_v3 = vpop.eup %3981  ;;  %v5654_v38 = vadd.f32 1.0, %v3980_v34  ;;  %2503 = vmatmul.bf16.gmra.mxu3 %v2214_v56  ;;  %v1043_v2 = vadd.f32 %v5571_v25, %v1042_v63  ;;  %vm5660_vm5 = vcmp.eq.f32.partialorder %v1048_v45, 8.507059e+37  ;;  %vm1059_vm6 = vweird.f32 %v5558_v11  ;;  %v2466_v56 = vpop.f32.mrf.mxu3 }
 0x176   : > { %v1980_v52 = vmul.f32 %v3982_v3, %v5619_v27  ;;  %v5667_v62 = vadd.f32 %v5139_v51, %v616_v6  ;;  %vm1060_vm7 = vweird.f32 %v5615_v13  ;;  %v1063_v15 = vand.u32 2147483647, %v5558_v11 }
 0x177   : > { %v1065_v0 = vand.u32 2147483648, %v5558_v11  ;;  %3987 = vrcp.f32 %v5652_v28  ;;  %v1988_v51 = vand.u32 2147483647, %v5619_v27  ;;  %v1990_v53 = vand.u32 2147483648, %v5619_v27  ;;  %vm5721_vm13 = vmor %vm1059_vm6, %vm1060_vm7 }
 0x178   : > { %v3984_v54 = vpop.eup %3983  ;;  %v1981_v44 = vsub.f32 1.0, %v1980_v52  ;;  %v5684_v59 = vadd.f32 %v5162_v43, %v1541_v26  ;;  %v1972_v35 = vsel %vm5677_vm8, %v5588_v55, %v1968_v20  ;;  %v1058_v23 = vadd.f32 %v5615_v13, %v1057_v22 }
 0x179   : > { %3989 = vrcp.f32 %v5654_v38  ;;  %v3671_v17 = vmul.f32 -1.442695, %v5657_v16  ;;  %vm1985_vm10 = vweird.f32 %v3982_v3  ;;  %v5702_v60 = vadd.f32 1.0, %v3984_v54 }
 0x17a   : > { %v5692_v41 = vpop.eup %3985  ;;  %v1982_v12 = vmul.f32 %v3982_v3, %v1981_v44  ;;  %v3469_v55 = vmul.f32 -1.442695, %v5667_v62  ;;  %v1047_v9 = vsel %vm5698_vm9, %v5571_v25, %v1043_v2  ;;  %vm5708_vm11 = vcmp.eq.f32.partialorder %v1063_v15, 8.507059e+37 }
 0x17b   : > { %vm1984_vm12 = vweird.f32 %v5619_v27  ;;  %v1070_v61 = vmul.f32 %v5692_v41, %v5638_v19  ;;  %v1977_v1 = vsel %vm5644_vm3, %v1976_v47, %v1972_v35  ;;  %vm5725_vm14 = vcmp.eq.f32.partialorder %v1988_v51, 8.507059e+37 }
 0x17c   : > { %v1983_v25 = vadd.f32 %v3982_v3, %v1982_v12  ;;  %3991 = vrcp.f32 %v5702_v60  ;;  %v1062_v36 = vsel %vm5721_vm13, %v5615_v13, %v1058_v23  ;;  %vm1986_vm15 = vmor %vm1984_vm12, %vm1985_vm10  ;;  %v1991_v5 = vor.u32 1.1754944e-38, %v1990_v53  ;;  %v1543_v53 = vpop.f32.mrf.mxu1 }
 0x17d   : > { %v5730_v27 = vpop.eup %3987  ;;  %3993 = vpow2.f32 %v3671_v17  ;;  %v3597_v11 = vmul.f32 -1.442695, %v5684_v59  ;;  %v1071_v57 = vsub.f32 1.0, %v1070_v61  ;;  %v1052_v63 = vsel %vm5660_vm5, %v5641_v37, %v1047_v9  ;;  %v5787_v61 = vld [vmem:[%s7081_s3] ss:$0 sm:$0xff] }
 0x17e   : > { %v1987_v21 = vsel %vm1986_vm15, %v3982_v3, %v1983_v25  ;;  %v1995_v30 = vmul.f32 %v5730_v27, %v5652_v28  ;;  %3995 = vpow2.f32 %v3469_v55  ;;  %v2192_v13 = vmul.f32 %v1977_v1, %v5437_v14 }
 0x17f   : > { %v5738_v42 = vpop.eup %3989  ;;  %v1066_v45 = vor.u32 1.1754944e-38, %v1065_v0  ;;  %v1992_v46 = vsel %vm5725_vm14, %v1991_v5, %v1987_v21  ;;  %v1078_v6 = vand.u32 2147483647, %v5638_v19  ;;  %v1080_v34 = vand.u32 2147483648, %v5638_v19  ;;  %v618_v0 = vpop.f32.mrf.mxu0 }
 0x180   : > { %v2193_v40 = vmul.f32 %v1992_v46, %v5519_v29  ;;  %v1085_v20 = vmul.f32 %v5738_v42, %v5654_v38  ;;  %3997 = vpow2.f32 %v3597_v11  ;;  %v2467_v37 = vadd.f32 %v2466_v56, %v2329_v24  ;;  %v2332_v46 = vpop.f32.mrf.mxu2 }
 0x181   : > { %v1067_v47 = vsel %vm5708_vm11, %v1066_v45, %v1062_v36  ;;  %v1072_v14 = vmul.f32 %v5692_v41, %v1071_v57  ;;  %v1996_v22 = vsub.f32 1.0, %v1995_v30  ;;  %v5757_v4 = vmul.f32 %v1052_v63, %v5399_v32 }
 0x182   : > { %v5753_v3 = vpop.eup %3991  ;;  %v1086_v26 = vsub.f32 1.0, %v1085_v20  ;;  %v2247_v2 = vpack.c.bf16 %v2193_v40, %v2192_v13  ;;  %vm1074_vm0 = vweird.f32 %v5638_v19  ;;  %v5763_v15 = vadd.f32 %v5634_v48, %v2467_v37 }
 0x183   : > { %v3994_v29 = vpop.eup %3993  ;;  %v2010_v52 = vmul.f32 %v5753_v3, %v5702_v60  ;;  %v5766_v18 = vmul.f32 %v1067_v47, %v5475_v10  ;;  %vm5768_vm1 = vcmp.eq.f32.partialorder %v1078_v6, 8.507059e+37  ;;  %v1081_v51 = vor.u32 1.1754944e-38, %v1080_v34  ;;  %v2469_v47 = vpop.f32.mrf.mxu3  ;;  %v5935_v6 = vld [vmem:[%s7083_s5] ss:$0 sm:$0xff] }
 0x184   : > { %v3996_v54 = vpop.eup %3995  ;;  %v5772_v32 = vadd.f32 1.0, %v3994_v29  ;;  %2371 = vmatmul.bf16.gmra.mxu2 %v2247_v2  ;;  %vm1075_vm2 = vweird.f32 %v5692_v41  ;;  %v2003_v35 = vand.u32 2147483647, %v5652_v28  ;;  %v2005_v23 = vand.u32 2147483648, %v5652_v28 }
 0x185   : > { %v5777_v17 = vadd.f32 1.0, %v3996_v54  ;;  %v1073_v10 = vadd.f32 %v5692_v41, %v1072_v14  ;;  %v1997_v49 = vmul.f32 %v5730_v27, %v1996_v22  ;;  %v1087_v12 = vmul.f32 %v5738_v42, %v1086_v26  ;;  %vm5803_vm5 = vmor %vm1074_vm0, %vm1075_vm2 }
 0x186   : > { %3999 = vrcp.f32 %v5772_v32  ;;  %v3998_v55 = vpop.eup %3997  ;;  %v2011_v9 = vsub.f32 1.0, %v2010_v52  ;;  %v3672_v33 = vmul.f32 -1.442695, %v5763_v15  ;;  %v5790_v1 = vadd.f32 %v5787_v61, %v618_v0 }
 0x187   : > { %v5793_v7 = vadd.f32 %v5162_v43, %v1543_v53  ;;  %vm1999_vm3 = vweird.f32 %v5652_v28  ;;  %vm1089_vm4 = vweird.f32 %v5654_v38  ;;  %v1093_v25 = vand.u32 2147483647, %v5654_v38  ;;  %v621_v37 = vpop.f32.mrf.mxu0 }
 0x188   : > { %4001 = vrcp.f32 %v5777_v17  ;;  %vm2000_vm6 = vweird.f32 %v5730_v27  ;;  %vm5808_vm7 = vcmp.eq.f32.partialorder %v2003_v35, 8.507059e+37  ;;  %v2006_v36 = vor.u32 1.1754944e-38, %v2005_v23  ;;  %v1546_v23 = vpop.f32.mrf.mxu1 }
 0x189   : > { %vm1090_vm8 = vweird.f32 %v5738_v42  ;;  %v1095_v5 = vand.u32 2147483648, %v5654_v38  ;;  %v1077_v11 = vsel %vm5803_vm5, %v5692_v41, %v1073_v10  ;;  %v1998_v19 = vadd.f32 %v5730_v27, %v1997_v49  ;;  %vm5837_vm10 = vmor %vm1999_vm3, %vm2000_vm6 }
 0x18a   : > { %v1088_v21 = vadd.f32 %v5738_v42, %v1087_v12  ;;  %v5819_v57 = vadd.f32 1.0, %v3998_v55  ;;  %v2012_v30 = vmul.f32 %v5753_v3, %v2011_v9  ;;  %4003 = vpow2.f32 %v3672_v33  ;;  %vm5852_vm12 = vmor %vm1089_vm4, %vm1090_vm8 }
 0x18b   : > { %v3470_v24 = vmul.f32 -1.442695, %v5790_v1  ;;  %v3598_v56 = vmul.f32 -1.442695, %v5793_v7  ;;  %vm5824_vm9 = vcmp.eq.f32.partialorder %v1093_v25, 8.507059e+37  ;;  %v2020_v45 = vand.u32 2147483648, %v5702_v60  ;;  %v2471_v13 = vpop.f32.mrf.mxu3 }
 0x18c   : > { %v4000_v63 = vpop.eup %3999  ;;  %v2018_v41 = vand.u32 2147483647, %v5702_v60  ;;  %4005 = vrcp.f32 %v5819_v57  ;;  %v1082_v40 = vsel %vm5768_vm1, %v1081_v51, %v1077_v11  ;;  %v1096_v34 = vor.u32 1.1754944e-38, %v1095_v5 }
 0x18d   : > { %vm2015_vm11 = vweird.f32 %v5753_v3  ;;  %v2709_v20 = vmul.f32 %v4000_v63, %v5772_v32  ;;  %v2002_v22 = vsel %vm5837_vm10, %v5730_v27, %v1998_v19  ;;  %v2719_v26 = vand.u32 2147483648, %v5772_v32 }
 0x18e   : > { %v5843_v14 = vpop.eup %4001  ;;  %4007 = vpow2.f32 %v3470_v24  ;;  %v2215_v2 = vpack.c.bf16 %v5766_v18, %v5757_v4  ;;  %v1092_v29 = vsel %vm5852_vm12, %v5738_v42, %v1088_v21  ;;  %v2013_v27 = vadd.f32 %v5753_v3, %v2012_v30  ;;  %v2334_v30 = vpop.f32.mrf.mxu2 }
 0x18f   : > { %v2710_v52 = vsub.f32 1.0, %v2709_v20  ;;  %4009 = vpow2.f32 %v3598_v56  ;;  %vm2014_vm13 = vweird.f32 %v5702_v60  ;;  %vm5864_vm14 = vcmp.eq.f32.partialorder %v2018_v41, 8.507059e+37 }
 0x190   : > { %v2021_v0 = vor.u32 1.1754944e-38, %v2020_v45  ;;  %v1100_v4 = vmul.f32 %v5843_v14, %v5777_v17  ;;  %2508 = vmatmul.bf16.gmra.mxu3 %v2215_v2  ;;  %v4004_v54 = vpop.eup %4003  ;;  %v5872_v42 = vmul.f32 %v1082_v40, %v5569_v58  ;;  %vm2714_vm15 = vweird.f32 %v4000_v63  ;;  %vm5883_vm0 = vmor %vm2014_vm13, %vm2015_vm11 }
 0x191   : > { %v2711_v18 = vmul.f32 %v4000_v63, %v2710_v52  ;;  %v2717_v44 = vand.u32 2147483647, %v5772_v32  ;;  %v2007_v51 = vsel %vm5808_vm7, %v2006_v36, %v2002_v22  ;;  %v1097_v53 = vsel %vm5824_vm9, %v1096_v34, %v1092_v29 }
 0x192   : > { %v5875_v60 = vpop.eup %4005  ;;  %vm2713_vm1 = vweird.f32 %v5772_v32  ;;  %v5888_v58 = vadd.f32 1.0, %v4004_v54  ;;  %v2017_v10 = vsel %vm5883_vm0, %v5753_v3, %v2013_v27  ;;  %v2720_v12 = vor.u32 1.1754944e-38, %v2719_v26  ;;  %v1548_v27 = vpop.f32.mrf.mxu1 }
 0x193   : > { %v2712_v49 = vadd.f32 %v4000_v63, %v2711_v18  ;;  %v2470_v55 = vadd.f32 %v2469_v47, %v2332_v46  ;;  %vm2715_vm2 = vmor %vm2713_vm1, %vm2714_vm15  ;;  %v1101_v33 = vsub.f32 1.0, %v1100_v4  ;;  %v1110_v25 = vand.u32 2147483648, %v5777_v17 }
 0x194   : > { %v4008_v9 = vpop.eup %4007  ;;  %4011 = vrcp.f32 %v5888_v58  ;;  %v5901_v32 = vadd.f32 %v5787_v61, %v621_v37  ;;  %vm2718_vm3 = vcmp.eq.f32.partialorder %v2717_v44, 8.507059e+37  ;;  %v2025_v3 = vmul.f32 %v5875_v60, %v5819_v57 }
 0x195   : > { %v4010_v31 = vpop.eup %4009  ;;  %v2716_v43 = vsel %vm2715_vm2, %v4000_v63, %v2712_v49  ;;  %v5905_v36 = vadd.f32 1.0, %v4008_v9  ;;  %v2194_v5 = vmul.f32 %v2007_v51, %v5595_v8  ;;  %v2022_v11 = vsel %vm5864_vm14, %v2021_v0, %v2017_v10  ;;  %v623_v8 = vpop.f32.mrf.mxu0 }
 0x196   : > { %v2721_v19 = vsel %vm2718_vm3, %v2720_v12, %v2716_v43  ;;  %v5910_v21 = vadd.f32 1.0, %v4010_v31  ;;  %v5913_v24 = vmul.f32 %v1097_v53, %v5598_v39  ;;  %v5918_v63 = vadd.f32 %v5634_v48, %v2470_v55 }
 0x197   : > { %v3188_v56 = vmul.f32 %v2721_v19, %v5657_v16  ;;  %4013 = vrcp.f32 %v5905_v36  ;;  %v1102_v41 = vmul.f32 %v5843_v14, %v1101_v33  ;;  %vm1104_vm4 = vweird.f32 %v5777_v17 }
 0x198   : > { %v1108_v45 = vand.u32 2147483647, %v5777_v17  ;;  %v5923_v46 = vor.u32 1.1754944e-38, %v1110_v25  ;;  %v3471_v39 = vmul.f32 -1.442695, %v5901_v32  ;;  %v2195_v40 = vmul.f32 %v2022_v11, %v5613_v50 }
 0x199   : > { %3220 = vst [vmem:[%s5928_s18] sm:$0xff] %v3188_v56  ;;  %v2026_v16 = vsub.f32 1.0, %v2025_v3  ;;  %4015 = vrcp.f32 %v5910_v21  ;;  %v5938_v34 = vadd.f32 %v5935_v6, %v1546_v23  ;;  %vm1105_vm5 = vweird.f32 %v5843_v14 }
 0x19a   : > { %v4012_v20 = vpop.eup %4011  ;;  %v2035_v50 = vand.u32 2147483648, %v5819_v57  ;;  %v2472_v47 = vadd.f32 %v2471_v13, %v2334_v30  ;;  %v5943_v37 = vadd.f32 %v5787_v61, %v623_v8  ;;  %vm2030_vm6 = vweird.f32 %v5875_v60  ;;  %vm5983_vm12 = vmor %vm1104_vm4, %vm1105_vm5 }
 0x19b   : > { %v2724_v22 = vmul.f32 %v4012_v20, %v5888_v58  ;;  %vm2728_vm7 = vweird.f32 %v5888_v58  ;;  %v3673_v28 = vmul.f32 -1.442695, %v5918_v63  ;;  %v1103_v26 = vadd.f32 %v5843_v14, %v1102_v41 }
 0x19c   : > { %v2732_v2 = vand.u32 2147483647, %v5888_v58  ;;  %v2734_v29 = vand.u32 2147483648, %v5888_v58  ;;  %4017 = vpow2.f32 %v3471_v39  ;;  %vm5954_vm8 = vcmp.eq.f32.partialorder %v1108_v45, 8.507059e+37 }
 0x19d   : > { %v5952_v52 = vpop.eup %4013  ;;  %v2027_v0 = vmul.f32 %v5875_v60, %v2026_v16  ;;  %vm2029_vm9 = vweird.f32 %v5819_v57  ;;  %v2725_v4 = vsub.f32 1.0, %v2724_v22  ;;  %4019 = vpow2.f32 %v3673_v28 }
 0x19e   : > { %v3599_v54 = vmul.f32 -1.442695, %v5938_v34  ;;  %vm2729_vm10 = vweird.f32 %v4012_v20  ;;  %v1115_v18 = vmul.f32 %v5952_v52, %v5905_v36  ;;  %v5964_v44 = vadd.f32 %v5634_v48, %v2472_v47  ;;  %vm6015_vm14 = vmor %vm2029_vm9, %vm2030_vm6 }
 0x19f   : > { %v3472_v51 = vmul.f32 -1.442695, %v5943_v37  ;;  %v5967_v53 = vpop.eup %4015  ;;  %v2726_v35 = vmul.f32 %v4012_v20, %v2725_v4  ;;  %v5970_v23 = vadd.f32 %v5935_v6, %v1548_v27  ;;  %v2248_v10 = vpack.c.bf16 %v2195_v40, %v2194_v5  ;;  %vm2730_vm13 = vmor %vm2728_vm7, %vm2729_vm10  ;;  %v2474_v27 = vpop.f32.mrf.mxu3 }
 0x1a0   : > { %4021 = vpow2.f32 %v3599_v54  ;;  %vm5972_vm11 = vcmp.eq.f32.partialorder %v2732_v2, 8.507059e+37  ;;  %v1116_v12 = vsub.f32 1.0, %v1115_v18  ;;  %v2040_v55 = vmul.f32 %v5967_v53, %v5910_v21 }
 0x1a1   : > { %v3674_v9 = vmul.f32 -1.442695, %v5964_v44  ;;  %v2727_v25 = vadd.f32 %v4012_v20, %v2726_v35  ;;  %v2735_v31 = vor.u32 1.1754944e-38, %v2734_v29  ;;  %v3600_v43 = vmul.f32 -1.442695, %v5970_v23  ;;  %2376 = vmatmul.bf16.gmra.mxu2 %v2248_v10 }
 0x1a2   : > { %v2216_v3 = vpack.c.bf16 %v5913_v24, %v5872_v42  ;;  %v4018_v5 = vpop.eup %4017  ;;  %v1107_v11 = vsel %vm5983_vm12, %v5843_v14, %v1103_v26  ;;  %v1117_v17 = vmul.f32 %v5952_v52, %v1116_v12  ;;  %v2041_v19 = vsub.f32 1.0, %v2040_v55  ;;  %v626_v55 = vpop.f32.mrf.mxu0 }
 0x1a3   : > { %4023 = vpow2.f32 %v3674_v9  ;;  %v4020_v30 = vpop.eup %4019  ;;  %v2028_v56 = vadd.f32 %v5875_v60, %v2027_v0  ;;  %v2731_v13 = vsel %vm2730_vm13, %v4012_v20, %v2727_v25  ;;  %v5998_v8 = vadd.f32 1.0, %v4018_v5 }
 0x1a4   : > { %4025 = vpow2.f32 %v3472_v51  ;;  %2513 = vmatmul.bf16.gmra.mxu3 %v2216_v3  ;;  %v2736_v14 = vsel %vm5972_vm11, %v2735_v31, %v2731_v13  ;;  %v2042_v42 = vmul.f32 %v5967_v53, %v2041_v19  ;;  %v6003_v58 = vadd.f32 1.0, %v4020_v30  ;;  %v1551_v13 = vpop.f32.mrf.mxu1 }
 0x1a5   : > { %4027 = vpow2.f32 %v3600_v43  ;;  %v2033_v41 = vand.u32 2147483647, %v5819_v57  ;;  %v2036_v45 = vor.u32 1.1754944e-38, %v2035_v50  ;;  %v3189_v39 = vmul.f32 %v2736_v14, %v5763_v15 }
 0x1a6   : > { %v4022_v24 = vpop.eup %4021  ;;  %4029 = vrcp.f32 %v5998_v8  ;;  %v1112_v40 = vsel %vm5954_vm8, %v5923_v46, %v1107_v11  ;;  %v1118_v20 = vadd.f32 %v5952_v52, %v1117_v17  ;;  %vm1120_vm15 = vweird.f32 %v5952_v52 }
 0x1a7   : > { %4031 = vrcp.f32 %v6003_v58  ;;  %v2032_v15 = vsel %vm6015_vm14, %v5875_v60, %v2028_v56  ;;  %3221 = vst [vmem:[%s5928_s18 + $0x8] sm:$0xff] %v3189_v39  ;;  %vm1119_vm0 = vweird.f32 %v5905_v36  ;;  %v1123_v46 = vand.u32 2147483647, %v5905_v36  ;;  %v2476_v16 = vpop.f32.mrf.mxu3 }
 0x1a8   : > { %v1125_v57 = vand.u32 2147483648, %v5905_v36  ;;  %v2043_v47 = vadd.f32 %v5967_v53, %v2042_v42  ;;  %vm2045_vm1 = vweird.f32 %v5967_v53  ;;  %v2048_v22 = vand.u32 2147483647, %v5910_v21  ;;  %vm6034_vm3 = vmor %vm1119_vm0, %vm1120_vm15  ;;  %v2337_v36 = vpop.f32.mrf.mxu2 }
 0x1a9   : > { %v4024_v50 = vpop.eup %4023  ;;  %v6032_v28 = vadd.f32 1.0, %v4022_v24  ;;  %vm2034_vm2 = vcmp.eq.f32.partialorder %v2033_v41, 8.507059e+37  ;;  %v2050_v2 = vand.u32 2147483648, %v5910_v21  ;;  %v1122_v4 = vsel %vm6034_vm3, %v5952_v52, %v1118_v20 }
 0x1aa   : > { %v4026_v26 = vpop.eup %4025  ;;  %v6039_v29 = vadd.f32 1.0, %v4024_v50  ;;  %v2037_v0 = vsel %vm2034_vm2, %v2036_v45, %v2032_v15  ;;  %vm2044_vm4 = vweird.f32 %v5910_v21  ;;  %v6048_v18 = vmul.f32 %v1112_v40, %v5667_v62 }
 0x1ab   : > { %v4028_v38 = vpop.eup %4027  ;;  %v1126_v51 = vor.u32 1.1754944e-38, %v1125_v57  ;;  %vm6052_vm5 = vmor %vm2044_vm4, %vm2045_vm1  ;;  %vm1124_vm6 = vcmp.eq.f32.partialorder %v1123_v46, 8.507059e+37  ;;  %vm2049_vm7 = vcmp.eq.f32.partialorder %v2048_v22, 8.507059e+37  ;;  %v6062_v62 = vmul.f32 %v2037_v0, %v5684_v59 }
 0x1ac   : > { %v6045_v54 = vpop.eup %4029  ;;  %4033 = vrcp.f32 %v6039_v29  ;;  %v2047_v21 = vsel %vm6052_vm5, %v5967_v53, %v2043_v47  ;;  %v2051_v49 = vor.u32 1.1754944e-38, %v2050_v2  ;;  %v2747_v9 = vand.u32 2147483647, %v6003_v58 }
 0x1ad   : > { %v4032_v10 = vpop.eup %4031  ;;  %4035 = vrcp.f32 %v6032_v28  ;;  %v1127_v52 = vsel %vm1124_vm6, %v1126_v51, %v1122_v4  ;;  %v2749_v33 = vand.u32 2147483648, %v6003_v58  ;;  %v1140_v25 = vand.u32 2147483648, %v5998_v8 }
 0x1ae   : > { %v2739_v12 = vmul.f32 %v4032_v10, %v6003_v58  ;;  %v6068_v31 = vadd.f32 1.0, %v4026_v26  ;;  %v2052_v53 = vsel %vm2049_vm7, %v2051_v49, %v2047_v21  ;;  %v1130_v3 = vmul.f32 %v6045_v54, %v5998_v8 }
 0x1af   : > { %v6072_v59 = vadd.f32 1.0, %v4028_v38  ;;  %v1138_v5 = vand.u32 2147483647, %v5998_v8  ;;  %v2475_v11 = vadd.f32 %v2474_v27, %v2337_v36  ;;  %v6077_v17 = vadd.f32 %v5787_v61, %v626_v55  ;;  %v628_v55 = vpop.f32.mrf.mxu0 }
 0x1b0   : > { %v2740_v43 = vsub.f32 1.0, %v2739_v12  ;;  %4037 = vrcp.f32 %v6068_v31  ;;  %v6080_v30 = vmul.f32 %v1127_v52, %v5790_v1  ;;  %vm2743_vm8 = vweird.f32 %v6003_v58  ;;  %v2339_v58 = vpop.f32.mrf.mxu2 }
 0x1b1   : > { %vm2744_vm9 = vweird.f32 %v4032_v10  ;;  %v6086_v42 = vmul.f32 %v2052_v53, %v5793_v7  ;;  %vm6088_vm10 = vcmp.eq.f32.partialorder %v2747_v9, 8.507059e+37  ;;  %v2750_v41 = vor.u32 1.1754944e-38, %v2749_v33  ;;  %v1553_v53 = vpop.f32.mrf.mxu1 }
 0x1b2   : > { %v4034_v19 = vpop.eup %4033  ;;  %v2741_v56 = vmul.f32 %v4032_v10, %v2740_v43  ;;  %v1131_v1 = vsub.f32 1.0, %v1130_v3  ;;  %v6093_v40 = vor.u32 1.1754944e-38, %v1140_v25  ;;  %4039 = vrcp.f32 %v6072_v59  ;;  %vm2745_vm11 = vmor %vm2743_vm8, %vm2744_vm9 }
 0x1b3   : > { %v6083_v14 = vpop.eup %4035  ;;  %v2754_v45 = vmul.f32 %v4034_v19, %v6039_v29  ;;  %v2764_v7 = vand.u32 2147483648, %v6039_v29  ;;  %v6098_v15 = vadd.f32 %v5634_v48, %v2475_v11  ;;  %v3473_v46 = vmul.f32 -1.442695, %v6077_v17 }
 0x1b4   : > { %v2742_v39 = vadd.f32 %v4032_v10, %v2741_v56  ;;  %v2055_v50 = vmul.f32 %v6083_v14, %v6032_v28  ;;  %v2063_v47 = vand.u32 2147483647, %v6032_v28  ;;  %v2065_v22 = vand.u32 2147483648, %v6032_v28 }
 0x1b5   : > { %v2755_v20 = vsub.f32 1.0, %v2754_v45  ;;  %vm2759_vm12 = vweird.f32 %v4034_v19  ;;  %v2762_v36 = vand.u32 2147483647, %v6039_v29  ;;  %v1132_v38 = vmul.f32 %v6045_v54, %v1131_v1 }
 0x1b6   : > { %v2746_v57 = vsel %vm2745_vm11, %v4032_v10, %v2742_v39  ;;  %v6105_v26 = vpop.eup %4037  ;;  %vm1134_vm13 = vweird.f32 %v5998_v8  ;;  %vm2758_vm14 = vweird.f32 %v6039_v29  ;;  %v2765_v51 = vor.u32 1.1754944e-38, %v2764_v7  ;;  %v2479_v39 = vpop.f32.mrf.mxu3 }
 0x1b7   : > { %v2751_v60 = vsel %vm6088_vm10, %v2750_v41, %v2746_v57  ;;  %v2756_v2 = vmul.f32 %v4034_v19, %v2755_v20  ;;  %v1145_v0 = vmul.f32 %v6105_v26, %v6068_v31  ;;  %v3675_v35 = vmul.f32 -1.442695, %v6098_v15  ;;  %vm2760_vm15 = vmor %vm2758_vm14, %vm2759_vm12 }
 0x1b8   : > { %v3190_v27 = vmul.f32 %v2751_v60, %v5918_v63  ;;  %4041 = vpow2.f32 %v3473_v46  ;;  %v6117_v10 = vpop.eup %4039  ;;  %v2056_v21 = vsub.f32 1.0, %v2055_v50  ;;  %v6121_v52 = vadd.f32 %v5935_v6, %v1551_v13  ;;  %v2342_v45 = vpop.f32.mrf.mxu2 }
 0x1b9   : > { %v2757_v4 = vadd.f32 %v4034_v19, %v2756_v2  ;;  %v1146_v63 = vsub.f32 1.0, %v1145_v0  ;;  %v2477_v49 = vadd.f32 %v2476_v16, %v2339_v58  ;;  %vm1135_vm0 = vweird.f32 %v6045_v54 }
 0x1ba   : > { %3222 = vst [vmem:[%s5928_s18 + $0x10] sm:$0xff] %v3190_v27  ;;  %vm2763_vm1 = vcmp.eq.f32.partialorder %v2762_v36, 8.507059e+37  ;;  %v2070_v12 = vmul.f32 %v6117_v10, %v6072_v59  ;;  %v6127_v9 = vadd.f32 %v6045_v54, %v1132_v38  ;;  %vm2059_vm2 = vweird.f32 %v6032_v28  ;;  %vm6170_vm5 = vmor %vm1134_vm13, %vm1135_vm0 }
 0x1bb   : > { %v2761_v29 = vsel %vm2760_vm15, %v4034_v19, %v2757_v4  ;;  %v6130_v33 = vor.u32 1.1754944e-38, %v2065_v22  ;;  %4043 = vpow2.f32 %v3675_v35  ;;  %v3601_v11 = vmul.f32 -1.442695, %v6121_v52 }
 0x1bc   : > { %v2766_v25 = vsel %vm2763_vm1, %v2765_v51, %v2761_v29  ;;  %v2071_v3 = vsub.f32 1.0, %v2070_v12  ;;  %v6135_v19 = vadd.f32 %v5634_v48, %v2477_v49  ;;  %vm6139_vm3 = vcmp.eq.f32.partialorder %v1138_v5, 8.507059e+37 }
 0x1bd   : > { %v3191_v43 = vmul.f32 %v2766_v25, %v5964_v44  ;;  %v2057_v13 = vmul.f32 %v6083_v14, %v2056_v21  ;;  %v1147_v24 = vmul.f32 %v6105_v26, %v1146_v63  ;;  %v6146_v41 = vadd.f32 %v5787_v61, %v628_v55 }
 0x1be   : > { %v2249_v44 = vpack.c.bf16 %v6086_v42, %v6062_v62  ;;  %v4042_v1 = vpop.eup %4041  ;;  %4045 = vpow2.f32 %v3601_v11  ;;  %v3676_v5 = vmul.f32 -1.442695, %v6135_v19  ;;  %v6153_v58 = vadd.f32 %v5935_v6, %v1553_v53 }
 0x1bf   : > { %3223 = vst [vmem:[%s5928_s18 + $0x18] sm:$0xff] %v3191_v43  ;;  %v2217_v16 = vpack.c.bf16 %v6080_v30, %v6048_v18  ;;  %vm6157_vm4 = vcmp.eq.f32.partialorder %v2063_v47, 8.507059e+37  ;;  %v1153_v7 = vand.u32 2147483647, %v6068_v31  ;;  %v2072_v62 = vmul.f32 %v6117_v10, %v2071_v3 }
 0x1c0   : > { %v6163_v42 = vadd.f32 1.0, %v4042_v1  ;;  %v3474_v46 = vmul.f32 -1.442695, %v6146_v41  ;;  %2381 = vmatmul.bf16.gmra.mxu2 %v2249_v44  ;;  %vm2060_vm6 = vweird.f32 %v6083_v14  ;;  %v1155_v18 = vand.u32 2147483648, %v6068_v31  ;;  %v2344_v56 = vpop.f32.mrf.mxu2 }
 0x1c1   : > { %4047 = vpow2.f32 %v3676_v5  ;;  %2518 = vmatmul.bf16.gmra.mxu3 %v2217_v16  ;;  %v2480_v30 = vadd.f32 %v2479_v39, %v2342_v45  ;;  %v4044_v50 = vpop.eup %4043  ;;  %v1137_v47 = vsel %vm6170_vm5, %v6045_v54, %v6127_v9  ;;  %v2058_v22 = vadd.f32 %v6083_v14, %v2057_v13  ;;  %vm6197_vm9 = vmor %vm2059_vm2, %vm2060_vm6  ;;  %v2481_v13 = vpop.f32.mrf.mxu3 }
 0x1c2   : > { %vm1150_vm7 = vweird.f32 %v6105_v26  ;;  %4049 = vrcp.f32 %v6163_v42  ;;  %v1148_v8 = vadd.f32 %v6105_v26, %v1147_v24  ;;  %v6184_v60 = vadd.f32 1.0, %v4044_v50 }
 0x1c3   : > { %4051 = vpow2.f32 %v3474_v46  ;;  %v3602_v2 = vmul.f32 -1.442695, %v6153_v58  ;;  %v2073_v36 = vadd.f32 %v6117_v10, %v2072_v62  ;;  %vm2075_vm8 = vweird.f32 %v6117_v10 }
 0x1c4   : > { %v2078_v27 = vand.u32 2147483647, %v6072_v59  ;;  %v6191_v54 = vadd.f32 %v5634_v48, %v2480_v30  ;;  %v4046_v38 = vpop.eup %4045  ;;  %vm1149_vm10 = vweird.f32 %v6068_v31  ;;  %vm6202_vm11 = vcmp.eq.f32.partialorder %v1153_v7, 8.507059e+37  ;;  %v631_v48 = vpop.f32.mrf.mxu0 }
 0x1c5   : > { %v2080_v51 = vand.u32 2147483648, %v6072_v59  ;;  %4053 = vrcp.f32 %v6184_v60  ;;  %v2062_v35 = vsel %vm6197_vm9, %v6083_v14, %v2058_v22  ;;  %vm6213_vm12 = vmor %vm1149_vm10, %vm1150_vm7  ;;  %vm2074_vm13 = vweird.f32 %v6072_v59 }
 0x1c6   : > { %v6218_v31 = vadd.f32 1.0, %v4046_v38  ;;  %v3677_v21 = vmul.f32 -1.442695, %v6191_v54  ;;  %v1142_v49 = vsel %vm6139_vm3, %v6093_v40, %v1137_v47  ;;  %v1152_v14 = vsel %vm6213_vm12, %v6105_v26, %v1148_v8  ;;  %vm6229_vm14 = vmor %vm2074_vm13, %vm2075_vm8 }
 0x1c7   : > { %v4048_v63 = vpop.eup %4047  ;;  %v1156_v29 = vor.u32 1.1754944e-38, %v1155_v18  ;;  %4055 = vpow2.f32 %v3602_v2  ;;  %v2077_v55 = vsel %vm6229_vm14, %v6117_v10, %v2073_v36  ;;  %vm2079_vm15 = vcmp.eq.f32.partialorder %v2078_v27, 8.507059e+37  ;;  %v1556_v18 = vpop.f32.mrf.mxu1 }
 0x1c8   : > { %v6233_v59 = vpop.eup %4049  ;;  %4057 = vrcp.f32 %v6218_v31  ;;  %v6240_v40 = vadd.f32 %v5787_v61, %v631_v48  ;;  %v2067_v9 = vsel %vm6157_vm4, %v6130_v33, %v2062_v35  ;;  %v2081_v25 = vor.u32 1.1754944e-38, %v2080_v51 }
 0x1c9   : > { %v4052_v26 = vpop.eup %4051  ;;  %v1160_v53 = vmul.f32 %v6233_v59, %v6163_v42  ;;  %v6247_v43 = vadd.f32 1.0, %v4048_v63  ;;  %v1157_v10 = vsel %vm6202_vm11, %v1156_v29, %v1152_v14  ;;  %v1170_v3 = vand.u32 2147483648, %v6163_v42 }
 0x1ca   : > { %v6252_v11 = vadd.f32 1.0, %v4052_v26  ;;  %4059 = vpow2.f32 %v3677_v21  ;;  %v2082_v44 = vsel %vm2079_vm15, %v2081_v25, %v2077_v55  ;;  %v2777_v33 = vand.u32 2147483647, %v6184_v60  ;;  %v6310_v26 = vpop.f32.mrf.mxu2 }
 0x1cb   : > { %v4054_v24 = vpop.eup %4053  ;;  %v1161_v45 = vsub.f32 1.0, %v1160_v53  ;;  %4061 = vrcp.f32 %v6247_v43  ;;  %v6257_v39 = vmul.f32 %v1142_v49, %v5901_v32  ;;  %v6260_v1 = vmul.f32 %v2067_v9, %v5938_v34 }
 0x1cc   : > { %v2769_v5 = vmul.f32 %v4054_v24, %v6184_v60  ;;  %v3475_v16 = vmul.f32 -1.442695, %v6240_v40  ;;  %v6265_v7 = vmul.f32 %v1157_v10, %v5943_v37  ;;  %v2779_v62 = vand.u32 2147483648, %v6184_v60 }
 0x1cd   : > { %v4056_v20 = vpop.eup %4055  ;;  %v1168_v46 = vand.u32 2147483647, %v6163_v42  ;;  %4063 = vrcp.f32 %v6252_v11  ;;  %v6273_v32 = vmul.f32 %v2082_v44, %v5970_v23  ;;  %vm2773_vm0 = vweird.f32 %v6184_v60  ;;  %v6312_v60 = vpop.f32.mrf.mxu3 }
 0x1ce   : > { %v6270_v57 = vpop.eup %4057  ;;  %v2770_v34 = vsub.f32 1.0, %v2769_v5  ;;  %vm1164_vm1 = vweird.f32 %v6163_v42  ;;  %vm6277_vm2 = vcmp.eq.f32.partialorder %v2777_v33, 8.507059e+37  ;;  %v1162_v30 = vmul.f32 %v6233_v59, %v1161_v45 }
 0x1cf   : > { %v1171_v50 = vor.u32 1.1754944e-38, %v1170_v3  ;;  %v2085_v47 = vmul.f32 %v6270_v57, %v6218_v31  ;;  %vm2774_vm3 = vweird.f32 %v4054_v24  ;;  %v6284_v23 = vadd.f32 1.0, %v4056_v20 }
 0x1d0   : > { %v4060_v22 = vpop.eup %4059  ;;  %v2771_v8 = vmul.f32 %v4054_v24, %v2770_v34  ;;  %4065 = vpow2.f32 %v3475_v16  ;;  %v2780_v36 = vor.u32 1.1754944e-38, %v2779_v62  ;;  %vm6286_vm4 = vcmp.eq.f32.partialorder %v1168_v46, 8.507059e+37  ;;  %vm2775_vm5 = vmor %vm2773_vm0, %vm2774_vm3  ;;  %v633_v16 = vpop.f32.mrf.mxu0 }
 0x1d1   : > { %v4062_v2 = vpop.eup %4061  ;;  %v2093_v38 = vand.u32 2147483647, %v6218_v31  ;;  %v6292_v0 = vadd.f32 %v5935_v6, %v1556_v18  ;;  %v6294_v4 = vadd.f32 %v2481_v13, %v2344_v56  ;;  %v2086_v48 = vsub.f32 1.0, %v2085_v47 }
 0x1d2   : > { %v2772_v51 = vadd.f32 %v4054_v24, %v2771_v8  ;;  %v2784_v35 = vmul.f32 %v4062_v2, %v6247_v43  ;;  %v6297_v28 = vadd.f32 1.0, %v4060_v22  ;;  %v1163_v63 = vadd.f32 %v6233_v59, %v1162_v30  ;;  %v1558_v30 = vpop.f32.mrf.mxu1 }
 0x1d3   : > { %v6299_v21 = vpop.eup %4063  ;;  %vm1165_vm6 = vweird.f32 %v6233_v59  ;;  %v2095_v49 = vand.u32 2147483648, %v6218_v31  ;;  %4067 = vrcp.f32 %v6284_v23  ;;  %v2792_v12 = vand.u32 2147483647, %v6247_v43 }
 0x1d4   : > { %v2776_v14 = vsel %vm2775_vm5, %v4054_v24, %v2772_v51  ;;  %v2785_v29 = vsub.f32 1.0, %v2784_v35  ;;  %v1175_v55 = vmul.f32 %v6299_v21, %v6252_v11  ;;  %vm2789_vm7 = vweird.f32 %v4062_v2  ;;  %vm6323_vm8 = vmor %vm1164_vm1, %vm1165_vm6 }
 0x1d5   : > { %v2781_v9 = vsel %vm6277_vm2, %v2780_v36, %v2776_v14  ;;  %v2794_v25 = vand.u32 2147483648, %v6247_v43  ;;  %v3603_v53 = vmul.f32 -1.442695, %v6292_v0  ;;  %v2087_v13 = vmul.f32 %v6270_v57, %v2086_v48  ;;  %v2349_v14 = vpop.f32.mrf.mxu2 }
 0x1d6   : > { %v4066_v10 = vpop.eup %4065  ;;  %v3192_v3 = vmul.f32 %v2781_v9, %v6098_v15  ;;  %v2786_v24 = vmul.f32 %v4062_v2, %v2785_v29  ;;  %4069 = vrcp.f32 %v6297_v28  ;;  %v1167_v44 = vsel %vm6323_vm8, %v6233_v59, %v1163_v63  ;;  %v6390_v63 = vld [vmem:[%s7086_s8] ss:$0 sm:$0xff]  ;;  %v2486_v29 = vpop.f32.mrf.mxu3 }
 0x1d7   : > { %vm2089_vm9 = vweird.f32 %v6218_v31  ;;  %v6333_v15 = vor.u32 1.1754944e-38, %v2095_v49  ;;  %vm2788_vm10 = vweird.f32 %v6247_v43  ;;  %vm6337_vm11 = vcmp.eq.f32.partialorder %v2792_v12, 8.507059e+37 }
 0x1d8   : > { %3224 = vst [vmem:[%s5928_s18 + $0x20] sm:$0xff] %v3192_v3  ;;  %v2787_v42 = vadd.f32 %v4062_v2, %v2786_v24  ;;  %v1176_v45 = vsub.f32 1.0, %v1175_v55  ;;  %v1185_v5 = vand.u32 2147483648, %v6252_v11  ;;  %vm2090_vm12 = vweird.f32 %v6270_v57  ;;  %vm2790_vm13 = vmor %vm2788_vm10, %vm2789_vm7 }
 0x1d9   : > { %v6342_v20 = vpop.eup %4067  ;;  %v2795_v59 = vor.u32 1.1754944e-38, %v2794_v25  ;;  %v6346_v62 = vadd.f32 1.0, %v4066_v10  ;;  %4071 = vpow2.f32 %v3603_v53  ;;  %v1172_v43 = vsel %vm6286_vm4, %v1171_v50, %v1167_v44  ;;  %vm6373_vm0 = vmor %vm2089_vm9, %vm2090_vm12 }
 0x1da   : > { %v2088_v46 = vadd.f32 %v6270_v57, %v2087_v13  ;;  %vm6351_vm14 = vcmp.eq.f32.partialorder %v2093_v38, 8.507059e+37  ;;  %v2791_v18 = vsel %vm2790_vm13, %v4062_v2, %v2787_v42  ;;  %v2100_v37 = vmul.f32 %v6342_v20, %v6284_v23 }
 0x1db   : > { %v2796_v47 = vsel %vm6337_vm11, %v2795_v59, %v2791_v18  ;;  %vm1179_vm15 = vweird.f32 %v6252_v11  ;;  %v1183_v22 = vand.u32 2147483647, %v6252_v11  ;;  %4073 = vrcp.f32 %v6346_v62 }
 0x1dc   : > { %v4070_v50 = vpop.eup %4069  ;;  %v3193_v8 = vmul.f32 %v2796_v47, %v6135_v19  ;;  %v1177_v36 = vmul.f32 %v6299_v21, %v1176_v45  ;;  %v6364_v2 = vor.u32 1.1754944e-38, %v1185_v5  ;;  %v2101_v27 = vsub.f32 1.0, %v2100_v37 }
 0x1dd   : > { %v6367_v38 = vmul.f32 %v1172_v43, %v6077_v17  ;;  %vm1180_vm1 = vweird.f32 %v6299_v21  ;;  %v2108_v19 = vand.u32 2147483647, %v6284_v23  ;;  %v2799_v48 = vmul.f32 %v4070_v50, %v6297_v28 }
 0x1de   : > { %v2092_v35 = vsel %vm6373_vm0, %v6270_v57, %v2088_v46  ;;  %3225 = vst [vmem:[%s5928_s18 + $0x28] sm:$0xff] %v3193_v8  ;;  %vm2104_vm2 = vweird.f32 %v6284_v23  ;;  %v2110_v17 = vand.u32 2147483648, %v6284_v23  ;;  %v2807_v31 = vand.u32 2147483647, %v6297_v28  ;;  %vm6433_vm7 = vmor %vm1179_vm15, %vm1180_vm1 }
 0x1df   : > { %v6394_v49 = vadd.f32 %v6390_v63, %v6294_v4  ;;  %v4072_v12 = vpop.eup %4071  ;;  %vm6396_vm3 = vcmp.eq.f32.partialorder %v1183_v22, 8.507059e+37  ;;  %v2800_v55 = vsub.f32 1.0, %v2799_v48  ;;  %v2809_v9 = vand.u32 2147483648, %v6297_v28 }
 0x1e0   : > { %v6402_v25 = vadd.f32 %v5787_v61, %v633_v16  ;;  %v6405_v53 = vadd.f32 %v5935_v6, %v1558_v30  ;;  %v1178_v10 = vadd.f32 %v6299_v21, %v1177_v36  ;;  %v2102_v4 = vmul.f32 %v6342_v20, %v2101_v27  ;;  %v636_v16 = vpop.f32.mrf.mxu0  ;;  %v6472_v36 = vpop.f32.mrf.mxu2 }
 0x1e1   : > { %v6409_v3 = vadd.f32 1.0, %v4072_v12  ;;  %v3678_v56 = vmul.f32 -1.442695, %v6394_v49  ;;  %v6412_v13 = vpop.eup %4073  ;;  %v2801_v24 = vmul.f32 %v4070_v50, %v2800_v55  ;;  %vm2804_vm4 = vweird.f32 %v4070_v50  ;;  %v6474_v27 = vpop.f32.mrf.mxu3 }
 0x1e2   : > { %v3476_v44 = vmul.f32 -1.442695, %v6402_v25  ;;  %v2250_v42 = vpack.c.bf16 %v6273_v32, %v6260_v1  ;;  %vm6417_vm5 = vcmp.eq.f32.partialorder %v2108_v19, 8.507059e+37  ;;  %vm2803_vm6 = vweird.f32 %v6297_v28 }
 0x1e3   : > { %v1190_v45 = vmul.f32 %v6412_v13, %v6346_v62  ;;  %4075 = vrcp.f32 %v6409_v3  ;;  %v3604_v5 = vmul.f32 -1.442695, %v6405_v53  ;;  %v2097_v59 = vsel %vm6351_vm14, %v6333_v15, %v2092_v35  ;;  %vm2805_vm10 = vmor %vm2803_vm6, %vm2804_vm4  ;;  %v1561_v15 = vpop.f32.mrf.mxu1 }
 0x1e4   : > { %vm2105_vm8 = vweird.f32 %v6342_v20  ;;  %v2802_v32 = vadd.f32 %v4070_v50, %v2801_v24  ;;  %vm2808_vm9 = vcmp.eq.f32.partialorder %v2807_v31, 8.507059e+37  ;;  %2386 = vmatmul.bf16.gmra.mxu2 %v2250_v42  ;;  %v2103_v28 = vadd.f32 %v6342_v20, %v2102_v4 }
 0x1e5   : > { %v2810_v43 = vor.u32 1.1754944e-38, %v2809_v9  ;;  %v1191_v46 = vsub.f32 1.0, %v1190_v45  ;;  %4077 = vpow2.f32 %v3678_v56  ;;  %v1182_v11 = vsel %vm6433_vm7, %v6299_v21, %v1178_v10  ;;  %vm6453_vm11 = vmor %vm2104_vm2, %vm2105_vm8 }
 0x1e6   : > { %v2806_v34 = vsel %vm2805_vm10, %v4070_v50, %v2802_v32  ;;  %4079 = vpow2.f32 %v3476_v44  ;;  %v2218_v18 = vpack.c.bf16 %v6265_v7, %v6257_v39  ;;  %v2111_v37 = vor.u32 1.1754944e-38, %v2110_v17 }
 0x1e7   : > { %v2811_v30 = vsel %vm2808_vm9, %v2810_v43, %v2806_v34  ;;  %v1192_v47 = vmul.f32 %v6412_v13, %v1191_v46  ;;  %4081 = vpow2.f32 %v3604_v5  ;;  %v6447_v22 = vmul.f32 %v2097_v59, %v6121_v52  ;;  %v4206_v59 = vld [vmem:[%s7081_s3] ss:$0 sm:$0xff] }
 0x1e8   : > { %v3194_v50 = vmul.f32 %v2811_v30, %v6191_v54  ;;  %2523 = vmatmul.bf16.gmra.mxu3 %v2218_v18  ;;  %v2485_v39 = vadd.f32 %v6312_v60, %v6310_v26  ;;  %v6461_v7 = vadd.f32 %v5787_v61, %v636_v16  ;;  %v1187_v52 = vsel %vm6396_vm3, %v6364_v2, %v1182_v11  ;;  %v638_v10 = vpop.f32.mrf.mxu0  ;;  %v6547_v34 = vpop.f32.mrf.mxu2 }
 0x1e9   : > { %v6463_v8 = vpop.eup %4075  ;;  %v2107_v23 = vsel %vm6453_vm11, %v6342_v20, %v2103_v28  ;;  %vm1194_vm12 = vweird.f32 %v6346_v62  ;;  %v2487_v54 = vadd.f32 %v2486_v29, %v2349_v14  ;;  %v1198_v61 = vand.u32 2147483647, %v6346_v62  ;;  %v6549_v18 = vpop.f32.mrf.mxu3 }
 0x1ea   : > { %3226 = vst [vmem:[%s5928_s18 + $0x30] sm:$0xff] %v3194_v50  ;;  %v2115_v26 = vmul.f32 %v6463_v8, %v6409_v3  ;;  %v6481_v60 = vadd.f32 %v6390_v63, %v2485_v39  ;;  %v3477_v2 = vmul.f32 -1.442695, %v6461_v7  ;;  %v1193_v20 = vadd.f32 %v6412_v13, %v1192_v47 }
 0x1eb   : > { %v4078_v51 = vpop.eup %4077  ;;  %vm1195_vm13 = vweird.f32 %v6412_v13  ;;  %v1200_v19 = vand.u32 2147483648, %v6346_v62  ;;  %v6488_v48 = vadd.f32 %v5935_v6, %v1561_v15  ;;  %v2112_v17 = vsel %vm6417_vm5, %v2111_v37, %v2107_v23  ;;  %v1563_v33 = vpop.f32.mrf.mxu1 }
 0x1ec   : > { %v4080_v35 = vpop.eup %4079  ;;  %v2116_v31 = vsub.f32 1.0, %v2115_v26  ;;  %v2123_v14 = vand.u32 2147483647, %v6409_v3  ;;  %v6493_v29 = vadd.f32 1.0, %v4078_v51  ;;  %v3679_v55 = vmul.f32 -1.442695, %v6481_v60  ;;  %vm6508_vm14 = vmor %vm1194_vm12, %vm1195_vm13 }
 0x1ed   : > { %v4082_v12 = vpop.eup %4081  ;;  %v6495_v57 = vadd.f32 1.0, %v4080_v35  ;;  %4083 = vpow2.f32 %v3477_v2  ;;  %v6499_v9 = vadd.f32 %v6390_v63, %v2487_v54  ;;  %v6502_v4 = vmul.f32 %v1187_v52, %v6146_v41 }
 0x1ee   : > { %vm6512_vm15 = vcmp.eq.f32.partialorder %v1198_v61, 8.507059e+37  ;;  %v2125_v44 = vand.u32 2147483648, %v6409_v3  ;;  %4085 = vrcp.f32 %v6493_v29  ;;  %v1197_v41 = vsel %vm6508_vm14, %v6412_v13, %v1193_v20 }
 0x1ef   : > { %v2117_v42 = vmul.f32 %v6463_v8, %v2116_v31  ;;  %4087 = vrcp.f32 %v6495_v57  ;;  %v3605_v62 = vmul.f32 -1.442695, %v6488_v48  ;;  %v2201_v45 = vmul.f32 %v2112_v17, %v6153_v58 }
 0x1f0   : > { %v1201_v5 = vor.u32 1.1754944e-38, %v1200_v19  ;;  %v6525_v16 = vadd.f32 1.0, %v4082_v12  ;;  %v6530_v1 = vadd.f32 %v4206_v59, %v638_v10  ;;  %vm2119_vm0 = vweird.f32 %v6409_v3 }
 0x1f1   : > { %vm6533_vm1 = vcmp.eq.f32.partialorder %v2123_v14, 8.507059e+37  ;;  %4089 = vpow2.f32 %v3679_v55  ;;  %v3680_v32 = vmul.f32 -1.442695, %v6499_v9  ;;  %v2126_v28 = vor.u32 1.1754944e-38, %v2125_v44 }
 0x1f2   : > { %v1202_v58 = vsel %vm6512_vm15, %v1201_v5, %v1197_v41  ;;  %4091 = vrcp.f32 %v6525_v16  ;;  %v6542_v43 = vadd.f32 %v5935_v6, %v1563_v33  ;;  %v2118_v15 = vadd.f32 %v6463_v8, %v2117_v42  ;;  %v6602_v42 = vpop.f32.mrf.mxu2 }
 0x1f3   : > { %v4084_v46 = vpop.eup %4083  ;;  %vm2120_vm2 = vweird.f32 %v6463_v8  ;;  %v2822_v11 = vand.u32 2147483647, %v6493_v29  ;;  %4093 = vpow2.f32 %v3605_v62  ;;  %v2824_v30 = vand.u32 2147483648, %v6493_v29  ;;  %v6604_v62 = vpop.f32.mrf.mxu3 }
 0x1f4   : > { %v4086_v37 = vpop.eup %4085  ;;  %v6552_v47 = vadd.f32 1.0, %v4084_v46  ;;  %v3478_v6 = vmul.f32 -1.442695, %v6530_v1  ;;  %v2251_v21 = vpack.c.bf16 %v2201_v45, %v6447_v22  ;;  %v6559_v39 = vmul.f32 %v1202_v58, %v6240_v40  ;;  %vm6567_vm4 = vmor %vm2119_vm0, %vm2120_vm2 }
 0x1f5   : > { %v6556_v50 = vpop.eup %4087  ;;  %v2814_v52 = vmul.f32 %v4086_v37, %v6493_v29  ;;  %vm2818_vm3 = vweird.f32 %v6493_v29  ;;  %4095 = vpow2.f32 %v3680_v32  ;;  %vm1209_vm5 = vweird.f32 %v6495_v57 }
 0x1f6   : > { %v1205_v22 = vmul.f32 %v6556_v50, %v6495_v57  ;;  %v1213_v40 = vand.u32 2147483647, %v6495_v57  ;;  %v1215_v54 = vand.u32 2147483648, %v6495_v57  ;;  %4097 = vrcp.f32 %v6552_v47  ;;  %2391 = vmatmul.bf16.gmra.mxu2 %v2251_v21 }
 0x1f7   : > { %v4090_v61 = vpop.eup %4089  ;;  %v2122_v3 = vsel %vm6567_vm4, %v6463_v8, %v2118_v15  ;;  %v2815_v26 = vsub.f32 1.0, %v2814_v52  ;;  %vm6580_vm6 = vcmp.eq.f32.partialorder %v2822_v11, 8.507059e+37  ;;  %v3606_v51 = vmul.f32 -1.442695, %v6542_v43 }
 0x1f8   : > { %v6585_v20 = vpop.eup %4091  ;;  %v2825_v19 = vor.u32 1.1754944e-38, %v2824_v30  ;;  %v1206_v35 = vsub.f32 1.0, %v1205_v22  ;;  %v6587_v17 = vadd.f32 1.0, %v4090_v61  ;;  %v2219_v31 = vpack.c.bf16 %v6502_v4, %v6367_v38 }
 0x1f9   : > { %v4094_v14 = vpop.eup %4093  ;;  %v2816_v12 = vmul.f32 %v4086_v37, %v2815_v26  ;;  %vm2819_vm7 = vweird.f32 %v4086_v37  ;;  %v2130_v8 = vmul.f32 %v6585_v20, %v6525_v16  ;;  %4099 = vpow2.f32 %v3478_v6 }
 0x1fa   : > { %v2127_v55 = vsel %vm6533_vm1, %v2126_v28, %v2122_v3  ;;  %v1207_v10 = vmul.f32 %v6556_v50, %v1206_v35  ;;  %vm6596_vm8 = vcmp.eq.f32.partialorder %v1213_v40, 8.507059e+37  ;;  %v1216_v24 = vor.u32 1.1754944e-38, %v1215_v54  ;;  %2528 = vmatmul.bf16.gmra.mxu3 %v2219_v31  ;;  %vm2820_vm9 = vmor %vm2818_vm3, %vm2819_vm7  ;;  %v6670_v35 = vpop.f32.mrf.mxu2 }
 0x1fb   : > { %4101 = vrcp.f32 %v6587_v17  ;;  %v4096_v38 = vpop.eup %4095  ;;  %v2817_v4 = vadd.f32 %v4086_v37, %v2816_v12  ;;  %v2131_v44 = vsub.f32 1.0, %v2130_v8  ;;  %v2138_v41 = vand.u32 2147483647, %v6525_v16  ;;  %v6672_v31 = vpop.f32.mrf.mxu3 }
 0x1fc   : > { %4103 = vpow2.f32 %v3606_v51  ;;  %v6606_v33 = vpop.eup %4097  ;;  %v1208_v45 = vadd.f32 %v6556_v50, %v1207_v10  ;;  %vm1210_vm10 = vweird.f32 %v6556_v50  ;;  %v2140_v5 = vand.u32 2147483648, %v6525_v16 }
 0x1fd   : > { %v6614_v59 = vadd.f32 1.0, %v4094_v14  ;;  %v2821_v13 = vsel %vm2820_vm9, %v4086_v37, %v2817_v4  ;;  %v2132_v32 = vmul.f32 %v6585_v20, %v2131_v44  ;;  %v1220_v58 = vmul.f32 %v6606_v33, %v6552_v47  ;;  %vm6629_vm12 = vmor %vm1209_vm5, %vm1210_vm10 }
 0x1fe   : > { %v1230_v28 = vand.u32 2147483648, %v6552_v47  ;;  %v2826_v29 = vsel %vm6580_vm6, %v2825_v19, %v2821_v13  ;;  %vm2135_vm11 = vweird.f32 %v6585_v20  ;;  %v6624_v46 = vadd.f32 1.0, %v4096_v38 }
 0x1ff   : > { %4105 = vrcp.f32 %v6614_v59  ;;  %v4100_v15 = vpop.eup %4099  ;;  %v3195_v11 = vmul.f32 %v2826_v29, %v6394_v49  ;;  %v2133_v30 = vadd.f32 %v6585_v20, %v2132_v32  ;;  %vm2134_vm13 = vweird.f32 %v6525_v16 }
 0x200   : > { %v2837_v6 = vand.u32 2147483647, %v6587_v17  ;;  %v6637_v52 = vmul.f32 %v2127_v55, %v6292_v0  ;;  %v1212_v49 = vsel %vm6629_vm12, %v6556_v50, %v1208_v45  ;;  %v2839_v57 = vand.u32 2147483648, %v6587_v17  ;;  %vm6646_vm14 = vmor %vm2134_vm13, %vm2135_vm11 }
 0x201   : > { %v4102_v21 = vpop.eup %4101  ;;  %v1221_v23 = vsub.f32 1.0, %v1220_v58  ;;  %3227 = vst [vmem:[%s5928_s18 + $0x38] sm:$0xff] %v3195_v11  ;;  %vm6650_vm15 = vcmp.eq.f32.partialorder %v2138_v41, 8.507059e+37  ;;  %v2141_v0 = vor.u32 1.1754944e-38, %v2140_v5  ;;  %v1228_v50 = vand.u32 2147483647, %v6552_v47 }
 0x202   : > { %v4104_v22 = vpop.eup %4103  ;;  %v2829_v54 = vmul.f32 %v4102_v21, %v6587_v17  ;;  %v2137_v61 = vsel %vm6646_vm14, %v6585_v20, %v2133_v30  ;;  %vm2833_vm0 = vweird.f32 %v6587_v17  ;;  %v6660_v3 = vor.u32 1.1754944e-38, %v1230_v28 }
 0x203   : > { %4107 = vrcp.f32 %v6624_v46  ;;  %v1217_v26 = vsel %vm6596_vm8, %v1216_v24, %v1212_v49  ;;  %vm6665_vm1 = vcmp.eq.f32.partialorder %v2837_v6, 8.507059e+37  ;;  %v2155_v19 = vand.u32 2147483648, %v6614_v59  ;;  %v2362_v49 = vpop.f32.mrf.mxu2 }
 0x204   : > { %v2830_v2 = vsub.f32 1.0, %v2829_v54  ;;  %v2840_v14 = vor.u32 1.1754944e-38, %v2839_v57  ;;  %v1222_v12 = vmul.f32 %v6606_v33, %v1221_v23  ;;  %v6677_v8 = vadd.f32 1.0, %v4100_v15  ;;  %v2499_v57 = vpop.f32.mrf.mxu3 }
 0x205   : > { %v6674_v20 = vpop.eup %4105  ;;  %v6679_v55 = vadd.f32 1.0, %v4104_v22  ;;  %v2142_v10 = vsel %vm6650_vm15, %v2141_v0, %v2137_v61  ;;  %vm2834_vm2 = vweird.f32 %v4102_v21  ;;  %v6686_v38 = vmul.f32 %v1217_v26, %v6402_v25 }
 0x206   : > { %v2831_v56 = vmul.f32 %v4102_v21, %v2830_v2  ;;  %v2145_v24 = vmul.f32 %v6674_v20, %v6614_v59  ;;  %v2153_v4 = vand.u32 2147483647, %v6614_v59  ;;  %v2852_v44 = vand.u32 2147483647, %v6624_v46  ;;  %vm2835_vm3 = vmor %vm2833_vm0, %vm2834_vm2 }
 0x207   : > { %4109 = vrcp.f32 %v6677_v8  ;;  %v6691_v5 = vor.u32 1.1754944e-38, %v2155_v19  ;;  %v2854_v13 = vand.u32 2147483648, %v6624_v46  ;;  %v2203_v58 = vmul.f32 %v2142_v10, %v6405_v53 }
 0x208   : > { %v2832_v41 = vadd.f32 %v4102_v21, %v2831_v56  ;;  %v2146_v45 = vsub.f32 1.0, %v2145_v24  ;;  %v6698_v25 = vadd.f32 %v6606_v33, %v1222_v12  ;;  %vm2848_vm4 = vweird.f32 %v6624_v46 }
 0x209   : > { %v4108_v32 = vpop.eup %4107  ;;  %4111 = vrcp.f32 %v6679_v55  ;;  %vm2150_vm5 = vweird.f32 %v6674_v20  ;;  %v1245_v15 = vand.u32 2147483648, %v6677_v8  ;;  %vm1225_vm6 = vweird.f32 %v6606_v33 }
 0x20a   : > { %v2836_v28 = vsel %vm2835_vm3, %v4102_v21, %v2832_v41  ;;  %v2844_v29 = vmul.f32 %v4108_v32, %v6624_v46  ;;  %v2147_v17 = vmul.f32 %v6674_v20, %v2146_v45  ;;  %vm2149_vm7 = vweird.f32 %v6614_v59 }
 0x20b   : > { %v2841_v53 = vsel %vm6665_vm1, %v2840_v14, %v2836_v28  ;;  %vm6710_vm8 = vcmp.eq.f32.partialorder %v2852_v44, 8.507059e+37  ;;  %v1243_v37 = vand.u32 2147483647, %v6677_v8  ;;  %v2855_v21 = vor.u32 1.1754944e-38, %v2854_v13  ;;  %vm6766_vm2 = vmor %vm2149_vm7, %vm2150_vm5 }
 0x20c   : > { %v3196_v30 = vmul.f32 %v2841_v53, %v6481_v60  ;;  %v2845_v6 = vsub.f32 1.0, %v2844_v29  ;;  %vm1239_vm9 = vweird.f32 %v6677_v8  ;;  %vm1224_vm10 = vweird.f32 %v6552_v47 }
 0x20d   : > { %v6717_v23 = vpop.eup %4109  ;;  %vm2849_vm11 = vweird.f32 %v4108_v32  ;;  %v2490_v22 = vadd.f32 %v6474_v27, %v6472_v36  ;;  %v2492_v40 = vadd.f32 %v6549_v18, %v6547_v34  ;;  %v2252_v16 = vpack.c.bf16 %v2203_v58, %v6637_v52  ;;  %v2501_v58 = vpop.f32.mrf.mxu3 }
 0x20e   : > { %3228 = vst [vmem:[%s5928_s18 + $0x40] sm:$0xff] %v3196_v30  ;;  %v2846_v60 = vmul.f32 %v4108_v32, %v2845_v6  ;;  %v1235_v0 = vmul.f32 %v6717_v23, %v6677_v8  ;;  %v1246_v54 = vor.u32 1.1754944e-38, %v1245_v15  ;;  %vm2164_vm12 = vweird.f32 %v6679_v55  ;;  %vm2850_vm0 = vmor %vm2848_vm4, %vm2849_vm11 }
 0x20f   : > { %v2168_v61 = vand.u32 2147483647, %v6679_v55  ;;  %v4112_v26 = vpop.eup %4111  ;;  %v2148_v2 = vadd.f32 %v6674_v20, %v2147_v17  ;;  %vm6731_vm13 = vcmp.eq.f32.partialorder %v1243_v37, 8.507059e+37  ;;  %v2170_v27 = vand.u32 2147483648, %v6679_v55  ;;  %2396 = vmatmul.bf16.gmra.mxu2 %v2252_v16  ;;  %vm6793_vm4 = vmor %vm1224_vm10, %vm1225_vm6 }
 0x210   : > { %v6737_v34 = vadd.f32 %v6390_v63, %v2490_v22  ;;  %v6740_v18 = vadd.f32 %v6390_v63, %v2492_v40  ;;  %vm6742_vm14 = vcmp.eq.f32.partialorder %v2153_v4, 8.507059e+37  ;;  %v2847_v51 = vadd.f32 %v4108_v32, %v2846_v60 }
 0x211   : > { %v1236_v19 = vsub.f32 1.0, %v1235_v0  ;;  %vm1240_vm15 = vweird.f32 %v6717_v23  ;;  %v2160_v14 = vmul.f32 %v4112_v26, %v6679_v55  ;;  %vm2165_vm1 = vweird.f32 %v4112_v26 }
 0x212   : > { %v3681_v12 = vmul.f32 -1.442695, %v6737_v34  ;;  %v3682_v10 = vmul.f32 -1.442695, %v6740_v18  ;;  %v2220_v56 = vpack.c.bf16 %v6686_v38, %v6559_v39  ;;  %v2851_v24 = vsel %vm2850_vm0, %v4108_v32, %v2847_v51  ;;  %v2364_v32 = vpop.f32.mrf.mxu2  ;;  %vm6776_vm3 = vmor %vm1239_vm9, %vm1240_vm15 }
 0x213   : > { %v1237_v4 = vmul.f32 %v6717_v23, %v1236_v19  ;;  %v2161_v44 = vsub.f32 1.0, %v2160_v14  ;;  %v2495_v41 = vadd.f32 %v6604_v62, %v6602_v42  ;;  %v2856_v45 = vsel %vm6710_vm8, %v2855_v21, %v2851_v24  ;;  %vm2166_vm5 = vmor %vm2164_vm12, %vm2165_vm1 }
 0x214   : > { %4113 = vpow2.f32 %v3681_v12  ;;  %2533 = vmatmul.bf16.gmra.mxu3 %v2220_v56  ;;  %v2497_v46 = vadd.f32 %v6672_v31, %v6670_v35  ;;  %v2500_v13 = vadd.f32 %v2499_v57, %v2362_v49  ;;  %v3197_v42 = vmul.f32 %v2856_v45, %v6499_v9 }
 0x215   : > { %v1238_v62 = vadd.f32 %v6717_v23, %v1237_v4  ;;  %v2162_v38 = vmul.f32 %v4112_v26, %v2161_v44  ;;  %4115 = vpow2.f32 %v3682_v10  ;;  %v6781_v59 = vadd.f32 %v6390_v63, %v2495_v41  ;;  %v2504_v0 = vpop.f32.mrf.mxu3 }
 0x216   : > { %v6784_v31 = vadd.f32 %v6390_v63, %v2497_v46  ;;  %v6787_v9 = vadd.f32 %v6390_v63, %v2500_v13  ;;  %v2502_v28 = vadd.f32 %v2501_v58, %v2364_v32  ;;  %v2152_v29 = vsel %vm6766_vm2, %v6674_v20, %v2148_v2  ;;  %3229 = vst [vmem:[%s5928_s18 + $0x48] sm:$0xff] %v3197_v42 }
 0x217   : > { %v1242_v15 = vsel %vm6776_vm3, %v6717_v23, %v1238_v62  ;;  %v2163_v53 = vadd.f32 %v4112_v26, %v2162_v38  ;;  %v2171_v17 = vor.u32 1.1754944e-38, %v2170_v27  ;;  %v1227_v11 = vsel %vm6793_vm4, %v6606_v33, %v6698_v25 }
 0x218   : > { %v3683_v37 = vmul.f32 -1.442695, %v6781_v59  ;;  %v3684_v20 = vmul.f32 -1.442695, %v6784_v31  ;;  %v3685_v30 = vmul.f32 -1.442695, %v6787_v9  ;;  %v1247_v6 = vsel %vm6731_vm13, %v1246_v54, %v1242_v15 }
 0x219   : > { %v2167_v21 = vsel %vm2166_vm5, %v4112_v26, %v2163_v53  ;;  %vm2169_vm6 = vcmp.eq.f32.partialorder %v2168_v61, 8.507059e+37  ;;  %v6817_v49 = vadd.f32 %v6390_v63, %v2502_v28  ;;  %vm1229_vm7 = vcmp.eq.f32.partialorder %v1228_v50, 8.507059e+37 }
 0x21a   : > { %v4114_v57 = vpop.eup %4113  ;;  %v2157_v33 = vsel %vm6742_vm14, %v6691_v5, %v2152_v29  ;;  %v2172_v55 = vsel %vm2169_vm6, %v2171_v17, %v2167_v21  ;;  %4117 = vpow2.f32 %v3683_v37  ;;  %v1232_v23 = vsel %vm1229_vm7, %v6660_v3, %v1227_v11  ;;  %v2367_v5 = vpop.f32.mrf.mxu2 }
 0x21b   : > { %v4116_v25 = vpop.eup %4115  ;;  %v2205_v22 = vmul.f32 %v2172_v55, %v6542_v43  ;;  %v6826_v40 = vadd.f32 1.0, %v4114_v57  ;;  %4119 = vpow2.f32 %v3684_v20  ;;  %v1280_v16 = vmul.f32 %v1247_v6, %v6530_v1 }
 0x21c   : > { %v6829_v60 = vadd.f32 1.0, %v4116_v25  ;;  %4121 = vpow2.f32 %v3685_v30  ;;  %v3686_v47 = vmul.f32 -1.442695, %v6817_v49  ;;  %v2204_v50 = vmul.f32 %v2157_v33, %v6488_v48 }
 0x21d   : > { %4123 = vrcp.f32 %v6826_v40  ;;  %v1279_v3 = vmul.f32 %v1232_v23, %v6461_v7  ;;  %v2867_v1 = vand.u32 2147483647, %v6826_v40  ;;  %v2869_v2 = vand.u32 2147483648, %v6826_v40  ;;  %v2506_v46 = vpop.f32.mrf.mxu3 }
 0x21e   : > { %4125 = vrcp.f32 %v6829_v60  ;;  %v2253_v43 = vpack.c.bf16 %v2205_v22, %v2204_v50  ;;  %v2882_v36 = vand.u32 2147483647, %v6829_v60  ;;  %v2505_v7 = vadd.f32 %v2504_v0, %v2367_v5 }
 0x21f   : > { %4127 = vpow2.f32 %v3686_v47  ;;  %v2221_v61 = vpack.c.bf16 %v1280_v16, %v1279_v3  ;;  %vm2863_vm8 = vweird.f32 %v6826_v40  ;;  %v2884_v19 = vand.u32 2147483648, %v6829_v60 }
 0x220   : > { %v4118_v54 = vpop.eup %4117  ;;  %2401 = vmatmul.bf16.gmra.mxu2 %v2253_v43  ;;  %vm6847_vm9 = vcmp.eq.f32.partialorder %v2867_v1, 8.507059e+37  ;;  %vm2878_vm10 = vweird.f32 %v6829_v60  ;;  %v2870_v24 = vor.u32 1.1754944e-38, %v2869_v2  ;;  %vm6854_vm11 = vcmp.eq.f32.partialorder %v2882_v36, 8.507059e+37 }
 0x221   : > { %v4120_v26 = vpop.eup %4119  ;;  %v6839_v48 = vadd.f32 1.0, %v4118_v54  ;;  %v6863_v62 = vadd.f32 %v6390_v63, %v2505_v7  ;;  %v2885_v32 = vor.u32 1.1754944e-38, %v2884_v19 }
 0x222   : > { %v4122_v27 = vpop.eup %4121  ;;  %v6841_v52 = vadd.f32 1.0, %v4120_v26  ;;  %v2369_v45 = vpop.f32.mrf.mxu2 }
 0x223   : > { %v4124_v51 = vpop.eup %4123  ;;  %4129 = vrcp.f32 %v6839_v48  ;;  %v2899_v41 = vand.u32 2147483648, %v6839_v48  ;;  %v2897_v39 = vand.u32 2147483647, %v6839_v48  ;;  %v6860_v42 = vadd.f32 1.0, %v4122_v27 }
 0x224   : > { %v4126_v14 = vpop.eup %4125  ;;  %v2859_v12 = vmul.f32 %v4124_v51, %v6826_v40  ;;  %4131 = vrcp.f32 %v6841_v52  ;;  %2538 = vmatmul.bf16.gmra.mxu3 %v2221_v61  ;;  %v2912_v58 = vand.u32 2147483647, %v6841_v52  ;;  %vm2864_vm12 = vweird.f32 %v4124_v51 }
 0x225   : > { %v4128_v56 = vpop.eup %4127  ;;  %v2874_v4 = vmul.f32 %v4126_v14, %v6829_v60  ;;  %vm2893_vm13 = vweird.f32 %v6839_v48  ;;  %v2914_v8 = vand.u32 2147483648, %v6841_v52  ;;  %4133 = vrcp.f32 %v6860_v42  ;;  %vm2865_vm1 = vmor %vm2863_vm8, %vm2864_vm12  ;;  %v2509_v0 = vpop.f32.mrf.mxu3 }
 0x226   : > { %v2860_v13 = vsub.f32 1.0, %v2859_v12  ;;  %v6866_v35 = vadd.f32 1.0, %v4128_v56  ;;  %vm2879_vm14 = vweird.f32 %v4126_v14  ;;  %v2900_v53 = vor.u32 1.1754944e-38, %v2899_v41 }
 0x227   : > { %v2875_v38 = vsub.f32 1.0, %v2874_v4  ;;  %vm2908_vm15 = vweird.f32 %v6841_v52  ;;  %vm6873_vm0 = vcmp.eq.f32.partialorder %v2897_v39, 8.507059e+37  ;;  %v3687_v30 = vmul.f32 -1.442695, %v6863_v62  ;;  %vm2880_vm3 = vmor %vm2878_vm10, %vm2879_vm14 }
 0x228   : > { %v2861_v28 = vmul.f32 %v4124_v51, %v2860_v13  ;;  %4135 = vrcp.f32 %v6866_v35  ;;  %vm6883_vm2 = vcmp.eq.f32.partialorder %v2912_v58, 8.507059e+37  ;;  %v2507_v33 = vadd.f32 %v2506_v46, %v2369_v45 }
 0x229   : > { %v4130_v29 = vpop.eup %4129  ;;  %v2876_v15 = vmul.f32 %v4126_v14, %v2875_v38  ;;  %v2915_v23 = vor.u32 1.1754944e-38, %v2914_v8  ;;  %v2927_v22 = vand.u32 2147483647, %v6860_v42  ;;  %vm2923_vm4 = vweird.f32 %v6860_v42 }
 0x22a   : > { %v4132_v17 = vpop.eup %4131  ;;  %v2862_v11 = vadd.f32 %v4124_v51, %v2861_v28  ;;  %v2889_v37 = vmul.f32 %v4130_v29, %v6839_v48  ;;  %v2929_v50 = vand.u32 2147483648, %v6860_v42  ;;  %v2372_v5 = vpop.f32.mrf.mxu2  ;;  %vm2894_vm5 = vweird.f32 %v4130_v29 }
 0x22b   : > { %v2877_v6 = vadd.f32 %v4126_v14, %v2876_v15  ;;  %v2904_v21 = vmul.f32 %v4132_v17, %v6841_v52  ;;  %v4134_v3 = vpop.eup %4133  ;;  %vm2909_vm6 = vweird.f32 %v4132_v17  ;;  %vm6901_vm7 = vcmp.eq.f32.partialorder %v2927_v22, 8.507059e+37  ;;  %vm2895_vm8 = vmor %vm2893_vm13, %vm2894_vm5 }
 0x22c   : > { %v2866_v55 = vsel %vm2865_vm1, %v4124_v51, %v2862_v11  ;;  %v2890_v25 = vsub.f32 1.0, %v2889_v37  ;;  %v2919_v26 = vmul.f32 %v4134_v3, %v6860_v42  ;;  %4137 = vpow2.f32 %v3687_v30 }
 0x22d   : > { %v2871_v40 = vsel %vm6847_vm9, %v2870_v24, %v2866_v55  ;;  %v2881_v16 = vsel %vm2880_vm3, %v4126_v14, %v2877_v6  ;;  %v2905_v47 = vsub.f32 1.0, %v2904_v21  ;;  %v2944_v19 = vand.u32 2147483648, %v6866_v35  ;;  %vm2910_vm9 = vmor %vm2908_vm15, %vm2909_vm6 }
 0x22e   : > { %v3198_v60 = vmul.f32 %v2871_v40, %v6737_v34  ;;  %v2886_v43 = vsel %vm6854_vm11, %v2885_v32, %v2881_v16  ;;  %v2891_v54 = vmul.f32 %v4130_v29, %v2890_v25  ;;  %v4136_v2 = vpop.eup %4135  ;;  %v2942_v34 = vand.u32 2147483647, %v6866_v35  ;;  %v2511_v32 = vpop.f32.mrf.mxu3 }
 0x22f   : > { %v3199_v1 = vmul.f32 %v2886_v43, %v6740_v18  ;;  %v2906_v61 = vmul.f32 %v4132_v17, %v2905_v47  ;;  %v2920_v18 = vsub.f32 1.0, %v2919_v26  ;;  %v2934_v51 = vmul.f32 %v4136_v2, %v6866_v35 }
 0x230   : > { %3230 = vst [vmem:[%s5928_s18 + $0x50] sm:$0xff] %v3198_v60  ;;  %v2892_v36 = vadd.f32 %v4130_v29, %v2891_v54  ;;  %vm2924_vm10 = vweird.f32 %v4134_v3  ;;  %v6915_v12 = vadd.f32 %v6390_v63, %v2507_v33  ;;  %v2510_v10 = vadd.f32 %v2509_v0, %v2372_v5 }
 0x231   : > { %3231 = vst [vmem:[%s5928_s18 + $0x58] sm:$0xff] %v3199_v1  ;;  %v2907_v7 = vadd.f32 %v4132_v17, %v2906_v61  ;;  %v2921_v24 = vmul.f32 %v4134_v3, %v2920_v18  ;;  %v2935_v4 = vsub.f32 1.0, %v2934_v51  ;;  %vm2939_vm11 = vweird.f32 %v4136_v2  ;;  %vm2925_vm12 = vmor %vm2923_vm4, %vm2924_vm10 }
 0x232   : > { %v2896_v14 = vsel %vm2895_vm8, %v4130_v29, %v2892_v36  ;;  %v3688_v52 = vmul.f32 -1.442695, %v6915_v12  ;;  %v6924_v45 = vadd.f32 %v6390_v63, %v2510_v10  ;;  %v2374_v38 = vpop.f32.mrf.mxu2  ;;  %v4138_v58 = vpop.eup %4137  ;;  %vm2938_vm13 = vweird.f32 %v6866_v35 }
 0x233   : > { %v2901_v48 = vsel %vm6873_vm0, %v2900_v53, %v2896_v14  ;;  %v2911_v56 = vsel %vm2910_vm9, %v4132_v17, %v2907_v7  ;;  %v2922_v13 = vadd.f32 %v4134_v3, %v2921_v24  ;;  %v2936_v39 = vmul.f32 %v4136_v2, %v2935_v4  ;;  %vm2940_vm14 = vmor %vm2938_vm13, %vm2939_vm11 }
 0x234   : > { %v3200_v44 = vmul.f32 %v2901_v48, %v6781_v59  ;;  %v2916_v41 = vsel %vm6883_vm2, %v2915_v23, %v2911_v56  ;;  %v2930_v59 = vor.u32 1.1754944e-38, %v2929_v50  ;;  %4139 = vpow2.f32 %v3688_v52 }
 0x235   : > { %v3201_v46 = vmul.f32 %v2916_v41, %v6784_v31  ;;  %v3689_v28 = vmul.f32 -1.442695, %v6924_v45  ;;  %v2512_v8 = vadd.f32 %v2511_v32, %v2374_v38  ;;  %v2926_v29 = vsel %vm2925_vm12, %v4134_v3, %v2922_v13 }
 0x236   : > { %3232 = vst [vmem:[%s5928_s18 + $0x60] sm:$0xff] %v3200_v44  ;;  %v2937_v31 = vadd.f32 %v4136_v2, %v2936_v39  ;;  %v2692_v15 = vadd.f32 1.0, %v4138_v58  ;;  %v2931_v53 = vsel %vm6901_vm7, %v2930_v59, %v2926_v29  ;;  %v2945_v42 = vor.u32 1.1754944e-38, %v2944_v19  ;;  %v2514_v33 = vpop.f32.mrf.mxu3 }
 0x237   : > { %3233 = vst [vmem:[%s5928_s18 + $0x68] sm:$0xff] %v3201_v46  ;;  %4141 = vpow2.f32 %v3689_v28  ;;  %v6938_v17 = vadd.f32 %v6390_v63, %v2512_v8  ;;  %v3202_v11 = vmul.f32 %v2931_v53, %v6787_v9  ;;  %vm2943_vm15 = vcmp.eq.f32.partialorder %v2942_v34, 8.507059e+37 }
 0x238   : > { %v2941_v37 = vsel %vm2940_vm14, %v4136_v2, %v2937_v31  ;;  %4143 = vrcp.f32 %v2692_v15  ;;  %v2959_v50 = vand.u32 2147483648, %v2692_v15  ;;  %v2957_v3 = vand.u32 2147483647, %v2692_v15 }
 0x239   : > { %v2946_v20 = vsel %vm2943_vm15, %v2945_v42, %v2941_v37  ;;  %v3690_v35 = vmul.f32 -1.442695, %v6938_v17  ;;  %3234 = vst [vmem:[%s5928_s18 + $0x70] sm:$0xff] %v3202_v11  ;;  %vm2953_vm1 = vweird.f32 %v2692_v15 }
 0x23a   : > { %v3203_v30 = vmul.f32 %v2946_v20, %v6817_v49  ;;  %v4140_v6 = vpop.eup %4139  ;;  %v2377_v57 = vpop.f32.mrf.mxu2  ;;  %v2960_v61 = vor.u32 1.1754944e-38, %v2959_v50  ;;  %vm2958_vm3 = vcmp.eq.f32.partialorder %v2957_v3, 8.507059e+37 }
 0x23b   : > { %4145 = vpow2.f32 %v3690_v35  ;;  %v2693_v21 = vadd.f32 1.0, %v4140_v6  ;;  %v2515_v25 = vadd.f32 %v2514_v33, %v2377_v57  ;;  %v6980_v35 = vld [vmem:[%s7086_s8] ss:$0 sm:$0xff] }
 0x23c   : > { %3235 = vst [vmem:[%s5928_s18 + $0x78] sm:$0xff] %v3203_v30 }
 0x23d   : > { %v4142_v55 = vpop.eup %4141  ;;  %4147 = vrcp.f32 %v2693_v21  ;;  %v6948_v40 = vadd.f32 %v6390_v63, %v2515_v25  ;;  %v2972_v2 = vand.u32 2147483647, %v2693_v21  ;;  %v2974_v36 = vand.u32 2147483648, %v2693_v21 }
 0x23e   : > { %v4144_v23 = vpop.eup %4143  ;;  %v6945_v22 = vadd.f32 1.0, %v4142_v55  ;;  %v2516_v54 = vpop.f32.mrf.mxu3  ;;  %vm2968_vm4 = vweird.f32 %v2693_v21 }
 0x23f   : > { %v2949_v9 = vmul.f32 %v4144_v23, %v2692_v15  ;;  %v3691_v5 = vmul.f32 -1.442695, %v6948_v40  ;;  %vm2954_vm0 = vweird.f32 %v4144_v23  ;;  %vm6961_vm6 = vcmp.eq.f32.partialorder %v2972_v2, 8.507059e+37 }
 0x240   : > { %4149 = vrcp.f32 %v6945_v22  ;;  %vm2955_vm2 = vmor %vm2953_vm1, %vm2954_vm0  ;;  %v2989_v14 = vand.u32 2147483648, %v6945_v22  ;;  %v2975_v44 = vor.u32 1.1754944e-38, %v2974_v36  ;;  %vm2983_vm7 = vweird.f32 %v6945_v22 }
 0x241   : > { %v4146_v16 = vpop.eup %4145  ;;  %v2950_v47 = vsub.f32 1.0, %v2949_v9 }
 0x242   : > { %v6951_v49 = vadd.f32 1.0, %v4146_v16  ;;  %v2379_v43 = vpop.f32.mrf.mxu2  ;;  %v2990_v38 = vor.u32 1.1754944e-38, %v2989_v14 }
 0x243   : > { %v2951_v0 = vmul.f32 %v4144_v23, %v2950_v47  ;;  %v4148_v60 = vpop.eup %4147  ;;  %v2517_v27 = vadd.f32 %v2516_v54, %v2379_v43 }
 0x244   : > { %4151 = vrcp.f32 %v6951_v49  ;;  %v2964_v26 = vmul.f32 %v4148_v60, %v2693_v21  ;;  %vm2969_vm5 = vweird.f32 %v4148_v60  ;;  %v3002_v53 = vand.u32 2147483647, %v6951_v49 }
 0x245   : > { %v2952_v1 = vadd.f32 %v4144_v23, %v2951_v0  ;;  %4153 = vpow2.f32 %v3691_v5  ;;  %v6958_v10 = vadd.f32 %v6390_v63, %v2517_v27  ;;  %v2987_v63 = vand.u32 2147483647, %v6945_v22  ;;  %vm2970_vm8 = vmor %vm2968_vm4, %vm2969_vm5 }
 0x246   : > { %v4150_v34 = vpop.eup %4149  ;;  %v2965_v18 = vsub.f32 1.0, %v2964_v26  ;;  %v2519_v58 = vpop.f32.mrf.mxu3  ;;  %v3004_v42 = vand.u32 2147483648, %v6951_v49  ;;  %vm2998_vm13 = vweird.f32 %v6951_v49  ;;  %vm3003_vm15 = vcmp.eq.f32.partialorder %v3002_v53, 8.507059e+37 }
 0x247   : > { %v2956_v7 = vsel %vm2955_vm2, %v4144_v23, %v2952_v1  ;;  %v2979_v19 = vmul.f32 %v4150_v34, %v6945_v22  ;;  %v3692_v52 = vmul.f32 -1.442695, %v6958_v10  ;;  %vm2984_vm9 = vweird.f32 %v4150_v34 }
 0x248   : > { %v2961_v51 = vsel %vm2958_vm3, %v2960_v61, %v2956_v7  ;;  %v2966_v56 = vmul.f32 %v4148_v60, %v2965_v18  ;;  %vm2985_vm10 = vmor %vm2983_vm7, %vm2984_vm9  ;;  %vm2988_vm12 = vcmp.eq.f32.partialorder %v2987_v63, 8.507059e+37  ;;  %v3005_v33 = vor.u32 1.1754944e-38, %v3004_v42 }
 0x249   : > { %v3204_v48 = vmul.f32 %v2961_v51, %v6863_v62  ;;  %v2980_v41 = vsub.f32 1.0, %v2979_v19  ;;  %4155 = vpow2.f32 %v3692_v52 }
 0x24a   : > { %v4152_v24 = vpop.eup %4151  ;;  %v2967_v46 = vadd.f32 %v4148_v60, %v2966_v56  ;;  %v2382_v32 = vpop.f32.mrf.mxu2 }
 0x24b   : > { %3236 = vst [vmem:[%s5928_s18 + $0x80] sm:$0xff] %v3204_v48  ;;  %v2994_v62 = vmul.f32 %v4152_v24, %v6951_v49  ;;  %v4154_v13 = vpop.eup %4153  ;;  %v2981_v39 = vmul.f32 %v4150_v34, %v2980_v41  ;;  %v2520_v29 = vadd.f32 %v2519_v58, %v2382_v32  ;;  %vm2999_vm11 = vweird.f32 %v4152_v24 }
 0x24c   : > { %v2971_v59 = vsel %vm2970_vm8, %v4148_v60, %v2967_v46  ;;  %v2696_v8 = vadd.f32 1.0, %v4154_v13  ;;  %vm3000_vm14 = vmor %vm2998_vm13, %vm2999_vm11 }
 0x24d   : > { %v2995_v28 = vsub.f32 1.0, %v2994_v62  ;;  %v2976_v31 = vsel %vm6961_vm6, %v2975_v44, %v2971_v59  ;;  %v2982_v15 = vadd.f32 %v4150_v34, %v2981_v39  ;;  %v6983_v30 = vadd.f32 %v6980_v35, %v2520_v29 }
 0x24e   : > { %v3205_v11 = vmul.f32 %v2976_v31, %v6915_v12  ;;  %4157 = vrcp.f32 %v2696_v8  ;;  %v2521_v16 = vpop.f32.mrf.mxu3  ;;  %v3019_v3 = vand.u32 2147483648, %v2696_v8  ;;  %v3017_v54 = vand.u32 2147483647, %v2696_v8 }
 0x24f   : > { %v2996_v37 = vmul.f32 %v4152_v24, %v2995_v28  ;;  %v2986_v20 = vsel %vm2985_vm10, %v4150_v34, %v2982_v15  ;;  %v4156_v21 = vpop.eup %4155  ;;  %v3693_v55 = vmul.f32 -1.442695, %v6983_v30  ;;  %vm3013_vm1 = vweird.f32 %v2696_v8 }
 0x250   : > { %3237 = vst [vmem:[%s5928_s18 + $0x88] sm:$0xff] %v3205_v11  ;;  %v2991_v6 = vsel %vm2988_vm12, %v2990_v38, %v2986_v20  ;;  %v2697_v23 = vadd.f32 1.0, %v4156_v21  ;;  %v3020_v36 = vor.u32 1.1754944e-38, %v3019_v3  ;;  %vm3018_vm3 = vcmp.eq.f32.partialorder %v3017_v54, 8.507059e+37 }
 0x251   : > { %v2997_v12 = vadd.f32 %v4152_v24, %v2996_v37  ;;  %v3206_v57 = vmul.f32 %v2991_v6, %v6924_v45  ;;  %4159 = vpow2.f32 %v3693_v55 }
 0x252   : > { %v2384_v22 = vpop.f32.mrf.mxu2  ;;  %4161 = vrcp.f32 %v2697_v23  ;;  %v3034_v18 = vand.u32 2147483648, %v2697_v23  ;;  %v3032_v14 = vand.u32 2147483647, %v2697_v23  ;;  %vm3028_vm5 = vweird.f32 %v2697_v23 }
 0x253   : > { %v3001_v25 = vsel %vm3000_vm14, %v4152_v24, %v2997_v12  ;;  %3238 = vst [vmem:[%s5928_s18 + $0x90] sm:$0xff] %v3206_v57  ;;  %v2522_v5 = vadd.f32 %v2521_v16, %v2384_v22 }
 0x254   : > { %v3006_v9 = vsel %vm3003_vm15, %v3005_v33, %v3001_v25  ;;  %v4158_v47 = vpop.eup %4157  ;;  %v3035_v4 = vor.u32 1.1754944e-38, %v3034_v18  ;;  %vm3033_vm7 = vcmp.eq.f32.partialorder %v3032_v14, 8.507059e+37 }
 0x255   : > { %v3207_v50 = vmul.f32 %v3006_v9, %v6938_v17  ;;  %v3009_v49 = vmul.f32 %v4158_v47, %v2696_v8  ;;  %v6993_v0 = vadd.f32 %v6980_v35, %v2522_v5  ;;  %vm3014_vm0 = vweird.f32 %v4158_v47 }
 0x256   : > { %vm3015_vm2 = vmor %vm3013_vm1, %vm3014_vm0 }
 0x257   : > { %3239 = vst [vmem:[%s5928_s18 + $0x98] sm:$0xff] %v3207_v50  ;;  %v3010_v45 = vsub.f32 1.0, %v3009_v49  ;;  %v4160_v60 = vpop.eup %4159  ;;  %v3694_v1 = vmul.f32 -1.442695, %v6993_v0 }
 0x258   : > { %v4162_v61 = vpop.eup %4161  ;;  %v2698_v26 = vadd.f32 1.0, %v4160_v60 }
 0x259   : > { %v3011_v43 = vmul.f32 %v4158_v47, %v3010_v45  ;;  %v3024_v17 = vmul.f32 %v4162_v61, %v2697_v23  ;;  %4163 = vpow2.f32 %v3694_v1  ;;  %vm3029_vm4 = vweird.f32 %v4162_v61 }
 0x25a   : > { %4165 = vrcp.f32 %v2698_v26  ;;  %vm3030_vm6 = vmor %vm3028_vm5, %vm3029_vm4  ;;  %v3049_v62 = vand.u32 2147483648, %v2698_v26  ;;  %v3047_v39 = vand.u32 2147483647, %v2698_v26  ;;  %vm3043_vm9 = vweird.f32 %v2698_v26 }
 0x25b   : > { %v3012_v2 = vadd.f32 %v4158_v47, %v3011_v43  ;;  %v3025_v34 = vsub.f32 1.0, %v3024_v17 }
 0x25c   : > { %v3050_v59 = vor.u32 1.1754944e-38, %v3049_v62  ;;  %vm3048_vm11 = vcmp.eq.f32.partialorder %v3047_v39, 8.507059e+37 }
 0x25d   : > { %v3016_v27 = vsel %vm3015_vm2, %v4158_v47, %v3012_v2  ;;  %v3026_v19 = vmul.f32 %v4162_v61, %v3025_v34 }
 0x25e   : > { %v3021_v7 = vsel %vm3018_vm3, %v3020_v36, %v3016_v27 }
 0x25f   : > { %v3208_v51 = vmul.f32 %v3021_v7, %v6948_v40  ;;  %v4164_v48 = vpop.eup %4163  ;;  %v3027_v56 = vadd.f32 %v4162_v61, %v3026_v19 }
 0x260   : > { %v4166_v24 = vpop.eup %4165  ;;  %v2699_v44 = vadd.f32 1.0, %v4164_v48 }
 0x261   : > { %3240 = vst [vmem:[%s5928_s18 + $0xa0] sm:$0xff] %v3208_v51  ;;  %v3031_v41 = vsel %vm3030_vm6, %v4162_v61, %v3027_v56  ;;  %v3039_v52 = vmul.f32 %v4166_v24, %v2698_v26  ;;  %vm3044_vm8 = vweird.f32 %v4166_v24 }
 0x262   : > { %v3036_v46 = vsel %vm3033_vm7, %v3035_v4, %v3031_v41  ;;  %4167 = vrcp.f32 %v2699_v44  ;;  %vm3045_vm10 = vmor %vm3043_vm9, %vm3044_vm8  ;;  %v3064_v42 = vand.u32 2147483648, %v2699_v44  ;;  %v3062_v20 = vand.u32 2147483647, %v2699_v44 }
 0x263   : > { %v3209_v63 = vmul.f32 %v3036_v46, %v6958_v10  ;;  %v3040_v40 = vsub.f32 1.0, %v3039_v52  ;;  %vm3058_vm13 = vweird.f32 %v2699_v44 }
 0x264   : > { %v3065_v57 = vor.u32 1.1754944e-38, %v3064_v42  ;;  %vm3063_vm15 = vcmp.eq.f32.partialorder %v3062_v20, 8.507059e+37 }
 0x265   : > { %3241 = vst [vmem:[%s5928_s18 + $0xa8] sm:$0xff] %v3209_v63  ;;  %v3041_v13 = vmul.f32 %v4166_v24, %v3040_v40 }
 0x267   : > { %v2387_v38 = vpop.f32.mrf.mxu2  ;;  %v3042_v32 = vadd.f32 %v4166_v24, %v3041_v13 }
 0x268   : > { %v4168_v58 = vpop.eup %4167 }
 0x269   : > { %v3046_v28 = vsel %vm3045_vm10, %v4166_v24, %v3042_v32  ;;  %v3054_v8 = vmul.f32 %v4168_v58, %v2699_v44  ;;  %vm3059_vm12 = vweird.f32 %v4168_v58 }
 0x26a   : > { %v3051_v31 = vsel %vm3048_vm11, %v3050_v59, %v3046_v28  ;;  %vm3060_vm14 = vmor %vm3058_vm13, %vm3059_vm12 }
 0x26b   : > { %v2524_v29 = vpop.f32.mrf.mxu3  ;;  %v3210_v10 = vmul.f32 %v3051_v31, %v6983_v30  ;;  %v3055_v53 = vsub.f32 1.0, %v3054_v8 }
 0x26c   : > { %v2525_v15 = vadd.f32 %v2524_v29, %v2387_v38 }
 0x26d   : > { %3242 = vst [vmem:[%s5928_s18 + $0xb0] sm:$0xff] %v3210_v10  ;;  %v3056_v37 = vmul.f32 %v4168_v58, %v3055_v53 }
 0x26e   : > { %v2572_v11 = vadd.f32 %v6980_v35, %v2525_v15 }
 0x26f   : > { %v2389_v6 = vpop.f32.mrf.mxu2  ;;  %v3057_v21 = vadd.f32 %v4168_v58, %v3056_v37 }
 0x270   : > { %v3695_v12 = vmul.f32 -1.442695, %v2572_v11 }
 0x271   : > { %v3061_v33 = vsel %vm3060_vm14, %v4168_v58, %v3057_v21 }
 0x272   : > { %4169 = vpow2.f32 %v3695_v12  ;;  %v3066_v30 = vsel %vm3063_vm15, %v3065_v57, %v3061_v33 }
 0x273   : > { %v2526_v55 = vpop.f32.mrf.mxu3  ;;  %v3211_v23 = vmul.f32 %v3066_v30, %v6993_v0 }
 0x274   : > { %v2527_v25 = vadd.f32 %v2526_v55, %v2389_v6 }
 0x275   : > { %3243 = vst [vmem:[%s5928_s18 + $0xb8] sm:$0xff] %v3211_v23 }
 0x276   : > { %v2573_v9 = vadd.f32 %v6980_v35, %v2527_v25 }
 0x278   : > { %v4170_v22 = vpop.eup %4169  ;;  %v3696_v16 = vmul.f32 -1.442695, %v2573_v9 }
 0x279   : > { %v2700_v47 = vadd.f32 1.0, %v4170_v22  ;;  %v2392_v50 = vpop.f32.mrf.mxu2 }
 0x27a   : > { %4171 = vpow2.f32 %v3696_v16 }
 0x27b   : > { %4173 = vrcp.f32 %v2700_v47  ;;  %v3079_v26 = vand.u32 2147483648, %v2700_v47  ;;  %v3077_v36 = vand.u32 2147483647, %v2700_v47  ;;  %vm3073_vm1 = vweird.f32 %v2700_v47 }
 0x27d   : > { %v2529_v49 = vpop.f32.mrf.mxu3  ;;  %v3080_v51 = vor.u32 1.1754944e-38, %v3079_v26  ;;  %vm3078_vm3 = vcmp.eq.f32.partialorder %v3077_v36, 8.507059e+37 }
 0x27e   : > { %v2530_v5 = vadd.f32 %v2529_v49, %v2392_v50 }
 0x280   : > { %v4172_v45 = vpop.eup %4171  ;;  %v7007_v3 = vadd.f32 %v6980_v35, %v2530_v5 }
 0x281   : > { %v4174_v60 = vpop.eup %4173  ;;  %v2701_v43 = vadd.f32 1.0, %v4172_v45  ;;  %v2394_v1 = vpop.f32.mrf.mxu2 }
 0x282   : > { %v3069_v54 = vmul.f32 %v4174_v60, %v2700_v47  ;;  %v3697_v0 = vmul.f32 -1.442695, %v7007_v3  ;;  %vm3074_vm0 = vweird.f32 %v4174_v60 }
 0x283   : > { %4175 = vrcp.f32 %v2701_v43  ;;  %vm3075_vm2 = vmor %vm3073_vm1, %vm3074_vm0  ;;  %v3094_v52 = vand.u32 2147483648, %v2701_v43  ;;  %v3092_v63 = vand.u32 2147483647, %v2701_v43  ;;  %vm3088_vm5 = vweird.f32 %v2701_v43 }
 0x284   : > { %v3070_v61 = vsub.f32 1.0, %v3069_v54  ;;  %4177 = vpow2.f32 %v3697_v0 }
 0x285   : > { %v2531_v2 = vpop.f32.mrf.mxu3  ;;  %v3095_v62 = vor.u32 1.1754944e-38, %v3094_v52  ;;  %vm3093_vm7 = vcmp.eq.f32.partialorder %v3092_v63, 8.507059e+37 }
 0x286   : > { %v3071_v17 = vmul.f32 %v4174_v60, %v3070_v61  ;;  %v2532_v27 = vadd.f32 %v2531_v2, %v2394_v1 }
 0x288   : > { %v3072_v34 = vadd.f32 %v4174_v60, %v3071_v17  ;;  %v7011_v7 = vadd.f32 %v6980_v35, %v2532_v27 }
 0x289   : > { %v4176_v18 = vpop.eup %4175 }
 0x28a   : > { %v4178_v19 = vpop.eup %4177  ;;  %v3076_v14 = vsel %vm3075_vm2, %v4174_v60, %v3072_v34  ;;  %v3084_v48 = vmul.f32 %v4176_v18, %v2701_v43  ;;  %v3698_v56 = vmul.f32 -1.442695, %v7011_v7  ;;  %vm3089_vm4 = vweird.f32 %v4176_v18 }
 0x28b   : > { %v3081_v24 = vsel %vm3078_vm3, %v3080_v51, %v3076_v14  ;;  %v2702_v4 = vadd.f32 1.0, %v4178_v19  ;;  %vm3090_vm6 = vmor %vm3088_vm5, %vm3089_vm4 }
 0x28c   : > { %v3212_v44 = vmul.f32 %v3081_v24, %v2572_v11  ;;  %v3085_v41 = vsub.f32 1.0, %v3084_v48  ;;  %4179 = vpow2.f32 %v3698_v56 }
 0x28d   : > { %4181 = vrcp.f32 %v2702_v4  ;;  %v3109_v10 = vand.u32 2147483648, %v2702_v4  ;;  %v3107_v42 = vand.u32 2147483647, %v2702_v4  ;;  %vm3103_vm9 = vweird.f32 %v2702_v4 }
 0x28e   : > { %3244 = vst [vmem:[%s5928_s18 + $0xc0] sm:$0xff] %v3212_v44  ;;  %v3086_v46 = vmul.f32 %v4176_v18, %v3085_v41 }
 0x28f   : > { %v3110_v21 = vor.u32 1.1754944e-38, %v3109_v10  ;;  %vm3108_vm11 = vcmp.eq.f32.partialorder %v3107_v42, 8.507059e+37 }
 0x290   : > { %v3087_v40 = vadd.f32 %v4176_v18, %v3086_v46 }
 0x292   : > { %v2397_v13 = vpop.f32.mrf.mxu2  ;;  %v4180_v39 = vpop.eup %4179  ;;  %v3091_v38 = vsel %vm3090_vm6, %v4176_v18, %v3087_v40 }
 0x293   : > { %v4182_v32 = vpop.eup %4181  ;;  %v3096_v58 = vsel %vm3093_vm7, %v3095_v62, %v3091_v38  ;;  %v2703_v59 = vadd.f32 1.0, %v4180_v39 }
 0x294   : > { %v3213_v28 = vmul.f32 %v3096_v58, %v2573_v9  ;;  %v3099_v8 = vmul.f32 %v4182_v32, %v2702_v4  ;;  %vm3104_vm8 = vweird.f32 %v4182_v32 }
 0x295   : > { %4183 = vrcp.f32 %v2703_v59  ;;  %vm3105_vm10 = vmor %vm3103_vm9, %vm3104_vm8  ;;  %v3124_v22 = vand.u32 2147483648, %v2703_v59  ;;  %v3122_v47 = vand.u32 2147483647, %v2703_v59  ;;  %vm3118_vm13 = vweird.f32 %v2703_v59 }
 0x296   : > { %3245 = vst [vmem:[%s5928_s18 + $0xc8] sm:$0xff] %v3213_v28  ;;  %v3100_v31 = vsub.f32 1.0, %v3099_v8 }
 0x297   : > { %v2534_v29 = vpop.f32.mrf.mxu3  ;;  %v3125_v43 = vor.u32 1.1754944e-38, %v3124_v22  ;;  %vm3123_vm15 = vcmp.eq.f32.partialorder %v3122_v47, 8.507059e+37 }
 0x298   : > { %v2535_v15 = vadd.f32 %v2534_v29, %v2397_v13  ;;  %v3101_v53 = vmul.f32 %v4182_v32, %v3100_v31 }
 0x29a   : > { %v7017_v11 = vadd.f32 %v6980_v35, %v2535_v15  ;;  %v2399_v37 = vpop.f32.mrf.mxu2  ;;  %v3102_v20 = vadd.f32 %v4182_v32, %v3101_v53 }
 0x29b   : > { %v4184_v12 = vpop.eup %4183 }
 0x29c   : > { %v3699_v6 = vmul.f32 -1.442695, %v7017_v11  ;;  %v3106_v57 = vsel %vm3105_vm10, %v4182_v32, %v3102_v20  ;;  %v3114_v33 = vmul.f32 %v4184_v12, %v2703_v59  ;;  %vm3119_vm12 = vweird.f32 %v4184_v12 }
 0x29d   : > { %v3111_v55 = vsel %vm3108_vm11, %v3110_v21, %v3106_v57  ;;  %vm3120_vm14 = vmor %vm3118_vm13, %vm3119_vm12 }
 0x29e   : > { %4185 = vpow2.f32 %v3699_v6  ;;  %v3214_v25 = vmul.f32 %v3111_v55, %v7007_v3  ;;  %v3115_v23 = vsub.f32 1.0, %v3114_v33 }
 0x29f   : > { %v2536_v30 = vpop.f32.mrf.mxu3 }
 0x2a0   : > { %v2537_v9 = vadd.f32 %v2536_v30, %v2399_v37  ;;  %3246 = vst [vmem:[%s5928_s18 + $0xd0] sm:$0xff] %v3214_v25  ;;  %v3116_v16 = vmul.f32 %v4184_v12, %v3115_v23 }
 0x2a2   : > { %v7023_v50 = vadd.f32 %v6980_v35, %v2537_v9  ;;  %v3117_v5 = vadd.f32 %v4184_v12, %v3116_v16 }
 0x2a3   : > { %v2402_v60 = vpop.f32.mrf.mxu2 }
 0x2a4   : > { %v4186_v49 = vpop.eup %4185  ;;  %v3700_v45 = vmul.f32 -1.442695, %v7023_v50  ;;  %v3121_v54 = vsel %vm3120_vm14, %v4184_v12, %v3117_v5 }
 0x2a5   : > { %v2704_v3 = vadd.f32 1.0, %v4186_v49  ;;  %v3126_v0 = vsel %vm3123_vm15, %v3125_v43, %v3121_v54 }
 0x2a6   : > { %4187 = vpow2.f32 %v3700_v45  ;;  %v3215_v61 = vmul.f32 %v3126_v0, %v7011_v7 }
 0x2a7   : > { %4189 = vrcp.f32 %v2704_v3  ;;  %v2539_v1 = vpop.f32.mrf.mxu3  ;;  %v3139_v56 = vand.u32 2147483648, %v2704_v3  ;;  %v3137_v7 = vand.u32 2147483647, %v2704_v3  ;;  %vm3133_vm1 = vweird.f32 %v2704_v3 }
 0x2a8   : > { %v2540_v26 = vadd.f32 %v2539_v1, %v2402_v60  ;;  %3247 = vst [vmem:[%s5928_s18 + $0xd8] sm:$0xff] %v3215_v61 }
 0x2a9   : > { %v3140_v63 = vor.u32 1.1754944e-38, %v3139_v56  ;;  %vm3138_vm3 = vcmp.eq.f32.partialorder %v3137_v7, 8.507059e+37 }
 0x2aa   : > { %v7029_v2 = vadd.f32 %v6980_v35, %v2540_v26 }
 0x2ab   : > { %v2404_v18 = vpop.f32.mrf.mxu2 }
 0x2ac   : > { %v4188_v17 = vpop.eup %4187  ;;  %v3701_v36 = vmul.f32 -1.442695, %v7029_v2 }
 0x2ad   : > { %v4190_v27 = vpop.eup %4189  ;;  %v2705_v34 = vadd.f32 1.0, %v4188_v17 }
 0x2ae   : > { %v3129_v51 = vmul.f32 %v4190_v27, %v2704_v3  ;;  %4191 = vpow2.f32 %v3701_v36  ;;  %vm3134_vm0 = vweird.f32 %v4190_v27 }
 0x2af   : > { %4193 = vrcp.f32 %v2705_v34  ;;  %v2541_v19 = vpop.f32.mrf.mxu3  ;;  %vm3135_vm2 = vmor %vm3133_vm1, %vm3134_vm0  ;;  %v3154_v32 = vand.u32 2147483648, %v2705_v34  ;;  %v3152_v59 = vand.u32 2147483647, %v2705_v34  ;;  %vm3148_vm5 = vweird.f32 %v2705_v34 }
 0x2b0   : > { %v3130_v14 = vsub.f32 1.0, %v3129_v51  ;;  %v2542_v48 = vadd.f32 %v2541_v19, %v2404_v18 }
 0x2b1   : > { %v3155_v31 = vor.u32 1.1754944e-38, %v3154_v32  ;;  %vm3153_vm7 = vcmp.eq.f32.partialorder %v3152_v59, 8.507059e+37 }
 0x2b2   : > { %v3131_v24 = vmul.f32 %v4190_v27, %v3130_v14  ;;  %v7033_v4 = vadd.f32 %v6980_v35, %v2542_v48 }
 0x2b4   : > { %v4192_v44 = vpop.eup %4191  ;;  %v3132_v41 = vadd.f32 %v4190_v27, %v3131_v24  ;;  %v3702_v52 = vmul.f32 -1.442695, %v7033_v4 }
 0x2b5   : > { %v4194_v46 = vpop.eup %4193  ;;  %v2706_v40 = vadd.f32 1.0, %v4192_v44 }
 0x2b6   : > { %v3136_v62 = vsel %vm3135_vm2, %v4190_v27, %v3132_v41  ;;  %v3144_v13 = vmul.f32 %v4194_v46, %v2705_v34  ;;  %4195 = vpow2.f32 %v3702_v52  ;;  %vm3149_vm4 = vweird.f32 %v4194_v46 }
 0x2b7   : > { %v3141_v39 = vsel %vm3138_vm3, %v3140_v63, %v3136_v62  ;;  %4197 = vrcp.f32 %v2706_v40  ;;  %vm3150_vm6 = vmor %vm3148_vm5, %vm3149_vm4  ;;  %v3169_v20 = vand.u32 2147483648, %v2706_v40  ;;  %v3167_v12 = vand.u32 2147483647, %v2706_v40 }
 0x2b8   : > { %v3216_v38 = vmul.f32 %v3141_v39, %v7017_v11  ;;  %v3145_v35 = vsub.f32 1.0, %v3144_v13  ;;  %vm3163_vm9 = vweird.f32 %v2706_v40 }
 0x2b9   : > { %v3170_v33 = vor.u32 1.1754944e-38, %v3169_v20  ;;  %vm3168_vm11 = vcmp.eq.f32.partialorder %v3167_v12, 8.507059e+37 }
 0x2ba   : > { %3248 = vst [vmem:[%s5928_s18 + $0xe0] sm:$0xff] %v3216_v38  ;;  %v3146_v58 = vmul.f32 %v4194_v46, %v3145_v35 }
 0x2bc   : > { %v4196_v28 = vpop.eup %4195  ;;  %v3147_v8 = vadd.f32 %v4194_v46, %v3146_v58 }
 0x2bd   : > { %v4198_v29 = vpop.eup %4197  ;;  %v2707_v15 = vadd.f32 1.0, %v4196_v28 }
 0x2be   : > { %v3151_v10 = vsel %vm3150_vm6, %v4194_v46, %v3147_v8  ;;  %v3159_v53 = vmul.f32 %v4198_v29, %v2706_v40  ;;  %vm3164_vm8 = vweird.f32 %v4198_v29 }
 0x2bf   : > { %v3156_v42 = vsel %vm3153_vm7, %v3155_v31, %v3151_v10  ;;  %4199 = vrcp.f32 %v2707_v15  ;;  %vm3165_vm10 = vmor %vm3163_vm9, %vm3164_vm8  ;;  %v3184_v22 = vand.u32 2147483648, %v2707_v15  ;;  %v3182_v47 = vand.u32 2147483647, %v2707_v15 }
 0x2c0   : > { %v3217_v11 = vmul.f32 %v3156_v42, %v7023_v50  ;;  %v3160_v37 = vsub.f32 1.0, %v3159_v53  ;;  %vm3178_vm13 = vweird.f32 %v2707_v15 }
 0x2c1   : > { %v3185_v49 = vor.u32 1.1754944e-38, %v3184_v22  ;;  %vm3183_vm15 = vcmp.eq.f32.partialorder %v3182_v47, 8.507059e+37 }
 0x2c2   : > { %3249 = vst [vmem:[%s5928_s18 + $0xe8] sm:$0xff] %v3217_v11  ;;  %v3161_v6 = vmul.f32 %v4198_v29, %v3160_v37 }
 0x2c4   : > { %v3162_v21 = vadd.f32 %v4198_v29, %v3161_v6 }
 0x2c5   : > { %v4200_v57 = vpop.eup %4199 }
 0x2c6   : > { %v3166_v55 = vsel %vm3165_vm10, %v4198_v29, %v3162_v21  ;;  %v3174_v30 = vmul.f32 %v4200_v57, %v2707_v15  ;;  %vm3179_vm12 = vweird.f32 %v4200_v57 }
 0x2c7   : > { %v3171_v25 = vsel %vm3168_vm11, %v3170_v33, %v3166_v55  ;;  %vm3180_vm14 = vmor %vm3178_vm13, %vm3179_vm12 }
 0x2c8   : > { %v3218_v23 = vmul.f32 %v3171_v25, %v7029_v2  ;;  %v3175_v9 = vsub.f32 1.0, %v3174_v30 }
 0x2ca   : > { %3250 = vst [vmem:[%s5928_s18 + $0xf0] sm:$0xff] %v3218_v23  ;;  %v3176_v16 = vmul.f32 %v4200_v57, %v3175_v9 }
 0x2cc   : > { %v3177_v50 = vadd.f32 %v4200_v57, %v3176_v16 }
 0x2ce   : > { %v3181_v5 = vsel %vm3180_vm14, %v4200_v57, %v3177_v50 }
 0x2cf   : > { %v3186_v45 = vsel %vm3183_vm15, %v3185_v49, %v3181_v5 }
 0x2d0   : > { %v3219_v60 = vmul.f32 %v3186_v45, %v7033_v4 }
 0x2d2   : > { %3251 = vst [vmem:[%s5928_s18 + $0xf8] sm:$0xff] %v3219_v60 }
 0x2d3   : > { %4235 = shalt.err (!%p4232_p3)
}
 0x2d4   : > { %s4272_s21 = smov 128   ;;  %s4273_s18 = smov 8  }
 0x2d5   : > { %3773 = dma.vmem_to_hbm [thread:$0]  (%p4362_p5), %s3266_s26, 4096, %s3268_s13, %s3253_s27, %s4272_s21, %s4272_s21, %s4273_s18  }
 0x2d6 PF: > { %p3779_p4 = scmp.ge.s32.totalorder %s4270_s12, 2  ;;  %s3282_s23 = sand.u32 1, %s4258_s30  }
 0x2d7   : > { %s3283_s24 = scalar_lea.sflag [#allocation3], %s3282_s23 }
 0x2d8   : > { %p3776_p7 = pnand %p3779_p4, %p4366_p6 }
 0x2da   : > { %p3777_p8 = pneg %p3776_p7 }
 0x2dc   : > { %4253 = dma.done.wait (%p3777_p8), %s3283_s24, 4096  }
 0x2dd   : > { %4255 = vsyncadd (%p3777_p8), %s3283_s24, 4294963200  ;;  %s7295_s28 = sld [smem:[#allocation5_spill]]  ;;  %p19_p9 = scmp.ge.s32.totalorder %s4349_s15, 4  }
 0x2de   : > { %s7296_s30 = smov %s4262_s10  ;;  %s7297_s10 = smov %s4266_s11 }
 0x2df   : > { %s7299_s12 = smov %s4349_s15  ;;  %21 = sbr.rel (!%p19_p9) target bundleno = 3 (0x3), region = 94 }
 0x2e3   : > { %s7298_s11 = smov %s7295_s28 }
 0x2e4   :  { %3289 = vsyncpa [#allocation3], 1 }
 0x2e5   :  { %3291 = vsyncpa [#allocation3 + $0x1], 1 }

// kernel: _lambda_.6
= control target key start
LH: loop header
LB: loop body
LE: loop exit
PB: predicated region body
PF: predicated region fallthrough
CT: control target
= control target key end

     0   :  { %s4865_s15 = smov 0   ;;  %s6112_s0 = inlined_call_operand.vmem [shape: bf16[512,1152], index: 0, kind: input, shape index: {}]   ;;  %s6113_s1 = inlined_call_operand.vmem [shape: bf16[512,128], index: 1, kind: input, shape index: {}]   ;;  %s6114_s2 = inlined_call_operand.vmem [shape: bf16[1152,128], index: 2, kind: input, shape index: {}]   ;;  %s6115_s3 = inlined_call_operand.vmem [shape: f32[1,128], index: 3, kind: input, shape index: {}]   ;;  %s6116_s4 = inlined_call_operand.vmem [shape: bf16[512,128], index: 4, kind: output, shape index: {}]  }
   0x1 LB: > { %s3371_s16 = sadd.s32 4294967295, %s4838_s15   ;;  %p3375_p0 = scmp.ge.s32.totalorder %s4838_s15, 1  ;;  %s4838_s15 = sphi %s4865_s15, %s14_s15  }
   0x2   : > { %p175_p1 = scmp.lt.s32.totalorder %s4838_s15, 3 }
   0x4   : > { %p176_p2 = pnand %p3375_p0, %p175_p1 }
   0x5   : > { %s3376_s23 = sshll.u32 (!%p176_p2), %s3371_s16, 5 }
   0x6   : > { %179 = sbr.rel (%p176_p2) target bundleno = 784 (0x310), region = 36  ;;  %p208_p3 = scmp.lt.s32.totalorder (!%p176_p2), %s3376_s23, 63 }
   0xb   : > { %v4431_v0 = vld [vmem:[%s6114_s2 + $0x38] sm:$0xff]  ;;  %v4430_v1 = vld [vmem:[%s6114_s2 + $0x30] sm:$0xff]  ;;  %v4429_v2 = vld [vmem:[%s6114_s2 + $0x28] sm:$0xff]  ;;  %s6140_s23 = smov (!%p208_p3, %s3376_s23), 63 }
   0xc   : > { %4670 = vmatpush.bf16.msra.mxu1 %v4431_v0  ;;  %4671 = vmatpush.bf16.msra.mxu2 %v4431_v0  ;;  %v4428_v3 = vld [vmem:[%s6114_s2 + $0x20] sm:$0xff]  ;;  %v4427_v4 = vld [vmem:[%s6114_s2 + $0x18] sm:$0xff]  ;;  %v4426_v5 = vld [vmem:[%s6114_s2 + $0x10] sm:$0xff]  ;;  %s4694_s30 = smul.u32 36, %s6140_s23  ;;  %s3379_s29 = sshll.u32 %s6140_s23, 2 }
   0xd   : > { %4672 = vmatpush.bf16.msra.mxu3 %v4431_v0  ;;  %1702 = vmatpush.bf16.msra.mxu0 %v4431_v0  ;;  %v4425_v6 = vld [vmem:[%s6114_s2 + $0x8] sm:$0xff]  ;;  %v4424_v7 = vld [vmem:[%s6114_s2] sm:$0xff]  ;;  %v4447_v16 = vld [vmem:[%s6114_s2 + $0xb8] sm:$0xff]  ;;  %s5571_s6 = scalar_lea.vmem %s6113_s1, %s3379_s29  ;;  %s5619_s10 = scalar_lea.vmem %s6116_s4, %s3379_s29 }
   0xe   : > { %s4900_s9 = scalar_lea.vmem %s6112_s0, %s4694_s30  ;;  %v4455_v17 = vld [vmem:[%s6114_s2 + $0xf8] sm:$0xff]  ;;  %v4446_v24 = vld [vmem:[%s6114_s2 + $0xb0] sm:$0xff]  ;;  %v4445_v28 = vld [vmem:[%s6114_s2 + $0xa8] sm:$0xff] }
   0xf   : > { %v3528_v8 = vld [vmem:[%s4900_s9 + $0x120] sm:$0xf]  ;;  %v4320_v9 = vld [vmem:[%s4900_s9 + $0x140] sm:$0xf0]  ;;  %v4439_v22 = vld [vmem:[%s6114_s2 + $0x78] sm:$0xff] }
  0x10   : > { %4673 = vmatpush.bf16.msra.mxu1 %v4430_v1  ;;  %4674 = vmatpush.bf16.msra.mxu2 %v4430_v1  ;;  %v3672_v10 = vld [vmem:[%s4900_s9 + $0x240] sm:$0xf]  ;;  %v4356_v11 = vld [vmem:[%s4900_s9 + $0x260] sm:$0xf0]  ;;  %v3529_v18 = vor.u32 %v4320_v9, %v3528_v8  ;;  %v4463_v23 = vld [vmem:[%s6114_s2 + $0x138] sm:$0xff] }
  0x11   : > { %4675 = vmatpush.bf16.msra.mxu3 %v4430_v1  ;;  %1703 = vmatpush.bf16.msra.mxu0 %v4430_v1  ;;  %v3816_v12 = vld [vmem:[%s4900_s9 + $0x360] sm:$0xf]  ;;  %v4392_v13 = vld [vmem:[%s4900_s9 + $0x380] sm:$0xf0]  ;;  %v3673_v19 = vor.u32 %v4356_v11, %v3672_v10  ;;  %v4454_v25 = vld [vmem:[%s6114_s2 + $0xf0] sm:$0xff] }
  0x12   : > { %v3384_v14 = vld [vmem:[%s4900_s9] sm:$0xf]  ;;  %v4284_v15 = vld [vmem:[%s4900_s9 + $0x20] sm:$0xf0]  ;;  %v3817_v20 = vor.u32 %v4392_v13, %v3816_v12  ;;  %v4438_v26 = vld [vmem:[%s6114_s2 + $0x70] sm:$0xff] }
  0x13   : > { %v3385_v21 = vor.u32 %v4284_v15, %v3384_v14  ;;  %v4462_v27 = vld [vmem:[%s6114_s2 + $0x130] sm:$0xff]  ;;  %v4453_v29 = vld [vmem:[%s6114_s2 + $0xe8] sm:$0xff]  ;;  %v4444_v33 = vld [vmem:[%s6114_s2 + $0xa0] sm:$0xff] }
  0x14   : > { %4676 = vmatpush.bf16.msra.mxu1 %v4429_v2  ;;  %4677 = vmatpush.bf16.msra.mxu2 %v4429_v2  ;;  %v4437_v30 = vld [vmem:[%s6114_s2 + $0x68] sm:$0xff]  ;;  %v4452_v34 = vld [vmem:[%s6114_s2 + $0xe0] sm:$0xff]  ;;  %v4443_v44 = vld [vmem:[%s6114_s2 + $0x98] sm:$0xff] }
  0x15   : > { %4678 = vmatpush.bf16.msra.mxu3 %v4429_v2  ;;  %1704 = vmatpush.bf16.msra.mxu0 %v4429_v2  ;;  %v4461_v31 = vld [vmem:[%s6114_s2 + $0x128] sm:$0xff]  ;;  %v4436_v42 = vld [vmem:[%s6114_s2 + $0x60] sm:$0xff]  ;;  %v4451_v45 = vld [vmem:[%s6114_s2 + $0xd8] sm:$0xff] }
  0x16   : > { %v3564_v32 = vld [vmem:[%s4900_s9 + $0x168] sm:$0xf]  ;;  %v4329_v35 = vld [vmem:[%s4900_s9 + $0x188] sm:$0xf0]  ;;  %v4460_v43 = vld [vmem:[%s6114_s2 + $0x120] sm:$0xff] }
  0x17   : > { %v3708_v36 = vld [vmem:[%s4900_s9 + $0x288] sm:$0xf]  ;;  %v4365_v37 = vld [vmem:[%s4900_s9 + $0x2a8] sm:$0xf0]  ;;  %v3565_v46 = vor.u32 %v4329_v35, %v3564_v32  ;;  %v4435_v50 = vld [vmem:[%s6114_s2 + $0x58] sm:$0xff] }
  0x18   : > { %4679 = vmatpush.bf16.msra.mxu1 %v4428_v3  ;;  %4680 = vmatpush.bf16.msra.mxu2 %v4428_v3  ;;  %v3852_v38 = vld [vmem:[%s4900_s9 + $0x3a8] sm:$0xf]  ;;  %v4401_v39 = vld [vmem:[%s4900_s9 + $0x3c8] sm:$0xf0]  ;;  %v3709_v47 = vor.u32 %v4365_v37, %v3708_v36  ;;  %v4459_v51 = vld [vmem:[%s6114_s2 + $0x118] sm:$0xff] }
  0x19   : > { %4681 = vmatpush.bf16.msra.mxu3 %v4428_v3  ;;  %1705 = vmatpush.bf16.msra.mxu0 %v4428_v3  ;;  %v3420_v40 = vld [vmem:[%s4900_s9 + $0x48] sm:$0xf]  ;;  %v4293_v41 = vld [vmem:[%s4900_s9 + $0x68] sm:$0xf0]  ;;  %v3853_v48 = vor.u32 %v4401_v39, %v3852_v38  ;;  %v4442_v52 = vld [vmem:[%s6114_s2 + $0x90] sm:$0xff] }
  0x1a   : > { %v3421_v49 = vor.u32 %v4293_v41, %v3420_v40  ;;  %v4450_v53 = vld [vmem:[%s6114_s2 + $0xd0] sm:$0xff]  ;;  %v4441_v56 = vld [vmem:[%s6114_s2 + $0x88] sm:$0xff]  ;;  %v4440_v61 = vld [vmem:[%s6114_s2 + $0x80] sm:$0xff] }
  0x1b   : > { %v4434_v54 = vld [vmem:[%s6114_s2 + $0x50] sm:$0xff]  ;;  %v4449_v57 = vld [vmem:[%s6114_s2 + $0xc8] sm:$0xff]  ;;  %v4448_v62 = vld [vmem:[%s6114_s2 + $0xc0] sm:$0xff] }
  0x1c   : > { %4682 = vmatpush.bf16.msra.mxu1 %v4427_v4  ;;  %4683 = vmatpush.bf16.msra.mxu2 %v4427_v4  ;;  %v4458_v55 = vld [vmem:[%s6114_s2 + $0x110] sm:$0xff]  ;;  %v4433_v58 = vld [vmem:[%s6114_s2 + $0x48] sm:$0xff]  ;;  %v4479_v12 = vld [vmem:[%s6114_s2 + $0x1b8] sm:$0xff] }
  0x1d   : > { %4684 = vmatpush.bf16.msra.mxu3 %v4427_v4  ;;  %1706 = vmatpush.bf16.msra.mxu0 %v4427_v4  ;;  %v4457_v59 = vld [vmem:[%s6114_s2 + $0x108] sm:$0xff]  ;;  %v3600_v60 = vld [vmem:[%s4900_s9 + $0x1b0] sm:$0xf]  ;;  %v4338_v63 = vld [vmem:[%s4900_s9 + $0x1d0] sm:$0xf0] }
  0x1e   : > { %v3744_v0 = vld [vmem:[%s4900_s9 + $0x2d0] sm:$0xf]  ;;  %v4374_v1 = vld [vmem:[%s4900_s9 + $0x2f0] sm:$0xf0]  ;;  %v3601_v8 = vor.u32 %v4338_v63, %v3600_v60  ;;  %v4487_v13 = vld [vmem:[%s6114_s2 + $0x1f8] sm:$0xff] }
  0x1f   : > { %v3888_v2 = vld [vmem:[%s4900_s9 + $0x3f0] sm:$0xf]  ;;  %v4410_v3 = vld [vmem:[%s4900_s9 + $0x410] sm:$0xf0]  ;;  %v3745_v9 = vor.u32 %v4374_v1, %v3744_v0  ;;  %v4471_v14 = vld [vmem:[%s6114_s2 + $0x178] sm:$0xff] }
  0x20   : > { %4685 = vmatpush.bf16.msra.mxu1 %v4426_v5  ;;  %4686 = vmatpush.bf16.msra.mxu2 %v4426_v5  ;;  %v3456_v4 = vld [vmem:[%s4900_s9 + $0x90] sm:$0xf]  ;;  %v3889_v10 = vor.u32 %v4410_v3, %v3888_v2  ;;  %v4495_v15 = vld [vmem:[%s6114_s2 + $0x238] sm:$0xff]  ;;  %v4281_v32 = vld [vmem:[%s4900_s9 + $0xc] sm:$0xf] }
  0x21   : > { %4687 = vmatpush.bf16.msra.mxu3 %v4426_v5  ;;  %1707 = vmatpush.bf16.msra.mxu0 %v4426_v5  ;;  %v4302_v5 = vld [vmem:[%s4900_s9 + $0xb0] sm:$0xf0]  ;;  %v4299_v60 = vld [vmem:[%s4900_s9 + $0x9c] sm:$0xf]  ;;  %v4304_v63 = vld [vmem:[%s4900_s9 + $0xc0] sm:$0xf0] }
  0x22   : > { %v3457_v11 = vor.u32 %v4302_v5, %v3456_v4  ;;  %v4286_v35 = vld [vmem:[%s4900_s9 + $0x30] sm:$0xf0]  ;;  %v4477_v4 = vld [vmem:[%s6114_s2 + $0x1a8] sm:$0xff] }
  0x23   : > { %v4478_v40 = vld [vmem:[%s6114_s2 + $0x1b0] sm:$0xff]  ;;  %v4485_v5 = vld [vmem:[%s6114_s2 + $0x1e8] sm:$0xff] }
  0x24   : > { %4688 = vmatpush.bf16.msra.mxu1 %v4425_v6  ;;  %4689 = vmatpush.bf16.msra.mxu2 %v4425_v6  ;;  %v4486_v41 = vld [vmem:[%s6114_s2 + $0x1f0] sm:$0xff] }
  0x25   : > { %4690 = vmatpush.bf16.msra.mxu3 %v4425_v6  ;;  %1708 = vmatpush.bf16.msra.mxu0 %v4425_v6  ;;  %v4432_v6 = vld [vmem:[%s6114_s2 + $0x40] sm:$0xff] }
  0x28   : > { %4691 = vmatpush.bf16.msra.mxu1 %v4424_v7  ;;  %4692 = vmatpush.bf16.msra.mxu2 %v4424_v7 }
  0x29   : > { %4693 = vmatpush.bf16.msra.mxu3 %v4424_v7  ;;  %1709 = vmatpush.bf16.msra.mxu0 %v4424_v7  ;;  %v4456_v7 = vld [vmem:[%s6114_s2 + $0x100] sm:$0xff] }
  0x2b   : > { %1730 = vmatmul.bf16.vlgmr.msra.gmra.mxu1 %v3529_v18  ;;  %1750 = vmatmul.bf16.vlgmr.msra.gmra.mxu2 %v3673_v19  ;;  %v3780_v18 = vld [vmem:[%s4900_s9 + $0x318] sm:$0xf]  ;;  %v4383_v19 = vld [vmem:[%s4900_s9 + $0x338] sm:$0xf0] }
  0x2c   : > { %1880 = vmatpush.bf16.msrb.mxu2 %v4447_v16  ;;  %1770 = vmatmul.bf16.vlgmr.msra.gmra.mxu3 %v3817_v20  ;;  %v3636_v16 = vld [vmem:[%s4900_s9 + $0x1f8] sm:$0xf] }
  0x2d   : > { %1969 = vmatpush.bf16.msrb.mxu3 %v4455_v17  ;;  %1710 = vmatmul.bf16.vlgmr.msra.gmra.mxu0 %v3385_v21  ;;  %v4347_v17 = vld [vmem:[%s4900_s9 + $0x218] sm:$0xf0]  ;;  %v3924_v20 = vld [vmem:[%s4900_s9 + $0x438] sm:$0xf] }
  0x2e   : > { %1791 = vmatpush.bf16.msrb.mxu1 %v4439_v22  ;;  %2058 = vmatpush.bf16.msrb.mxu0 %v4463_v23  ;;  %v4419_v21 = vld [vmem:[%s4900_s9 + $0x458] sm:$0xf0]  ;;  %v3492_v22 = vld [vmem:[%s4900_s9 + $0xd8] sm:$0xf] }
  0x2f   : > { %v4311_v23 = vld [vmem:[%s4900_s9 + $0xf8] sm:$0xf0] }
  0x30   : > { %1881 = vmatpush.bf16.msrb.mxu2 %v4446_v24  ;;  %v3637_v24 = vor.u32 %v4347_v17, %v3636_v16 }
  0x31   : > { %1970 = vmatpush.bf16.msrb.mxu3 %v4454_v25  ;;  %v3781_v25 = vor.u32 %v4383_v19, %v3780_v18 }
  0x32   : > { %1792 = vmatpush.bf16.msrb.mxu1 %v4438_v26  ;;  %2059 = vmatpush.bf16.msrb.mxu0 %v4462_v27  ;;  %v3925_v26 = vor.u32 %v4419_v21, %v3924_v20  ;;  %v3493_v27 = vor.u32 %v4311_v23, %v3492_v22  ;;  %v5104_v20 = vld [vmem:[%s6115_s3] ss:$0 sm:$0xff]  ;;  %v4316_v21 = vld [vmem:[%s4900_s9 + $0x124] sm:$0xf]  ;;  %v3530_v22 = vld [vmem:[%s4900_s9 + $0x144] sm:$0xf0] }
  0x33   : > { %v3536_v23 = vld [vmem:[%s4900_s9 + $0x128] sm:$0xf] }
  0x34   : > { %1882 = vmatpush.bf16.msrb.mxu2 %v4445_v28  ;;  %v4280_v28 = vld [vmem:[%s4900_s9 + $0x4] sm:$0xf] }
  0x35   : > { %1971 = vmatpush.bf16.msrb.mxu3 %v4453_v29  ;;  %v3386_v29 = vld [vmem:[%s4900_s9 + $0x24] sm:$0xf0] }
  0x36   : > { %1793 = vmatpush.bf16.msrb.mxu1 %v4437_v30  ;;  %2060 = vmatpush.bf16.msrb.mxu0 %v4461_v31  ;;  %v3392_v30 = vld [vmem:[%s4900_s9 + $0x8] sm:$0xf]  ;;  %v4285_v31 = vld [vmem:[%s4900_s9 + $0x28] sm:$0xf0]  ;;  %v3389_v36 = vor.u32 %v4280_v28, %v3386_v29  ;;  %v4322_v28 = vld [vmem:[%s4900_s9 + $0x150] sm:$0xf0]  ;;  %v3533_v29 = vor.u32 %v4316_v21, %v3530_v22 }
  0x37   : > { %v3393_v37 = vor.u32 %v4285_v31, %v3392_v30 }
  0x38   : > { %1883 = vmatpush.bf16.msrb.mxu2 %v4444_v33  ;;  %v3394_v33 = vld [vmem:[%s4900_s9 + $0x2c] sm:$0xf0] }
  0x39   : > { %1972 = vmatpush.bf16.msrb.mxu3 %v4452_v34  ;;  %v3400_v34 = vld [vmem:[%s4900_s9 + $0x10] sm:$0xf]  ;;  %v3397_v38 = vor.u32 %v4281_v32, %v3394_v33 }
  0x3a   : > { %1794 = vmatpush.bf16.msrb.mxu1 %v4436_v42  ;;  %2061 = vmatpush.bf16.msrb.mxu0 %v4460_v43  ;;  %v3401_v39 = vor.u32 %v4286_v35, %v3400_v34  ;;  %v4470_v42 = vld [vmem:[%s6114_s2 + $0x170] sm:$0xff] }
  0x3b   : > { %1735 = vmatmul.bf16.gmra.mxu1 %v3565_v46  ;;  %1755 = vmatmul.bf16.gmra.mxu2 %v3709_v47  ;;  %v4494_v43 = vld [vmem:[%s6114_s2 + $0x230] sm:$0xff] }
  0x3c   : > { %1884 = vmatpush.bf16.msrb.mxu2 %v4443_v44  ;;  %1775 = vmatmul.bf16.gmra.mxu3 %v3853_v48  ;;  %v4289_v44 = vld [vmem:[%s4900_s9 + $0x4c] sm:$0xf]  ;;  %v3428_v46 = vld [vmem:[%s4900_s9 + $0x50] sm:$0xf]  ;;  %v4294_v47 = vld [vmem:[%s4900_s9 + $0x70] sm:$0xf0] }
  0x3d   : > { %1973 = vmatpush.bf16.msrb.mxu3 %v4451_v45  ;;  %1715 = vmatmul.bf16.gmra.mxu0 %v3421_v49  ;;  %v3422_v45 = vld [vmem:[%s4900_s9 + $0x6c] sm:$0xf0]  ;;  %v4290_v48 = vld [vmem:[%s4900_s9 + $0x54] sm:$0xf]  ;;  %v3430_v49 = vld [vmem:[%s4900_s9 + $0x74] sm:$0xf0] }
  0x3e   : > { %1795 = vmatpush.bf16.msrb.mxu1 %v4435_v50  ;;  %2062 = vmatpush.bf16.msrb.mxu0 %v4459_v51  ;;  %v3436_v50 = vld [vmem:[%s4900_s9 + $0x58] sm:$0xf]  ;;  %v4295_v51 = vld [vmem:[%s4900_s9 + $0x78] sm:$0xf0] }
  0x40   : > { %1885 = vmatpush.bf16.msrb.mxu2 %v4442_v52  ;;  %v3425_v52 = vor.u32 %v4289_v44, %v3422_v45 }
  0x41   : > { %1974 = vmatpush.bf16.msrb.mxu3 %v4450_v53  ;;  %v3429_v53 = vor.u32 %v4294_v47, %v3428_v46  ;;  %v4492_v46 = vld [vmem:[%s6114_s2 + $0x220] sm:$0xff]  ;;  %v4325_v47 = vld [vmem:[%s4900_s9 + $0x16c] sm:$0xf] }
  0x42   : > { %1796 = vmatpush.bf16.msrb.mxu1 %v4434_v54  ;;  %2063 = vmatpush.bf16.msrb.mxu0 %v4458_v55  ;;  %v3433_v54 = vor.u32 %v4290_v48, %v3430_v49  ;;  %v3437_v55 = vor.u32 %v4295_v51, %v3436_v50  ;;  %v3566_v48 = vld [vmem:[%s4900_s9 + $0x18c] sm:$0xf0]  ;;  %v4330_v50 = vld [vmem:[%s4900_s9 + $0x190] sm:$0xf0] }
  0x43   : > { %v3572_v49 = vld [vmem:[%s4900_s9 + $0x170] sm:$0xf]  ;;  %v4326_v51 = vld [vmem:[%s4900_s9 + $0x174] sm:$0xf] }
  0x44   : > { %1886 = vmatpush.bf16.msrb.mxu2 %v4441_v56  ;;  %v4298_v56 = vld [vmem:[%s4900_s9 + $0x94] sm:$0xf] }
  0x45   : > { %1975 = vmatpush.bf16.msrb.mxu3 %v4449_v57  ;;  %v3458_v57 = vld [vmem:[%s4900_s9 + $0xb4] sm:$0xf0] }
  0x46   : > { %1797 = vmatpush.bf16.msrb.mxu1 %v4433_v58  ;;  %2064 = vmatpush.bf16.msrb.mxu0 %v4457_v59  ;;  %v3464_v58 = vld [vmem:[%s4900_s9 + $0x98] sm:$0xf]  ;;  %v4303_v59 = vld [vmem:[%s4900_s9 + $0xb8] sm:$0xf0]  ;;  %v3461_v0 = vor.u32 %v4298_v56, %v3458_v57 }
  0x47   : > { %v3465_v1 = vor.u32 %v4303_v59, %v3464_v58  ;;  %v3569_v58 = vor.u32 %v4325_v47, %v3566_v48  ;;  %v3573_v59 = vor.u32 %v4330_v50, %v3572_v49  ;;  %v3638_v47 = vld [vmem:[%s4900_s9 + $0x21c] sm:$0xf0]  ;;  %v4348_v49 = vld [vmem:[%s4900_s9 + $0x220] sm:$0xf0] }
  0x48   : > { %1887 = vmatpush.bf16.msrb.mxu2 %v4440_v61  ;;  %v3466_v61 = vld [vmem:[%s4900_s9 + $0xbc] sm:$0xf0]  ;;  %v4344_v50 = vld [vmem:[%s4900_s9 + $0x204] sm:$0xf] }
  0x49   : > { %1976 = vmatpush.bf16.msrb.mxu3 %v4448_v62  ;;  %v3472_v62 = vld [vmem:[%s4900_s9 + $0xa0] sm:$0xf]  ;;  %v3469_v2 = vor.u32 %v4299_v60, %v3466_v61 }
  0x4a   : > { %1798 = vmatpush.bf16.msrb.mxu1 %v4432_v6  ;;  %2065 = vmatpush.bf16.msrb.mxu0 %v4456_v7  ;;  %v3473_v3 = vor.u32 %v4304_v63, %v3472_v62  ;;  %v4469_v6 = vld [vmem:[%s6114_s2 + $0x168] sm:$0xff]  ;;  %v3644_v48 = vld [vmem:[%s4900_s9 + $0x200] sm:$0xf] }
  0x4b   : > { %1740 = vmatmul.bf16.gmra.mxu1 %v3601_v8  ;;  %1760 = vmatmul.bf16.gmra.mxu2 %v3745_v9  ;;  %v4493_v7 = vld [vmem:[%s6114_s2 + $0x228] sm:$0xff]  ;;  %v4307_v8 = vld [vmem:[%s4900_s9 + $0xdc] sm:$0xf]  ;;  %v3494_v9 = vld [vmem:[%s4900_s9 + $0xfc] sm:$0xf0] }
  0x4c   : > { %1780 = vmatmul.bf16.gmra.mxu3 %v3889_v10  ;;  %2236 = vmatpush.bf16.msra.mxu2 %v4479_v12  ;;  %v3500_v10 = vld [vmem:[%s4900_s9 + $0xe0] sm:$0xf]  ;;  %v4308_v12 = vld [vmem:[%s4900_s9 + $0xe4] sm:$0xf]  ;;  %v3497_v16 = vor.u32 %v4307_v8, %v3494_v9  ;;  %v4334_v9 = vld [vmem:[%s4900_s9 + $0x1b4] sm:$0xf] }
  0x4d   : > { %1720 = vmatmul.bf16.gmra.mxu0 %v3457_v11  ;;  %2325 = vmatpush.bf16.msra.mxu3 %v4487_v13  ;;  %v4312_v11 = vld [vmem:[%s4900_s9 + $0x100] sm:$0xf0]  ;;  %v3502_v13 = vld [vmem:[%s4900_s9 + $0x104] sm:$0xf0] }
  0x4e   : > { %2147 = vmatpush.bf16.msra.mxu1 %v4471_v14  ;;  %2414 = vmatpush.bf16.msra.mxu0 %v4495_v15  ;;  %v3508_v14 = vld [vmem:[%s4900_s9 + $0xe8] sm:$0xf]  ;;  %v4313_v15 = vld [vmem:[%s4900_s9 + $0x108] sm:$0xf0]  ;;  %v3501_v17 = vor.u32 %v4312_v11, %v3500_v10  ;;  %v3505_v18 = vor.u32 %v4308_v12, %v3502_v13  ;;  %v3602_v10 = vld [vmem:[%s4900_s9 + $0x1d4] sm:$0xf0] }
  0x4f   : > { %v3509_v19 = vor.u32 %v4313_v15, %v3508_v14  ;;  %v3608_v11 = vld [vmem:[%s4900_s9 + $0x1b8] sm:$0xf]  ;;  %v4339_v12 = vld [vmem:[%s4900_s9 + $0x1d8] sm:$0xf0]  ;;  %v3610_v14 = vld [vmem:[%s4900_s9 + $0x1dc] sm:$0xf0]  ;;  %v3605_v21 = vor.u32 %v4334_v9, %v3602_v10 }
  0x50   : > { %2237 = vmatpush.bf16.msra.mxu2 %v4478_v40  ;;  %v4335_v13 = vld [vmem:[%s4900_s9 + $0x1bc] sm:$0xf]  ;;  %v3616_v15 = vld [vmem:[%s4900_s9 + $0x1c0] sm:$0xf]  ;;  %v3609_v22 = vor.u32 %v4339_v12, %v3608_v11 }
  0x51   : > { %2326 = vmatpush.bf16.msra.mxu3 %v4486_v41 }
  0x52   : > { %2148 = vmatpush.bf16.msra.mxu1 %v4470_v42  ;;  %2415 = vmatpush.bf16.msra.mxu0 %v4494_v43  ;;  %v4468_v43 = vld [vmem:[%s6114_s2 + $0x160] sm:$0xff] }
  0x54   : > { %2238 = vmatpush.bf16.msra.mxu2 %v4477_v4 }
  0x55   : > { %2327 = vmatpush.bf16.msra.mxu3 %v4485_v5 }
  0x56   : > { %2149 = vmatpush.bf16.msra.mxu1 %v4469_v6  ;;  %2416 = vmatpush.bf16.msra.mxu0 %v4493_v7 }
  0x5a   : > { %2150 = vmatpush.bf16.msra.mxu1 %v4468_v43  ;;  %2417 = vmatpush.bf16.msra.mxu0 %v4492_v46  ;;  %v4491_v43 = vld [vmem:[%s6114_s2 + $0x218] sm:$0xff] }
  0x5b   : > { %1745 = vmatmul.bf16.gmra.mxu1 %v3637_v24  ;;  %1765 = vmatmul.bf16.gmra.mxu2 %v3781_v25  ;;  %v4321_v24 = vld [vmem:[%s4900_s9 + $0x148] sm:$0xf0]  ;;  %v4343_v46 = vld [vmem:[%s4900_s9 + $0x1fc] sm:$0xf] }
  0x5c   : > { %1785 = vmatmul.bf16.gmra.mxu3 %v3925_v26  ;;  %v4317_v25 = vld [vmem:[%s4900_s9 + $0x12c] sm:$0xf]  ;;  %v3538_v26 = vld [vmem:[%s4900_s9 + $0x14c] sm:$0xf0]  ;;  %v3537_v30 = vor.u32 %v4321_v24, %v3536_v23 }
  0x5d   : > { %1725 = vmatmul.bf16.gmra.mxu0 %v3493_v27  ;;  %v3544_v27 = vld [vmem:[%s4900_s9 + $0x130] sm:$0xf]  ;;  %v3541_v32 = vor.u32 %v4317_v25, %v3538_v26  ;;  %v3613_v25 = vor.u32 %v4335_v13, %v3610_v14 }
  0x5e   : > { %v3545_v33 = vor.u32 %v4322_v28, %v3544_v27  ;;  %2418 = vmatpush.bf16.msra.mxu0 %v4491_v43 }
  0x6b   : > { %1799 = vmatmul.bf16.vlgmr.msrb.gmra.mxu1 %v3389_v36  ;;  %1888 = vmatmul.bf16.vlgmr.msrb.gmra.mxu2 %v3393_v37  ;;  %v4476_v36 = vld [vmem:[%s6114_s2 + $0x1a0] sm:$0xff] }
  0x6c   : > { %1977 = vmatmul.bf16.vlgmr.msrb.gmra.mxu3 %v3397_v38  ;;  %v4484_v37 = vld [vmem:[%s6114_s2 + $0x1e0] sm:$0xff]  ;;  %2239 = vmatpush.bf16.msra.mxu2 %v4476_v36 }
  0x6d   : > { %2066 = vmatmul.bf16.vlgmr.msrb.gmra.mxu0 %v3401_v39  ;;  %2328 = vmatpush.bf16.msra.mxu3 %v4484_v37 }
  0x7b   : > { %1804 = vmatmul.bf16.gmra.mxu1 %v3425_v52  ;;  %1893 = vmatmul.bf16.gmra.mxu2 %v3429_v53  ;;  %v3574_v52 = vld [vmem:[%s4900_s9 + $0x194] sm:$0xf0] }
  0x7c   : > { %1982 = vmatmul.bf16.gmra.mxu3 %v3433_v54  ;;  %v3580_v53 = vld [vmem:[%s4900_s9 + $0x178] sm:$0xf]  ;;  %v4331_v54 = vld [vmem:[%s4900_s9 + $0x198] sm:$0xf0]  ;;  %v3577_v62 = vor.u32 %v4326_v51, %v3574_v52  ;;  %v3646_v51 = vld [vmem:[%s4900_s9 + $0x224] sm:$0xf0] }
  0x7d   : > { %2071 = vmatmul.bf16.gmra.mxu0 %v3437_v55  ;;  %v3581_v63 = vor.u32 %v4331_v54, %v3580_v53  ;;  %v3652_v52 = vld [vmem:[%s4900_s9 + $0x208] sm:$0xf]  ;;  %v4349_v53 = vld [vmem:[%s4900_s9 + $0x228] sm:$0xf0] }
  0x8b   : > { %1809 = vmatmul.bf16.gmra.mxu1 %v3461_v0  ;;  %1898 = vmatmul.bf16.gmra.mxu2 %v3465_v1 }
  0x8c   : > { %1987 = vmatmul.bf16.gmra.mxu3 %v3469_v2 }
  0x8d   : > { %2076 = vmatmul.bf16.gmra.mxu0 %v3473_v3 }
  0x9b   : > { %1814 = vmatmul.bf16.gmra.mxu1 %v3497_v16  ;;  %1903 = vmatmul.bf16.gmra.mxu2 %v3501_v17  ;;  %v4340_v16 = vld [vmem:[%s4900_s9 + $0x1e0] sm:$0xf0] }
  0x9c   : > { %1992 = vmatmul.bf16.gmra.mxu3 %v3505_v18  ;;  %v3617_v26 = vor.u32 %v4340_v16, %v3616_v15  ;;  %v4352_v16 = vld [vmem:[%s4900_s9 + $0x244] sm:$0xf] }
  0x9d   : > { %2081 = vmatmul.bf16.gmra.mxu0 %v3509_v19 }
  0xa8   : > { %v1731_v31 = vpop.f32.mrf.mxu1 }
  0xa9   : > { %v5115_v34 = vadd.f32 %v5104_v20, %v1731_v31 }
  0xaa   : > { %v5117_v35 = vpop.f32.mrf.mxu0 }
  0xab   : > { %1819 = vmatmul.bf16.gmra.mxu1 %v3533_v29  ;;  %1908 = vmatmul.bf16.gmra.mxu2 %v3537_v30  ;;  %v4475_v29 = vld [vmem:[%s6114_s2 + $0x198] sm:$0xff] }
  0xac   : > { %1997 = vmatmul.bf16.gmra.mxu3 %v3541_v32  ;;  %v4483_v30 = vld [vmem:[%s6114_s2 + $0x1d8] sm:$0xff]  ;;  %2240 = vmatpush.bf16.msra.mxu2 %v4475_v29 }
  0xad   : > { %2086 = vmatmul.bf16.gmra.mxu0 %v3545_v33  ;;  %2329 = vmatpush.bf16.msra.mxu3 %v4483_v30  ;;  %v1712_v30 = vadd.f32 %v5104_v20, %v5117_v35  ;;  %v4474_v35 = vld [vmem:[%s6114_s2 + $0x190] sm:$0xff] }
  0xae   : > { %v1751_v38 = vpop.f32.mrf.mxu2 }
  0xaf   : > { %v5126_v39 = vadd.f32 %v5104_v20, %v1751_v38  ;;  %v1771_v40 = vpop.f32.mrf.mxu3 }
  0xb0   : > { %v5129_v41 = vadd.f32 %v5104_v20, %v1771_v40  ;;  %v1733_v42 = vpop.f32.mrf.mxu1  ;;  %2241 = vmatpush.bf16.msra.mxu2 %v4474_v35 }
  0xb1   : > { %v5135_v44 = vadd.f32 %v5104_v20, %v1733_v42  ;;  %v4467_v42 = vld [vmem:[%s6114_s2 + $0x158] sm:$0xff] }
  0xb2   : > { %v5137_v45 = vpop.f32.mrf.mxu0  ;;  %2151 = vmatpush.bf16.msra.mxu1 %v4467_v42 }
  0xb6   : > { %v1753_v55 = vpop.f32.mrf.mxu2 }
  0xb7   : > { %v5151_v56 = vadd.f32 %v5104_v20, %v1753_v55  ;;  %v1773_v57 = vpop.f32.mrf.mxu3 }
  0xb8   : > { %v5154_v60 = vadd.f32 %v5104_v20, %v1773_v57  ;;  %v1736_v61 = vpop.f32.mrf.mxu1 }
  0xb9   : > { %v5157_v0 = vadd.f32 %v5104_v20, %v1736_v61 }
  0xba   : > { %v5159_v1 = vpop.f32.mrf.mxu0 }
  0xbb   : > { %1824 = vmatmul.bf16.gmra.mxu1 %v3569_v58  ;;  %1913 = vmatmul.bf16.gmra.mxu2 %v3573_v59  ;;  %v3641_v58 = vor.u32 %v4343_v46, %v3638_v47  ;;  %v3645_v59 = vor.u32 %v4348_v49, %v3644_v48 }
  0xbc   : > { %2002 = vmatmul.bf16.gmra.mxu3 %v3577_v62 }
  0xbd   : > { %2091 = vmatmul.bf16.gmra.mxu0 %v3581_v63  ;;  %v3649_v63 = vor.u32 %v4344_v50, %v3646_v51  ;;  %v4482_v51 = vld [vmem:[%s6114_s2 + $0x1d0] sm:$0xff] }
  0xbe   : > { %v1756_v2 = vpop.f32.mrf.mxu2  ;;  %2330 = vmatpush.bf16.msra.mxu3 %v4482_v51 }
  0xbf   : > { %v5162_v3 = vadd.f32 %v5104_v20, %v1756_v2  ;;  %v1776_v4 = vpop.f32.mrf.mxu3  ;;  %v3653_v2 = vor.u32 %v4349_v53, %v3652_v52  ;;  %v1714_v53 = vadd.f32 %v5104_v20, %v5137_v45  ;;  %v3710_v45 = vld [vmem:[%s4900_s9 + $0x2ac] sm:$0xf0] }
  0xc0   : > { %v5165_v5 = vadd.f32 %v5104_v20, %v1776_v4  ;;  %v1738_v6 = vpop.f32.mrf.mxu1 }
  0xc1   : > { %v5168_v7 = vadd.f32 %v5104_v20, %v1738_v6 }
  0xc2   : > { %v5170_v8 = vpop.f32.mrf.mxu0 }
  0xc3   : > { %v1719_v51 = vadd.f32 %v5104_v20, %v5170_v8 }
  0xc6   : > { %v1758_v17 = vpop.f32.mrf.mxu2 }
  0xc7   : > { %v5181_v18 = vadd.f32 %v5104_v20, %v1758_v17  ;;  %v1778_v19 = vpop.f32.mrf.mxu3  ;;  %v3674_v17 = vld [vmem:[%s4900_s9 + $0x264] sm:$0xf0] }
  0xc8   : > { %v5184_v23 = vadd.f32 %v5104_v20, %v1778_v19  ;;  %v1741_v24 = vpop.f32.mrf.mxu1  ;;  %v3680_v19 = vld [vmem:[%s4900_s9 + $0x248] sm:$0xf] }
  0xc9   : > { %v5187_v27 = vadd.f32 %v5104_v20, %v1741_v24  ;;  %v3682_v24 = vld [vmem:[%s4900_s9 + $0x26c] sm:$0xf0] }
  0xca   : > { %v5189_v28 = vpop.f32.mrf.mxu0 }
  0xcb   : > { %1829 = vmatmul.bf16.gmra.mxu1 %v3605_v21  ;;  %1918 = vmatmul.bf16.gmra.mxu2 %v3609_v22  ;;  %v4357_v21 = vld [vmem:[%s4900_s9 + $0x268] sm:$0xf0]  ;;  %v1722_v8 = vadd.f32 %v5104_v20, %v5189_v28 }
  0xcc   : > { %2007 = vmatmul.bf16.gmra.mxu3 %v3613_v25  ;;  %v4353_v22 = vld [vmem:[%s4900_s9 + $0x24c] sm:$0xf]  ;;  %v3688_v25 = vld [vmem:[%s4900_s9 + $0x250] sm:$0xf]  ;;  %v3681_v42 = vor.u32 %v4357_v21, %v3680_v19  ;;  %v4362_v19 = vld [vmem:[%s4900_s9 + $0x294] sm:$0xf] }
  0xcd   : > { %2096 = vmatmul.bf16.gmra.mxu0 %v3617_v26  ;;  %v4358_v26 = vld [vmem:[%s4900_s9 + $0x270] sm:$0xf0]  ;;  %v3685_v47 = vor.u32 %v4353_v22, %v3682_v24  ;;  %v3718_v21 = vld [vmem:[%s4900_s9 + $0x2b4] sm:$0xf0]  ;;  %v4367_v24 = vld [vmem:[%s4900_s9 + $0x2b8] sm:$0xf0] }
  0xce   : > { %v1761_v31 = vpop.f32.mrf.mxu2  ;;  %v3689_v48 = vor.u32 %v4358_v26, %v3688_v25  ;;  %v3724_v22 = vld [vmem:[%s4900_s9 + $0x298] sm:$0xf]  ;;  %v1717_v26 = vadd.f32 %v5104_v20, %v5159_v1  ;;  %v4473_v28 = vld [vmem:[%s6114_s2 + $0x188] sm:$0xff] }
  0xcf   : > { %v5198_v32 = vadd.f32 %v5104_v20, %v1761_v31  ;;  %v1781_v33 = vpop.f32.mrf.mxu3  ;;  %2242 = vmatpush.bf16.msra.mxu2 %v4473_v28 }
  0xd0   : > { %v5201_v36 = vadd.f32 %v5104_v20, %v1781_v33  ;;  %v1743_v37 = vpop.f32.mrf.mxu1 }
  0xd1   : > { %v5204_v38 = vadd.f32 %v5104_v20, %v1743_v37  ;;  %v3677_v37 = vor.u32 %v4352_v16, %v3674_v17  ;;  %v3716_v16 = vld [vmem:[%s4900_s9 + $0x290] sm:$0xf]  ;;  %v4366_v17 = vld [vmem:[%s4900_s9 + $0x2b0] sm:$0xf0] }
  0xd2   : > { %v5206_v40 = vpop.f32.mrf.mxu0 }
  0xd6   : > { %v1763_v54 = vpop.f32.mrf.mxu2 }
  0xd7   : > { %v5223_v55 = vadd.f32 %v5104_v20, %v1763_v54  ;;  %v1783_v57 = vpop.f32.mrf.mxu3 }
  0xd8   : > { %v5226_v61 = vadd.f32 %v5104_v20, %v1783_v57  ;;  %v1746_v62 = vpop.f32.mrf.mxu1 }
  0xd9   : > { %v5229_v4 = vadd.f32 %v5104_v20, %v1746_v62 }
  0xda   : > { %v5231_v6 = vpop.f32.mrf.mxu0 }
  0xdb   : > { %1834 = vmatmul.bf16.gmra.mxu1 %v3641_v58  ;;  %1923 = vmatmul.bf16.gmra.mxu2 %v3645_v59 }
  0xdc   : > { %2012 = vmatmul.bf16.gmra.mxu3 %v3649_v63 }
  0xdd   : > { %2101 = vmatmul.bf16.gmra.mxu0 %v3653_v2  ;;  %v4466_v2 = vld [vmem:[%s6114_s2 + $0x150] sm:$0xff] }
  0xde   : > { %v1766_v9 = vpop.f32.mrf.mxu2  ;;  %2152 = vmatpush.bf16.msra.mxu1 %v4466_v2  ;;  %v3746_v2 = vld [vmem:[%s4900_s9 + $0x2f4] sm:$0xf0] }
  0xdf   : > { %v5234_v10 = vadd.f32 %v5104_v20, %v1766_v9  ;;  %v1786_v11 = vpop.f32.mrf.mxu3  ;;  %v4490_v9 = vld [vmem:[%s6114_s2 + $0x210] sm:$0xff] }
  0xe0   : > { %v5237_v12 = vadd.f32 %v5104_v20, %v1786_v11  ;;  %v1748_v13 = vpop.f32.mrf.mxu1  ;;  %v4361_v11 = vld [vmem:[%s4900_s9 + $0x28c] sm:$0xf]  ;;  %2419 = vmatpush.bf16.msra.mxu0 %v4490_v9  ;;  %v3752_v9 = vld [vmem:[%s4900_s9 + $0x2d8] sm:$0xf] }
  0xe1   : > { %v5240_v14 = vadd.f32 %v5104_v20, %v1748_v13 }
  0xe2   : > { %v5242_v15 = vpop.f32.mrf.mxu0 }
  0xe6   : > { %v1768_v29 = vpop.f32.mrf.mxu2 }
  0xe7   : > { %v5255_v31 = vadd.f32 %v5104_v20, %v1768_v29  ;;  %v1788_v33 = vpop.f32.mrf.mxu3 }
  0xe8   : > { %v5258_v43 = vadd.f32 %v5104_v20, %v1788_v33  ;;  %v1800_v46 = vpop.f32.mrf.mxu1  ;;  %v3713_v33 = vor.u32 %v4361_v11, %v3710_v45  ;;  %v4375_v11 = vld [vmem:[%s4900_s9 + $0x2f8] sm:$0xf0] }
  0xe9   : > { %v1801_v49 = vadd.f32 %v1800_v46, %v1712_v30  ;;  %v3721_v46 = vor.u32 %v4362_v19, %v3718_v21  ;;  %v4371_v45 = vld [vmem:[%s4900_s9 + $0x2dc] sm:$0xf]  ;;  %v4376_v19 = vld [vmem:[%s4900_s9 + $0x300] sm:$0xf0] }
  0xea   : > { %v2067_v50 = vpop.f32.mrf.mxu0 }
  0xeb   : > { %1839 = vmatmul.bf16.gmra.mxu1 %v3677_v37  ;;  %1928 = vmatmul.bf16.gmra.mxu2 %v3681_v42  ;;  %v3717_v37 = vor.u32 %v4366_v17, %v3716_v16  ;;  %v3754_v16 = vld [vmem:[%s4900_s9 + $0x2fc] sm:$0xf0] }
  0xec   : > { %2017 = vmatmul.bf16.gmra.mxu3 %v3685_v47  ;;  %v3725_v47 = vor.u32 %v4367_v24, %v3724_v22  ;;  %v3760_v17 = vld [vmem:[%s4900_s9 + $0x2e0] sm:$0xf] }
  0xed   : > { %2106 = vmatmul.bf16.gmra.mxu0 %v3689_v48 }
  0xee   : > { %v1889_v52 = vpop.f32.mrf.mxu2 }
  0xef   : > { %v1890_v54 = vadd.f32 %v1889_v52, %v1801_v49  ;;  %v1978_v57 = vpop.f32.mrf.mxu3 }
  0xf0   : > { %v1802_v58 = vpop.f32.mrf.mxu1 }
  0xf1   : > { %v1979_v59 = vadd.f32 %v1978_v57, %v1890_v54  ;;  %v1803_v62 = vadd.f32 %v1802_v58, %v1714_v53 }
  0xf2   : > { %v2069_v63 = vpop.f32.mrf.mxu0 }
  0xf3   : > { %v5276_v13 = vadd.f32 %v2067_v50, %v1979_v59 }
  0xf6   : > { %v1891_v25 = vpop.f32.mrf.mxu2 }
  0xf7   : > { %v1892_v29 = vadd.f32 %v1891_v25, %v1803_v62  ;;  %v1980_v30 = vpop.f32.mrf.mxu3  ;;  %v4370_v62 = vld [vmem:[%s4900_s9 + $0x2d4] sm:$0xf] }
  0xf8   : > { %v1805_v42 = vpop.f32.mrf.mxu1  ;;  %v3749_v25 = vor.u32 %v4370_v62, %v3746_v2  ;;  %v4379_v62 = vld [vmem:[%s4900_s9 + $0x31c] sm:$0xf] }
  0xf9   : > { %v1981_v48 = vadd.f32 %v1980_v30, %v1892_v29  ;;  %v1806_v49 = vadd.f32 %v1805_v42, %v1717_v26  ;;  %v3753_v26 = vor.u32 %v4375_v11, %v3752_v9  ;;  %v3757_v30 = vor.u32 %v4371_v45, %v3754_v16  ;;  %v3788_v9 = vld [vmem:[%s4900_s9 + $0x320] sm:$0xf]  ;;  %v4384_v11 = vld [vmem:[%s4900_s9 + $0x340] sm:$0xf0]  ;;  %v3790_v16 = vld [vmem:[%s4900_s9 + $0x344] sm:$0xf0] }
  0xfa   : > { %v2072_v50 = vpop.f32.mrf.mxu0  ;;  %v4380_v45 = vld [vmem:[%s4900_s9 + $0x324] sm:$0xf] }
  0xfb   : > { %1844 = vmatmul.bf16.gmra.mxu1 %v3713_v33  ;;  %1933 = vmatmul.bf16.gmra.mxu2 %v3717_v37  ;;  %v5286_v35 = vadd.f32 %v2069_v63, %v1981_v48  ;;  %v3761_v33 = vor.u32 %v4376_v19, %v3760_v17  ;;  %v4481_v48 = vld [vmem:[%s6114_s2 + $0x1c8] sm:$0xff] }
  0xfc   : > { %2022 = vmatmul.bf16.gmra.mxu3 %v3721_v46  ;;  %v3796_v17 = vld [vmem:[%s4900_s9 + $0x328] sm:$0xf]  ;;  %v4385_v19 = vld [vmem:[%s4900_s9 + $0x348] sm:$0xf0] }
  0xfd   : > { %2111 = vmatmul.bf16.gmra.mxu0 %v3725_v47  ;;  %2331 = vmatpush.bf16.msra.mxu3 %v4481_v48  ;;  %v1729_v48 = vadd.f32 %v5104_v20, %v5242_v15 }
  0xfe   : > { %v1894_v1 = vpop.f32.mrf.mxu2 }
  0xff   : > { %v1895_v52 = vadd.f32 %v1894_v1, %v1806_v49  ;;  %v1983_v53 = vpop.f32.mrf.mxu3 }
 0x100   : > { %v1807_v54 = vpop.f32.mrf.mxu1 }
 0x101   : > { %v1984_v57 = vadd.f32 %v1983_v53, %v1895_v52  ;;  %v1808_v58 = vadd.f32 %v1807_v54, %v1719_v51 }
 0x102   : > { %v2074_v59 = vpop.f32.mrf.mxu0 }
 0x103   : > { %v5292_v63 = vadd.f32 %v2072_v50, %v1984_v57  ;;  %v1724_v50 = vadd.f32 %v5104_v20, %v5206_v40  ;;  %v3782_v40 = vld [vmem:[%s4900_s9 + $0x33c] sm:$0xf0] }
 0x106   : > { %v1896_v21 = vpop.f32.mrf.mxu2 }
 0x107   : > { %v1897_v22 = vadd.f32 %v1896_v21, %v1808_v58  ;;  %v1985_v24 = vpop.f32.mrf.mxu3  ;;  %v4465_v58 = vld [vmem:[%s6114_s2 + $0x148] sm:$0xff] }
 0x108   : > { %v1810_v29 = vpop.f32.mrf.mxu1  ;;  %2153 = vmatpush.bf16.msra.mxu1 %v4465_v58  ;;  %v3818_v58 = vld [vmem:[%s4900_s9 + $0x384] sm:$0xf0] }
 0x109   : > { %v1986_v37 = vadd.f32 %v1985_v24, %v1897_v22  ;;  %v1811_v42 = vadd.f32 %v1810_v29, %v1722_v8  ;;  %v1727_v8 = vadd.f32 %v5104_v20, %v5231_v6 }
 0x10a   : > { %v2077_v46 = vpop.f32.mrf.mxu0 }
 0x10b   : > { %1849 = vmatmul.bf16.gmra.mxu1 %v3749_v25  ;;  %1938 = vmatmul.bf16.gmra.mxu2 %v3753_v26  ;;  %v5302_v47 = vadd.f32 %v2074_v59, %v1986_v37  ;;  %v4489_v59 = vld [vmem:[%s6114_s2 + $0x208] sm:$0xff]  ;;  %v3785_v25 = vor.u32 %v4379_v62, %v3782_v40  ;;  %v3789_v26 = vor.u32 %v4384_v11, %v3788_v9  ;;  %v3826_v9 = vld [vmem:[%s4900_s9 + $0x38c] sm:$0xf0] }
 0x10c   : > { %2027 = vmatmul.bf16.gmra.mxu3 %v3757_v30  ;;  %2420 = vmatpush.bf16.msra.mxu0 %v4489_v59  ;;  %v3793_v30 = vor.u32 %v4380_v45, %v3790_v16  ;;  %v3824_v59 = vld [vmem:[%s4900_s9 + $0x368] sm:$0xf]  ;;  %v4393_v62 = vld [vmem:[%s4900_s9 + $0x388] sm:$0xf0]  ;;  %v3832_v11 = vld [vmem:[%s4900_s9 + $0x370] sm:$0xf] }
 0x10d   : > { %2116 = vmatmul.bf16.gmra.mxu0 %v3761_v33  ;;  %v3797_v33 = vor.u32 %v4385_v19, %v3796_v17  ;;  %v4389_v40 = vld [vmem:[%s4900_s9 + $0x36c] sm:$0xf]  ;;  %v4394_v45 = vld [vmem:[%s4900_s9 + $0x390] sm:$0xf0]  ;;  %v3825_v15 = vor.u32 %v4393_v62, %v3824_v59  ;;  %v3862_v62 = vld [vmem:[%s4900_s9 + $0x3d4] sm:$0xf0] }
 0x10e   : > { %v1899_v49 = vpop.f32.mrf.mxu2  ;;  %v4398_v59 = vld [vmem:[%s4900_s9 + $0x3b4] sm:$0xf] }
 0x10f   : > { %v1900_v1 = vadd.f32 %v1899_v49, %v1811_v42  ;;  %v1988_v51 = vpop.f32.mrf.mxu3 }
 0x110   : > { %v1812_v52 = vpop.f32.mrf.mxu1 }
 0x111   : > { %v1989_v53 = vadd.f32 %v1988_v51, %v1900_v1  ;;  %v1813_v54 = vadd.f32 %v1812_v52, %v1724_v50 }
 0x112   : > { %v2079_v57 = vpop.f32.mrf.mxu0 }
 0x113   : > { %v5320_v2 = vadd.f32 %v2077_v46, %v1989_v53 }
 0x116   : > { %v1901_v21 = vpop.f32.mrf.mxu2 }
 0x117   : > { %v1902_v22 = vadd.f32 %v1901_v21, %v1813_v54  ;;  %v1990_v24 = vpop.f32.mrf.mxu3  ;;  %v4388_v54 = vld [vmem:[%s4900_s9 + $0x364] sm:$0xf] }
 0x118   : > { %v1815_v29 = vpop.f32.mrf.mxu1  ;;  %v3821_v20 = vor.u32 %v4388_v54, %v3818_v58  ;;  %v3860_v54 = vld [vmem:[%s4900_s9 + $0x3b0] sm:$0xf]  ;;  %v4402_v58 = vld [vmem:[%s4900_s9 + $0x3d0] sm:$0xf0] }
 0x119   : > { %v1991_v37 = vadd.f32 %v1990_v24, %v1902_v22  ;;  %v1816_v42 = vadd.f32 %v1815_v29, %v1727_v8  ;;  %v3829_v8 = vor.u32 %v4389_v40, %v3826_v9  ;;  %v3833_v22 = vor.u32 %v4394_v45, %v3832_v11  ;;  %v4403_v40 = vld [vmem:[%s4900_s9 + $0x3d8] sm:$0xf0] }
 0x11a   : > { %v2082_v46 = vpop.f32.mrf.mxu0 }
 0x11b   : > { %1854 = vmatmul.bf16.gmra.mxu1 %v3785_v25  ;;  %1943 = vmatmul.bf16.gmra.mxu2 %v3789_v26  ;;  %v5330_v28 = vadd.f32 %v2079_v57, %v1991_v37 }
 0x11c   : > { %2032 = vmatmul.bf16.gmra.mxu3 %v3793_v30  ;;  %v4472_v30 = vld [vmem:[%s6114_s2 + $0x180] sm:$0xff] }
 0x11d   : > { %2121 = vmatmul.bf16.gmra.mxu0 %v3797_v33  ;;  %v4480_v33 = vld [vmem:[%s6114_s2 + $0x1c0] sm:$0xff]  ;;  %2243 = vmatpush.bf16.msra.mxu2 %v4472_v30 }
 0x11e   : > { %v1904_v6 = vpop.f32.mrf.mxu2  ;;  %2332 = vmatpush.bf16.msra.mxu3 %v4480_v33 }
 0x11f   : > { %v1905_v49 = vadd.f32 %v1904_v6, %v1816_v42  ;;  %v1993_v50 = vpop.f32.mrf.mxu3 }
 0x120   : > { %v1817_v1 = vpop.f32.mrf.mxu1 }
 0x121   : > { %v1994_v51 = vadd.f32 %v1993_v50, %v1905_v49  ;;  %v1818_v52 = vadd.f32 %v1817_v1, %v1729_v48  ;;  %v4464_v50 = vld [vmem:[%s6114_s2 + $0x140] sm:$0xff] }
 0x122   : > { %v2084_v53 = vpop.f32.mrf.mxu0  ;;  %v4488_v1 = vld [vmem:[%s6114_s2 + $0x200] sm:$0xff]  ;;  %2154 = vmatpush.bf16.msra.mxu1 %v4464_v50  ;;  %v4407_v50 = vld [vmem:[%s4900_s9 + $0x3fc] sm:$0xf] }
 0x123   : > { %v5336_v57 = vadd.f32 %v2082_v46, %v1994_v51  ;;  %v4397_v51 = vld [vmem:[%s4900_s9 + $0x3ac] sm:$0xf]  ;;  %2421 = vmatpush.bf16.msra.mxu0 %v4488_v1  ;;  %v3898_v1 = vld [vmem:[%s4900_s9 + $0x41c] sm:$0xf0] }
 0x126   : > { %v1906_v16 = vpop.f32.mrf.mxu2 }
 0x127   : > { %v1907_v17 = vadd.f32 %v1906_v16, %v1818_v52  ;;  %v1995_v19 = vpop.f32.mrf.mxu3  ;;  %v3854_v52 = vld [vmem:[%s4900_s9 + $0x3cc] sm:$0xf0] }
 0x128   : > { %v1820_v21 = vpop.f32.mrf.mxu1  ;;  %v3857_v16 = vor.u32 %v4397_v51, %v3854_v52  ;;  %v3904_v51 = vld [vmem:[%s4900_s9 + $0x400] sm:$0xf]  ;;  %v4412_v52 = vld [vmem:[%s4900_s9 + $0x420] sm:$0xf0] }
 0x129   : > { %v1996_v24 = vadd.f32 %v1995_v19, %v1907_v17  ;;  %v1821_v25 = vadd.f32 %v1820_v21, %v5115_v34  ;;  %v3861_v17 = vor.u32 %v4402_v58, %v3860_v54 }
 0x12a   : > { %v2087_v26 = vpop.f32.mrf.mxu0 }
 0x12b   : > { %1859 = vmatmul.bf16.gmra.mxu1 %v3821_v20  ;;  %1948 = vmatmul.bf16.gmra.mxu2 %v3825_v15  ;;  %v5345_v29 = vadd.f32 %v2084_v53, %v1996_v24  ;;  %v3865_v20 = vor.u32 %v4398_v59, %v3862_v62 }
 0x12c   : > { %2037 = vmatmul.bf16.gmra.mxu3 %v3829_v8 }
 0x12d   : > { %2126 = vmatmul.bf16.gmra.mxu0 %v3833_v22 }
 0x12e   : > { %v1909_v37 = vpop.f32.mrf.mxu2 }
 0x12f   : > { %v1910_v34 = vadd.f32 %v1909_v37, %v1821_v25  ;;  %v1998_v42 = vpop.f32.mrf.mxu3 }
 0x130   : > { %v1822_v46 = vpop.f32.mrf.mxu1 }
 0x131   : > { %v1999_v6 = vadd.f32 %v1998_v42, %v1910_v34  ;;  %v1823_v48 = vadd.f32 %v1822_v46, %v5135_v44  ;;  %v3868_v44 = vld [vmem:[%s4900_s9 + $0x3b8] sm:$0xf]  ;;  %v4406_v42 = vld [vmem:[%s4900_s9 + $0x3f4] sm:$0xf] }
 0x132   : > { %v2089_v49 = vpop.f32.mrf.mxu0  ;;  %v3869_v15 = vor.u32 %v4403_v40, %v3868_v44  ;;  %v3890_v46 = vld [vmem:[%s4900_s9 + $0x414] sm:$0xf0] }
 0x133   : > { %v5362_v53 = vadd.f32 %v2087_v26, %v1999_v6  ;;  %v3893_v62 = vor.u32 %v4406_v42, %v3890_v46  ;;  %v3940_v42 = vld [vmem:[%s4900_s9 + $0x448] sm:$0xf]  ;;  %v4421_v46 = vld [vmem:[%s4900_s9 + $0x468] sm:$0xf0] }
 0x136   : > { %v1911_v9 = vpop.f32.mrf.mxu2 }
 0x137   : > { %v1912_v11 = vadd.f32 %v1911_v9, %v1823_v48  ;;  %v2000_v45 = vpop.f32.mrf.mxu3  ;;  %v3896_v48 = vld [vmem:[%s4900_s9 + $0x3f8] sm:$0xf]  ;;  %v3901_v9 = vor.u32 %v4407_v50, %v3898_v1 }
 0x138   : > { %v1825_v19 = vpop.f32.mrf.mxu1 }
 0x139   : > { %v2001_v21 = vadd.f32 %v2000_v45, %v1912_v11  ;;  %v1826_v8 = vadd.f32 %v1825_v19, %v5157_v0  ;;  %v3905_v11 = vor.u32 %v4412_v52, %v3904_v51 }
 0x13a   : > { %v2092_v22 = vpop.f32.mrf.mxu0 }
 0x13b   : > { %1864 = vmatmul.bf16.gmra.mxu1 %v3857_v16  ;;  %1953 = vmatmul.bf16.gmra.mxu2 %v3861_v17  ;;  %v5371_v24 = vadd.f32 %v2089_v49, %v2001_v21  ;;  %v4411_v49 = vld [vmem:[%s4900_s9 + $0x418] sm:$0xf0] }
 0x13c   : > { %2042 = vmatmul.bf16.gmra.mxu3 %v3865_v20  ;;  %v3897_v44 = vor.u32 %v4411_v49, %v3896_v48 }
 0x13d   : > { %2131 = vmatmul.bf16.gmra.mxu0 %v3869_v15 }
 0x13e   : > { %v1914_v25 = vpop.f32.mrf.mxu2 }
 0x13f   : > { %v1915_v26 = vadd.f32 %v1914_v25, %v1826_v8  ;;  %v2003_v30 = vpop.f32.mrf.mxu3  ;;  %v4415_v25 = vld [vmem:[%s4900_s9 + $0x43c] sm:$0xf] }
 0x140   : > { %v1827_v33 = vpop.f32.mrf.mxu1 }
 0x141   : > { %v2004_v37 = vadd.f32 %v2003_v30, %v1915_v26  ;;  %v1828_v0 = vadd.f32 %v1827_v33, %v5168_v7  ;;  %v3926_v26 = vld [vmem:[%s4900_s9 + $0x45c] sm:$0xf0] }
 0x142   : > { %v2094_v34 = vpop.f32.mrf.mxu0  ;;  %v3932_v33 = vld [vmem:[%s4900_s9 + $0x440] sm:$0xf]  ;;  %v3929_v1 = vor.u32 %v4415_v25, %v3926_v26  ;;  %v4288_v26 = vld [vmem:[%s4900_s9 + $0x40] sm:$0xf0] }
 0x143   : > { %v5376_v6 = vadd.f32 %v2092_v22, %v2004_v37  ;;  %v4420_v37 = vld [vmem:[%s4900_s9 + $0x460] sm:$0xf0]  ;;  %v3416_v25 = vld [vmem:[%s4900_s9 + $0x20] sm:$0xf] }
 0x144   : > { %v3933_v51 = vor.u32 %v4420_v37, %v3932_v33 }
 0x146   : > { %v1916_v54 = vpop.f32.mrf.mxu2 }
 0x147   : > { %v1917_v58 = vadd.f32 %v1916_v54, %v1828_v0  ;;  %v2005_v59 = vpop.f32.mrf.mxu3  ;;  %v4416_v0 = vld [vmem:[%s4900_s9 + $0x444] sm:$0xf] }
 0x148   : > { %v1830_v40 = vpop.f32.mrf.mxu1 }
 0x149   : > { %v2006_v7 = vadd.f32 %v2005_v59, %v1917_v58  ;;  %v1831_v45 = vadd.f32 %v1830_v40, %v5187_v27  ;;  %v3941_v58 = vor.u32 %v4421_v46, %v3940_v42 }
 0x14a   : > { %v2097_v16 = vpop.f32.mrf.mxu0 }
 0x14b   : > { %1869 = vmatmul.bf16.gmra.mxu1 %v3893_v62  ;;  %1958 = vmatmul.bf16.gmra.mxu2 %v3897_v44  ;;  %v5385_v17 = vadd.f32 %v2094_v34, %v2006_v7  ;;  %v3934_v34 = vld [vmem:[%s4900_s9 + $0x464] sm:$0xf0] }
 0x14c   : > { %2047 = vmatmul.bf16.gmra.mxu3 %v3901_v9  ;;  %v3937_v54 = vor.u32 %v4416_v0, %v3934_v34 }
 0x14d   : > { %2136 = vmatmul.bf16.gmra.mxu0 %v3905_v11 }
 0x14e   : > { %v1919_v19 = vpop.f32.mrf.mxu2 }
 0x14f   : > { %v1920_v20 = vadd.f32 %v1919_v19, %v1831_v45  ;;  %v2008_v15 = vpop.f32.mrf.mxu3  ;;  %v4282_v19 = vld [vmem:[%s4900_s9 + $0x14] sm:$0xf] }
 0x150   : > { %v1832_v21 = vpop.f32.mrf.mxu1 }
 0x151   : > { %v2009_v8 = vadd.f32 %v2008_v15, %v1920_v20  ;;  %v1833_v27 = vadd.f32 %v1832_v21, %v5204_v38  ;;  %v3402_v20 = vld [vmem:[%s4900_s9 + $0x34] sm:$0xf0] }
 0x152   : > { %v2099_v22 = vpop.f32.mrf.mxu0  ;;  %v3408_v21 = vld [vmem:[%s4900_s9 + $0x18] sm:$0xf]  ;;  %v3405_v34 = vor.u32 %v4282_v19, %v3402_v20  ;;  %v3452_v19 = vld [vmem:[%s4900_s9 + $0x68] sm:$0xf]  ;;  %v4297_v20 = vld [vmem:[%s4900_s9 + $0x88] sm:$0xf0] }
 0x153   : > { %v5390_v30 = vadd.f32 %v2097_v16, %v2009_v8  ;;  %v4287_v8 = vld [vmem:[%s4900_s9 + $0x38] sm:$0xf0] }
 0x154   : > { %v3409_v42 = vor.u32 %v4287_v8, %v3408_v21 }
 0x156   : > { %v1921_v48 = vpop.f32.mrf.mxu2 }
 0x157   : > { %v1922_v49 = vadd.f32 %v1921_v48, %v1833_v27  ;;  %v2010_v50 = vpop.f32.mrf.mxu3  ;;  %v4283_v27 = vld [vmem:[%s4900_s9 + $0x1c] sm:$0xf] }
 0x158   : > { %v1835_v52 = vpop.f32.mrf.mxu1 }
 0x159   : > { %v2011_v38 = vadd.f32 %v2010_v50, %v1922_v49  ;;  %v1836_v59 = vadd.f32 %v1835_v52, %v5229_v4  ;;  %v3417_v49 = vor.u32 %v4288_v26, %v3416_v25 }
 0x15a   : > { %v2102_v62 = vpop.f32.mrf.mxu0 }
 0x15b   : > { %1874 = vmatmul.bf16.gmra.mxu1 %v3929_v1  ;;  %1963 = vmatmul.bf16.gmra.mxu2 %v3933_v51  ;;  %v5399_v44 = vadd.f32 %v2099_v22, %v2011_v38  ;;  %v3410_v22 = vld [vmem:[%s4900_s9 + $0x3c] sm:$0xf0] }
 0x15c   : > { %2052 = vmatmul.bf16.gmra.mxu3 %v3937_v54  ;;  %v3413_v48 = vor.u32 %v4283_v27, %v3410_v22 }
 0x15d   : > { %2141 = vmatmul.bf16.gmra.mxu0 %v3941_v58 }
 0x15e   : > { %v1924_v40 = vpop.f32.mrf.mxu2 }
 0x15f   : > { %v1925_v9 = vadd.f32 %v1924_v40, %v1836_v59  ;;  %v2013_v11 = vpop.f32.mrf.mxu3  ;;  %v4291_v40 = vld [vmem:[%s4900_s9 + $0x5c] sm:$0xf] }
 0x160   : > { %v1837_v7 = vpop.f32.mrf.mxu1 }
 0x161   : > { %v2014_v45 = vadd.f32 %v2013_v11, %v1925_v9  ;;  %v1838_v4 = vadd.f32 %v1837_v7, %v5240_v14  ;;  %v3438_v9 = vld [vmem:[%s4900_s9 + $0x7c] sm:$0xf0] }
 0x162   : > { %v2104_v16 = vpop.f32.mrf.mxu0  ;;  %v3444_v7 = vld [vmem:[%s4900_s9 + $0x60] sm:$0xf]  ;;  %v3441_v22 = vor.u32 %v4291_v40, %v3438_v9  ;;  %v3488_v40 = vld [vmem:[%s4900_s9 + $0xb0] sm:$0xf]  ;;  %v4306_v9 = vld [vmem:[%s4900_s9 + $0xd0] sm:$0xf0] }
 0x163   : > { %v5404_v15 = vadd.f32 %v2102_v62, %v2014_v45  ;;  %v4296_v45 = vld [vmem:[%s4900_s9 + $0x80] sm:$0xf0] }
 0x164   : > { %v3445_v25 = vor.u32 %v4296_v45, %v3444_v7 }
 0x166   : > { %v1926_v33 = vpop.f32.mrf.mxu2 }
 0x167   : > { %v1927_v37 = vadd.f32 %v1926_v33, %v1838_v4  ;;  %v2015_v0 = vpop.f32.mrf.mxu3  ;;  %v4292_v4 = vld [vmem:[%s4900_s9 + $0x64] sm:$0xf] }
 0x168   : > { %v1840_v46 = vpop.f32.mrf.mxu1 }
 0x169   : > { %v2016_v14 = vadd.f32 %v2015_v0, %v1927_v37  ;;  %v1841_v50 = vadd.f32 %v1840_v46, %v5126_v39  ;;  %v3453_v37 = vor.u32 %v4297_v20, %v3452_v19 }
 0x16a   : > { %v2107_v1 = vpop.f32.mrf.mxu0 }
 0x16b   : > { %2155 = vmatmul.bf16.vlgmr.msra.gmra.mxu1 %v3405_v34  ;;  %2244 = vmatmul.bf16.vlgmr.msra.gmra.mxu2 %v3409_v42  ;;  %v5413_v51 = vadd.f32 %v2104_v16, %v2016_v14  ;;  %v3446_v16 = vld [vmem:[%s4900_s9 + $0x84] sm:$0xf0] }
 0x16c   : > { %2333 = vmatmul.bf16.vlgmr.msra.gmra.mxu3 %v3413_v48  ;;  %v3449_v33 = vor.u32 %v4292_v4, %v3446_v16 }
 0x16d   : > { %2422 = vmatmul.bf16.vlgmr.msra.gmra.mxu0 %v3417_v49 }
 0x16e   : > { %v1929_v52 = vpop.f32.mrf.mxu2 }
 0x16f   : > { %v1930_v54 = vadd.f32 %v1929_v52, %v1841_v50  ;;  %v2018_v58 = vpop.f32.mrf.mxu3  ;;  %v4300_v52 = vld [vmem:[%s4900_s9 + $0xa4] sm:$0xf] }
 0x170   : > { %v1842_v38 = vpop.f32.mrf.mxu1 }
 0x171   : > { %v2019_v59 = vadd.f32 %v2018_v58, %v1930_v54  ;;  %v1843_v39 = vadd.f32 %v1842_v38, %v5151_v56  ;;  %v3474_v54 = vld [vmem:[%s4900_s9 + $0xc4] sm:$0xf0] }
 0x172   : > { %v2109_v62 = vpop.f32.mrf.mxu0  ;;  %v3480_v38 = vld [vmem:[%s4900_s9 + $0xa8] sm:$0xf]  ;;  %v3477_v16 = vor.u32 %v4300_v52, %v3474_v54  ;;  %v3524_v52 = vld [vmem:[%s4900_s9 + $0xf8] sm:$0xf]  ;;  %v4315_v54 = vld [vmem:[%s4900_s9 + $0x118] sm:$0xf0] }
 0x173   : > { %v5418_v11 = vadd.f32 %v2107_v1, %v2019_v59  ;;  %v4305_v59 = vld [vmem:[%s4900_s9 + $0xc8] sm:$0xf0] }
 0x174   : > { %v3481_v19 = vor.u32 %v4305_v59, %v3480_v38 }
 0x176   : > { %v1931_v21 = vpop.f32.mrf.mxu2 }
 0x177   : > { %v1932_v8 = vadd.f32 %v1931_v21, %v1843_v39  ;;  %v2020_v27 = vpop.f32.mrf.mxu3  ;;  %v4301_v39 = vld [vmem:[%s4900_s9 + $0xac] sm:$0xf] }
 0x178   : > { %v1845_v26 = vpop.f32.mrf.mxu1 }
 0x179   : > { %v2021_v56 = vadd.f32 %v2020_v27, %v1932_v8  ;;  %v1846_v0 = vadd.f32 %v1845_v26, %v5162_v3  ;;  %v3489_v8 = vor.u32 %v4306_v9, %v3488_v40 }
 0x17a   : > { %v2112_v34 = vpop.f32.mrf.mxu0 }
 0x17b   : > { %2160 = vmatmul.bf16.gmra.mxu1 %v3441_v22  ;;  %2249 = vmatmul.bf16.gmra.mxu2 %v3445_v25  ;;  %v5427_v42 = vadd.f32 %v2109_v62, %v2021_v56  ;;  %v3482_v62 = vld [vmem:[%s4900_s9 + $0xcc] sm:$0xf0] }
 0x17c   : > { %2338 = vmatmul.bf16.gmra.mxu3 %v3449_v33  ;;  %v3485_v21 = vor.u32 %v4301_v39, %v3482_v62 }
 0x17d   : > { %2427 = vmatmul.bf16.gmra.mxu0 %v3453_v37 }
 0x17e   : > { %v1934_v46 = vpop.f32.mrf.mxu2 }
 0x17f   : > { %v1935_v48 = vadd.f32 %v1934_v46, %v1846_v0  ;;  %v2023_v49 = vpop.f32.mrf.mxu3  ;;  %v4309_v46 = vld [vmem:[%s4900_s9 + $0xec] sm:$0xf] }
 0x180   : > { %v1847_v14 = vpop.f32.mrf.mxu1 }
 0x181   : > { %v2024_v50 = vadd.f32 %v2023_v49, %v1935_v48  ;;  %v1848_v3 = vadd.f32 %v1847_v14, %v5181_v18  ;;  %v3510_v48 = vld [vmem:[%s4900_s9 + $0x10c] sm:$0xf0] }
 0x182   : > { %v2114_v1 = vpop.f32.mrf.mxu0  ;;  %v3516_v14 = vld [vmem:[%s4900_s9 + $0xf0] sm:$0xf]  ;;  %v3513_v62 = vor.u32 %v4309_v46, %v3510_v48  ;;  %v3560_v46 = vld [vmem:[%s4900_s9 + $0x140] sm:$0xf]  ;;  %v4324_v48 = vld [vmem:[%s4900_s9 + $0x160] sm:$0xf0] }
 0x183   : > { %v5432_v58 = vadd.f32 %v2112_v34, %v2024_v50  ;;  %v4314_v50 = vld [vmem:[%s4900_s9 + $0x110] sm:$0xf0] }
 0x184   : > { %v3517_v40 = vor.u32 %v4314_v50, %v3516_v14 }
 0x186   : > { %v1936_v7 = vpop.f32.mrf.mxu2 }
 0x187   : > { %v1937_v45 = vadd.f32 %v1936_v7, %v1848_v3  ;;  %v2025_v4 = vpop.f32.mrf.mxu3  ;;  %v4310_v3 = vld [vmem:[%s4900_s9 + $0xf4] sm:$0xf] }
 0x188   : > { %v1850_v20 = vpop.f32.mrf.mxu1 }
 0x189   : > { %v2026_v18 = vadd.f32 %v2025_v4, %v1937_v45  ;;  %v1851_v27 = vadd.f32 %v1850_v20, %v5198_v32  ;;  %v3525_v45 = vor.u32 %v4315_v54, %v3524_v52 }
 0x18a   : > { %v2117_v22 = vpop.f32.mrf.mxu0 }
 0x18b   : > { %2165 = vmatmul.bf16.gmra.mxu1 %v3477_v16  ;;  %2254 = vmatmul.bf16.gmra.mxu2 %v3481_v19  ;;  %v5441_v25 = vadd.f32 %v2114_v1, %v2026_v18  ;;  %v3518_v1 = vld [vmem:[%s4900_s9 + $0x114] sm:$0xf0] }
 0x18c   : > { %2343 = vmatmul.bf16.gmra.mxu3 %v3485_v21  ;;  %v3521_v7 = vor.u32 %v4310_v3, %v3518_v1 }
 0x18d   : > { %2432 = vmatmul.bf16.gmra.mxu0 %v3489_v8 }
 0x18e   : > { %v1939_v26 = vpop.f32.mrf.mxu2 }
 0x18f   : > { %v1940_v33 = vadd.f32 %v1939_v26, %v1851_v27  ;;  %v2028_v37 = vpop.f32.mrf.mxu3  ;;  %v4318_v26 = vld [vmem:[%s4900_s9 + $0x134] sm:$0xf] }
 0x190   : > { %v1852_v56 = vpop.f32.mrf.mxu1 }
 0x191   : > { %v2029_v0 = vadd.f32 %v2028_v37, %v1940_v33  ;;  %v1853_v32 = vadd.f32 %v1852_v56, %v5223_v55  ;;  %v3546_v33 = vld [vmem:[%s4900_s9 + $0x154] sm:$0xf0] }
 0x192   : > { %v2119_v34 = vpop.f32.mrf.mxu0  ;;  %v3552_v56 = vld [vmem:[%s4900_s9 + $0x138] sm:$0xf]  ;;  %v3549_v1 = vor.u32 %v4318_v26, %v3546_v33  ;;  %v3596_v26 = vld [vmem:[%s4900_s9 + $0x188] sm:$0xf]  ;;  %v4333_v33 = vld [vmem:[%s4900_s9 + $0x1a8] sm:$0xf0] }
 0x193   : > { %v5446_v49 = vadd.f32 %v2117_v22, %v2029_v0  ;;  %v4323_v0 = vld [vmem:[%s4900_s9 + $0x158] sm:$0xf0] }
 0x194   : > { %v3553_v52 = vor.u32 %v4323_v0, %v3552_v56 }
 0x196   : > { %v1941_v38 = vpop.f32.mrf.mxu2 }
 0x197   : > { %v1942_v59 = vadd.f32 %v1941_v38, %v1853_v32  ;;  %v2030_v39 = vpop.f32.mrf.mxu3  ;;  %v4319_v32 = vld [vmem:[%s4900_s9 + $0x13c] sm:$0xf] }
 0x198   : > { %v1855_v9 = vpop.f32.mrf.mxu1 }
 0x199   : > { %v2031_v55 = vadd.f32 %v2030_v39, %v1942_v59  ;;  %v1856_v4 = vadd.f32 %v1855_v9, %v5234_v10  ;;  %v3561_v59 = vor.u32 %v4324_v48, %v3560_v46 }
 0x19a   : > { %v2122_v16 = vpop.f32.mrf.mxu0 }
 0x19b   : > { %2170 = vmatmul.bf16.gmra.mxu1 %v3513_v62  ;;  %2259 = vmatmul.bf16.gmra.mxu2 %v3517_v40  ;;  %v5455_v19 = vadd.f32 %v2119_v34, %v2031_v55  ;;  %v3554_v34 = vld [vmem:[%s4900_s9 + $0x15c] sm:$0xf0] }
 0x19c   : > { %2348 = vmatmul.bf16.gmra.mxu3 %v3521_v7  ;;  %v3557_v38 = vor.u32 %v4319_v32, %v3554_v34 }
 0x19d   : > { %2437 = vmatmul.bf16.gmra.mxu0 %v3525_v45 }
 0x19e   : > { %v1944_v20 = vpop.f32.mrf.mxu2 }
 0x19f   : > { %v1945_v21 = vadd.f32 %v1944_v20, %v1856_v4  ;;  %v2033_v8 = vpop.f32.mrf.mxu3  ;;  %v4327_v20 = vld [vmem:[%s4900_s9 + $0x17c] sm:$0xf] }
 0x1a0   : > { %v1857_v18 = vpop.f32.mrf.mxu1 }
 0x1a1   : > { %v2034_v27 = vadd.f32 %v2033_v8, %v1945_v21  ;;  %v1858_v10 = vadd.f32 %v1857_v18, %v5255_v31  ;;  %v3582_v21 = vld [vmem:[%s4900_s9 + $0x19c] sm:$0xf0] }
 0x1a2   : > { %v2124_v22 = vpop.f32.mrf.mxu0  ;;  %v3588_v18 = vld [vmem:[%s4900_s9 + $0x180] sm:$0xf]  ;;  %v3585_v34 = vor.u32 %v4327_v20, %v3582_v21  ;;  %v3632_v20 = vld [vmem:[%s4900_s9 + $0x1d0] sm:$0xf]  ;;  %v4342_v21 = vld [vmem:[%s4900_s9 + $0x1f0] sm:$0xf0] }
 0x1a3   : > { %v5460_v37 = vadd.f32 %v2122_v16, %v2034_v27  ;;  %v4332_v27 = vld [vmem:[%s4900_s9 + $0x1a0] sm:$0xf0] }
 0x1a4   : > { %v3589_v46 = vor.u32 %v4332_v27, %v3588_v18 }
 0x1a6   : > { %v1946_v14 = vpop.f32.mrf.mxu2 }
 0x1a7   : > { %v1947_v50 = vadd.f32 %v1946_v14, %v1858_v10  ;;  %v2035_v3 = vpop.f32.mrf.mxu3  ;;  %v4328_v10 = vld [vmem:[%s4900_s9 + $0x184] sm:$0xf] }
 0x1a8   : > { %v1860_v54 = vpop.f32.mrf.mxu1 }
 0x1a9   : > { %v2036_v31 = vadd.f32 %v2035_v3, %v1947_v50  ;;  %v1861_v39 = vadd.f32 %v1860_v54, %v5129_v41  ;;  %v3597_v50 = vor.u32 %v4333_v33, %v3596_v26 }
 0x1aa   : > { %v2127_v62 = vpop.f32.mrf.mxu0 }
 0x1ab   : > { %2175 = vmatmul.bf16.gmra.mxu1 %v3549_v1  ;;  %2264 = vmatmul.bf16.gmra.mxu2 %v3553_v52  ;;  %v5469_v40 = vadd.f32 %v2124_v22, %v2036_v31  ;;  %v3590_v22 = vld [vmem:[%s4900_s9 + $0x1a4] sm:$0xf0] }
 0x1ac   : > { %2353 = vmatmul.bf16.gmra.mxu3 %v3557_v38  ;;  %v3593_v14 = vor.u32 %v4328_v10, %v3590_v22 }
 0x1ad   : > { %2442 = vmatmul.bf16.gmra.mxu0 %v3561_v59 }
 0x1ae   : > { %v1949_v9 = vpop.f32.mrf.mxu2 }
 0x1af   : > { %v1950_v7 = vadd.f32 %v1949_v9, %v1861_v39  ;;  %v2038_v45 = vpop.f32.mrf.mxu3  ;;  %v4336_v9 = vld [vmem:[%s4900_s9 + $0x1c4] sm:$0xf] }
 0x1b0   : > { %v1862_v55 = vpop.f32.mrf.mxu1 }
 0x1b1   : > { %v2039_v4 = vadd.f32 %v2038_v45, %v1950_v7  ;;  %v1863_v41 = vadd.f32 %v1862_v55, %v5154_v60  ;;  %v3618_v7 = vld [vmem:[%s4900_s9 + $0x1e4] sm:$0xf0] }
 0x1b2   : > { %v2129_v16 = vpop.f32.mrf.mxu0  ;;  %v3624_v55 = vld [vmem:[%s4900_s9 + $0x1c8] sm:$0xf]  ;;  %v3621_v22 = vor.u32 %v4336_v9, %v3618_v7  ;;  %v3668_v9 = vld [vmem:[%s4900_s9 + $0x218] sm:$0xf]  ;;  %v4351_v7 = vld [vmem:[%s4900_s9 + $0x238] sm:$0xf0] }
 0x1b3   : > { %v5474_v8 = vadd.f32 %v2127_v62, %v2039_v4  ;;  %v4341_v4 = vld [vmem:[%s4900_s9 + $0x1e8] sm:$0xf0] }
 0x1b4   : > { %v3625_v26 = vor.u32 %v4341_v4, %v3624_v55 }
 0x1b6   : > { %v1951_v56 = vpop.f32.mrf.mxu2 }
 0x1b7   : > { %v1952_v0 = vadd.f32 %v1951_v56, %v1863_v41  ;;  %v2040_v32 = vpop.f32.mrf.mxu3  ;;  %v4337_v41 = vld [vmem:[%s4900_s9 + $0x1cc] sm:$0xf] }
 0x1b8   : > { %v1865_v48 = vpop.f32.mrf.mxu1 }
 0x1b9   : > { %v2041_v60 = vadd.f32 %v2040_v32, %v1952_v0  ;;  %v1866_v3 = vadd.f32 %v1865_v48, %v5165_v5  ;;  %v3633_v0 = vor.u32 %v4342_v21, %v3632_v20 }
 0x1ba   : > { %v2132_v1 = vpop.f32.mrf.mxu0 }
 0x1bb   : > { %2180 = vmatmul.bf16.gmra.mxu1 %v3585_v34  ;;  %2269 = vmatmul.bf16.gmra.mxu2 %v3589_v46  ;;  %v5483_v52 = vadd.f32 %v2129_v16, %v2041_v60  ;;  %v3626_v16 = vld [vmem:[%s4900_s9 + $0x1ec] sm:$0xf0] }
 0x1bc   : > { %2358 = vmatmul.bf16.gmra.mxu3 %v3593_v14  ;;  %v3629_v56 = vor.u32 %v4337_v41, %v3626_v16 }
 0x1bd   : > { %2447 = vmatmul.bf16.gmra.mxu0 %v3597_v50 }
 0x1be   : > { %v1954_v54 = vpop.f32.mrf.mxu2 }
 0x1bf   : > { %v1955_v38 = vadd.f32 %v1954_v54, %v1866_v3  ;;  %v2043_v59 = vpop.f32.mrf.mxu3  ;;  %v4345_v54 = vld [vmem:[%s4900_s9 + $0x20c] sm:$0xf] }
 0x1c0   : > { %v1867_v31 = vpop.f32.mrf.mxu1 }
 0x1c1   : > { %v2044_v39 = vadd.f32 %v2043_v59, %v1955_v38  ;;  %v1868_v5 = vadd.f32 %v1867_v31, %v5184_v23  ;;  %v3654_v38 = vld [vmem:[%s4900_s9 + $0x22c] sm:$0xf0] }
 0x1c2   : > { %v2134_v62 = vpop.f32.mrf.mxu0  ;;  %v3660_v31 = vld [vmem:[%s4900_s9 + $0x210] sm:$0xf]  ;;  %v3657_v16 = vor.u32 %v4345_v54, %v3654_v38  ;;  %v3704_v54 = vld [vmem:[%s4900_s9 + $0x260] sm:$0xf]  ;;  %v4360_v38 = vld [vmem:[%s4900_s9 + $0x280] sm:$0xf0] }
 0x1c3   : > { %v5488_v45 = vadd.f32 %v2132_v1, %v2044_v39  ;;  %v4350_v39 = vld [vmem:[%s4900_s9 + $0x230] sm:$0xf0] }
 0x1c4   : > { %v3661_v20 = vor.u32 %v4350_v39, %v3660_v31 }
 0x1c6   : > { %v1956_v18 = vpop.f32.mrf.mxu2 }
 0x1c7   : > { %v1957_v27 = vadd.f32 %v1956_v18, %v1868_v5  ;;  %v2045_v10 = vpop.f32.mrf.mxu3  ;;  %v4346_v5 = vld [vmem:[%s4900_s9 + $0x214] sm:$0xf] }
 0x1c8   : > { %v1870_v33 = vpop.f32.mrf.mxu1 }
 0x1c9   : > { %v2046_v23 = vadd.f32 %v2045_v10, %v1957_v27  ;;  %v1871_v32 = vadd.f32 %v1870_v33, %v5201_v36  ;;  %v3669_v27 = vor.u32 %v4351_v7, %v3668_v9 }
 0x1ca   : > { %v2137_v34 = vpop.f32.mrf.mxu0 }
 0x1cb   : > { %2185 = vmatmul.bf16.gmra.mxu1 %v3621_v22  ;;  %2274 = vmatmul.bf16.gmra.mxu2 %v3625_v26  ;;  %v5497_v46 = vadd.f32 %v2134_v62, %v2046_v23  ;;  %v3662_v62 = vld [vmem:[%s4900_s9 + $0x234] sm:$0xf0] }
 0x1cc   : > { %2363 = vmatmul.bf16.gmra.mxu3 %v3629_v56  ;;  %v3665_v18 = vor.u32 %v4346_v5, %v3662_v62 }
 0x1cd   : > { %2452 = vmatmul.bf16.gmra.mxu0 %v3633_v0 }
 0x1ce   : > { %v1959_v48 = vpop.f32.mrf.mxu2 }
 0x1cf   : > { %v1960_v14 = vadd.f32 %v1959_v48, %v1871_v32  ;;  %v2048_v50 = vpop.f32.mrf.mxu3  ;;  %v4354_v48 = vld [vmem:[%s4900_s9 + $0x254] sm:$0xf] }
 0x1d0   : > { %v1872_v60 = vpop.f32.mrf.mxu1 }
 0x1d1   : > { %v2049_v3 = vadd.f32 %v2048_v50, %v1960_v14  ;;  %v1873_v36 = vadd.f32 %v1872_v60, %v5226_v61  ;;  %v3690_v14 = vld [vmem:[%s4900_s9 + $0x274] sm:$0xf0] }
 0x1d2   : > { %v2139_v1 = vpop.f32.mrf.mxu0  ;;  %v3696_v60 = vld [vmem:[%s4900_s9 + $0x258] sm:$0xf]  ;;  %v3693_v62 = vor.u32 %v4354_v48, %v3690_v14  ;;  %v3740_v14 = vld [vmem:[%s4900_s9 + $0x2a8] sm:$0xf] }
 0x1d3   : > { %v5502_v59 = vadd.f32 %v2137_v34, %v2049_v3  ;;  %v4359_v3 = vld [vmem:[%s4900_s9 + $0x278] sm:$0xf0] }
 0x1d4   : > { %v3697_v9 = vor.u32 %v4359_v3, %v3696_v60  ;;  %v4369_v60 = vld [vmem:[%s4900_s9 + $0x2c8] sm:$0xf0] }
 0x1d6   : > { %v1961_v55 = vpop.f32.mrf.mxu2 }
 0x1d7   : > { %v1962_v4 = vadd.f32 %v1961_v55, %v1873_v36  ;;  %v2050_v41 = vpop.f32.mrf.mxu3  ;;  %v4355_v36 = vld [vmem:[%s4900_s9 + $0x25c] sm:$0xf] }
 0x1d8   : > { %v1875_v21 = vpop.f32.mrf.mxu1 }
 0x1d9   : > { %v2051_v61 = vadd.f32 %v2050_v41, %v1962_v4  ;;  %v1876_v10 = vadd.f32 %v1875_v21, %v5237_v12  ;;  %v3705_v4 = vor.u32 %v4360_v38, %v3704_v54 }
 0x1da   : > { %v2142_v22 = vpop.f32.mrf.mxu0 }
 0x1db   : > { %2190 = vmatmul.bf16.gmra.mxu1 %v3657_v16  ;;  %2279 = vmatmul.bf16.gmra.mxu2 %v3661_v20  ;;  %v5511_v26 = vadd.f32 %v2139_v1, %v2051_v61  ;;  %v3698_v1 = vld [vmem:[%s4900_s9 + $0x27c] sm:$0xf0] }
 0x1dc   : > { %2368 = vmatmul.bf16.gmra.mxu3 %v3665_v18  ;;  %v3701_v55 = vor.u32 %v4355_v36, %v3698_v1 }
 0x1dd   : > { %2457 = vmatmul.bf16.gmra.mxu0 %v3669_v27 }
 0x1de   : > { %v1964_v33 = vpop.f32.mrf.mxu2 }
 0x1df   : > { %v1965_v56 = vadd.f32 %v1964_v33, %v1876_v10  ;;  %v2053_v0 = vpop.f32.mrf.mxu3 }
 0x1e0   : > { %v1877_v23 = vpop.f32.mrf.mxu1 }
 0x1e1   : > { %v2054_v32 = vadd.f32 %v2053_v0, %v1965_v56  ;;  %v1878_v12 = vadd.f32 %v1877_v23, %v5258_v43  ;;  %v4363_v56 = vld [vmem:[%s4900_s9 + $0x29c] sm:$0xf]  ;;  %v3726_v0 = vld [vmem:[%s4900_s9 + $0x2bc] sm:$0xf0] }
 0x1e2   : > { %v2144_v34 = vpop.f32.mrf.mxu0  ;;  %v3732_v23 = vld [vmem:[%s4900_s9 + $0x2a0] sm:$0xf]  ;;  %v3729_v54 = vor.u32 %v4363_v56, %v3726_v0  ;;  %v3762_v56 = vld [vmem:[%s4900_s9 + $0x304] sm:$0xf0] }
 0x1e3   : > { %v5516_v50 = vadd.f32 %v2142_v22, %v2054_v32  ;;  %v4368_v32 = vld [vmem:[%s4900_s9 + $0x2c0] sm:$0xf0]  ;;  %v3768_v0 = vld [vmem:[%s4900_s9 + $0x2e8] sm:$0xf] }
 0x1e4   : > { %v3733_v38 = vor.u32 %v4368_v32, %v3732_v23  ;;  %v4373_v23 = vld [vmem:[%s4900_s9 + $0x2ec] sm:$0xf]  ;;  %v3770_v32 = vld [vmem:[%s4900_s9 + $0x30c] sm:$0xf0] }
 0x1e6   : > { %v1966_v31 = vpop.f32.mrf.mxu2 }
 0x1e7   : > { %v1967_v39 = vadd.f32 %v1966_v31, %v1878_v12  ;;  %v2055_v5 = vpop.f32.mrf.mxu3  ;;  %v4364_v12 = vld [vmem:[%s4900_s9 + $0x2a4] sm:$0xf] }
 0x1e8   : > { %v2156_v7 = vpop.f32.mrf.mxu1 }
 0x1e9   : > { %v2056_v43 = vadd.f32 %v2055_v5, %v1967_v39  ;;  %v2157_v20 = vadd.f32 %v2156_v7, %v5276_v13  ;;  %v3741_v5 = vor.u32 %v4369_v60, %v3740_v14  ;;  %v4378_v14 = vld [vmem:[%s4900_s9 + $0x310] sm:$0xf0] }
 0x1ea   : > { %v2423_v41 = vpop.f32.mrf.mxu0 }
 0x1eb   : > { %2195 = vmatmul.bf16.gmra.mxu1 %v3693_v62  ;;  %2284 = vmatmul.bf16.gmra.mxu2 %v3697_v9  ;;  %v5524_v16 = vadd.f32 %v2144_v34, %v2056_v43  ;;  %v3734_v34 = vld [vmem:[%s4900_s9 + $0x2c4] sm:$0xf0] }
 0x1ec   : > { %2373 = vmatmul.bf16.gmra.mxu3 %v3701_v55  ;;  %v3737_v39 = vor.u32 %v4364_v12, %v3734_v34 }
 0x1ed   : > { %2462 = vmatmul.bf16.gmra.mxu0 %v3705_v4 }
 0x1ee   : > { %v2245_v21 = vpop.f32.mrf.mxu2 }
 0x1ef   : > { %v2246_v18 = vadd.f32 %v2245_v21, %v2157_v20  ;;  %v2334_v27 = vpop.f32.mrf.mxu3 }
 0x1f0   : > { %v2158_v61 = vpop.f32.mrf.mxu1 }
 0x1f1   : > { %v2335_v10 = vadd.f32 %v2334_v27, %v2246_v18  ;;  %v2159_v13 = vadd.f32 %v2158_v61, %v5286_v35 }
 0x1f2   : > { %v2425_v22 = vpop.f32.mrf.mxu0 }
 0x1f3   : > { %v5527_v33 = vadd.f32 %v2423_v41, %v2335_v10 }
 0x1f5   : > { %v4246_v48 = vmul.f32 -1.442695, %v5527_v33 }
 0x1f6   : > { %v2247_v3 = vpop.f32.mrf.mxu2 }
 0x1f7   : > { %4704 = vpow2.f32 %v4246_v48  ;;  %v2248_v36 = vadd.f32 %v2247_v3, %v2159_v13  ;;  %v2336_v1 = vpop.f32.mrf.mxu3  ;;  %v3776_v13 = vld [vmem:[%s4900_s9 + $0x2f0] sm:$0xf] }
 0x1f8   : > { %v2161_v31 = vpop.f32.mrf.mxu1 }
 0x1f9   : > { %v2337_v62 = vadd.f32 %v2336_v1, %v2248_v36  ;;  %v2162_v4 = vadd.f32 %v2161_v31, %v5292_v63  ;;  %v4377_v63 = vld [vmem:[%s4900_s9 + $0x308] sm:$0xf0] }
 0x1fa   : > { %v2428_v9 = vpop.f32.mrf.mxu0 }
 0x1fb   : > { %v5539_v7 = vadd.f32 %v2425_v22, %v2337_v62  ;;  %2200 = vmatmul.bf16.gmra.mxu1 %v3729_v54  ;;  %2289 = vmatmul.bf16.gmra.mxu2 %v3733_v38  ;;  %v4372_v22 = vld [vmem:[%s4900_s9 + $0x2e4] sm:$0xf]  ;;  %v3773_v62 = vor.u32 %v4373_v23, %v3770_v32 }
 0x1fc   : > { %2378 = vmatmul.bf16.gmra.mxu3 %v3737_v39  ;;  %v3765_v1 = vor.u32 %v4372_v22, %v3762_v56  ;;  %v3769_v39 = vor.u32 %v4377_v63, %v3768_v0 }
 0x1fd   : > { %2467 = vmatmul.bf16.gmra.mxu0 %v3741_v5  ;;  %v4705_v35 = vpop.eup %4704  ;;  %v4247_v55 = vmul.f32 -1.442695, %v5539_v7 }
 0x1fe   : > { %v5543_v43 = vadd.f32 1.0, %v4705_v35  ;;  %v2250_v41 = vpop.f32.mrf.mxu2 }
 0x1ff   : > { %4706 = vpow2.f32 %v4247_v55  ;;  %v2251_v20 = vadd.f32 %v2250_v41, %v2162_v4  ;;  %v2339_v21 = vpop.f32.mrf.mxu3 }
 0x200   : > { %4708 = vrcp.f32 %v5543_v43  ;;  %v2163_v18 = vpop.f32.mrf.mxu1  ;;  %vm2700_vm1 = vweird.f32 %v5543_v43  ;;  %v2704_v0 = vand.u32 2147483647, %v5543_v43 }
 0x201   : > { %v2340_v27 = vadd.f32 %v2339_v21, %v2251_v20  ;;  %v2164_v48 = vadd.f32 %v2163_v18, %v5302_v47 }
 0x202   : > { %v2430_v61 = vpop.f32.mrf.mxu0  ;;  %vm2705_vm3 = vcmp.eq.f32.partialorder %v2704_v0, 8.507059e+37 }
 0x203   : > { %v5546_v10 = vadd.f32 %v2428_v9, %v2340_v27  ;;  %v3777_v9 = vor.u32 %v4378_v14, %v3776_v13  ;;  %v4497_v13 = vld [vmem:[%s5571_s6] sm:$0xff]  }
 0x205   : > { %v4707_v12 = vpop.eup %4706  ;;  %v4248_v34 = vmul.f32 -1.442695, %v5546_v10 }
 0x206   : > { %v4709_v60 = vpop.eup %4708  ;;  %v5558_v3 = vadd.f32 1.0, %v4707_v12  ;;  %v2252_v36 = vpop.f32.mrf.mxu2  ;;  %v4387_v12 = vld [vmem:[%s4900_s9 + $0x358] sm:$0xf0] }
 0x207   : > { %v2696_v54 = vmul.f32 %v4709_v60, %v5543_v43  ;;  %4710 = vpow2.f32 %v4248_v34  ;;  %v2253_v38 = vadd.f32 %v2252_v36, %v2164_v48  ;;  %v2341_v31 = vpop.f32.mrf.mxu3  ;;  %vm2701_vm0 = vweird.f32 %v4709_v60  ;;  %v4381_v48 = vld [vmem:[%s4900_s9 + $0x32c] sm:$0xf] }
 0x208   : > { %4712 = vrcp.f32 %v5558_v3  ;;  %v2166_v5 = vpop.f32.mrf.mxu1  ;;  %vm5580_vm2 = vmor %vm2700_vm1, %vm2701_vm0  ;;  %vm2715_vm5 = vweird.f32 %v5558_v3 }
 0x209   : > { %v2697_v47 = vsub.f32 1.0, %v2696_v54  ;;  %v2342_v35 = vadd.f32 %v2341_v31, %v2253_v38  ;;  %v2167_v23 = vadd.f32 %v2166_v5, %v5320_v2  ;;  %v3798_v2 = vld [vmem:[%s4900_s9 + $0x34c] sm:$0xf0]  ;;  %v2719_v31 = vand.u32 2147483647, %v5558_v3 }
 0x20a   : > { %v2433_v55 = vpop.f32.mrf.mxu0  ;;  %v3804_v54 = vld [vmem:[%s4900_s9 + $0x330] sm:$0xf]  ;;  %v4386_v5 = vld [vmem:[%s4900_s9 + $0x350] sm:$0xf0] }
 0x20b   : > { %v2698_v4 = vmul.f32 %v4709_v60, %v2697_v47  ;;  %v5563_v41 = vadd.f32 %v2430_v61, %v2342_v35  ;;  %2205 = vmatmul.bf16.gmra.mxu1 %v3765_v1  ;;  %2294 = vmatmul.bf16.gmra.mxu2 %v3769_v39  ;;  %v2706_v61 = vand.u32 2147483648, %v5543_v43  ;;  %v2721_v39 = vand.u32 2147483648, %v5558_v3  ;;  %v4382_v47 = vld [vmem:[%s4900_s9 + $0x334] sm:$0xf]  ;;  %v3806_v35 = vld [vmem:[%s4900_s9 + $0x354] sm:$0xf0] }
 0x20c   : > { %2383 = vmatmul.bf16.gmra.mxu3 %v3773_v62  ;;  %vm2720_vm7 = vcmp.eq.f32.partialorder %v2719_v31, 8.507059e+37 }
 0x20d   : > { %2472 = vmatmul.bf16.gmra.mxu0 %v3777_v9  ;;  %v4711_v20 = vpop.eup %4710  ;;  %v2699_v21 = vadd.f32 %v4709_v60, %v2698_v4  ;;  %v4249_v18 = vmul.f32 -1.442695, %v5563_v41  ;;  %v2707_v38 = vor.u32 1.1754944e-38, %v2706_v61 }
 0x20e   : > { %v4713_v27 = vpop.eup %4712  ;;  %v5575_v22 = vadd.f32 1.0, %v4711_v20  ;;  %v2255_v56 = vpop.f32.mrf.mxu2  ;;  %v4499_v20 = vunpack.c.h.bf16 %v4497_v13 }
 0x20f   : > { %v2711_v63 = vmul.f32 %v4713_v27, %v5558_v3  ;;  %4714 = vpow2.f32 %v4249_v18  ;;  %v2344_v32 = vpop.f32.mrf.mxu3  ;;  %v2703_v43 = vsel %vm5580_vm2, %v4709_v60, %v2699_v21  ;;  %v2256_v36 = vadd.f32 %v2255_v56, %v2167_v23  ;;  %v3812_v23 = vld [vmem:[%s4900_s9 + $0x338] sm:$0xf] }
 0x210   : > { %4716 = vrcp.f32 %v5575_v22  ;;  %v2168_v34 = vpop.f32.mrf.mxu1  ;;  %vm2716_vm4 = vweird.f32 %v4713_v27  ;;  %v4498_v60 = vunpack.c.l.bf16 %v4497_v13  ;;  %v2708_v4 = vsel %vm2705_vm3, %v2707_v38, %v2703_v43 }
 0x211   : > { %v2712_v14 = vsub.f32 1.0, %v2711_v63  ;;  %v2345_v9 = vadd.f32 %v2344_v32, %v2256_v36  ;;  %v3801_v21 = vor.u32 %v4381_v48, %v3798_v2  ;;  %v3805_v63 = vor.u32 %v4386_v5, %v3804_v54  ;;  %vm2717_vm6 = vmor %vm2715_vm5, %vm2716_vm4 }
 0x212   : > { %v2435_v1 = vpop.f32.mrf.mxu0  ;;  %v2722_v32 = vor.u32 1.1754944e-38, %v2721_v39  ;;  %v3809_v13 = vor.u32 %v4382_v47, %v3806_v35  ;;  %v3175_v48 = vmul.f32 %v2708_v4, %v5527_v33  ;;  %v2169_v38 = vadd.f32 %v2168_v34, %v5330_v28 }
 0x213   : > { %v2713_v62 = vmul.f32 %v4713_v27, %v2712_v14  ;;  %v5597_v61 = vadd.f32 %v2433_v55, %v2345_v9  ;;  %v3813_v39 = vor.u32 %v4387_v12, %v3812_v23  ;;  %v2734_v28 = vand.u32 2147483647, %v5575_v22 }
 0x214   : > { %v3207_v9 = vadd.f32 %v4498_v60, %v3175_v48  ;;  %vm2730_vm9 = vweird.f32 %v5575_v22  ;;  %v4640_v48 = vld [vmem:[%s5571_s6 + $0x8] sm:$0xff]  }
 0x215   : > { %v4715_v18 = vpop.eup %4714  ;;  %v2714_v56 = vadd.f32 %v4713_v27, %v2713_v62  ;;  %v4250_v55 = vmul.f32 -1.442695, %v5597_v61  ;;  %vm5642_vm11 = vcmp.eq.f32.partialorder %v2734_v28, 8.507059e+37  ;;  %v4503_v28 = vunpack.c.h.bf16 %v4640_v48 }
 0x216   : > { %v5601_v0 = vpop.eup %4716  ;;  %v5604_v14 = vadd.f32 1.0, %v4715_v18  ;;  %v2257_v43 = vpop.f32.mrf.mxu2 }
 0x217   : > { %v2718_v36 = vsel %vm2717_vm6, %v4713_v27, %v2714_v56  ;;  %v2726_v3 = vmul.f32 %v5601_v0, %v5575_v22  ;;  %v2346_v2 = vpop.f32.mrf.mxu3  ;;  %v2258_v27 = vadd.f32 %v2257_v43, %v2169_v38  ;;  %vm2731_vm8 = vweird.f32 %v5601_v0 }
 0x218   : > { %v2723_v54 = vsel %vm2720_vm7, %v2722_v32, %v2718_v36  ;;  %4718 = vrcp.f32 %v5604_v14  ;;  %v2171_v31 = vpop.f32.mrf.mxu1  ;;  %vm5631_vm10 = vmor %vm2730_vm9, %vm2731_vm8  ;;  %v2749_v38 = vand.u32 2147483647, %v5604_v14  ;;  %vm2745_vm13 = vweird.f32 %v5604_v14 }
 0x219   : > { %v3176_v5 = vmul.f32 %v2723_v54, %v5539_v7  ;;  %v2727_v62 = vsub.f32 1.0, %v2726_v3  ;;  %4720 = vpow2.f32 %v4250_v55  ;;  %v2347_v7 = vadd.f32 %v2346_v2, %v2258_v27  ;;  %v3840_v27 = vld [vmem:[%s4900_s9 + $0x378] sm:$0xf] }
 0x21a   : > { %v2438_v33 = vpop.f32.mrf.mxu0  ;;  %v2172_v4 = vadd.f32 %v2171_v31, %v5336_v57  ;;  %v2751_v31 = vand.u32 2147483648, %v5604_v14  ;;  %vm2750_vm15 = vcmp.eq.f32.partialorder %v2749_v38, 8.507059e+37 }
 0x21b   : > { %v3208_v47 = vadd.f32 %v4499_v20, %v3176_v5  ;;  %v2728_v35 = vmul.f32 %v5601_v0, %v2727_v62  ;;  %2210 = vmatmul.bf16.gmra.mxu1 %v3801_v21  ;;  %2299 = vmatmul.bf16.gmra.mxu2 %v3805_v63  ;;  %v2736_v21 = vand.u32 2147483648, %v5575_v22  ;;  %v5626_v18 = vadd.f32 %v2435_v1, %v2347_v7  ;;  %v3834_v62 = vld [vmem:[%s4900_s9 + $0x394] sm:$0xf0]  ;;  %v4391_v7 = vld [vmem:[%s4900_s9 + $0x37c] sm:$0xf] }
 0x21c   : > { %2388 = vmatmul.bf16.gmra.mxu3 %v3809_v13 }
 0x21d   : > { %2477 = vmatmul.bf16.gmra.mxu0 %v3813_v39  ;;  %v4563_v34 = vpack.c.bf16 %v3208_v47, %v3207_v9  ;;  %v2729_v60 = vadd.f32 %v5601_v0, %v2728_v35  ;;  %v4251_v13 = vmul.f32 -1.442695, %v5626_v18  ;;  %v2737_v54 = vor.u32 1.1754944e-38, %v2736_v21  ;;  %v4390_v39 = vld [vmem:[%s4900_s9 + $0x374] sm:$0xf] }
 0x21e   : > { %v4719_v20 = vpop.eup %4718  ;;  %v2260_v56 = vpop.f32.mrf.mxu2  ;;  %v4395_v9 = vld [vmem:[%s4900_s9 + $0x398] sm:$0xf0]  ;;  %v4502_v47 = vunpack.c.l.bf16 %v4640_v48 }
 0x21f   : > { %v4721_v63 = vpop.eup %4720  ;;  %4564 = vst [vmem:[%s5619_s10] sm:$0xff] %v4563_v34   ;;  %v2741_v23 = vmul.f32 %v4719_v20, %v5604_v14  ;;  %v2261_v12 = vadd.f32 %v2260_v56, %v2172_v4  ;;  %v2349_v32 = vpop.f32.mrf.mxu3  ;;  %v2733_v22 = vsel %vm5631_vm10, %v5601_v0, %v2729_v60  ;;  %vm2746_vm12 = vweird.f32 %v4719_v20  ;;  %v3842_v34 = vld [vmem:[%s4900_s9 + $0x39c] sm:$0xf0] }
 0x220   : > { %v5635_v57 = vadd.f32 1.0, %v4721_v63  ;;  %v2173_v1 = vpop.f32.mrf.mxu1  ;;  %v2738_v35 = vsel %vm5642_vm11, %v2737_v54, %v2733_v22  ;;  %v3848_v56 = vld [vmem:[%s4900_s9 + $0x380] sm:$0xf]  ;;  %vm2747_vm14 = vmor %vm2745_vm13, %vm2746_vm12  ;;  %v2752_v63 = vor.u32 1.1754944e-38, %v2751_v31 }
 0x221   : > { %v2742_v3 = vsub.f32 1.0, %v2741_v23  ;;  %v2350_v55 = vadd.f32 %v2349_v32, %v2261_v12  ;;  %v2174_v21 = vadd.f32 %v2173_v1, %v5345_v29  ;;  %v3837_v12 = vor.u32 %v4390_v39, %v3834_v62 }
 0x222   : > { %v2440_v2 = vpop.f32.mrf.mxu0  ;;  %4722 = vrcp.f32 %v5635_v57  ;;  %v3841_v32 = vor.u32 %v4395_v9, %v3840_v27  ;;  %v3177_v43 = vmul.f32 %v2738_v35, %v5546_v10  ;;  %v3845_v29 = vor.u32 %v4391_v7, %v3842_v34 }
 0x223   : > { %v2743_v5 = vmul.f32 %v4719_v20, %v2742_v3  ;;  %4724 = vpow2.f32 %v4251_v13  ;;  %v5650_v0 = vadd.f32 %v2438_v33, %v2350_v55  ;;  %v4396_v33 = vld [vmem:[%s4900_s9 + $0x3a0] sm:$0xf0]  ;;  %vm2760_vm1 = vweird.f32 %v5635_v57 }
 0x224   : > { %v3849_v1 = vor.u32 %v4396_v33, %v3848_v56  ;;  %v3209_v10 = vadd.f32 %v4502_v47, %v3177_v43 }
 0x225   : > { %v2744_v60 = vadd.f32 %v4719_v20, %v2743_v5  ;;  %v4252_v4 = vmul.f32 -1.442695, %v5650_v0 }
 0x226   : > { %v2262_v23 = vpop.f32.mrf.mxu2 }
 0x227   : > { %v2748_v13 = vsel %vm2747_vm14, %v4719_v20, %v2744_v60  ;;  %4726 = vpow2.f32 %v4252_v4  ;;  %v2263_v48 = vadd.f32 %v2262_v23, %v2174_v21  ;;  %v2351_v22 = vpop.f32.mrf.mxu3  ;;  %v2764_v21 = vand.u32 2147483647, %v5635_v57  ;;  %v4399_v23 = vld [vmem:[%s4900_s9 + $0x3bc] sm:$0xf] }
 0x228   : > { %v5666_v14 = vpop.eup %4722  ;;  %v2753_v36 = vsel %vm2750_vm15, %v2752_v63, %v2748_v13  ;;  %v2176_v3 = vpop.f32.mrf.mxu1  ;;  %v3876_v13 = vld [vmem:[%s4900_s9 + $0x3c0] sm:$0xf] }
 0x229   : > { %v4725_v55 = vpop.eup %4724  ;;  %v3178_v54 = vmul.f32 %v2753_v36, %v5563_v41  ;;  %v2756_v38 = vmul.f32 %v5666_v14, %v5635_v57  ;;  %v2352_v31 = vadd.f32 %v2351_v22, %v2263_v48  ;;  %v2177_v34 = vadd.f32 %v2176_v3, %v5362_v53  ;;  %v4404_v48 = vld [vmem:[%s4900_s9 + $0x3e0] sm:$0xf0] }
 0x22a   : > { %v2443_v39 = vpop.f32.mrf.mxu0  ;;  %v5671_v5 = vadd.f32 1.0, %v4725_v55  ;;  %vm2761_vm0 = vweird.f32 %v5666_v14  ;;  %v2766_v53 = vand.u32 2147483648, %v5635_v57  ;;  %v4400_v3 = vld [vmem:[%s4900_s9 + $0x3c4] sm:$0xf]  ;;  %vm2765_vm3 = vcmp.eq.f32.partialorder %v2764_v21, 8.507059e+37 }
 0x22b   : > { %v3210_v20 = vadd.f32 %v4503_v28, %v3178_v54  ;;  %v2757_v62 = vsub.f32 1.0, %v2756_v38  ;;  %v5673_v27 = vadd.f32 %v2440_v2, %v2352_v31  ;;  %2215 = vmatmul.bf16.gmra.mxu1 %v3837_v12  ;;  %2304 = vmatmul.bf16.gmra.mxu2 %v3841_v32  ;;  %v3870_v12 = vld [vmem:[%s4900_s9 + $0x3dc] sm:$0xf0]  ;;  %vm5692_vm2 = vmor %vm2760_vm1, %vm2761_vm0  ;;  %v3884_v54 = vld [vmem:[%s4900_s9 + $0x3c8] sm:$0xf] }
 0x22c   : > { %4728 = vrcp.f32 %v5671_v5  ;;  %2393 = vmatmul.bf16.gmra.mxu3 %v3845_v29  ;;  %v3878_v29 = vld [vmem:[%s4900_s9 + $0x3e4] sm:$0xf0]  ;;  %v3873_v55 = vor.u32 %v4399_v23, %v3870_v12  ;;  %v4405_v38 = vld [vmem:[%s4900_s9 + $0x3e8] sm:$0xf0]  ;;  %vm2775_vm5 = vweird.f32 %v5671_v5 }
 0x22d   : > { %2482 = vmatmul.bf16.gmra.mxu0 %v3849_v1  ;;  %v4727_v41 = vpop.eup %4726  ;;  %v4568_v9 = vpack.c.bf16 %v3210_v20, %v3209_v10  ;;  %v2758_v35 = vmul.f32 %v5666_v14, %v2757_v62  ;;  %v4253_v7 = vmul.f32 -1.442695, %v5673_v27  ;;  %v2767_v1 = vor.u32 1.1754944e-38, %v2766_v53 }
 0x22e   : > { %v5679_v47 = vadd.f32 1.0, %v4727_v41  ;;  %v2265_v2 = vpop.f32.mrf.mxu2  ;;  %v2779_v20 = vand.u32 2147483647, %v5671_v5  ;;  %v3877_v41 = vor.u32 %v4404_v48, %v3876_v13  ;;  %v3881_v53 = vor.u32 %v4400_v3, %v3878_v29 }
 0x22f   : > { %4655 = vst [vmem:[%s5619_s10 + $0x8] sm:$0xff] %v4568_v9   ;;  %v2759_v28 = vadd.f32 %v5666_v14, %v2758_v35  ;;  %4730 = vpow2.f32 %v4253_v7  ;;  %v2266_v60 = vadd.f32 %v2265_v2, %v2177_v34  ;;  %v2354_v4 = vpop.f32.mrf.mxu3  ;;  %v4641_v2 = vld [vmem:[%s5571_s6 + $0x10] sm:$0xff]  }
 0x230   : > { %4732 = vrcp.f32 %v5679_v47  ;;  %v2178_v56 = vpop.f32.mrf.mxu1  ;;  %v4507_v48 = vunpack.c.h.bf16 %v4641_v2  ;;  %vm2780_vm7 = vcmp.eq.f32.partialorder %v2779_v20, 8.507059e+37  ;;  %vm2790_vm9 = vweird.f32 %v5679_v47 }
 0x231   : > { %v2355_v33 = vadd.f32 %v2354_v4, %v2266_v60  ;;  %v2763_v22 = vsel %vm5692_vm2, %v5666_v14, %v2759_v28  ;;  %v2179_v7 = vadd.f32 %v2178_v56, %v5371_v24  ;;  %v4506_v56 = vunpack.c.l.bf16 %v4641_v2 }
 0x232   : > { %v5688_v63 = vpop.f32.mrf.mxu0  ;;  %v4729_v32 = vpop.eup %4728  ;;  %v2768_v9 = vsel %vm2765_vm3, %v2767_v1, %v2763_v22 }
 0x233   : > { %v2771_v57 = vmul.f32 %v4729_v32, %v5671_v5  ;;  %v5702_v36 = vadd.f32 %v2443_v39, %v2355_v33  ;;  %v2781_v39 = vand.u32 2147483648, %v5671_v5  ;;  %vm2776_vm4 = vweird.f32 %v4729_v32 }
 0x234   : > { %v3885_v33 = vor.u32 %v4405_v38, %v3884_v54  ;;  %v3179_v13 = vmul.f32 %v2768_v9, %v5597_v61  ;;  %vm2777_vm6 = vmor %vm2775_vm5, %vm2776_vm4  ;;  %v2796_v38 = vand.u32 2147483648, %v5679_v47 }
 0x235   : > { %v4731_v31 = vpop.eup %4730  ;;  %v2772_v10 = vsub.f32 1.0, %v2771_v57  ;;  %v4254_v62 = vmul.f32 -1.442695, %v5702_v36  ;;  %v2782_v22 = vor.u32 1.1754944e-38, %v2781_v39 }
 0x236   : > { %v5710_v14 = vpop.eup %4732  ;;  %v5713_v35 = vadd.f32 1.0, %v4731_v31  ;;  %v2267_v34 = vpop.f32.mrf.mxu2  ;;  %v2794_v31 = vand.u32 2147483647, %v5679_v47 }
 0x237   : > { %v2773_v28 = vmul.f32 %v4729_v32, %v2772_v10  ;;  %v2786_v60 = vmul.f32 %v5710_v14, %v5679_v47  ;;  %4734 = vpow2.f32 %v4254_v62  ;;  %v2356_v4 = vpop.f32.mrf.mxu3  ;;  %v2268_v43 = vadd.f32 %v2267_v34, %v2179_v7  ;;  %v4642_v47 = vld [vmem:[%s5571_s6 + $0x18] sm:$0xff]  }
 0x238   : > { %4736 = vrcp.f32 %v5713_v35  ;;  %v2181_v21 = vpop.f32.mrf.mxu1  ;;  %vm2791_vm8 = vweird.f32 %v5710_v14  ;;  %v3211_v62 = vadd.f32 %v4506_v56, %v3179_v13  ;;  %vm2795_vm11 = vcmp.eq.f32.partialorder %v2794_v31, 8.507059e+37  ;;  %v4413_v13 = vld [vmem:[%s4900_s9 + $0x428] sm:$0xf0] }
 0x239   : > { %v2774_v23 = vadd.f32 %v4729_v32, %v2773_v28  ;;  %v2787_v12 = vsub.f32 1.0, %v2786_v60  ;;  %v2357_v3 = vadd.f32 %v2356_v4, %v2268_v43  ;;  %vm5739_vm10 = vmor %vm2790_vm9, %vm2791_vm8  ;;  %v2182_v7 = vadd.f32 %v2181_v21, %v5376_v6 }
 0x23a   : > { %v5721_v24 = vpop.f32.mrf.mxu0  ;;  %v2797_v28 = vor.u32 1.1754944e-38, %v2796_v38  ;;  %v2809_v56 = vand.u32 2147483647, %v5713_v35  ;;  %vm2805_vm13 = vweird.f32 %v5713_v35  ;;  %v4414_v38 = vld [vmem:[%s4900_s9 + $0x430] sm:$0xf0] }
 0x23b   : > { %v2778_v57 = vsel %vm2777_vm6, %v4729_v32, %v2774_v23  ;;  %v2788_v1 = vmul.f32 %v5710_v14, %v2787_v12  ;;  %2220 = vmatmul.bf16.gmra.mxu1 %v3873_v55  ;;  %2309 = vmatmul.bf16.gmra.mxu2 %v3877_v41  ;;  %v5735_v10 = vadd.f32 %v5688_v63, %v2357_v3  ;;  %v2811_v23 = vand.u32 2147483648, %v5713_v35 }
 0x23c   : > { %v2783_v29 = vsel %vm2780_vm7, %v2782_v22, %v2778_v57  ;;  %2398 = vmatmul.bf16.gmra.mxu3 %v3881_v53  ;;  %v4408_v53 = vld [vmem:[%s4900_s9 + $0x404] sm:$0xf]  ;;  %v4511_v22 = vunpack.c.h.bf16 %v4642_v47  ;;  %vm2810_vm15 = vcmp.eq.f32.partialorder %v2809_v56, 8.507059e+37 }
 0x23d   : > { %2487 = vmatmul.bf16.gmra.mxu0 %v3885_v33  ;;  %v4735_v5 = vpop.eup %4734  ;;  %v3180_v61 = vmul.f32 %v2783_v29, %v5626_v18  ;;  %v2789_v54 = vadd.f32 %v5710_v14, %v2788_v1  ;;  %v3906_v33 = vld [vmem:[%s4900_s9 + $0x424] sm:$0xf0]  ;;  %v4255_v12 = vmul.f32 -1.442695, %v5735_v10  ;;  %v4409_v1 = vld [vmem:[%s4900_s9 + $0x40c] sm:$0xf] }
 0x23e   : > { %v4737_v32 = vpop.eup %4736  ;;  %v5732_v55 = vadd.f32 1.0, %v4735_v5  ;;  %v2270_v20 = vpop.f32.mrf.mxu2  ;;  %v3909_v5 = vor.u32 %v4408_v53, %v3906_v33 }
 0x23f   : > { %v3212_v41 = vadd.f32 %v4507_v48, %v3180_v61  ;;  %v2801_v9 = vmul.f32 %v4737_v32, %v5713_v35  ;;  %v2359_v39 = vpop.f32.mrf.mxu3  ;;  %v2793_v63 = vsel %vm5739_vm10, %v5710_v14, %v2789_v54  ;;  %v2271_v43 = vadd.f32 %v2270_v20, %v2182_v7  ;;  %v3912_v14 = vld [vmem:[%s4900_s9 + $0x408] sm:$0xf]  ;;  %v3914_v61 = vld [vmem:[%s4900_s9 + $0x42c] sm:$0xf0] }
 0x240   : > { %4738 = vrcp.f32 %v5732_v55  ;;  %v2183_v34 = vpop.f32.mrf.mxu1  ;;  %v2798_v6 = vsel %vm2795_vm11, %v2797_v28, %v2793_v63  ;;  %vm2806_vm12 = vweird.f32 %v4737_v32  ;;  %v4510_v48 = vunpack.c.l.bf16 %v4642_v47  ;;  %v3920_v54 = vld [vmem:[%s4900_s9 + $0x410] sm:$0xf] }
 0x241   : > { %v4573_v2 = vpack.c.bf16 %v3212_v41, %v3211_v62  ;;  %v2802_v60 = vsub.f32 1.0, %v2801_v9  ;;  %4740 = vpow2.f32 %v4255_v12  ;;  %v2360_v57 = vadd.f32 %v2359_v39, %v2271_v43  ;;  %vm2807_vm14 = vmor %vm2805_vm13, %vm2806_vm12 }
 0x242   : > { %v2450_v4 = vpop.f32.mrf.mxu0  ;;  %v2184_v29 = vadd.f32 %v2183_v34, %v5385_v17  ;;  %v3181_v20 = vmul.f32 %v2798_v6, %v5650_v0  ;;  %v2812_v62 = vor.u32 1.1754944e-38, %v2811_v23  ;;  %v3913_v9 = vor.u32 %v4413_v13, %v3912_v14 }
 0x243   : > { %4656 = vst [vmem:[%s5619_s10 + $0x10] sm:$0xff] %v4573_v2   ;;  %v2803_v21 = vmul.f32 %v4737_v32, %v2802_v60  ;;  %v5769_v41 = vadd.f32 %v5721_v24, %v2360_v57  ;;  %v3917_v0 = vor.u32 %v4409_v1, %v3914_v61  ;;  %v3921_v2 = vor.u32 %v4414_v38, %v3920_v54  ;;  %v4417_v1 = vld [vmem:[%s4900_s9 + $0x44c] sm:$0xf]  ;;  %v3942_v54 = vld [vmem:[%s4900_s9 + $0x46c] sm:$0xf0] }
 0x244   : > { %v2826_v57 = vand.u32 2147483648, %v5732_v55  ;;  %vm2820_vm1 = vweird.f32 %v5732_v55 }
 0x245   : > { %v2804_v3 = vadd.f32 %v4737_v32, %v2803_v21  ;;  %v4256_v7 = vmul.f32 -1.442695, %v5769_v41 }
 0x246   : > { %v5764_v31 = vpop.eup %4738  ;;  %v2272_v18 = vpop.f32.mrf.mxu2 }
 0x247   : > { %v2808_v39 = vsel %vm2807_vm14, %v4737_v32, %v2804_v3  ;;  %v2816_v17 = vmul.f32 %v5764_v31, %v5732_v55  ;;  %v2273_v35 = vadd.f32 %v2272_v18, %v2184_v29  ;;  %v2361_v47 = vpop.f32.mrf.mxu3  ;;  %v4741_v33 = vpop.eup %4740  ;;  %v3213_v32 = vadd.f32 %v4510_v48, %v3181_v20  ;;  %v3948_v20 = vld [vmem:[%s4900_s9 + $0x450] sm:$0xf] }
 0x248   : > { %v2813_v63 = vsel %vm2810_vm15, %v2812_v62, %v2808_v39  ;;  %v2186_v34 = vpop.f32.mrf.mxu1  ;;  %4742 = vpow2.f32 %v4256_v7  ;;  %v5776_v43 = vadd.f32 1.0, %v4741_v33  ;;  %vm2821_vm0 = vweird.f32 %v5764_v31  ;;  %v4422_v62 = vld [vmem:[%s4900_s9 + $0x470] sm:$0xf0]  ;;  %v3950_v39 = vld [vmem:[%s4900_s9 + $0x474] sm:$0xf0] }
 0x249   : > { %v3182_v28 = vmul.f32 %v2813_v63, %v5673_v27  ;;  %v2817_v60 = vsub.f32 1.0, %v2816_v17  ;;  %v2362_v24 = vadd.f32 %v2361_v47, %v2273_v35  ;;  %v2187_v6 = vadd.f32 %v2186_v34, %v5390_v30  ;;  %vm5793_vm2 = vmor %vm2820_vm1, %vm2821_vm0  ;;  %v3956_v63 = vld [vmem:[%s4900_s9 + $0x458] sm:$0xf]  ;;  %v4423_v7 = vld [vmem:[%s4900_s9 + $0x478] sm:$0xf0] }
 0x24a   : > { %v2453_v53 = vpop.f32.mrf.mxu0  ;;  %4744 = vrcp.f32 %v5776_v43  ;;  %v2824_v3 = vand.u32 2147483647, %v5732_v55  ;;  %v4418_v55 = vld [vmem:[%s4900_s9 + $0x454] sm:$0xf]  ;;  %v2827_v17 = vor.u32 1.1754944e-38, %v2826_v57  ;;  %vm2835_vm5 = vweird.f32 %v5776_v43 }
 0x24b   : > { %v3214_v23 = vadd.f32 %v4511_v22, %v3182_v28  ;;  %v2818_v12 = vmul.f32 %v5764_v31, %v2817_v60  ;;  %v5778_v14 = vadd.f32 %v2450_v4, %v2362_v24  ;;  %2225 = vmatmul.bf16.gmra.mxu1 %v3909_v5  ;;  %2314 = vmatmul.bf16.gmra.mxu2 %v3913_v9  ;;  %v4643_v60 = vld [vmem:[%s5571_s6 + $0x20] sm:$0xff]  }
 0x24c   : > { %2403 = vmatmul.bf16.gmra.mxu3 %v3917_v0  ;;  %vm2825_vm3 = vcmp.eq.f32.partialorder %v2824_v3, 8.507059e+37  ;;  %v3945_v0 = vor.u32 %v4417_v1, %v3942_v54 }
 0x24d   : > { %2492 = vmatmul.bf16.gmra.mxu0 %v3921_v2  ;;  %v4578_v27 = vpack.c.bf16 %v3214_v23, %v3213_v32  ;;  %v4257_v21 = vmul.f32 -1.442695, %v5778_v14  ;;  %v2819_v13 = vadd.f32 %v5764_v31, %v2818_v12  ;;  %v3949_v2 = vor.u32 %v4422_v62, %v3948_v20 }
 0x24e   : > { %v2275_v56 = vpop.f32.mrf.mxu2  ;;  %v4743_v22 = vpop.eup %4742  ;;  %v3953_v23 = vor.u32 %v4418_v55, %v3950_v39  ;;  %v2841_v12 = vand.u32 2147483648, %v5776_v43 }
 0x24f   : > { %4657 = vst [vmem:[%s5619_s10 + $0x18] sm:$0xff] %v4578_v27   ;;  %v2276_v4 = vadd.f32 %v2275_v56, %v2187_v6  ;;  %v2364_v48 = vpop.f32.mrf.mxu3  ;;  %4746 = vpow2.f32 %v4257_v21  ;;  %v5790_v29 = vadd.f32 1.0, %v4743_v22  ;;  %v2823_v9 = vsel %vm5793_vm2, %v5764_v31, %v2819_v13 }
 0x250   : > { %v2188_v30 = vpop.f32.mrf.mxu1  ;;  %v4745_v18 = vpop.eup %4744  ;;  %v2828_v24 = vsel %vm2825_vm3, %v2827_v17, %v2823_v9  ;;  %v3957_v21 = vor.u32 %v4423_v7, %v3956_v63  ;;  %v2842_v54 = vor.u32 1.1754944e-38, %v2841_v12  ;;  %v4644_v12 = vld [vmem:[%s5571_s6 + $0x28] sm:$0xff]  }
 0x251   : > { %v2365_v5 = vadd.f32 %v2364_v48, %v2276_v4  ;;  %4748 = vrcp.f32 %v5790_v29  ;;  %v2831_v35 = vmul.f32 %v4745_v18, %v5776_v43  ;;  %v2189_v34 = vadd.f32 %v2188_v30, %v5399_v44 }
 0x252   : > { %v2455_v61 = vpop.f32.mrf.mxu0  ;;  %vm2836_vm4 = vweird.f32 %v4745_v18  ;;  %v2839_v44 = vand.u32 2147483647, %v5776_v43  ;;  %v4514_v48 = vunpack.c.l.bf16 %v4643_v60  ;;  %v3183_v22 = vmul.f32 %v2828_v24, %v5702_v36 }
 0x253   : > { %v5806_v47 = vadd.f32 %v2453_v53, %v2365_v5  ;;  %v2832_v31 = vsub.f32 1.0, %v2831_v35  ;;  %v4515_v5 = vunpack.c.h.bf16 %v4643_v60  ;;  %vm2837_vm6 = vmor %vm2835_vm5, %vm2836_vm4  ;;  %vm2850_vm9 = vweird.f32 %v5790_v29 }
 0x254   : > { %vm2840_vm7 = vcmp.eq.f32.partialorder %v2839_v44, 8.507059e+37  ;;  %v3215_v36 = vadd.f32 %v4514_v48, %v3183_v22  ;;  %v4518_v22 = vunpack.c.l.bf16 %v4644_v12 }
 0x255   : > { %v4747_v28 = vpop.eup %4746  ;;  %v4258_v33 = vmul.f32 -1.442695, %v5806_v47  ;;  %v2833_v56 = vmul.f32 %v4745_v18, %v2832_v31 }
 0x256   : > { %v2277_v32 = vpop.f32.mrf.mxu2  ;;  %v5814_v27 = vadd.f32 1.0, %v4747_v28 }
 0x257   : > { %v2278_v53 = vadd.f32 %v2277_v32, %v2189_v34  ;;  %v2366_v6 = vpop.f32.mrf.mxu3  ;;  %4750 = vpow2.f32 %v4258_v33  ;;  %v4749_v4 = vpop.eup %4748  ;;  %v2834_v30 = vadd.f32 %v4745_v18, %v2833_v56 }
 0x258   : > { %v2191_v13 = vpop.f32.mrf.mxu1  ;;  %4752 = vrcp.f32 %v5814_v27  ;;  %v2846_v1 = vmul.f32 %v4749_v4, %v5790_v29  ;;  %vm2851_vm8 = vweird.f32 %v4749_v4  ;;  %v2869_v56 = vand.u32 2147483647, %v5814_v27 }
 0x259   : > { %v2367_v3 = vadd.f32 %v2366_v6, %v2278_v53  ;;  %v2838_v38 = vsel %vm2837_vm6, %v4745_v18, %v2834_v30  ;;  %v2192_v55 = vadd.f32 %v2191_v13, %v5404_v15  ;;  %vm5832_vm10 = vmor %vm2850_vm9, %vm2851_vm8  ;;  %vm2865_vm13 = vweird.f32 %v5814_v27 }
 0x25a   : > { %v2458_v57 = vpop.f32.mrf.mxu0  ;;  %v2847_v20 = vsub.f32 1.0, %v2846_v1  ;;  %v2843_v9 = vsel %vm2840_vm7, %v2842_v54, %v2838_v38  ;;  %vm2870_vm15 = vcmp.eq.f32.partialorder %v2869_v56, 8.507059e+37 }
 0x25b   : > { %2230 = vmatmul.bf16.gmra.mxu1 %v3945_v0  ;;  %2319 = vmatmul.bf16.gmra.mxu2 %v3949_v2  ;;  %v5821_v62 = vadd.f32 %v2455_v61, %v2367_v3  ;;  %v3184_v39 = vmul.f32 %v2843_v9, %v5735_v10  ;;  %v2856_v61 = vand.u32 2147483648, %v5790_v29  ;;  %v2854_v10 = vand.u32 2147483647, %v5790_v29 }
 0x25c   : > { %2408 = vmatmul.bf16.gmra.mxu3 %v3953_v23  ;;  %v2848_v17 = vmul.f32 %v4749_v4, %v2847_v20  ;;  %v2871_v29 = vand.u32 2147483648, %v5814_v27  ;;  %v4519_v3 = vunpack.c.h.bf16 %v4644_v12 }
 0x25d   : > { %2497 = vmatmul.bf16.gmra.mxu0 %v3957_v21  ;;  %v4751_v43 = vpop.eup %4750  ;;  %v4259_v35 = vmul.f32 -1.442695, %v5821_v62  ;;  %v3216_v2 = vadd.f32 %v4515_v5, %v3184_v39  ;;  %v2857_v53 = vor.u32 1.1754944e-38, %v2856_v61  ;;  %vm2855_vm11 = vcmp.eq.f32.partialorder %v2854_v10, 8.507059e+37 }
 0x25e   : > { %v2280_v63 = vpop.f32.mrf.mxu2  ;;  %v4753_v7 = vpop.eup %4752  ;;  %v5828_v18 = vadd.f32 1.0, %v4751_v43  ;;  %v2849_v15 = vadd.f32 %v4749_v4, %v2848_v17  ;;  %v2872_v5 = vor.u32 1.1754944e-38, %v2871_v29 }
 0x25f   : > { %v2281_v34 = vadd.f32 %v2280_v63, %v2192_v55  ;;  %v2369_v0 = vpop.f32.mrf.mxu3  ;;  %v2861_v28 = vmul.f32 %v4753_v7, %v5814_v27  ;;  %v4583_v33 = vpack.c.bf16 %v3216_v2, %v3215_v36  ;;  %vm2866_vm12 = vweird.f32 %v4753_v7 }
 0x260   : > { %v2193_v60 = vpop.f32.mrf.mxu1  ;;  %4754 = vrcp.f32 %v5828_v18  ;;  %v2853_v32 = vsel %vm5832_vm10, %v4749_v4, %v2849_v15  ;;  %vm2867_vm14 = vmor %vm2865_vm13, %vm2866_vm12  ;;  %vm2880_vm1 = vweird.f32 %v5828_v18 }
 0x261   : > { %v2862_v23 = vsub.f32 1.0, %v2861_v28  ;;  %4756 = vpow2.f32 %v4259_v35  ;;  %v2370_v6 = vadd.f32 %v2369_v0, %v2281_v34  ;;  %4658 = vst [vmem:[%s5619_s10 + $0x20] sm:$0xff] %v4583_v33   ;;  %v2858_v44 = vsel %vm2855_vm11, %v2857_v53, %v2853_v32 }
 0x262   : > { %v2460_v31 = vpop.f32.mrf.mxu0  ;;  %v2194_v48 = vadd.f32 %v2193_v60, %v5413_v51  ;;  %v3185_v9 = vmul.f32 %v2858_v44, %v5769_v41  ;;  %v2886_v33 = vand.u32 2147483648, %v5828_v18 }
 0x263   : > { %v2863_v21 = vmul.f32 %v4753_v7, %v2862_v23  ;;  %v5843_v13 = vadd.f32 %v2458_v57, %v2370_v6 }
 0x264   : > { %v3217_v61 = vadd.f32 %v4518_v22, %v3185_v9  ;;  %v2887_v56 = vor.u32 1.1754944e-38, %v2886_v33 }
 0x265   : > { %v2864_v4 = vadd.f32 %v4753_v7, %v2863_v21  ;;  %v4260_v54 = vmul.f32 -1.442695, %v5843_v13 }
 0x266   : > { %v2282_v30 = vpop.f32.mrf.mxu2  ;;  %v4755_v1 = vpop.eup %4754 }
 0x267   : > { %v2283_v38 = vadd.f32 %v2282_v30, %v2194_v48  ;;  %v2371_v20 = vpop.f32.mrf.mxu3  ;;  %v4757_v36 = vpop.eup %4756  ;;  %v2868_v57 = vsel %vm2867_vm14, %v4753_v7, %v2864_v4  ;;  %v2876_v51 = vmul.f32 %v4755_v1, %v5828_v18  ;;  %4758 = vpow2.f32 %v4260_v54  ;;  %v4645_v48 = vld [vmem:[%s5571_s6 + $0x30] sm:$0xff]  }
 0x268   : > { %v2196_v55 = vpop.f32.mrf.mxu1  ;;  %v2873_v43 = vsel %vm2870_vm15, %v2872_v5, %v2868_v57  ;;  %v5850_v39 = vadd.f32 1.0, %v4757_v36  ;;  %vm2881_vm0 = vweird.f32 %v4755_v1  ;;  %v4522_v57 = vunpack.c.l.bf16 %v4645_v48 }
 0x269   : > { %v2372_v27 = vadd.f32 %v2371_v20, %v2283_v38  ;;  %v3186_v35 = vmul.f32 %v2873_v43, %v5778_v14  ;;  %v2877_v63 = vsub.f32 1.0, %v2876_v51  ;;  %v2197_v0 = vadd.f32 %v2196_v55, %v5418_v11  ;;  %vm2882_vm2 = vmor %vm2880_vm1, %vm2881_vm0 }
 0x26a   : > { %v2463_v17 = vpop.f32.mrf.mxu0  ;;  %4760 = vrcp.f32 %v5850_v39  ;;  %v2884_v11 = vand.u32 2147483647, %v5828_v18  ;;  %v2901_v22 = vand.u32 2147483648, %v5850_v39  ;;  %v2899_v54 = vand.u32 2147483647, %v5850_v39 }
 0x26b   : > { %v3218_v34 = vadd.f32 %v4519_v3, %v3186_v35  ;;  %v2878_v41 = vmul.f32 %v4755_v1, %v2877_v63  ;;  %v5854_v7 = vadd.f32 %v2460_v31, %v2372_v27  ;;  %vm2895_vm5 = vweird.f32 %v5850_v39 }
 0x26c   : > { %vm2885_vm3 = vcmp.eq.f32.partialorder %v2884_v11, 8.507059e+37  ;;  %v2902_v43 = vor.u32 1.1754944e-38, %v2901_v22  ;;  %v4523_v35 = vunpack.c.h.bf16 %v4645_v48  ;;  %vm2900_vm7 = vcmp.eq.f32.partialorder %v2899_v54, 8.507059e+37 }
 0x26d   : > { %v4588_v2 = vpack.c.bf16 %v3218_v34, %v3217_v61  ;;  %v4261_v15 = vmul.f32 -1.442695, %v5854_v7  ;;  %v4759_v28 = vpop.eup %4758  ;;  %v2879_v60 = vadd.f32 %v4755_v1, %v2878_v41 }
 0x26e   : > { %v2285_v10 = vpop.f32.mrf.mxu2  ;;  %v5860_v32 = vadd.f32 1.0, %v4759_v28 }
 0x26f   : > { %v2286_v24 = vadd.f32 %v2285_v10, %v2197_v0  ;;  %v2374_v14 = vpop.f32.mrf.mxu3  ;;  %4659 = vst [vmem:[%s5619_s10 + $0x28] sm:$0xff] %v4588_v2   ;;  %4762 = vpow2.f32 %v4261_v15  ;;  %v2883_v6 = vsel %vm2882_vm2, %v4755_v1, %v2879_v60 }
 0x270   : > { %v2198_v31 = vpop.f32.mrf.mxu1  ;;  %v4761_v23 = vpop.eup %4760  ;;  %4764 = vrcp.f32 %v5860_v32  ;;  %v2888_v3 = vsel %vm2885_vm3, %v2887_v56, %v2883_v6  ;;  %vm2910_vm9 = vweird.f32 %v5860_v32 }
 0x271   : > { %v2375_v12 = vadd.f32 %v2374_v14, %v2286_v24  ;;  %v2891_v29 = vmul.f32 %v4761_v23, %v5850_v39  ;;  %v2199_v18 = vadd.f32 %v2198_v31, %v5427_v42  ;;  %vm2896_vm4 = vweird.f32 %v4761_v23 }
 0x272   : > { %v2465_v53 = vpop.f32.mrf.mxu0  ;;  %v3187_v42 = vmul.f32 %v2888_v3, %v5806_v47  ;;  %vm2897_vm6 = vmor %vm2895_vm5, %vm2896_vm4 }
 0x273   : > { %v5866_v21 = vadd.f32 %v2463_v17, %v2375_v12  ;;  %v2892_v44 = vsub.f32 1.0, %v2891_v29 }
 0x274   : > { %v3219_v15 = vadd.f32 %v4522_v57, %v3187_v42 }
 0x275   : > { %v4262_v4 = vmul.f32 -1.442695, %v5866_v21  ;;  %v4763_v30 = vpop.eup %4762  ;;  %v2893_v5 = vmul.f32 %v4761_v23, %v2892_v44 }
 0x276   : > { %v2287_v38 = vpop.f32.mrf.mxu2  ;;  %v5873_v1 = vadd.f32 1.0, %v4763_v30  ;;  %v4765_v9 = vpop.eup %4764 }
 0x277   : > { %4766 = vpow2.f32 %v4262_v4  ;;  %v2288_v20 = vadd.f32 %v2287_v38, %v2199_v18  ;;  %v2376_v36 = vpop.f32.mrf.mxu3  ;;  %v2894_v51 = vadd.f32 %v4761_v23, %v2893_v5  ;;  %v2906_v27 = vmul.f32 %v4765_v9, %v5860_v32  ;;  %v4646_v4 = vld [vmem:[%s5571_s6 + $0x38] sm:$0xff]  }
 0x278   : > { %v2201_v55 = vpop.f32.mrf.mxu1  ;;  %4768 = vrcp.f32 %v5873_v1  ;;  %vm2911_vm8 = vweird.f32 %v4765_v9  ;;  %v2931_v18 = vand.u32 2147483648, %v5873_v1  ;;  %v2929_v3 = vand.u32 2147483647, %v5873_v1 }
 0x279   : > { %v2898_v63 = vsel %vm2897_vm6, %v4761_v23, %v2894_v51  ;;  %v2377_v61 = vadd.f32 %v2376_v36, %v2288_v20  ;;  %v2907_v41 = vsub.f32 1.0, %v2906_v27  ;;  %v2202_v10 = vadd.f32 %v2201_v55, %v5432_v58  ;;  %vm5892_vm10 = vmor %vm2910_vm9, %vm2911_vm8 }
 0x27a   : > { %v2468_v17 = vpop.f32.mrf.mxu0  ;;  %v2903_v34 = vsel %vm2900_vm7, %v2902_v43, %v2898_v63  ;;  %v2914_v23 = vand.u32 2147483647, %v5860_v32  ;;  %v4526_v36 = vunpack.c.l.bf16 %v4646_v4  ;;  %vm2925_vm13 = vweird.f32 %v5873_v1 }
 0x27b   : > { %v3188_v0 = vmul.f32 %v2903_v34, %v5821_v62  ;;  %v5880_v2 = vadd.f32 %v2465_v53, %v2377_v61  ;;  %v2908_v47 = vmul.f32 %v4765_v9, %v2907_v41  ;;  %v2916_v62 = vand.u32 2147483648, %v5860_v32 }
 0x27c   : > { %vm2915_vm11 = vcmp.eq.f32.partialorder %v2914_v23, 8.507059e+37  ;;  %v4527_v55 = vunpack.c.h.bf16 %v4646_v4  ;;  %v2932_v42 = vor.u32 1.1754944e-38, %v2931_v18  ;;  %vm2930_vm15 = vcmp.eq.f32.partialorder %v2929_v3, 8.507059e+37 }
 0x27d   : > { %v4767_v39 = vpop.eup %4766  ;;  %v3220_v28 = vadd.f32 %v4523_v35, %v3188_v0  ;;  %v4263_v24 = vmul.f32 -1.442695, %v5880_v2  ;;  %v2909_v31 = vadd.f32 %v4765_v9, %v2908_v47  ;;  %v2917_v32 = vor.u32 1.1754944e-38, %v2916_v62 }
 0x27e   : > { %v5883_v60 = vadd.f32 1.0, %v4767_v39  ;;  %v2290_v14 = vpop.f32.mrf.mxu2  ;;  %v4769_v33 = vpop.eup %4768 }
 0x27f   : > { %v2291_v11 = vadd.f32 %v2290_v14, %v2202_v10  ;;  %v2379_v12 = vpop.f32.mrf.mxu3  ;;  %v4593_v53 = vpack.c.bf16 %v3220_v28, %v3219_v15  ;;  %v2921_v58 = vmul.f32 %v4769_v33, %v5873_v1  ;;  %v2913_v44 = vsel %vm5892_vm10, %v4765_v9, %v2909_v31 }
 0x280   : > { %4770 = vrcp.f32 %v5883_v60  ;;  %v2203_v29 = vpop.f32.mrf.mxu1  ;;  %vm2926_vm12 = vweird.f32 %v4769_v33  ;;  %v2918_v54 = vsel %vm2915_vm11, %v2917_v32, %v2913_v44  ;;  %vm2940_vm1 = vweird.f32 %v5883_v60 }
 0x281   : > { %4660 = vst [vmem:[%s5619_s10 + $0x30] sm:$0xff] %v4593_v53   ;;  %v2922_v48 = vsub.f32 1.0, %v2921_v58  ;;  %4772 = vpow2.f32 %v4263_v24  ;;  %v2380_v22 = vadd.f32 %v2379_v12, %v2291_v11  ;;  %v2204_v38 = vadd.f32 %v2203_v29, %v5441_v25  ;;  %vm2927_vm14 = vmor %vm2925_vm13, %vm2926_vm12 }
 0x282   : > { %v2470_v56 = vpop.f32.mrf.mxu0  ;;  %v3189_v25 = vmul.f32 %v2918_v54, %v5843_v13  ;;  %v2946_v53 = vand.u32 2147483648, %v5883_v60  ;;  %v2944_v29 = vand.u32 2147483647, %v5883_v60 }
 0x283   : > { %v2923_v30 = vmul.f32 %v4769_v33, %v2922_v48  ;;  %v5902_v5 = vadd.f32 %v2468_v17, %v2380_v22  ;;  %v4647_v22 = vld [vmem:[%s5571_s6 + $0x40] sm:$0xff]  }
 0x284   : > { %v3221_v10 = vadd.f32 %v4526_v36, %v3189_v25  ;;  %v2947_v4 = vor.u32 1.1754944e-38, %v2946_v53  ;;  %vm2945_vm3 = vcmp.eq.f32.partialorder %v2944_v29, 8.507059e+37  ;;  %v4531_v25 = vunpack.c.h.bf16 %v4647_v22 }
 0x285   : > { %v2924_v9 = vadd.f32 %v4769_v33, %v2923_v30  ;;  %v4264_v57 = vmul.f32 -1.442695, %v5902_v5 }
 0x286   : > { %v5905_v20 = vpop.eup %4770  ;;  %v2292_v51 = vpop.f32.mrf.mxu2 }
 0x287   : > { %v2936_v43 = vmul.f32 %v5905_v20, %v5883_v60  ;;  %v2293_v27 = vadd.f32 %v2292_v51, %v2204_v38  ;;  %v2381_v17 = vpop.f32.mrf.mxu3  ;;  %v4773_v35 = vpop.eup %4772  ;;  %v2928_v63 = vsel %vm2927_vm14, %v4769_v33, %v2924_v9  ;;  %4774 = vpow2.f32 %v4264_v57 }
 0x288   : > { %v2206_v61 = vpop.f32.mrf.mxu1  ;;  %v2933_v34 = vsel %vm2930_vm15, %v2932_v42, %v2928_v63  ;;  %v5912_v41 = vadd.f32 1.0, %v4773_v35  ;;  %vm2941_vm0 = vweird.f32 %v5905_v20  ;;  %v4530_v51 = vunpack.c.l.bf16 %v4647_v22 }
 0x289   : > { %v2937_v1 = vsub.f32 1.0, %v2936_v43  ;;  %v2382_v0 = vadd.f32 %v2381_v17, %v2293_v27  ;;  %v3190_v15 = vmul.f32 %v2933_v34, %v5854_v7  ;;  %v2207_v24 = vadd.f32 %v2206_v61, %v5446_v49  ;;  %vm2942_vm2 = vmor %vm2940_vm1, %vm2941_vm0 }
 0x28a   : > { %v2473_v39 = vpop.f32.mrf.mxu0  ;;  %4776 = vrcp.f32 %v5912_v41  ;;  %v2959_v30 = vand.u32 2147483647, %v5912_v41  ;;  %v2961_v3 = vand.u32 2147483648, %v5912_v41  ;;  %vm2955_vm5 = vweird.f32 %v5912_v41 }
 0x28b   : > { %v2938_v47 = vmul.f32 %v5905_v20, %v2937_v1  ;;  %v3222_v28 = vadd.f32 %v4527_v55, %v3190_v15  ;;  %v5917_v13 = vadd.f32 %v2470_v56, %v2382_v0 }
 0x28c   : > { %v2962_v63 = vor.u32 1.1754944e-38, %v2961_v3  ;;  %vm2960_vm7 = vcmp.eq.f32.partialorder %v2959_v30, 8.507059e+37 }
 0x28d   : > { %v4775_v14 = vpop.eup %4774  ;;  %v4598_v33 = vpack.c.bf16 %v3222_v28, %v3221_v10  ;;  %v4265_v31 = vmul.f32 -1.442695, %v5917_v13  ;;  %v2939_v62 = vadd.f32 %v5905_v20, %v2938_v47 }
 0x28e   : > { %v2295_v23 = vpop.f32.mrf.mxu2  ;;  %v5923_v7 = vadd.f32 1.0, %v4775_v14 }
 0x28f   : > { %v2296_v11 = vadd.f32 %v2295_v23, %v2207_v24  ;;  %v2384_v12 = vpop.f32.mrf.mxu3  ;;  %4661 = vst [vmem:[%s5619_s10 + $0x38] sm:$0xff] %v4598_v33   ;;  %4778 = vpow2.f32 %v4265_v31  ;;  %v2943_v48 = vsel %vm2942_vm2, %v5905_v20, %v2939_v62 }
 0x290   : > { %v2208_v58 = vpop.f32.mrf.mxu1  ;;  %v4777_v49 = vpop.eup %4776  ;;  %4780 = vrcp.f32 %v5923_v7  ;;  %v2948_v38 = vsel %vm2945_vm3, %v2947_v4, %v2943_v48  ;;  %v2976_v62 = vand.u32 2147483648, %v5923_v7  ;;  %vm2970_vm9 = vweird.f32 %v5923_v7  ;;  %v4648_v48 = vld [vmem:[%s5571_s6 + $0x48] sm:$0xff]  }
 0x291   : > { %v2951_v56 = vmul.f32 %v4777_v49, %v5912_v41  ;;  %v2385_v44 = vadd.f32 %v2384_v12, %v2296_v11  ;;  %v2209_v60 = vadd.f32 %v2208_v58, %v5455_v19  ;;  %vm2956_vm4 = vweird.f32 %v4777_v49 }
 0x292   : > { %v2475_v6 = vpop.f32.mrf.mxu0  ;;  %v3191_v35 = vmul.f32 %v2948_v38, %v5866_v21  ;;  %vm2957_vm6 = vmor %vm2955_vm5, %vm2956_vm4  ;;  %v2977_v22 = vor.u32 1.1754944e-38, %v2976_v62  ;;  %v4534_v38 = vunpack.c.l.bf16 %v4648_v48 }
 0x293   : > { %v2952_v32 = vsub.f32 1.0, %v2951_v56  ;;  %v5933_v18 = vadd.f32 %v2473_v39, %v2385_v44 }
 0x294   : > { %v3223_v10 = vadd.f32 %v4530_v51, %v3191_v35 }
 0x295   : > { %v4779_v54 = vpop.eup %4778  ;;  %v2953_v36 = vmul.f32 %v4777_v49, %v2952_v32  ;;  %v4266_v9 = vmul.f32 -1.442695, %v5933_v18 }
 0x296   : > { %v2297_v57 = vpop.f32.mrf.mxu2  ;;  %v4781_v20 = vpop.eup %4780  ;;  %v5939_v55 = vadd.f32 1.0, %v4779_v54 }
 0x297   : > { %v2298_v42 = vadd.f32 %v2297_v57, %v2209_v60  ;;  %v2386_v43 = vpop.f32.mrf.mxu3  ;;  %v2954_v27 = vadd.f32 %v4777_v49, %v2953_v36  ;;  %v2966_v17 = vmul.f32 %v4781_v20, %v5923_v7  ;;  %4782 = vpow2.f32 %v4266_v9 }
 0x298   : > { %v2211_v19 = vpop.f32.mrf.mxu1  ;;  %4784 = vrcp.f32 %v5939_v55  ;;  %vm2971_vm8 = vweird.f32 %v4781_v20  ;;  %v2989_v30 = vand.u32 2147483647, %v5939_v55  ;;  %vm2985_vm13 = vweird.f32 %v5939_v55 }
 0x299   : > { %v2958_v34 = vsel %vm2957_vm6, %v4777_v49, %v2954_v27  ;;  %v2967_v1 = vsub.f32 1.0, %v2966_v17  ;;  %v2387_v0 = vadd.f32 %v2386_v43, %v2298_v42  ;;  %v2212_v21 = vadd.f32 %v2211_v19, %v5460_v37  ;;  %vm5957_vm10 = vmor %vm2970_vm9, %vm2971_vm8 }
 0x29a   : > { %v2478_v61 = vpop.f32.mrf.mxu0  ;;  %v2963_v39 = vsel %vm2960_vm7, %v2962_v63, %v2958_v34  ;;  %v2974_v37 = vand.u32 2147483647, %v5923_v7  ;;  %v2991_v7 = vand.u32 2147483648, %v5939_v55  ;;  %vm2990_vm15 = vcmp.eq.f32.partialorder %v2989_v30, 8.507059e+37 }
 0x29b   : > { %v3192_v41 = vmul.f32 %v2963_v39, %v5880_v2  ;;  %v2968_v15 = vmul.f32 %v4781_v20, %v2967_v1  ;;  %v5947_v47 = vadd.f32 %v2475_v6, %v2387_v0 }
 0x29c   : > { %vm2975_vm11 = vcmp.eq.f32.partialorder %v2974_v37, 8.507059e+37  ;;  %v2992_v51 = vor.u32 1.1754944e-38, %v2991_v7 }
 0x29d   : > { %v4783_v28 = vpop.eup %4782  ;;  %v3224_v24 = vadd.f32 %v4531_v25, %v3192_v41  ;;  %v2969_v14 = vadd.f32 %v4781_v20, %v2968_v15  ;;  %v4267_v33 = vmul.f32 -1.442695, %v5947_v47 }
 0x29e   : > { %v2300_v31 = vpop.f32.mrf.mxu2  ;;  %v4785_v23 = vpop.eup %4784  ;;  %v5952_v11 = vadd.f32 1.0, %v4783_v28 }
 0x29f   : > { %v2301_v2 = vadd.f32 %v2300_v31, %v2212_v21  ;;  %v2389_v12 = vpop.f32.mrf.mxu3  ;;  %v4603_v53 = vpack.c.bf16 %v3224_v24, %v3223_v10  ;;  %v2981_v58 = vmul.f32 %v4785_v23, %v5939_v55  ;;  %v2973_v56 = vsel %vm5957_vm10, %v4781_v20, %v2969_v14 }
 0x2a0   : > { %v2213_v49 = vpop.f32.mrf.mxu1  ;;  %4786 = vrcp.f32 %v5952_v11  ;;  %vm2986_vm12 = vweird.f32 %v4785_v23  ;;  %v2978_v3 = vsel %vm2975_vm11, %v2977_v22, %v2973_v56  ;;  %v4535_v20 = vunpack.c.h.bf16 %v4648_v48 }
 0x2a1   : > { %4662 = vst [vmem:[%s5619_s10 + $0x40] sm:$0xff] %v4603_v53   ;;  %v2982_v44 = vsub.f32 1.0, %v2981_v58  ;;  %4788 = vpow2.f32 %v4267_v33  ;;  %v2390_v4 = vadd.f32 %v2389_v12, %v2301_v2  ;;  %v2214_v54 = vadd.f32 %v2213_v49, %v5469_v40  ;;  %vm2987_vm14 = vmor %vm2985_vm13, %vm2986_vm12 }
 0x2a2   : > { %v2480_v6 = vpop.f32.mrf.mxu0  ;;  %v3193_v19 = vmul.f32 %v2978_v3, %v5902_v5  ;;  %vm3000_vm1 = vweird.f32 %v5952_v11 }
 0x2a3   : > { %v2983_v32 = vmul.f32 %v4785_v23, %v2982_v44  ;;  %v5968_v60 = vadd.f32 %v2478_v61, %v2390_v4  ;;  %v4649_v44 = vld [vmem:[%s5571_s6 + $0x50] sm:$0xff]  }
 0x2a4   : > { %v3225_v39 = vadd.f32 %v4534_v38, %v3193_v19 }
 0x2a5   : > { %v2984_v36 = vadd.f32 %v4785_v23, %v2983_v32  ;;  %v4268_v42 = vmul.f32 -1.442695, %v5968_v60 }
 0x2a6   : > { %v2302_v9 = vpop.f32.mrf.mxu2  ;;  %v4787_v57 = vpop.eup %4786 }
 0x2a7   : > { %v2303_v43 = vadd.f32 %v2302_v9, %v2214_v54  ;;  %v2391_v27 = vpop.f32.mrf.mxu3  ;;  %v4789_v17 = vpop.eup %4788  ;;  %v2988_v35 = vsel %vm2987_vm14, %v4785_v23, %v2984_v36  ;;  %v2996_v40 = vmul.f32 %v4787_v57, %v5952_v11  ;;  %4790 = vpow2.f32 %v4268_v42 }
 0x2a8   : > { %v2216_v25 = vpop.f32.mrf.mxu1  ;;  %v2993_v63 = vsel %vm2990_vm15, %v2992_v51, %v2988_v35  ;;  %v5975_v61 = vadd.f32 1.0, %v4789_v17  ;;  %vm3001_vm0 = vweird.f32 %v4787_v57  ;;  %v3006_v23 = vand.u32 2147483648, %v5952_v11 }
 0x2a9   : > { %v2392_v55 = vadd.f32 %v2391_v27, %v2303_v43  ;;  %v3194_v1 = vmul.f32 %v2993_v63, %v5917_v13  ;;  %v2997_v0 = vsub.f32 1.0, %v2996_v40  ;;  %v2217_v10 = vadd.f32 %v2216_v25, %v5474_v8  ;;  %vm3002_vm2 = vmor %vm3000_vm1, %vm3001_vm0 }
 0x2aa   : > { %v2483_v34 = vpop.f32.mrf.mxu0  ;;  %4792 = vrcp.f32 %v5975_v61  ;;  %v3004_v8 = vand.u32 2147483647, %v5952_v11  ;;  %v3021_v48 = vand.u32 2147483648, %v5975_v61  ;;  %v3019_v30 = vand.u32 2147483647, %v5975_v61 }
 0x2ab   : > { %v3226_v41 = vadd.f32 %v4535_v20, %v3194_v1  ;;  %v2998_v5 = vmul.f32 %v4787_v57, %v2997_v0  ;;  %v5979_v15 = vadd.f32 %v2480_v6, %v2392_v55  ;;  %v3007_v6 = vor.u32 1.1754944e-38, %v3006_v23 }
 0x2ac   : > { %vm3005_vm3 = vcmp.eq.f32.partialorder %v3004_v8, 8.507059e+37  ;;  %vm3015_vm5 = vweird.f32 %v5975_v61  ;;  %v3022_v42 = vor.u32 1.1754944e-38, %v3021_v48  ;;  %v4539_v17 = vunpack.c.h.bf16 %v4649_v44  ;;  %v4650_v8 = vld [vmem:[%s5571_s6 + $0x58] sm:$0xff]  }
 0x2ad   : > { %v4608_v21 = vpack.c.bf16 %v3226_v41, %v3225_v39  ;;  %v4269_v28 = vmul.f32 -1.442695, %v5979_v15  ;;  %v4791_v14 = vpop.eup %4790  ;;  %v2999_v33 = vadd.f32 %v4787_v57, %v2998_v5  ;;  %vm3020_vm7 = vcmp.eq.f32.partialorder %v3019_v30, 8.507059e+37 }
 0x2ae   : > { %v2305_v24 = vpop.f32.mrf.mxu2  ;;  %v5985_v62 = vadd.f32 1.0, %v4791_v14 }
 0x2af   : > { %v2306_v31 = vadd.f32 %v2305_v24, %v2217_v10  ;;  %v2394_v13 = vpop.f32.mrf.mxu3  ;;  %4663 = vst [vmem:[%s5619_s10 + $0x48] sm:$0xff] %v4608_v21   ;;  %4794 = vpow2.f32 %v4269_v28  ;;  %v3003_v49 = vsel %vm3002_vm2, %v4787_v57, %v2999_v33  ;;  %v4538_v57 = vunpack.c.l.bf16 %v4649_v44 }
 0x2b0   : > { %v2218_v2 = vpop.f32.mrf.mxu1  ;;  %v4793_v12 = vpop.eup %4792  ;;  %4796 = vrcp.f32 %v5985_v62  ;;  %v3008_v4 = vsel %vm3005_vm3, %v3007_v6, %v3003_v49  ;;  %v3036_v28 = vand.u32 2147483648, %v5985_v62  ;;  %vm3030_vm9 = vweird.f32 %v5985_v62 }
 0x2b1   : > { %v2395_v53 = vadd.f32 %v2394_v13, %v2306_v31  ;;  %v3011_v58 = vmul.f32 %v4793_v12, %v5975_v61  ;;  %v2219_v11 = vadd.f32 %v2218_v2, %v5483_v52  ;;  %vm3016_vm4 = vweird.f32 %v4793_v12 }
 0x2b2   : > { %v2485_v37 = vpop.f32.mrf.mxu0  ;;  %v3195_v52 = vmul.f32 %v3008_v4, %v5933_v18  ;;  %vm3017_vm6 = vmor %vm3015_vm5, %vm3016_vm4 }
 0x2b3   : > { %v5991_v29 = vadd.f32 %v2483_v34, %v2395_v53  ;;  %v3012_v56 = vsub.f32 1.0, %v3011_v58 }
 0x2b4   : > { %v3227_v34 = vadd.f32 %v4538_v57, %v3195_v52 }
 0x2b5   : > { %v4270_v22 = vmul.f32 -1.442695, %v5991_v29  ;;  %v4795_v7 = vpop.eup %4794  ;;  %v3013_v32 = vmul.f32 %v4793_v12, %v3012_v56 }
 0x2b6   : > { %v2307_v3 = vpop.f32.mrf.mxu2  ;;  %v5998_v54 = vadd.f32 1.0, %v4795_v7  ;;  %v4797_v9 = vpop.eup %4796 }
 0x2b7   : > { %4798 = vpow2.f32 %v4270_v22  ;;  %v2308_v38 = vadd.f32 %v2307_v3, %v2219_v11  ;;  %v2396_v36 = vpop.f32.mrf.mxu3  ;;  %v3014_v20 = vadd.f32 %v4793_v12, %v3013_v32  ;;  %v3026_v43 = vmul.f32 %v4797_v9, %v5985_v62 }
 0x2b8   : > { %v2221_v51 = vpop.f32.mrf.mxu1  ;;  %4800 = vrcp.f32 %v5998_v54  ;;  %vm3031_vm8 = vweird.f32 %v4797_v9  ;;  %v3051_v53 = vand.u32 2147483648, %v5998_v54  ;;  %v3049_v49 = vand.u32 2147483647, %v5998_v54 }
 0x2b9   : > { %v3018_v19 = vsel %vm3017_vm6, %v4793_v12, %v3014_v20  ;;  %v2397_v35 = vadd.f32 %v2396_v36, %v2308_v38  ;;  %v3027_v25 = vsub.f32 1.0, %v3026_v43  ;;  %v2222_v1 = vadd.f32 %v2221_v51, %v5488_v45  ;;  %vm6017_vm10 = vmor %vm3030_vm9, %vm3031_vm8 }
 0x2ba   : > { %v2488_v27 = vpop.f32.mrf.mxu0  ;;  %v3023_v40 = vsel %vm3020_vm7, %v3022_v42, %v3018_v19  ;;  %v4542_v22 = vunpack.c.l.bf16 %v4650_v8  ;;  %vm3045_vm13 = vweird.f32 %v5998_v54  ;;  %v4543_v32 = vunpack.c.h.bf16 %v4650_v8 }
 0x2bb   : > { %v3196_v63 = vmul.f32 %v3023_v40, %v5947_v47  ;;  %v6005_v55 = vadd.f32 %v2485_v37, %v2397_v35  ;;  %v3028_v18 = vmul.f32 %v4797_v9, %v3027_v25  ;;  %v3034_v47 = vand.u32 2147483647, %v5985_v62 }
 0x2bc   : > { %v3037_v62 = vor.u32 1.1754944e-38, %v3036_v28  ;;  %v3052_v30 = vor.u32 1.1754944e-38, %v3051_v53  ;;  %vm3050_vm15 = vcmp.eq.f32.partialorder %v3049_v49, 8.507059e+37 }
 0x2bd   : > { %v4799_v61 = vpop.eup %4798  ;;  %v3228_v0 = vadd.f32 %v4539_v17, %v3196_v63  ;;  %v4271_v41 = vmul.f32 -1.442695, %v6005_v55  ;;  %v3029_v21 = vadd.f32 %v4797_v9, %v3028_v18  ;;  %vm3035_vm11 = vcmp.eq.f32.partialorder %v3034_v47, 8.507059e+37 }
 0x2be   : > { %v6008_v39 = vadd.f32 1.0, %v4799_v61  ;;  %v2310_v5 = vpop.f32.mrf.mxu2  ;;  %v4801_v10 = vpop.eup %4800 }
 0x2bf   : > { %v2311_v24 = vadd.f32 %v2310_v5, %v2222_v1  ;;  %v2399_v14 = vpop.f32.mrf.mxu3  ;;  %v4613_v33 = vpack.c.bf16 %v3228_v0, %v3227_v34  ;;  %v3041_v45 = vmul.f32 %v4801_v10, %v5998_v54  ;;  %v3033_v23 = vsel %vm6017_vm10, %v4797_v9, %v3029_v21 }
 0x2c0   : > { %4802 = vrcp.f32 %v6008_v39  ;;  %v2223_v31 = vpop.f32.mrf.mxu1  ;;  %vm3046_vm12 = vweird.f32 %v4801_v10  ;;  %v3038_v56 = vsel %vm3035_vm11, %v3037_v62, %v3033_v23  ;;  %vm3060_vm1 = vweird.f32 %v6008_v39 }
 0x2c1   : > { %4664 = vst [vmem:[%s5619_s10 + $0x50] sm:$0xff] %v4613_v33   ;;  %v3042_v2 = vsub.f32 1.0, %v3041_v45  ;;  %4804 = vpow2.f32 %v4271_v41  ;;  %v2400_v12 = vadd.f32 %v2399_v14, %v2311_v24  ;;  %v2224_v44 = vadd.f32 %v2223_v31, %v5497_v46  ;;  %vm3047_vm14 = vmor %vm3045_vm13, %vm3046_vm12  ;;  %v4651_v24 = vld [vmem:[%s5571_s6 + $0x60] sm:$0xff]  }
 0x2c2   : > { %v2490_v37 = vpop.f32.mrf.mxu0  ;;  %v3197_v57 = vmul.f32 %v3038_v56, %v5968_v60  ;;  %v3066_v41 = vand.u32 2147483648, %v6008_v39 }
 0x2c3   : > { %v3043_v58 = vmul.f32 %v4801_v10, %v3042_v2  ;;  %v6027_v6 = vadd.f32 %v2488_v27, %v2400_v12 }
 0x2c4   : > { %v3229_v17 = vadd.f32 %v4542_v22, %v3197_v57  ;;  %v3067_v14 = vor.u32 1.1754944e-38, %v3066_v41 }
 0x2c5   : > { %v3044_v11 = vadd.f32 %v4801_v10, %v3043_v58  ;;  %v4272_v7 = vmul.f32 -1.442695, %v6027_v6 }
 0x2c6   : > { %v4803_v48 = vpop.eup %4802  ;;  %v2312_v4 = vpop.f32.mrf.mxu2 }
 0x2c7   : > { %v3056_v3 = vmul.f32 %v4803_v48, %v6008_v39  ;;  %v2313_v38 = vadd.f32 %v2312_v4, %v2224_v44  ;;  %v2401_v36 = vpop.f32.mrf.mxu3  ;;  %v4805_v9 = vpop.eup %4804  ;;  %v3048_v20 = vsel %vm3047_vm14, %v4801_v10, %v3044_v11  ;;  %4806 = vpow2.f32 %v4272_v7 }
 0x2c8   : > { %v2226_v46 = vpop.f32.mrf.mxu1  ;;  %v3053_v51 = vsel %vm3050_vm15, %v3052_v30, %v3048_v20  ;;  %v6034_v54 = vadd.f32 1.0, %v4805_v9  ;;  %vm3061_vm0 = vweird.f32 %v4803_v48  ;;  %v4547_v7 = vunpack.c.h.bf16 %v4651_v24 }
 0x2c9   : > { %v3057_v52 = vsub.f32 1.0, %v3056_v3  ;;  %v2402_v42 = vadd.f32 %v2401_v36, %v2313_v38  ;;  %v3198_v43 = vmul.f32 %v3053_v51, %v5979_v15  ;;  %v2227_v60 = vadd.f32 %v2226_v46, %v5502_v59  ;;  %vm3062_vm2 = vmor %vm3060_vm1, %vm3061_vm0 }
 0x2ca   : > { %4808 = vrcp.f32 %v6034_v54  ;;  %v2493_v40 = vpop.f32.mrf.mxu0  ;;  %v3064_v59 = vand.u32 2147483647, %v6008_v39  ;;  %v3079_v31 = vand.u32 2147483647, %v6034_v54  ;;  %v3081_v13 = vand.u32 2147483648, %v6034_v54 }
 0x2cb   : > { %v3058_v27 = vmul.f32 %v4803_v48, %v3057_v52  ;;  %v3230_v19 = vadd.f32 %v4543_v32, %v3198_v43  ;;  %v6038_v35 = vadd.f32 %v2490_v37, %v2402_v42  ;;  %v4546_v37 = vunpack.c.l.bf16 %v4651_v24 }
 0x2cc   : > { %vm3065_vm3 = vcmp.eq.f32.partialorder %v3064_v59, 8.507059e+37  ;;  %vm3075_vm5 = vweird.f32 %v6034_v54  ;;  %v3082_v4 = vor.u32 1.1754944e-38, %v3081_v13  ;;  %vm3080_vm7 = vcmp.eq.f32.partialorder %v3079_v31, 8.507059e+37 }
 0x2cd   : > { %v4807_v25 = vpop.eup %4806  ;;  %v4618_v63 = vpack.c.bf16 %v3230_v19, %v3229_v17  ;;  %v4273_v61 = vmul.f32 -1.442695, %v6038_v35  ;;  %v3059_v18 = vadd.f32 %v4803_v48, %v3058_v27 }
 0x2ce   : > { %v2315_v34 = vpop.f32.mrf.mxu2  ;;  %v6042_v15 = vadd.f32 1.0, %v4807_v25 }
 0x2cf   : > { %v2316_v1 = vadd.f32 %v2315_v34, %v2227_v60  ;;  %v2404_v0 = vpop.f32.mrf.mxu3  ;;  %4665 = vst [vmem:[%s5619_s10 + $0x58] sm:$0xff] %v4618_v63   ;;  %4810 = vpow2.f32 %v4273_v61  ;;  %v3063_v28 = vsel %vm3062_vm2, %v4803_v48, %v3059_v18 }
 0x2d0   : > { %v2228_v5 = vpop.f32.mrf.mxu1  ;;  %v4809_v10 = vpop.eup %4808  ;;  %4812 = vrcp.f32 %v6042_v15  ;;  %v3068_v2 = vsel %vm3065_vm3, %v3067_v14, %v3063_v28  ;;  %v3096_v27 = vand.u32 2147483648, %v6042_v15  ;;  %vm3090_vm9 = vweird.f32 %v6042_v15 }
 0x2d1   : > { %v3071_v21 = vmul.f32 %v4809_v10, %v6034_v54  ;;  %v2405_v47 = vadd.f32 %v2404_v0, %v2316_v1  ;;  %v2229_v23 = vadd.f32 %v2228_v5, %v5511_v26  ;;  %vm3076_vm4 = vweird.f32 %v4809_v10  ;;  %v4652_v1 = vld [vmem:[%s5571_s6 + $0x68] sm:$0xff]  }
 0x2d2   : > { %v2495_v49 = vpop.f32.mrf.mxu0  ;;  %v3199_v11 = vmul.f32 %v3068_v2, %v5991_v29  ;;  %vm3077_vm6 = vmor %vm3075_vm5, %vm3076_vm4  ;;  %v3097_v0 = vor.u32 1.1754944e-38, %v3096_v27  ;;  %v4550_v28 = vunpack.c.l.bf16 %v4652_v1  ;;  %v4551_v31 = vunpack.c.h.bf16 %v4652_v1 }
 0x2d3   : > { %v3072_v33 = vsub.f32 1.0, %v3071_v21  ;;  %v6051_v45 = vadd.f32 %v2493_v40, %v2405_v47 }
 0x2d4   : > { %v3231_v20 = vadd.f32 %v4546_v37, %v3199_v11 }
 0x2d5   : > { %v4811_v39 = vpop.eup %4810  ;;  %v3073_v12 = vmul.f32 %v4809_v10, %v3072_v33  ;;  %v4274_v8 = vmul.f32 -1.442695, %v6051_v45 }
 0x2d6   : > { %v2317_v62 = vpop.f32.mrf.mxu2  ;;  %v4813_v53 = vpop.eup %4812  ;;  %v6057_v58 = vadd.f32 1.0, %v4811_v39 }
 0x2d7   : > { %v2318_v56 = vadd.f32 %v2317_v62, %v2229_v23  ;;  %v2406_v44 = vpop.f32.mrf.mxu3  ;;  %v3074_v48 = vadd.f32 %v4809_v10, %v3073_v12  ;;  %v3086_v22 = vmul.f32 %v4813_v53, %v6042_v15  ;;  %4814 = vpow2.f32 %v4274_v8 }
 0x2d8   : > { %v2231_v26 = vpop.f32.mrf.mxu1  ;;  %4816 = vrcp.f32 %v6057_v58  ;;  %vm3091_vm8 = vweird.f32 %v4813_v53  ;;  %vm3105_vm13 = vweird.f32 %v6057_v58 }
 0x2d9   : > { %v3078_v32 = vsel %vm3077_vm6, %v4809_v10, %v3074_v48  ;;  %v3087_v30 = vsub.f32 1.0, %v3086_v22  ;;  %v2407_v3 = vadd.f32 %v2406_v44, %v2318_v56  ;;  %v2232_v46 = vadd.f32 %v2231_v26, %v5516_v50  ;;  %vm6075_vm10 = vmor %vm3090_vm9, %vm3091_vm8 }
 0x2da   : > { %v3083_v38 = vsel %vm3080_vm7, %v3082_v4, %v3078_v32  ;;  %v3094_v50 = vand.u32 2147483647, %v6042_v15  ;;  %v2498_v63 = vpop.f32.mrf.mxu0  ;;  %v3111_v15 = vand.u32 2147483648, %v6057_v58  ;;  %v3109_v10 = vand.u32 2147483647, %v6057_v58 }
 0x2db   : > { %v3200_v36 = vmul.f32 %v3083_v38, %v6005_v55  ;;  %v3088_v9 = vmul.f32 %v4813_v53, %v3087_v30  ;;  %v6065_v57 = vadd.f32 %v2495_v49, %v2407_v3 }
 0x2dc   : > { %vm3095_vm11 = vcmp.eq.f32.partialorder %v3094_v50, 8.507059e+37  ;;  %v3112_v13 = vor.u32 1.1754944e-38, %v3111_v15  ;;  %vm3110_vm15 = vcmp.eq.f32.partialorder %v3109_v10, 8.507059e+37 }
 0x2dd   : > { %v4815_v29 = vpop.eup %4814  ;;  %v3232_v51 = vadd.f32 %v4547_v7, %v3200_v36  ;;  %v3089_v52 = vadd.f32 %v4813_v53, %v3088_v9  ;;  %v4275_v54 = vmul.f32 -1.442695, %v6065_v57 }
 0x2de   : > { %v2320_v42 = vpop.f32.mrf.mxu2  ;;  %v4817_v43 = vpop.eup %4816  ;;  %v6070_v17 = vadd.f32 1.0, %v4815_v29 }
 0x2df   : > { %v2321_v55 = vadd.f32 %v2320_v42, %v2232_v46  ;;  %v2409_v19 = vpop.f32.mrf.mxu3  ;;  %v4623_v60 = vpack.c.bf16 %v3232_v51, %v3231_v20  ;;  %v3101_v40 = vmul.f32 %v4817_v43, %v6057_v58  ;;  %v3093_v61 = vsel %vm6075_vm10, %v4813_v53, %v3089_v52  ;;  %v4653_v52 = vld [vmem:[%s5571_s6 + $0x70] sm:$0xff]  }
 0x2e0   : > { %4818 = vrcp.f32 %v6070_v17  ;;  %v2233_v18 = vpop.f32.mrf.mxu1  ;;  %vm3106_vm12 = vweird.f32 %v4817_v43  ;;  %v3098_v59 = vsel %vm3095_vm11, %v3097_v0, %v3093_v61  ;;  %vm3120_vm1 = vweird.f32 %v6070_v17 }
 0x2e1   : > { %4666 = vst [vmem:[%s5619_s10 + $0x60] sm:$0xff] %v4623_v60   ;;  %v3102_v34 = vsub.f32 1.0, %v3101_v40  ;;  %4820 = vpow2.f32 %v4275_v54  ;;  %v2410_v41 = vadd.f32 %v2409_v19, %v2321_v55  ;;  %v2234_v47 = vadd.f32 %v2233_v18, %v5524_v16  ;;  %vm3107_vm14 = vmor %vm3105_vm13, %vm3106_vm12 }
 0x2e2   : > { %v3201_v12 = vmul.f32 %v3098_v59, %v6027_v6  ;;  %v2500_v44 = vpop.f32.mrf.mxu0  ;;  %v3124_v38 = vand.u32 2147483647, %v6070_v17  ;;  %v4554_v60 = vunpack.c.l.bf16 %v4653_v52  ;;  %v4555_v25 = vunpack.c.h.bf16 %v4653_v52 }
 0x2e3   : > { %v3103_v5 = vmul.f32 %v4817_v43, %v3102_v34  ;;  %v6086_v21 = vadd.f32 %v2498_v63, %v2410_v41 }
 0x2e4   : > { %v3233_v48 = vadd.f32 %v4550_v28, %v3201_v12  ;;  %vm3125_vm3 = vcmp.eq.f32.partialorder %v3124_v38, 8.507059e+37 }
 0x2e5   : > { %v3104_v24 = vadd.f32 %v4817_v43, %v3103_v5  ;;  %v4276_v23 = vmul.f32 -1.442695, %v6086_v21 }
 0x2e6   : > { %v2322_v14 = vpop.f32.mrf.mxu2  ;;  %v4819_v33 = vpop.eup %4818 }
 0x2e7   : > { %v2323_v39 = vadd.f32 %v2322_v14, %v2234_v47  ;;  %v4821_v2 = vpop.eup %4820  ;;  %v3108_v8 = vsel %vm3107_vm14, %v4817_v43, %v3104_v24  ;;  %v3116_v62 = vmul.f32 %v4819_v33, %v6070_v17  ;;  %v2411_v16 = vpop.f32.mrf.mxu3  ;;  %4822 = vpow2.f32 %v4276_v23 }
 0x2e8   : > { %v3113_v53 = vsel %vm3110_vm15, %v3112_v13, %v3108_v8  ;;  %v2692_v37 = vadd.f32 1.0, %v4821_v2  ;;  %vm3121_vm0 = vweird.f32 %v4819_v33 }
 0x2e9   : > { %v2412_v58 = vadd.f32 %v2411_v16, %v2323_v39  ;;  %v3202_v49 = vmul.f32 %v3113_v53, %v6038_v35  ;;  %v3117_v56 = vsub.f32 1.0, %v3116_v62  ;;  %v3126_v35 = vand.u32 2147483648, %v6070_v17  ;;  %vm3122_vm2 = vmor %vm3120_vm1, %vm3121_vm0 }
 0x2ea   : > { %4824 = vrcp.f32 %v2692_v37  ;;  %v3141_v29 = vand.u32 2147483648, %v2692_v37  ;;  %v3139_v42 = vand.u32 2147483647, %v2692_v37  ;;  %vm3135_vm5 = vweird.f32 %v2692_v37 }
 0x2eb   : > { %v3234_v22 = vadd.f32 %v4551_v31, %v3202_v49  ;;  %v3118_v26 = vmul.f32 %v4819_v33, %v3117_v56  ;;  %v6094_v11 = vadd.f32 %v2500_v44, %v2412_v58  ;;  %v3127_v46 = vor.u32 1.1754944e-38, %v3126_v35  ;;  %v4654_v31 = vld [vmem:[%s5571_s6 + $0x78] sm:$0xff]  }
 0x2ec   : > { %v3142_v17 = vor.u32 1.1754944e-38, %v3141_v29  ;;  %vm3140_vm7 = vcmp.eq.f32.partialorder %v3139_v42, 8.507059e+37  ;;  %v4558_v2 = vunpack.c.l.bf16 %v4654_v31  ;;  %v4559_v62 = vunpack.c.h.bf16 %v4654_v31 }
 0x2ed   : > { %v4628_v6 = vpack.c.bf16 %v3234_v22, %v3233_v48  ;;  %v4277_v7 = vmul.f32 -1.442695, %v6094_v11  ;;  %v4823_v4 = vpop.eup %4822  ;;  %v3119_v32 = vadd.f32 %v4819_v33, %v3118_v26 }
 0x2ee   : > { %v2693_v30 = vadd.f32 1.0, %v4823_v4 }
 0x2ef   : > { %4667 = vst [vmem:[%s5619_s10 + $0x68] sm:$0xff] %v4628_v6   ;;  %4826 = vpow2.f32 %v4277_v7  ;;  %v3123_v9 = vsel %vm3122_vm2, %v4819_v33, %v3119_v32 }
 0x2f0   : > { %v4825_v3 = vpop.eup %4824  ;;  %4828 = vrcp.f32 %v2693_v30  ;;  %v3128_v43 = vsel %vm3125_vm3, %v3127_v46, %v3123_v9  ;;  %v3156_v10 = vand.u32 2147483648, %v2693_v30  ;;  %vm3150_vm9 = vweird.f32 %v2693_v30 }
 0x2f1   : > { %v3131_v36 = vmul.f32 %v4825_v3, %v2692_v37  ;;  %vm3136_vm4 = vweird.f32 %v4825_v3  ;;  %v3203_v40 = vmul.f32 %v3128_v43, %v6051_v45  ;;  %v3154_v47 = vand.u32 2147483647, %v2693_v30 }
 0x2f2   : > { %vm3137_vm6 = vmor %vm3135_vm5, %vm3136_vm4  ;;  %v3157_v14 = vor.u32 1.1754944e-38, %v3156_v10 }
 0x2f3   : > { %v3132_v20 = vsub.f32 1.0, %v3131_v36  ;;  %v3235_v0 = vadd.f32 %v4554_v60, %v3203_v40  ;;  %vm3155_vm11 = vcmp.eq.f32.partialorder %v3154_v47, 8.507059e+37 }
 0x2f5   : > { %v4827_v51 = vpop.eup %4826  ;;  %v3133_v54 = vmul.f32 %v4825_v3, %v3132_v20 }
 0x2f6   : > { %v2694_v27 = vadd.f32 1.0, %v4827_v51  ;;  %v4829_v55 = vpop.eup %4828 }
 0x2f7   : > { %v3134_v19 = vadd.f32 %v4825_v3, %v3133_v54  ;;  %v3146_v50 = vmul.f32 %v4829_v55, %v2693_v30  ;;  %vm3151_vm8 = vweird.f32 %v4829_v55 }
 0x2f8   : > { %4830 = vrcp.f32 %v2694_v27  ;;  %vm3152_vm10 = vmor %vm3150_vm9, %vm3151_vm8  ;;  %v3171_v33 = vand.u32 2147483648, %v2694_v27  ;;  %v3169_v13 = vand.u32 2147483647, %v2694_v27  ;;  %vm3165_vm13 = vweird.f32 %v2694_v27 }
 0x2f9   : > { %v3138_v63 = vsel %vm3137_vm6, %v4825_v3, %v3134_v19  ;;  %v3147_v34 = vsub.f32 1.0, %v3146_v50 }
 0x2fa   : > { %v3143_v61 = vsel %vm3140_vm7, %v3142_v17, %v3138_v63  ;;  %v3172_v12 = vor.u32 1.1754944e-38, %v3171_v33  ;;  %vm3170_vm15 = vcmp.eq.f32.partialorder %v3169_v13, 8.507059e+37 }
 0x2fb   : > { %v3204_v18 = vmul.f32 %v3143_v61, %v6065_v57  ;;  %v3148_v1 = vmul.f32 %v4829_v55, %v3147_v34 }
 0x2fd   : > { %v3236_v15 = vadd.f32 %v4555_v25, %v3204_v18  ;;  %v3149_v5 = vadd.f32 %v4829_v55, %v3148_v1 }
 0x2fe   : > { %v4831_v41 = vpop.eup %4830 }
 0x2ff   : > { %v4633_v59 = vpack.c.bf16 %v3236_v15, %v3235_v0  ;;  %v3161_v45 = vmul.f32 %v4831_v41, %v2694_v27  ;;  %v3153_v28 = vsel %vm3152_vm10, %v4829_v55, %v3149_v5  ;;  %vm3166_vm12 = vweird.f32 %v4831_v41 }
 0x300   : > { %v3158_v23 = vsel %vm3155_vm11, %v3157_v14, %v3153_v28  ;;  %vm3167_vm14 = vmor %vm3165_vm13, %vm3166_vm12 }
 0x301   : > { %4668 = vst [vmem:[%s5619_s10 + $0x70] sm:$0xff] %v4633_v59   ;;  %v3162_v24 = vsub.f32 1.0, %v3161_v45  ;;  %v3205_v8 = vmul.f32 %v3158_v23, %v6086_v21 }
 0x303   : > { %v3163_v57 = vmul.f32 %v4831_v41, %v3162_v24  ;;  %v3237_v58 = vadd.f32 %v4558_v2, %v3205_v8 }
 0x305   : > { %v3164_v39 = vadd.f32 %v4831_v41, %v3163_v57 }
 0x307   : > { %v3168_v16 = vsel %vm3167_vm14, %v4831_v41, %v3164_v39 }
 0x308   : > { %v3173_v53 = vsel %vm3170_vm15, %v3172_v12, %v3168_v16 }
 0x309   : > { %v3206_v37 = vmul.f32 %v3173_v53, %v6094_v11 }
 0x30b   : > { %v3238_v49 = vadd.f32 %v4559_v62, %v3206_v37 }
 0x30d   : > { %v4638_v56 = vpack.c.bf16 %v3238_v49, %v3237_v58 }
 0x30f   : > { %4669 = vst [vmem:[%s5619_s10 + $0x78] sm:$0xff] %v4638_v56  }
 0x310 PF: > { %s14_s15 = sadd.s32 1, %s4838_s15  }
 0x311   : > { %p11_p4 = scmp.ge.s32.totalorder %s14_s15, 4  }
 0x313   :  { %13 = sbr.rel (!%p11_p4) target bundleno = 1 (0x1), region = 69 }

</bundles_post_ra>
